<compile_context>
chip_gen: v7x
topology: tpu7x:2x2x1
jax: 0.10.0
libtpu: 0.0.40
codegen_flags: <defaults>
</compile_context>

<pallas_src>
import functools

import jax
import jax.numpy as jnp
from jax.experimental import pallas as pl
from jax.experimental.pallas import tpu as pltpu

# Full-f32 matmul precision for both the kernels and the pure-JAX reference.
jax.config.update("jax_default_matmul_precision", "highest")

_VMEM_LIMIT = 32 * 1024 * 1024  # safe on v5e (128 MiB), v6e (128), v7x (64)


def _cparams(n_parallel):
    return pltpu.CompilerParams(
        dimension_semantics=("parallel",) * n_parallel,
        vmem_limit_bytes=_VMEM_LIMIT)


# ---------------------------------------------------------------------------
# In-kernel math helpers (only ops with guaranteed Mosaic lowering)
# ---------------------------------------------------------------------------

def _erf_approx(x):
    """Abramowitz & Stegun 7.1.26 erf, max abs error ~1.5e-7."""
    ax = jnp.where(x >= 0.0, x, -x)
    t = 1.0 / (1.0 + 0.3275911 * ax)
    poly = ((((1.061405429 * t - 1.453152027) * t + 1.421413741) * t
             - 0.284496736) * t + 0.254829592) * t
    y = 1.0 - poly * jnp.exp(-(ax * ax))
    return jnp.where(x >= 0.0, y, -y)


def _gelu_exact(x):
    return 0.5 * x * (1.0 + _erf_approx(x * 0.7071067811865476))


def _conv3x3_flat(xp, w_all, bias, masks, s, p):
    """3x3 'same' conv on a zero-padded flat activation.

    xp:    [C_in, P + 2*(S+1)]   padded-flat activation (value)
    w_all: [9, C_out, C_in]      w_all[k] = W[:, :, ky, kx], k = ky*3 + kx
    bias:  [C_out, 1]
    masks: [9, 1, P]             horizontal-wrap validity masks
    """
    pad = s + 1
    acc = None
    for k in range(9):
        dy = k // 3 - 1
        dx = k % 3 - 1
        off = pad + dy * s + dx
        sh = xp[:, off:off + p] * masks[k]
        term = jnp.dot(w_all[k], sh, preferred_element_type=jnp.float32)
        acc = term if acc is None else acc + term
    return acc + bias


# ---------------------------------------------------------------------------
# Kernels
# ---------------------------------------------------------------------------

def _proj_ln_kernel(x_ref, g_ref, b_ref, ts_ref, ta_ref, *out_refs,
                    eps, emit_xn):
    """LayerNorm(last dim, eps) fused with Spatial_Learn's per-channel
    projections:  s = to_s @ x_n,  a = x_n @ to_a  (one batch element)."""
    x = x_ref[0]                                            # [C, S, S]
    mu = jnp.mean(x, axis=-1, keepdims=True)
    var = jnp.mean((x - mu) ** 2, axis=-1, keepdims=True)
    xn = (x - mu) * jax.lax.rsqrt(var + eps) * g_ref[...] + b_ref[...]

    s = jnp.einsum('clh,chw->clw', ts_ref[...], xn,
                   preferred_element_type=jnp.float32)      # [C, L, S]
    a = jnp.einsum('chw,cwl->chl', xn, ta_ref[...],
                   preferred_element_type=jnp.float32)      # [C, S, L]

    out_refs[0][0] = s.astype(out_refs[0].dtype)
    out_refs[1][0] = a.astype(out_refs[1].dtype)
    if emit_xn:
        out_refs[2][0] = xn.astype(out_refs[2].dtype)


def _msa_kernel(xq_ref, xkv_ref, wq_ref, wk_ref, wv_ref, wp_ref, bp_ref,
                o_ref, xcat_ref, *, nh, hd):
    """SpatialMSA in [C, D] space (lane-dense), exact GELU fused.

    Q/K are projected in [M, C] layout so attention only needs
    last-dim-contracted matmuls; V and the output stay in [C, *] layout."""
    xq = xq_ref[0]                                          # [C, D]
    xkv = xkv_ref[0]                                        # [C, D]
    dn = (((1,), (1,)), ((), ()))

    # Hoisted projections (contraction over D = 128 lanes).
    q_t = jax.lax.dot_general(wq_ref[...], xq, dn,
                              preferred_element_type=jnp.float32)   # [M, C]
    k_t = jax.lax.dot_general(wk_ref[...], xkv, dn,
                              preferred_element_type=jnp.float32)   # [M, C]
    v = jax.lax.dot_general(xkv, wv_ref[...], dn,
                            preferred_element_type=jnp.float32)     # [C, M]

    for h in range(nh):                                     # tiny, static
        lo = h * hd
        qh = q_t[lo:lo + hd, :]                             # [hd, C]
        kh = k_t[lo:lo + hd, :]
        vh = v[:, lo:lo + hd]                               # [C, hd]

        # F.normalize(x, dim=-1, p=2): x / max(||x||, 1e-12)
        qn = qh * jax.lax.rsqrt(
            jnp.maximum(jnp.sum(qh * qh, axis=-1, keepdims=True), 1e-24))
        kn = kh * jax.lax.rsqrt(
            jnp.maximum(jnp.sum(kh * kh, axis=-1, keepdims=True), 1e-24))

        attn = jax.lax.dot_general(kn, qn, dn,
                                   preferred_element_type=jnp.float32)  # [hd,hd]
        attn = attn - jnp.max(attn, axis=-1, keepdims=True)
        attn = jnp.exp(attn)
        attn = attn / jnp.sum(attn, axis=-1, keepdims=True)

        # xcat[:, lo:lo+hd][c, d] = sum_j vh[c, j] * attn[d, j]
        xh = jax.lax.dot_general(vh, attn, dn,
                                 preferred_element_type=jnp.float32)    # [C, hd]
        xcat_ref[:, lo:lo + hd] = xh

    out = jax.lax.dot_general(xcat_ref[...], wp_ref[...], dn,
                              preferred_element_type=jnp.float32)       # [C, D]
    out = out + bp_ref[...]
    o_ref[0] = _gelu_exact(out).astype(o_ref.dtype)


def _pos_emb_kernel(xpad_ref, mask_ref, w1_ref, b1_ref, w2_ref, b2_ref,
                    o_ref, ybuf_ref, *, s, p):
    """pos_emb: conv3x3 + bias -> GELU -> conv3x3 + bias, fully fused.

    The intermediate lives only in a zero-padded VMEM scratch."""
    masks = mask_ref[...]                                   # [9, 1, P]
    y1 = _conv3x3_flat(xpad_ref[0], w1_ref[...], b1_ref[...], masks, s, p)
    y1 = _gelu_exact(y1)

    ybuf_ref[...] = jnp.zeros_like(ybuf_ref)
    ybuf_ref[:, s + 1:s + 1 + p] = y1

    y2 = _conv3x3_flat(ybuf_ref[...], w2_ref[...], b2_ref[...], masks, s, p)
    o_ref[0] = y2.astype(o_ref.dtype)


def _combine_kernel(a_ref, s_ref, pos_ref, x_ref, g_ref, b_ref,
                    sr_ref, srn_ref, *, eps):
    """sr = a @ s + pos + x_hsi, with the post-LayerNorm fused."""
    y = jnp.einsum('chl,clw->chw', a_ref[0], s_ref[0],
                   preferred_element_type=jnp.float32)
    sr = y + pos_ref[0] + x_ref[0]
    mu = jnp.mean(sr, axis=-1, keepdims=True)
    var = jnp.mean((sr - mu) ** 2, axis=-1, keepdims=True)
    srn = (sr - mu) * jax.lax.rsqrt(var + eps) * g_ref[...] + b_ref[...]
    sr_ref[0] = sr.astype(sr_ref.dtype)
    srn_ref[0] = srn.astype(srn_ref.dtype)


def _ffn_kernel(srn_ref, sr_ref, mask_ref, w1_ref, wdw_ref, w3_ref,
                o_ref, hbuf_ref, *, s, p, neg_slope):
    """FeedForward fully fused: 1x1 -> leaky -> dw3x3 -> leaky -> 1x1 + res."""
    srn = srn_ref[0]                                        # [C, P]
    h1 = jnp.dot(w1_ref[...], srn, preferred_element_type=jnp.float32)
    h1 = jnp.where(h1 >= 0, h1, neg_slope * h1)

    hbuf_ref[...] = jnp.zeros_like(hbuf_ref)
    hbuf_ref[:, s + 1:s + 1 + p] = h1
    hp = hbuf_ref[...]                                      # [C, Pp]

    masks = mask_ref[...]                                   # [9, 1, P]
    wdw = wdw_ref[...]                                      # [9, C, 1]
    pad = s + 1
    acc = jnp.zeros_like(h1)                                # f32 accumulation
    for k in range(9):
        dy = k // 3 - 1
        dx = k % 3 - 1
        off = pad + dy * s + dx
        acc = acc + wdw[k] * (hp[:, off:off + p] * masks[k])
    h2 = jnp.where(acc >= 0, acc, neg_slope * acc)

    y = jnp.dot(w3_ref[...], h2, preferred_element_type=jnp.float32)
    o_ref[0] = (y + sr_ref[0]).astype(o_ref.dtype)


# ---------------------------------------------------------------------------
# pallas_call wrappers
# ---------------------------------------------------------------------------

def _proj_ln(x, gamma, beta, to_s, to_a, eps, emit_xn):
    b, c, s, _ = x.shape
    l = to_s.shape[1]
    out_shape = [jax.ShapeDtypeStruct((b, c, l, s), x.dtype),
                 jax.ShapeDtypeStruct((b, c, s, l), x.dtype)]
    out_specs = [pl.BlockSpec((1, c, l, s), lambda i: (i, 0, 0, 0)),
                 pl.BlockSpec((1, c, s, l), lambda i: (i, 0, 0, 0))]
    if emit_xn:
        out_shape.append(jax.ShapeDtypeStruct((b, c, s, s), x.dtype))
        out_specs.append(pl.BlockSpec((1, c, s, s), lambda i: (i, 0, 0, 0)))
    kern = functools.partial(_proj_ln_kernel, eps=eps, emit_xn=emit_xn)
    return pl.pallas_call(
        kern,
        out_shape=tuple(out_shape),
        grid=(b,),
        in_specs=[
            pl.BlockSpec((1, c, s, s), lambda i: (i, 0, 0, 0)),
            pl.BlockSpec((1, 1, s), lambda i: (0, 0, 0)),
            pl.BlockSpec((1, 1, s), lambda i: (0, 0, 0)),
            pl.BlockSpec((c, l, s), lambda i: (0, 0, 0)),
            pl.BlockSpec((c, s, l), lambda i: (0, 0, 0)),
        ],
        out_specs=tuple(out_specs),
        compiler_params=_cparams(1),
    )(x, gamma.reshape(1, 1, s), beta.reshape(1, 1, s), to_s, to_a)


def _msa(xq, xkv, wq, wk, wv, wp, bp, nh, hd):
    b, c, d = xq.shape
    m = nh * hd
    kern = functools.partial(_msa_kernel, nh=nh, hd=hd)
    return pl.pallas_call(
        kern,
        out_shape=jax.ShapeDtypeStruct((b, c, d), xq.dtype),
        grid=(b,),
        in_specs=[
            pl.BlockSpec((1, c, d), lambda i: (i, 0, 0)),
            pl.BlockSpec((1, c, d), lambda i: (i, 0, 0)),
            pl.BlockSpec((m, d), lambda i: (0, 0)),
            pl.BlockSpec((m, d), lambda i: (0, 0)),
            pl.BlockSpec((m, d), lambda i: (0, 0)),
            pl.BlockSpec((d, m), lambda i: (0, 0)),
            pl.BlockSpec((1, d), lambda i: (0, 0)),
        ],
        out_specs=pl.BlockSpec((1, c, d), lambda i: (i, 0, 0)),
        scratch_shapes=[pltpu.VMEM((c, m), jnp.float32)],
        compiler_params=_cparams(1),
    )(xq, xkv, wq, wk, wv, wp, bp.reshape(1, d))


def _pos_emb(xpad, masks, w1, b1, w2, b2, s):
    b, c, pp = xpad.shape
    p = s * s
    kern = functools.partial(_pos_emb_kernel, s=s, p=p)
    return pl.pallas_call(
        kern,
        out_shape=jax.ShapeDtypeStruct((b, c, p), xpad.dtype),
        grid=(b,),
        in_specs=[
            pl.BlockSpec((1, c, pp), lambda i: (i, 0, 0)),
            pl.BlockSpec((9, 1, p), lambda i: (0, 0, 0)),
            pl.BlockSpec((9, c, c), lambda i: (0, 0, 0)),
            pl.BlockSpec((c, 1), lambda i: (0, 0)),
            pl.BlockSpec((9, c, c), lambda i: (0, 0, 0)),
            pl.BlockSpec((c, 1), lambda i: (0, 0)),
        ],
        out_specs=pl.BlockSpec((1, c, p), lambda i: (i, 0, 0)),
        scratch_shapes=[pltpu.VMEM((c, pp), jnp.float32)],
        compiler_params=_cparams(1),
    )(xpad, masks, w1, b1.reshape(c, 1), w2, b2.reshape(c, 1))


def _combine(a, s, pos, x_hsi, gamma, beta, eps):
    b, c, sd, _ = pos.shape
    l = s.shape[2]
    kern = functools.partial(_combine_kernel, eps=eps)
    return pl.pallas_call(
        kern,
        out_shape=(jax.ShapeDtypeStruct((b, c, sd, sd), x_hsi.dtype),
                   jax.ShapeDtypeStruct((b, c, sd, sd), x_hsi.dtype)),
        grid=(b,),
        in_specs=[
            pl.BlockSpec((1, c, sd, l), lambda i: (i, 0, 0, 0)),
            pl.BlockSpec((1, c, l, sd), lambda i: (i, 0, 0, 0)),
            pl.BlockSpec((1, c, sd, sd), lambda i: (i, 0, 0, 0)),
            pl.BlockSpec((1, c, sd, sd), lambda i: (i, 0, 0, 0)),
            pl.BlockSpec((1, 1, sd), lambda i: (0, 0, 0)),
            pl.BlockSpec((1, 1, sd), lambda i: (0, 0, 0)),
        ],
        out_specs=(pl.BlockSpec((1, c, sd, sd), lambda i: (i, 0, 0, 0)),
                   pl.BlockSpec((1, c, sd, sd), lambda i: (i, 0, 0, 0))),
        compiler_params=_cparams(1),
    )(a, s, pos, x_hsi, gamma.reshape(1, 1, sd), beta.reshape(1, 1, sd))


def _ffn(srn_flat, sr_flat, masks, w_f1, wdw, w_f3, s, neg_slope=0.1):
    b, c, p = srn_flat.shape
    pp = p + 2 * (s + 1)
    kern = functools.partial(_ffn_kernel, s=s, p=p, neg_slope=neg_slope)
    return pl.pallas_call(
        kern,
        out_shape=jax.ShapeDtypeStruct((b, c, p), sr_flat.dtype),
        grid=(b,),
        in_specs=[
            pl.BlockSpec((1, c, p), lambda i: (i, 0, 0)),
            pl.BlockSpec((1, c, p), lambda i: (i, 0, 0)),
            pl.BlockSpec((9, 1, p), lambda i: (0, 0, 0)),
            pl.BlockSpec((c, c), lambda i: (0, 0)),
            pl.BlockSpec((9, c, 1), lambda i: (0, 0, 0)),
            pl.BlockSpec((c, c), lambda i: (0, 0)),
        ],
        out_specs=pl.BlockSpec((1, c, p), lambda i: (i, 0, 0)),
        scratch_shapes=[pltpu.VMEM((c, pp), jnp.float32)],
        compiler_params=_cparams(1),
    )(srn_flat, sr_flat, masks, w_f1, wdw, w_f3)


# ---------------------------------------------------------------------------
# Forward pass (wrapper = trivial reshapes, weight re-layouts, one tiny pad)
# ---------------------------------------------------------------------------

def _conv_masks(s):
    """[9, 1, S*S] f32 validity masks for the row-major 3x3 shift trick."""
    p = s * s
    pos = jnp.arange(p)
    w_idx = pos % s
    h_idx = pos // s
    rows = []
    for k in range(9):
        dy, dx = k // 3 - 1, k % 3 - 1
        valid = ((w_idx + dx >= 0) & (w_idx + dx < s) &
                 (h_idx + dy >= 0) & (h_idx + dy < s))
        rows.append(valid.astype(jnp.float32))
    return jnp.stack(rows).reshape(9, 1, p)


def guided_spatial_sr(x_msi, x_hsi, params, *, heads, head_dim):
    b, c, s, s2 = x_hsi.shape
    assert s == s2, "module requires square spatial dims (w_in == h_in)"
    l = params["to_s_hsi"].shape[1]
    d = s * l
    p = s * s
    # NOTE: nn.LayerNorm(w_in, h_in) normalizes over the last dim (w_in) with
    # eps = h_in (second positional arg of LayerNorm). Faithfully reproduced.
    eps = float(s)

    # -- LayerNorm (fused) + Spatial_Learn projections ------------------------
    # MSI branch: the normalized activation is not needed downstream -> skipped.
    s_msi, a_msi = _proj_ln(x_msi, params["g_msi"], params["b_msi"],
                            params["to_s_msi"], params["to_a_msi"], eps,
                            emit_xn=False)
    s_hsi, a_hsi, x_hsi_n = _proj_ln(x_hsi, params["g_hsi"], params["b_hsi"],
                                     params["to_s_hsi"], params["to_a_hsi"],
                                     eps, emit_xn=True)

    # -- SpatialMSA (q from msi, k/v from hsi) in lane-dense [C, D] layout -----
    # Reshapes below merge trailing dims only (no-copy).
    s_out = _msa(s_msi.reshape(b, c, d), s_hsi.reshape(b, c, d),
                 params["wq_s"], params["wk_s"], params["wv_s"],
                 params["wp_s"], params["bp_s"], heads, head_dim)
    a_out = _msa(a_msi.reshape(b, c, d), a_hsi.reshape(b, c, d),
                 params["wq_a"], params["wk_a"], params["wv_a"],
                 params["wp_a"], params["bp_a"], heads, head_dim)
    s_out = s_out.reshape(b, c, l, s)
    a_out = a_out.reshape(b, c, s, l)

    # -- positional embedding: conv3x3 -> GELU -> conv3x3 fused in one kernel --
    masks = _conv_masks(s)
    xn_pad = jnp.pad(x_hsi_n.reshape(b, c, p),
                     ((0, 0), (0, 0), (s + 1, s + 1)))
    w1 = params["w_pos1"].transpose(2, 3, 0, 1).reshape(9, c, c)
    w2 = params["w_pos2"].transpose(2, 3, 0, 1).reshape(9, c, c)
    pos = _pos_emb(xn_pad, masks, w1, params["b_pos1"], w2, params["b_pos2"], s)
    pos = pos.reshape(b, c, s, s)

    # -- a @ s + pos, residual with original x_hsi, fused post-LayerNorm ------
    sr, sr_n = _combine(a_out, s_out, pos, x_hsi,
                        params["g_sr"], params["b_sr"], eps)

    # -- FeedForward, fully fused (incl. depthwise 3x3 and residual) ----------
    wdw = params["w_dw"].transpose(2, 3, 0, 1).reshape(9, c, 1)
    out = _ffn(sr_n.reshape(b, c, p), sr.reshape(b, c, p), masks,
               params["w_f1"], wdw, params["w_f3"], s, neg_slope=0.1)
    return out.reshape(b, c, s, s)


# ---------------------------------------------------------------------------
# Pure-JAX reference mirroring the PyTorch forward
# ---------------------------------------------------------------------------

def reference_forward(x_msi, x_hsi, params, *, heads, head_dim):
    b, c, hdim, wdim = x_hsi.shape
    l = params["to_s_hsi"].shape[1]
    eps = float(hdim)

    def ln(x, g, bta):
        mu = jnp.mean(x, axis=-1, keepdims=True)
        var = jnp.mean((x - mu) ** 2, axis=-1, keepdims=True)
        return (x - mu) * jax.lax.rsqrt(var + eps) * g + bta

    def l2n(t):
        n = jnp.sqrt(jnp.sum(t * t, axis=-1, keepdims=True))
        return t / jnp.maximum(n, 1e-12)

    def msa(xq, xkv, wq, wk, wv, wp, bp):
        q, k, v = xq @ wq.T, xkv @ wk.T, xkv @ wv.T

        def split(t):
            return t.reshape(b, c, heads, head_dim).transpose(0, 2, 3, 1)

        q, k, v = split(q), split(k), split(v)              # [B, nh, hd, C]
        q, k = l2n(q), l2n(k)
        attn = jnp.einsum('bhic,bhjc->bhij', k, q)
        attn = jax.nn.softmax(attn, axis=-1)
        x = jnp.einsum('bhij,bhjc->bhic', attn, v)
        x = x.transpose(0, 3, 1, 2).reshape(b, c, heads * head_dim)
        return jax.nn.gelu(x @ wp.T + bp, approximate=False)

    def conv3x3(x, w, bias):
        y = jax.lax.conv_general_dilated(
            x, w, window_strides=(1, 1), padding=((1, 1), (1, 1)),
            dimension_numbers=("NCHW", "OIHW", "NCHW"))
        return y + bias[None, :, None, None]

    def leaky(x):
        return jnp.where(x >= 0, x, 0.1 * x)

    x_msi_n = ln(x_msi, params["g_msi"], params["b_msi"])
    x_hsi_n = ln(x_hsi, params["g_hsi"], params["b_hsi"])

    s_hsi = jnp.einsum('clh,bchw->bclw', params["to_s_hsi"], x_hsi_n)
    a_hsi = jnp.einsum('bchw,cwl->bchl', x_hsi_n, params["to_a_hsi"])
    s_msi = jnp.einsum('clh,bchw->bclw', params["to_s_msi"], x_msi_n)
    a_msi = jnp.einsum('bchw,cwl->bchl', x_msi_n, params["to_a_msi"])

    s = msa(s_msi.reshape(b, c, l * wdim), s_hsi.reshape(b, c, l * wdim),
            params["wq_s"], params["wk_s"], params["wv_s"],
            params["wp_s"], params["bp_s"]).reshape(b, c, l, wdim)
    a = msa(a_msi.reshape(b, c, hdim * l), a_hsi.reshape(b, c, hdim * l),
            params["wq_a"], params["wk_a"], params["wv_a"],
            params["wp_a"], params["bp_a"]).reshape(b, c, hdim, l)

    pos = conv3x3(x_hsi_n, params["w_pos1"], params["b_pos1"])
    pos = jax.nn.gelu(pos, approximate=False)
    pos = conv3x3(pos, params["w_pos2"], params["b_pos2"])

    sr = jnp.einsum('bchl,bclw->bchw', a, s) + pos + x_hsi
    sr_n = ln(sr, params["g_sr"], params["b_sr"])

    h1 = leaky(jnp.einsum('oi,bihw->bohw', params["w_f1"], sr_n))
    h2 = leaky(jax.lax.conv_general_dilated(
        h1, params["w_dw"], window_strides=(1, 1), padding=((1, 1), (1, 1)),
        dimension_numbers=("NCHW", "OIHW", "NCHW"), feature_group_count=c))
    out = jnp.einsum('oi,bihw->bohw', params["w_f3"], h2)
    return out + sr


# ---------------------------------------------------------------------------
# Test
# ---------------------------------------------------------------------------

if __name__ == "__main__":
    B, C, S, L = 2, 4, 16, 8
    HEADS, HEAD_DIM = 2, 8
    D = S * L            # 128
    M = HEADS * HEAD_DIM

    keys = iter(jax.random.split(jax.random.PRNGKey(0), 40))

    def rnd(shape, scale=0.1):
        return jax.random.normal(next(keys), shape, dtype=jnp.float32) * scale

    x_msi = rnd((B, C, S, S), 1.0)
    x_hsi = rnd((B, C, S, S), 1.0)

    params = dict(
        g_msi=1.0 + rnd((S,)), b_msi=rnd((S,)),
        g_hsi=1.0 + rnd((S,)), b_hsi=rnd((S,)),
        g_sr=1.0 + rnd((S,)), b_sr=rnd((S,)),
        to_s_hsi=rnd((C, L, S)), to_a_hsi=rnd((C, S, L)),
        to_s_msi=rnd((C, L, S)), to_a_msi=rnd((C, S, L)),
        w_pos1=rnd((C, C, 3, 3)), b_pos1=rnd((C,)),
        w_pos2=rnd((C, C, 3, 3)), b_pos2=rnd((C,)),
        wq_s=rnd((M, D)), wk_s=rnd((M, D)), wv_s=rnd((M, D)),
        wp_s=rnd((D, M)), bp_s=rnd((D,)),
        wq_a=rnd((M, D)), wk_a=rnd((M, D)), wv_a=rnd((M, D)),
        wp_a=rnd((D, M)), bp_a=rnd((D,)),
        w_f1=rnd((C, C)), w_dw=rnd((C, 1, 3, 3)), w_f3=rnd((C, C)),
    )

    fwd = jax.jit(guided_spatial_sr, static_argnames=("heads", "head_dim"))
    out = fwd(x_msi, x_hsi, params, heads=HEADS, head_dim=HEAD_DIM)
    out = jax.block_until_ready(out)

    ref = reference_forward(x_msi, x_hsi, params, heads=HEADS, head_dim=HEAD_DIM)
    assert out.shape == (B, C, S, S), out.shape
    err = float(jnp.max(jnp.abs(out - ref)))
    assert err < 2e-3, f"mismatch vs reference: max abs err = {err}"

    print("KERNEL_OK")
</pallas_src>

<mosaic_0001>
module attributes {stable_mosaic.version = 11 : i64} {
  func.func @_proj_ln_kernel(%arg0: i32, %arg1: memref<1x4x16x16xf32, #tpu.memory_space<vmem>>, %arg2: memref<1x1x16xf32, #tpu.memory_space<vmem>>, %arg3: memref<1x1x16xf32, #tpu.memory_space<vmem>>, %arg4: memref<4x8x16xf32, #tpu.memory_space<vmem>>, %arg5: memref<4x16x8xf32, #tpu.memory_space<vmem>>, %arg6: memref<1x4x8x16xf32, #tpu.memory_space<vmem>>, %arg7: memref<1x4x16x8xf32, #tpu.memory_space<vmem>>, %arg8: memref<1x4x16x16xf32, #tpu.memory_space<vmem>>) attributes {dimension_semantics = [#tpu.dimension_semantics<parallel>], iteration_bounds = array<i64: 2>, scalar_prefetch = 0 : i64, scratch_operands = 0 : i64, tpu.core_type = #tpu.core_type<tc>, window_params = [{transform_indices = @transform_0, window_bounds = array<i64: 1, 4, 16, 16>}, {pipeline_mode = #tpu.pipeline_mode<synchronous>, transform_indices = @transform_1, window_bounds = array<i64: 1, 1, 16>}, {pipeline_mode = #tpu.pipeline_mode<synchronous>, transform_indices = @transform_2, window_bounds = array<i64: 1, 1, 16>}, {pipeline_mode = #tpu.pipeline_mode<synchronous>, transform_indices = @transform_3, window_bounds = array<i64: 4, 8, 16>}, {pipeline_mode = #tpu.pipeline_mode<synchronous>, transform_indices = @transform_4, window_bounds = array<i64: 4, 16, 8>}, {transform_indices = @transform_5, window_bounds = array<i64: 1, 4, 8, 16>}, {transform_indices = @transform_6, window_bounds = array<i64: 1, 4, 16, 8>}, {transform_indices = @transform_7, window_bounds = array<i64: 1, 4, 16, 16>}]} {
    %c0 = arith.constant 0 : index
    %c0_0 = arith.constant 0 : index
    %c0_1 = arith.constant 0 : index
    %c0_2 = arith.constant 0 : index
    %0 = vector.load %arg1[%c0, %c0_0, %c0_1, %c0_2] : memref<1x4x16x16xf32, #tpu.memory_space<vmem>>, vector<1x4x16x16xf32>
    %1 = vector.shape_cast %0 : vector<1x4x16x16xf32> to vector<4x16x16xf32>
    %cst = arith.constant dense<0.000000e+00> : vector<4x16xf32>
    %2 = vector.multi_reduction <add>, %1, %cst [2] : vector<4x16x16xf32> to vector<4x16xf32>
    %3 = vector.shape_cast %2 : vector<4x16xf32> to vector<4x16x1xf32>
    %cst_3 = arith.constant 1.600000e+01 : f32
    %4 = vector.broadcast %cst_3 : f32 to vector<4x16x1xf32>
    %5 = arith.divf %3, %4 : vector<4x16x1xf32>
    %6 = vector.broadcast %5 : vector<4x16x1xf32> to vector<4x16x16xf32>
    %7 = arith.subf %1, %6 : vector<4x16x16xf32>
    %8 = arith.mulf %7, %7 : vector<4x16x16xf32>
    %cst_4 = arith.constant dense<0.000000e+00> : vector<4x16xf32>
    %9 = vector.multi_reduction <add>, %8, %cst_4 [2] : vector<4x16x16xf32> to vector<4x16xf32>
    %10 = vector.shape_cast %9 : vector<4x16xf32> to vector<4x16x1xf32>
    %cst_5 = arith.constant 1.600000e+01 : f32
    %11 = vector.broadcast %cst_5 : f32 to vector<4x16x1xf32>
    %12 = arith.divf %10, %11 : vector<4x16x1xf32>
    %13 = vector.broadcast %5 : vector<4x16x1xf32> to vector<4x16x16xf32>
    %14 = arith.subf %1, %13 : vector<4x16x16xf32>
    %cst_6 = arith.constant 1.600000e+01 : f32
    %15 = vector.broadcast %cst_6 : f32 to vector<4x16x1xf32>
    %16 = arith.addf %12, %15 : vector<4x16x1xf32>
    %17 = math.rsqrt %16 : vector<4x16x1xf32>
    %18 = vector.broadcast %17 : vector<4x16x1xf32> to vector<4x16x16xf32>
    %19 = arith.mulf %14, %18 : vector<4x16x16xf32>
    %c0_7 = arith.constant 0 : index
    %c0_8 = arith.constant 0 : index
    %c0_9 = arith.constant 0 : index
    %20 = vector.load %arg2[%c0_7, %c0_8, %c0_9] : memref<1x1x16xf32, #tpu.memory_space<vmem>>, vector<1x1x16xf32>
    %21 = vector.broadcast %20 : vector<1x1x16xf32> to vector<4x16x16xf32>
    %22 = arith.mulf %19, %21 : vector<4x16x16xf32>
    %c0_10 = arith.constant 0 : index
    %c0_11 = arith.constant 0 : index
    %c0_12 = arith.constant 0 : index
    %23 = vector.load %arg3[%c0_10, %c0_11, %c0_12] : memref<1x1x16xf32, #tpu.memory_space<vmem>>, vector<1x1x16xf32>
    %24 = vector.broadcast %23 : vector<1x1x16xf32> to vector<4x16x16xf32>
    %25 = arith.addf %22, %24 : vector<4x16x16xf32>
    %c0_13 = arith.constant 0 : index
    %c0_14 = arith.constant 0 : index
    %c0_15 = arith.constant 0 : index
    %26 = vector.load %arg4[%c0_13, %c0_14, %c0_15] : memref<4x8x16xf32, #tpu.memory_space<vmem>>, vector<4x8x16xf32>
    "tpu.trace_start"() <{level = 10 : i32, message = "clh,chw->clw"}> : () -> ()
    %cst_16 = arith.constant dense<0.000000e+00> : vector<4x8x16xf32>
    %27 = tpu.matmul %26, %25, %cst_16 {dimension_numbers = #tpu.dot_dimension_numbers<[2], [1], [1], [2], [0, 0, 0, 1, 1, 2], [0], [0]>, precision = #tpu.contract_precision<fp32>} : vector<4x8x16xf32>, vector<4x16x16xf32>, vector<4x8x16xf32> -> vector<4x8x16xf32>
    "tpu.trace_stop"() : () -> ()
    %c0_17 = arith.constant 0 : index
    %c0_18 = arith.constant 0 : index
    %c0_19 = arith.constant 0 : index
    %28 = vector.load %arg5[%c0_17, %c0_18, %c0_19] : memref<4x16x8xf32, #tpu.memory_space<vmem>>, vector<4x16x8xf32>
    "tpu.trace_start"() <{level = 10 : i32, message = "chw,cwl->chl"}> : () -> ()
    %cst_20 = arith.constant dense<0.000000e+00> : vector<4x16x8xf32>
    %29 = tpu.matmul %25, %28, %cst_20 {dimension_numbers = #tpu.dot_dimension_numbers<[2], [1], [1], [2], [0, 0, 0, 1, 1, 2], [0], [0]>, precision = #tpu.contract_precision<fp32>} : vector<4x16x16xf32>, vector<4x16x8xf32>, vector<4x16x8xf32> -> vector<4x16x8xf32>
    "tpu.trace_stop"() : () -> ()
    %c0_21 = arith.constant 0 : index
    %c0_22 = arith.constant 0 : index
    %c0_23 = arith.constant 0 : index
    %c0_24 = arith.constant 0 : index
    %30 = vector.load %arg6[%c0_21, %c0_22, %c0_23, %c0_24] : memref<1x4x8x16xf32, #tpu.memory_space<vmem>>, vector<1x4x8x16xf32>
    %31 = vector.shape_cast %30 : vector<1x4x8x16xf32> to vector<4x8x16xf32>
    %32 = vector.shape_cast %27 : vector<4x8x16xf32> to vector<1x4x8x16xf32>
    tpu.vector_store %arg6[%c0_21, %c0_22, %c0_23, %c0_24], %32 {strides = array<i32>} : memref<1x4x8x16xf32, #tpu.memory_space<vmem>>, vector<1x4x8x16xf32>,
    %c0_25 = arith.constant 0 : index
    %c0_26 = arith.constant 0 : index
    %c0_27 = arith.constant 0 : index
    %c0_28 = arith.constant 0 : index
    %33 = vector.load %arg7[%c0_25, %c0_26, %c0_27, %c0_28] : memref<1x4x16x8xf32, #tpu.memory_space<vmem>>, vector<1x4x16x8xf32>
    %34 = vector.shape_cast %33 : vector<1x4x16x8xf32> to vector<4x16x8xf32>
    %35 = vector.shape_cast %29 : vector<4x16x8xf32> to vector<1x4x16x8xf32>
    tpu.vector_store %arg7[%c0_25, %c0_26, %c0_27, %c0_28], %35 {strides = array<i32>} : memref<1x4x16x8xf32, #tpu.memory_space<vmem>>, vector<1x4x16x8xf32>,
    %c0_29 = arith.constant 0 : index
    %c0_30 = arith.constant 0 : index
    %c0_31 = arith.constant 0 : index
    %c0_32 = arith.constant 0 : index
    %36 = vector.load %arg8[%c0_29, %c0_30, %c0_31, %c0_32] : memref<1x4x16x16xf32, #tpu.memory_space<vmem>>, vector<1x4x16x16xf32>
    %37 = vector.shape_cast %36 : vector<1x4x16x16xf32> to vector<4x16x16xf32>
    %38 = vector.shape_cast %25 : vector<4x16x16xf32> to vector<1x4x16x16xf32>
    tpu.vector_store %arg8[%c0_29, %c0_30, %c0_31, %c0_32], %38 {strides = array<i32>} : memref<1x4x16x16xf32, #tpu.memory_space<vmem>>, vector<1x4x16x16xf32>,
    return
  }
  func.func @transform_0(%arg0: i32) -> (i32, i32, i32, i32) {
    %c0_i32 = arith.constant 0 : i32
    %c0_i32_0 = arith.constant 0 : i32
    %c0_i32_1 = arith.constant 0 : i32
    %c0_i32_2 = arith.constant 0 : i32
    return %arg0, %c0_i32, %c0_i32_0, %c0_i32_1 : i32, i32, i32, i32
  }
  func.func @transform_1(%arg0: i32) -> (i32, i32, i32) {
    %c0_i32 = arith.constant 0 : i32
    %c0_i32_0 = arith.constant 0 : i32
    %c0_i32_1 = arith.constant 0 : i32
    %c0_i32_2 = arith.constant 0 : i32
    return %c0_i32, %c0_i32_0, %c0_i32_1 : i32, i32, i32
  }
  func.func @transform_2(%arg0: i32) -> (i32, i32, i32) {
    %c0_i32 = arith.constant 0 : i32
    %c0_i32_0 = arith.constant 0 : i32
    %c0_i32_1 = arith.constant 0 : i32
    %c0_i32_2 = arith.constant 0 : i32
    return %c0_i32, %c0_i32_0, %c0_i32_1 : i32, i32, i32
  }
  func.func @transform_3(%arg0: i32) -> (i32, i32, i32) {
    %c0_i32 = arith.constant 0 : i32
    %c0_i32_0 = arith.constant 0 : i32
    %c0_i32_1 = arith.constant 0 : i32
    %c0_i32_2 = arith.constant 0 : i32
    return %c0_i32, %c0_i32_0, %c0_i32_1 : i32, i32, i32
  }
  func.func @transform_4(%arg0: i32) -> (i32, i32, i32) {
    %c0_i32 = arith.constant 0 : i32
    %c0_i32_0 = arith.constant 0 : i32
    %c0_i32_1 = arith.constant 0 : i32
    %c0_i32_2 = arith.constant 0 : i32
    return %c0_i32, %c0_i32_0, %c0_i32_1 : i32, i32, i32
  }
  func.func @transform_5(%arg0: i32) -> (i32, i32, i32, i32) {
    %c0_i32 = arith.constant 0 : i32
    %c0_i32_0 = arith.constant 0 : i32
    %c0_i32_1 = arith.constant 0 : i32
    %c0_i32_2 = arith.constant 0 : i32
    return %arg0, %c0_i32, %c0_i32_0, %c0_i32_1 : i32, i32, i32, i32
  }
  func.func @transform_6(%arg0: i32) -> (i32, i32, i32, i32) {
    %c0_i32 = arith.constant 0 : i32
    %c0_i32_0 = arith.constant 0 : i32
    %c0_i32_1 = arith.constant 0 : i32
    %c0_i32_2 = arith.constant 0 : i32
    return %arg0, %c0_i32, %c0_i32_0, %c0_i32_1 : i32, i32, i32, i32
  }
  func.func @transform_7(%arg0: i32) -> (i32, i32, i32, i32) {
    %c0_i32 = arith.constant 0 : i32
    %c0_i32_0 = arith.constant 0 : i32
    %c0_i32_1 = arith.constant 0 : i32
    %c0_i32_2 = arith.constant 0 : i32
    return %arg0, %c0_i32, %c0_i32_0, %c0_i32_1 : i32, i32, i32, i32
  }
}

module attributes {stable_mosaic.version = 11 : i64} {
  func.func @_pos_emb_kernel(%arg0: i32, %arg1: memref<1x4x290xf32, #tpu.memory_space<vmem>>, %arg2: memref<9x1x256xf32, #tpu.memory_space<vmem>>, %arg3: memref<9x4x4xf32, #tpu.memory_space<vmem>>, %arg4: memref<4x1xf32, #tpu.memory_space<vmem>>, %arg5: memref<9x4x4xf32, #tpu.memory_space<vmem>>, %arg6: memref<4x1xf32, #tpu.memory_space<vmem>>, %arg7: memref<1x4x256xf32, #tpu.memory_space<vmem>>, %arg8: memref<4x290xf32, #tpu.memory_space<vmem>>) attributes {dimension_semantics = [#tpu.dimension_semantics<parallel>], iteration_bounds = array<i64: 2>, scalar_prefetch = 0 : i64, scratch_operands = 1 : i64, tpu.core_type = #tpu.core_type<tc>, window_params = [{transform_indices = @transform_0, window_bounds = array<i64: 1, 4, 290>}, {pipeline_mode = #tpu.pipeline_mode<synchronous>, transform_indices = @transform_1, window_bounds = array<i64: 9, 1, 256>}, {pipeline_mode = #tpu.pipeline_mode<synchronous>, transform_indices = @transform_2, window_bounds = array<i64: 9, 4, 4>}, {pipeline_mode = #tpu.pipeline_mode<synchronous>, transform_indices = @transform_3, window_bounds = array<i64: 4, 1>}, {pipeline_mode = #tpu.pipeline_mode<synchronous>, transform_indices = @transform_4, window_bounds = array<i64: 9, 4, 4>}, {pipeline_mode = #tpu.pipeline_mode<synchronous>, transform_indices = @transform_5, window_bounds = array<i64: 4, 1>}, {transform_indices = @transform_6, window_bounds = array<i64: 1, 4, 256>}]} {
    %c0 = arith.constant 0 : index
    %c0_0 = arith.constant 0 : index
    %c0_1 = arith.constant 0 : index
    %0 = vector.load %arg2[%c0, %c0_0, %c0_1] : memref<9x1x256xf32, #tpu.memory_space<vmem>>, vector<9x1x256xf32>
    %c0_2 = arith.constant 0 : index
    %c0_3 = arith.constant 0 : index
    %c0_4 = arith.constant 0 : index
    %1 = vector.load %arg1[%c0_2, %c0_3, %c0_4] : memref<1x4x290xf32, #tpu.memory_space<vmem>>, vector<1x4x290xf32>
    %2 = vector.shape_cast %1 : vector<1x4x290xf32> to vector<4x290xf32>
    %c0_5 = arith.constant 0 : index
    %c0_6 = arith.constant 0 : index
    %c0_7 = arith.constant 0 : index
    %3 = vector.load %arg3[%c0_5, %c0_6, %c0_7] : memref<9x4x4xf32, #tpu.memory_space<vmem>>, vector<9x4x4xf32>
    %c0_8 = arith.constant 0 : index
    %c0_9 = arith.constant 0 : index
    %4 = vector.load %arg4[%c0_8, %c0_9] : memref<4x1xf32, #tpu.memory_space<vmem>>, vector<4x1xf32>
    %5 = vector.extract_strided_slice %2 {offsets = [0, 0], sizes = [4, 256], strides = [1, 1]} : vector<4x290xf32> to vector<4x256xf32>
    %6 = vector.extract_strided_slice %0 {offsets = [0, 0, 0], sizes = [1, 1, 256], strides = [1, 1, 1]} : vector<9x1x256xf32> to vector<1x1x256xf32>
    %7 = vector.shape_cast %6 : vector<1x1x256xf32> to vector<1x256xf32>
    %8 = vector.broadcast %7 : vector<1x256xf32> to vector<4x256xf32>
    %9 = arith.mulf %5, %8 : vector<4x256xf32>
    %10 = vector.extract_strided_slice %3 {offsets = [0, 0, 0], sizes = [1, 4, 4], strides = [1, 1, 1]} : vector<9x4x4xf32> to vector<1x4x4xf32>
    %11 = vector.shape_cast %10 : vector<1x4x4xf32> to vector<4x4xf32>
    %cst = arith.constant dense<0.000000e+00> : vector<4x256xf32>
    %12 = tpu.matmul %11, %9, %cst {dimension_numbers = #tpu.dot_dimension_numbers<[1], [0], [0], [1], [0, 0, 1, 1], [], []>, precision = #tpu.contract_precision<fp32>} : vector<4x4xf32>, vector<4x256xf32>, vector<4x256xf32> -> vector<4x256xf32>
    %13 = vector.extract_strided_slice %2 {offsets = [0, 1], sizes = [4, 256], strides = [1, 1]} : vector<4x290xf32> to vector<4x256xf32>
    %14 = vector.extract_strided_slice %0 {offsets = [1, 0, 0], sizes = [1, 1, 256], strides = [1, 1, 1]} : vector<9x1x256xf32> to vector<1x1x256xf32>
    %15 = vector.shape_cast %14 : vector<1x1x256xf32> to vector<1x256xf32>
    %16 = vector.broadcast %15 : vector<1x256xf32> to vector<4x256xf32>
    %17 = arith.mulf %13, %16 : vector<4x256xf32>
    %18 = vector.extract_strided_slice %3 {offsets = [1, 0, 0], sizes = [1, 4, 4], strides = [1, 1, 1]} : vector<9x4x4xf32> to vector<1x4x4xf32>
    %19 = vector.shape_cast %18 : vector<1x4x4xf32> to vector<4x4xf32>
    %cst_10 = arith.constant dense<0.000000e+00> : vector<4x256xf32>
    %20 = tpu.matmul %19, %17, %cst_10 {dimension_numbers = #tpu.dot_dimension_numbers<[1], [0], [0], [1], [0, 0, 1, 1], [], []>, precision = #tpu.contract_precision<fp32>} : vector<4x4xf32>, vector<4x256xf32>, vector<4x256xf32> -> vector<4x256xf32>
    %21 = arith.addf %12, %20 : vector<4x256xf32>
    %22 = vector.extract_strided_slice %2 {offsets = [0, 2], sizes = [4, 256], strides = [1, 1]} : vector<4x290xf32> to vector<4x256xf32>
    %23 = vector.extract_strided_slice %0 {offsets = [2, 0, 0], sizes = [1, 1, 256], strides = [1, 1, 1]} : vector<9x1x256xf32> to vector<1x1x256xf32>
    %24 = vector.shape_cast %23 : vector<1x1x256xf32> to vector<1x256xf32>
    %25 = vector.broadcast %24 : vector<1x256xf32> to vector<4x256xf32>
    %26 = arith.mulf %22, %25 : vector<4x256xf32>
    %27 = vector.extract_strided_slice %3 {offsets = [2, 0, 0], sizes = [1, 4, 4], strides = [1, 1, 1]} : vector<9x4x4xf32> to vector<1x4x4xf32>
    %28 = vector.shape_cast %27 : vector<1x4x4xf32> to vector<4x4xf32>
    %cst_11 = arith.constant dense<0.000000e+00> : vector<4x256xf32>
    %29 = tpu.matmul %28, %26, %cst_11 {dimension_numbers = #tpu.dot_dimension_numbers<[1], [0], [0], [1], [0, 0, 1, 1], [], []>, precision = #tpu.contract_precision<fp32>} : vector<4x4xf32>, vector<4x256xf32>, vector<4x256xf32> -> vector<4x256xf32>
    %30 = arith.addf %21, %29 : vector<4x256xf32>
    %31 = vector.extract_strided_slice %2 {offsets = [0, 16], sizes = [4, 256], strides = [1, 1]} : vector<4x290xf32> to vector<4x256xf32>
    %32 = vector.extract_strided_slice %0 {offsets = [3, 0, 0], sizes = [1, 1, 256], strides = [1, 1, 1]} : vector<9x1x256xf32> to vector<1x1x256xf32>
    %33 = vector.shape_cast %32 : vector<1x1x256xf32> to vector<1x256xf32>
    %34 = vector.broadcast %33 : vector<1x256xf32> to vector<4x256xf32>
    %35 = arith.mulf %31, %34 : vector<4x256xf32>
    %36 = vector.extract_strided_slice %3 {offsets = [3, 0, 0], sizes = [1, 4, 4], strides = [1, 1, 1]} : vector<9x4x4xf32> to vector<1x4x4xf32>
    %37 = vector.shape_cast %36 : vector<1x4x4xf32> to vector<4x4xf32>
    %cst_12 = arith.constant dense<0.000000e+00> : vector<4x256xf32>
    %38 = tpu.matmul %37, %35, %cst_12 {dimension_numbers = #tpu.dot_dimension_numbers<[1], [0], [0], [1], [0, 0, 1, 1], [], []>, precision = #tpu.contract_precision<fp32>} : vector<4x4xf32>, vector<4x256xf32>, vector<4x256xf32> -> vector<4x256xf32>
    %39 = arith.addf %30, %38 : vector<4x256xf32>
    %40 = vector.extract_strided_slice %2 {offsets = [0, 17], sizes = [4, 256], strides = [1, 1]} : vector<4x290xf32> to vector<4x256xf32>
    %41 = vector.extract_strided_slice %0 {offsets = [4, 0, 0], sizes = [1, 1, 256], strides = [1, 1, 1]} : vector<9x1x256xf32> to vector<1x1x256xf32>
    %42 = vector.shape_cast %41 : vector<1x1x256xf32> to vector<1x256xf32>
    %43 = vector.broadcast %42 : vector<1x256xf32> to vector<4x256xf32>
    %44 = arith.mulf %40, %43 : vector<4x256xf32>
    %45 = vector.extract_strided_slice %3 {offsets = [4, 0, 0], sizes = [1, 4, 4], strides = [1, 1, 1]} : vector<9x4x4xf32> to vector<1x4x4xf32>
    %46 = vector.shape_cast %45 : vector<1x4x4xf32> to vector<4x4xf32>
    %cst_13 = arith.constant dense<0.000000e+00> : vector<4x256xf32>
    %47 = tpu.matmul %46, %44, %cst_13 {dimension_numbers = #tpu.dot_dimension_numbers<[1], [0], [0], [1], [0, 0, 1, 1], [], []>, precision = #tpu.contract_precision<fp32>} : vector<4x4xf32>, vector<4x256xf32>, vector<4x256xf32> -> vector<4x256xf32>
    %48 = arith.addf %39, %47 : vector<4x256xf32>
    %49 = vector.extract_strided_slice %2 {offsets = [0, 18], sizes = [4, 256], strides = [1, 1]} : vector<4x290xf32> to vector<4x256xf32>
    %50 = vector.extract_strided_slice %0 {offsets = [5, 0, 0], sizes = [1, 1, 256], strides = [1, 1, 1]} : vector<9x1x256xf32> to vector<1x1x256xf32>
    %51 = vector.shape_cast %50 : vector<1x1x256xf32> to vector<1x256xf32>
    %52 = vector.broadcast %51 : vector<1x256xf32> to vector<4x256xf32>
    %53 = arith.mulf %49, %52 : vector<4x256xf32>
    %54 = vector.extract_strided_slice %3 {offsets = [5, 0, 0], sizes = [1, 4, 4], strides = [1, 1, 1]} : vector<9x4x4xf32> to vector<1x4x4xf32>
    %55 = vector.shape_cast %54 : vector<1x4x4xf32> to vector<4x4xf32>
    %cst_14 = arith.constant dense<0.000000e+00> : vector<4x256xf32>
    %56 = tpu.matmul %55, %53, %cst_14 {dimension_numbers = #tpu.dot_dimension_numbers<[1], [0], [0], [1], [0, 0, 1, 1], [], []>, precision = #tpu.contract_precision<fp32>} : vector<4x4xf32>, vector<4x256xf32>, vector<4x256xf32> -> vector<4x256xf32>
    %57 = arith.addf %48, %56 : vector<4x256xf32>
    %58 = vector.extract_strided_slice %2 {offsets = [0, 32], sizes = [4, 256], strides = [1, 1]} : vector<4x290xf32> to vector<4x256xf32>
    %59 = vector.extract_strided_slice %0 {offsets = [6, 0, 0], sizes = [1, 1, 256], strides = [1, 1, 1]} : vector<9x1x256xf32> to vector<1x1x256xf32>
    %60 = vector.shape_cast %59 : vector<1x1x256xf32> to vector<1x256xf32>
    %61 = vector.broadcast %60 : vector<1x256xf32> to vector<4x256xf32>
    %62 = arith.mulf %58, %61 : vector<4x256xf32>
    %63 = vector.extract_strided_slice %3 {offsets = [6, 0, 0], sizes = [1, 4, 4], strides = [1, 1, 1]} : vector<9x4x4xf32> to vector<1x4x4xf32>
    %64 = vector.shape_cast %63 : vector<1x4x4xf32> to vector<4x4xf32>
    %cst_15 = arith.constant dense<0.000000e+00> : vector<4x256xf32>
    %65 = tpu.matmul %64, %62, %cst_15 {dimension_numbers = #tpu.dot_dimension_numbers<[1], [0], [0], [1], [0, 0, 1, 1], [], []>, precision = #tpu.contract_precision<fp32>} : vector<4x4xf32>, vector<4x256xf32>, vector<4x256xf32> -> vector<4x256xf32>
    %66 = arith.addf %57, %65 : vector<4x256xf32>
    %67 = vector.extract_strided_slice %2 {offsets = [0, 33], sizes = [4, 256], strides = [1, 1]} : vector<4x290xf32> to vector<4x256xf32>
    %68 = vector.extract_strided_slice %0 {offsets = [7, 0, 0], sizes = [1, 1, 256], strides = [1, 1, 1]} : vector<9x1x256xf32> to vector<1x1x256xf32>
    %69 = vector.shape_cast %68 : vector<1x1x256xf32> to vector<1x256xf32>
    %70 = vector.broadcast %69 : vector<1x256xf32> to vector<4x256xf32>
    %71 = arith.mulf %67, %70 : vector<4x256xf32>
    %72 = vector.extract_strided_slice %3 {offsets = [7, 0, 0], sizes = [1, 4, 4], strides = [1, 1, 1]} : vector<9x4x4xf32> to vector<1x4x4xf32>
    %73 = vector.shape_cast %72 : vector<1x4x4xf32> to vector<4x4xf32>
    %cst_16 = arith.constant dense<0.000000e+00> : vector<4x256xf32>
    %74 = tpu.matmul %73, %71, %cst_16 {dimension_numbers = #tpu.dot_dimension_numbers<[1], [0], [0], [1], [0, 0, 1, 1], [], []>, precision = #tpu.contract_precision<fp32>} : vector<4x4xf32>, vector<4x256xf32>, vector<4x256xf32> -> vector<4x256xf32>
    %75 = arith.addf %66, %74 : vector<4x256xf32>
    %76 = vector.extract_strided_slice %2 {offsets = [0, 34], sizes = [4, 256], strides = [1, 1]} : vector<4x290xf32> to vector<4x256xf32>
    %77 = vector.extract_strided_slice %0 {offsets = [8, 0, 0], sizes = [1, 1, 256], strides = [1, 1, 1]} : vector<9x1x256xf32> to vector<1x1x256xf32>
    %78 = vector.shape_cast %77 : vector<1x1x256xf32> to vector<1x256xf32>
    %79 = vector.broadcast %78 : vector<1x256xf32> to vector<4x256xf32>
    %80 = arith.mulf %76, %79 : vector<4x256xf32>
    %81 = vector.extract_strided_slice %3 {offsets = [8, 0, 0], sizes = [1, 4, 4], strides = [1, 1, 1]} : vector<9x4x4xf32> to vector<1x4x4xf32>
    %82 = vector.shape_cast %81 : vector<1x4x4xf32> to vector<4x4xf32>
    %cst_17 = arith.constant dense<0.000000e+00> : vector<4x256xf32>
    %83 = tpu.matmul %82, %80, %cst_17 {dimension_numbers = #tpu.dot_dimension_numbers<[1], [0], [0], [1], [0, 0, 1, 1], [], []>, precision = #tpu.contract_precision<fp32>} : vector<4x4xf32>, vector<4x256xf32>, vector<4x256xf32> -> vector<4x256xf32>
    %84 = arith.addf %75, %83 : vector<4x256xf32>
    %85 = vector.broadcast %4 : vector<4x1xf32> to vector<4x256xf32>
    %86 = arith.addf %84, %85 : vector<4x256xf32>
    %cst_18 = arith.constant 5.000000e-01 : f32
    %87 = vector.broadcast %cst_18 : f32 to vector<4x256xf32>
    %88 = arith.mulf %87, %86 : vector<4x256xf32>
    %cst_19 = arith.constant 0.707106769 : f32
    %89 = vector.broadcast %cst_19 : f32 to vector<4x256xf32>
    %90 = arith.mulf %86, %89 : vector<4x256xf32>
    %cst_20 = arith.constant 0.000000e+00 : f32
    %91 = vector.broadcast %cst_20 : f32 to vector<4x256xf32>
    %92 = arith.cmpf oge, %90, %91 : vector<4x256xf32>
    %cst_21 = arith.constant 0.000000e+00 : f32
    %93 = vector.broadcast %cst_21 : f32 to vector<4x256xf32>
    %94 = arith.subf %93, %90 : vector<4x256xf32>
    %95 = arith.select %92, %90, %94 : vector<4x256xi1>, vector<4x256xf32>
    %cst_22 = arith.constant 0.327591091 : f32
    %96 = vector.broadcast %cst_22 : f32 to vector<4x256xf32>
    %97 = arith.mulf %96, %95 : vector<4x256xf32>
    %cst_23 = arith.constant 1.000000e+00 : f32
    %98 = vector.broadcast %cst_23 : f32 to vector<4x256xf32>
    %99 = arith.addf %98, %97 : vector<4x256xf32>
    %cst_24 = arith.constant 1.000000e+00 : f32
    %100 = vector.broadcast %cst_24 : f32 to vector<4x256xf32>
    %101 = arith.divf %100, %99 : vector<4x256xf32>
    %cst_25 = arith.constant 1.06140542 : f32
    %102 = vector.broadcast %cst_25 : f32 to vector<4x256xf32>
    %103 = arith.mulf %102, %101 : vector<4x256xf32>
    %cst_26 = arith.constant 1.45315206 : f32
    %104 = vector.broadcast %cst_26 : f32 to vector<4x256xf32>
    %105 = arith.subf %103, %104 : vector<4x256xf32>
    %106 = arith.mulf %105, %101 : vector<4x256xf32>
    %cst_27 = arith.constant 1.42141378 : f32
    %107 = vector.broadcast %cst_27 : f32 to vector<4x256xf32>
    %108 = arith.addf %106, %107 : vector<4x256xf32>
    %109 = arith.mulf %108, %101 : vector<4x256xf32>
    %cst_28 = arith.constant 0.284496725 : f32
    %110 = vector.broadcast %cst_28 : f32 to vector<4x256xf32>
    %111 = arith.subf %109, %110 : vector<4x256xf32>
    %112 = arith.mulf %111, %101 : vector<4x256xf32>
    %cst_29 = arith.constant 0.254829586 : f32
    %113 = vector.broadcast %cst_29 : f32 to vector<4x256xf32>
    %114 = arith.addf %112, %113 : vector<4x256xf32>
    %115 = arith.mulf %114, %101 : vector<4x256xf32>
    %116 = arith.mulf %95, %95 : vector<4x256xf32>
    %cst_30 = arith.constant 0.000000e+00 : f32
    %117 = vector.broadcast %cst_30 : f32 to vector<4x256xf32>
    %118 = arith.subf %117, %116 : vector<4x256xf32>
    %119 = math.exp %118 : vector<4x256xf32>
    %120 = arith.mulf %115, %119 : vector<4x256xf32>
    %cst_31 = arith.constant 1.000000e+00 : f32
    %121 = vector.broadcast %cst_31 : f32 to vector<4x256xf32>
    %122 = arith.subf %121, %120 : vector<4x256xf32>
    %cst_32 = arith.constant 0.000000e+00 : f32
    %123 = vector.broadcast %cst_32 : f32 to vector<4x256xf32>
    %124 = arith.cmpf oge, %90, %123 : vector<4x256xf32>
    %cst_33 = arith.constant 0.000000e+00 : f32
    %125 = vector.broadcast %cst_33 : f32 to vector<4x256xf32>
    %126 = arith.subf %125, %122 : vector<4x256xf32>
    %127 = arith.select %124, %122, %126 : vector<4x256xi1>, vector<4x256xf32>
    %cst_34 = arith.constant 1.000000e+00 : f32
    %128 = vector.broadcast %cst_34 : f32 to vector<4x256xf32>
    %129 = arith.addf %128, %127 : vector<4x256xf32>
    %130 = arith.mulf %88, %129 : vector<4x256xf32>
    %cst_35 = arith.constant 0.000000e+00 : f32
    %131 = vector.broadcast %cst_35 : f32 to vector<4x290xf32>
    %c0_36 = arith.constant 0 : index
    %c0_37 = arith.constant 0 : index
    %132 = vector.load %arg8[%c0_36, %c0_37] : memref<4x290xf32, #tpu.memory_space<vmem>>, vector<4x290xf32>
    tpu.vector_store %arg8[%c0_36, %c0_37], %131 {strides = array<i32>} : memref<4x290xf32, #tpu.memory_space<vmem>>, vector<4x290xf32>,
    %c0_38 = arith.constant 0 : index
    %c17 = arith.constant 17 : index
    %133 = vector.load %arg8[%c0_38, %c17] : memref<4x290xf32, #tpu.memory_space<vmem>>, vector<4x256xf32>
    tpu.vector_store %arg8[%c0_38, %c17], %130 {strides = array<i32>} : memref<4x290xf32, #tpu.memory_space<vmem>>, vector<4x256xf32>,
    %c0_39 = arith.constant 0 : index
    %c0_40 = arith.constant 0 : index
    %134 = vector.load %arg8[%c0_39, %c0_40] : memref<4x290xf32, #tpu.memory_space<vmem>>, vector<4x290xf32>
    %c0_41 = arith.constant 0 : index
    %c0_42 = arith.constant 0 : index
    %c0_43 = arith.constant 0 : index
    %135 = vector.load %arg5[%c0_41, %c0_42, %c0_43] : memref<9x4x4xf32, #tpu.memory_space<vmem>>, vector<9x4x4xf32>
    %c0_44 = arith.constant 0 : index
    %c0_45 = arith.constant 0 : index
    %136 = vector.load %arg6[%c0_44, %c0_45] : memref<4x1xf32, #tpu.memory_space<vmem>>, vector<4x1xf32>
    %137 = vector.extract_strided_slice %134 {offsets = [0, 0], sizes = [4, 256], strides = [1, 1]} : vector<4x290xf32> to vector<4x256xf32>
    %138 = vector.extract_strided_slice %0 {offsets = [0, 0, 0], sizes = [1, 1, 256], strides = [1, 1, 1]} : vector<9x1x256xf32> to vector<1x1x256xf32>
    %139 = vector.shape_cast %138 : vector<1x1x256xf32> to vector<1x256xf32>
    %140 = vector.broadcast %139 : vector<1x256xf32> to vector<4x256xf32>
    %141 = arith.mulf %137, %140 : vector<4x256xf32>
    %142 = vector.extract_strided_slice %135 {offsets = [0, 0, 0], sizes = [1, 4, 4], strides = [1, 1, 1]} : vector<9x4x4xf32> to vector<1x4x4xf32>
    %143 = vector.shape_cast %142 : vector<1x4x4xf32> to vector<4x4xf32>
    %cst_46 = arith.constant dense<0.000000e+00> : vector<4x256xf32>
    %144 = tpu.matmul %143, %141, %cst_46 {dimension_numbers = #tpu.dot_dimension_numbers<[1], [0], [0], [1], [0, 0, 1, 1], [], []>, precision = #tpu.contract_precision<fp32>} : vector<4x4xf32>, vector<4x256xf32>, vector<4x256xf32> -> vector<4x256xf32>
    %145 = vector.extract_strided_slice %134 {offsets = [0, 1], sizes = [4, 256], strides = [1, 1]} : vector<4x290xf32> to vector<4x256xf32>
    %146 = vector.extract_strided_slice %0 {offsets = [1, 0, 0], sizes = [1, 1, 256], strides = [1, 1, 1]} : vector<9x1x256xf32> to vector<1x1x256xf32>
    %147 = vector.shape_cast %146 : vector<1x1x256xf32> to vector<1x256xf32>
    %148 = vector.broadcast %147 : vector<1x256xf32> to vector<4x256xf32>
    %149 = arith.mulf %145, %148 : vector<4x256xf32>
    %150 = vector.extract_strided_slice %135 {offsets = [1, 0, 0], sizes = [1, 4, 4], strides = [1, 1, 1]} : vector<9x4x4xf32> to vector<1x4x4xf32>
    %151 = vector.shape_cast %150 : vector<1x4x4xf32> to vector<4x4xf32>
    %cst_47 = arith.constant dense<0.000000e+00> : vector<4x256xf32>
    %152 = tpu.matmul %151, %149, %cst_47 {dimension_numbers = #tpu.dot_dimension_numbers<[1], [0], [0], [1], [0, 0, 1, 1], [], []>, precision = #tpu.contract_precision<fp32>} : vector<4x4xf32>, vector<4x256xf32>, vector<4x256xf32> -> vector<4x256xf32>
    %153 = arith.addf %144, %152 : vector<4x256xf32>
    %154 = vector.extract_strided_slice %134 {offsets = [0, 2], sizes = [4, 256], strides = [1, 1]} : vector<4x290xf32> to vector<4x256xf32>
    %155 = vector.extract_strided_slice %0 {offsets = [2, 0, 0], sizes = [1, 1, 256], strides = [1, 1, 1]} : vector<9x1x256xf32> to vector<1x1x256xf32>
    %156 = vector.shape_cast %155 : vector<1x1x256xf32> to vector<1x256xf32>
    %157 = vector.broadcast %156 : vector<1x256xf32> to vector<4x256xf32>
    %158 = arith.mulf %154, %157 : vector<4x256xf32>
    %159 = vector.extract_strided_slice %135 {offsets = [2, 0, 0], sizes = [1, 4, 4], strides = [1, 1, 1]} : vector<9x4x4xf32> to vector<1x4x4xf32>
    %160 = vector.shape_cast %159 : vector<1x4x4xf32> to vector<4x4xf32>
    %cst_48 = arith.constant dense<0.000000e+00> : vector<4x256xf32>
    %161 = tpu.matmul %160, %158, %cst_48 {dimension_numbers = #tpu.dot_dimension_numbers<[1], [0], [0], [1], [0, 0, 1, 1], [], []>, precision = #tpu.contract_precision<fp32>} : vector<4x4xf32>, vector<4x256xf32>, vector<4x256xf32> -> vector<4x256xf32>
    %162 = arith.addf %153, %161 : vector<4x256xf32>
    %163 = vector.extract_strided_slice %134 {offsets = [0, 16], sizes = [4, 256], strides = [1, 1]} : vector<4x290xf32> to vector<4x256xf32>
    %164 = vector.extract_strided_slice %0 {offsets = [3, 0, 0], sizes = [1, 1, 256], strides = [1, 1, 1]} : vector<9x1x256xf32> to vector<1x1x256xf32>
    %165 = vector.shape_cast %164 : vector<1x1x256xf32> to vector<1x256xf32>
    %166 = vector.broadcast %165 : vector<1x256xf32> to vector<4x256xf32>
    %167 = arith.mulf %163, %166 : vector<4x256xf32>
    %168 = vector.extract_strided_slice %135 {offsets = [3, 0, 0], sizes = [1, 4, 4], strides = [1, 1, 1]} : vector<9x4x4xf32> to vector<1x4x4xf32>
    %169 = vector.shape_cast %168 : vector<1x4x4xf32> to vector<4x4xf32>
    %cst_49 = arith.constant dense<0.000000e+00> : vector<4x256xf32>
    %170 = tpu.matmul %169, %167, %cst_49 {dimension_numbers = #tpu.dot_dimension_numbers<[1], [0], [0], [1], [0, 0, 1, 1], [], []>, precision = #tpu.contract_precision<fp32>} : vector<4x4xf32>, vector<4x256xf32>, vector<4x256xf32> -> vector<4x256xf32>
    %171 = arith.addf %162, %170 : vector<4x256xf32>
    %172 = vector.extract_strided_slice %134 {offsets = [0, 17], sizes = [4, 256], strides = [1, 1]} : vector<4x290xf32> to vector<4x256xf32>
    %173 = vector.extract_strided_slice %0 {offsets = [4, 0, 0], sizes = [1, 1, 256], strides = [1, 1, 1]} : vector<9x1x256xf32> to vector<1x1x256xf32>
    %174 = vector.shape_cast %173 : vector<1x1x256xf32> to vector<1x256xf32>
    %175 = vector.broadcast %174 : vector<1x256xf32> to vector<4x256xf32>
    %176 = arith.mulf %172, %175 : vector<4x256xf32>
    %177 = vector.extract_strided_slice %135 {offsets = [4, 0, 0], sizes = [1, 4, 4], strides = [1, 1, 1]} : vector<9x4x4xf32> to vector<1x4x4xf32>
    %178 = vector.shape_cast %177 : vector<1x4x4xf32> to vector<4x4xf32>
    %cst_50 = arith.constant dense<0.000000e+00> : vector<4x256xf32>
    %179 = tpu.matmul %178, %176, %cst_50 {dimension_numbers = #tpu.dot_dimension_numbers<[1], [0], [0], [1], [0, 0, 1, 1], [], []>, precision = #tpu.contract_precision<fp32>} : vector<4x4xf32>, vector<4x256xf32>, vector<4x256xf32> -> vector<4x256xf32>
    %180 = arith.addf %171, %179 : vector<4x256xf32>
    %181 = vector.extract_strided_slice %134 {offsets = [0, 18], sizes = [4, 256], strides = [1, 1]} : vector<4x290xf32> to vector<4x256xf32>
    %182 = vector.extract_strided_slice %0 {offsets = [5, 0, 0], sizes = [1, 1, 256], strides = [1, 1, 1]} : vector<9x1x256xf32> to vector<1x1x256xf32>
    %183 = vector.shape_cast %182 : vector<1x1x256xf32> to vector<1x256xf32>
    %184 = vector.broadcast %183 : vector<1x256xf32> to vector<4x256xf32>
    %185 = arith.mulf %181, %184 : vector<4x256xf32>
    %186 = vector.extract_strided_slice %135 {offsets = [5, 0, 0], sizes = [1, 4, 4], strides = [1, 1, 1]} : vector<9x4x4xf32> to vector<1x4x4xf32>
    %187 = vector.shape_cast %186 : vector<1x4x4xf32> to vector<4x4xf32>
    %cst_51 = arith.constant dense<0.000000e+00> : vector<4x256xf32>
    %188 = tpu.matmul %187, %185, %cst_51 {dimension_numbers = #tpu.dot_dimension_numbers<[1], [0], [0], [1], [0, 0, 1, 1], [], []>, precision = #tpu.contract_precision<fp32>} : vector<4x4xf32>, vector<4x256xf32>, vector<4x256xf32> -> vector<4x256xf32>
    %189 = arith.addf %180, %188 : vector<4x256xf32>
    %190 = vector.extract_strided_slice %134 {offsets = [0, 32], sizes = [4, 256], strides = [1, 1]} : vector<4x290xf32> to vector<4x256xf32>
    %191 = vector.extract_strided_slice %0 {offsets = [6, 0, 0], sizes = [1, 1, 256], strides = [1, 1, 1]} : vector<9x1x256xf32> to vector<1x1x256xf32>
    %192 = vector.shape_cast %191 : vector<1x1x256xf32> to vector<1x256xf32>
    %193 = vector.broadcast %192 : vector<1x256xf32> to vector<4x256xf32>
    %194 = arith.mulf %190, %193 : vector<4x256xf32>
    %195 = vector.extract_strided_slice %135 {offsets = [6, 0, 0], sizes = [1, 4, 4], strides = [1, 1, 1]} : vector<9x4x4xf32> to vector<1x4x4xf32>
    %196 = vector.shape_cast %195 : vector<1x4x4xf32> to vector<4x4xf32>
    %cst_52 = arith.constant dense<0.000000e+00> : vector<4x256xf32>
    %197 = tpu.matmul %196, %194, %cst_52 {dimension_numbers = #tpu.dot_dimension_numbers<[1], [0], [0], [1], [0, 0, 1, 1], [], []>, precision = #tpu.contract_precision<fp32>} : vector<4x4xf32>, vector<4x256xf32>, vector<4x256xf32> -> vector<4x256xf32>
    %198 = arith.addf %189, %197 : vector<4x256xf32>
    %199 = vector.extract_strided_slice %134 {offsets = [0, 33], sizes = [4, 256], strides = [1, 1]} : vector<4x290xf32> to vector<4x256xf32>
    %200 = vector.extract_strided_slice %0 {offsets = [7, 0, 0], sizes = [1, 1, 256], strides = [1, 1, 1]} : vector<9x1x256xf32> to vector<1x1x256xf32>
    %201 = vector.shape_cast %200 : vector<1x1x256xf32> to vector<1x256xf32>
    %202 = vector.broadcast %201 : vector<1x256xf32> to vector<4x256xf32>
    %203 = arith.mulf %199, %202 : vector<4x256xf32>
    %204 = vector.extract_strided_slice %135 {offsets = [7, 0, 0], sizes = [1, 4, 4], strides = [1, 1, 1]} : vector<9x4x4xf32> to vector<1x4x4xf32>
    %205 = vector.shape_cast %204 : vector<1x4x4xf32> to vector<4x4xf32>
    %cst_53 = arith.constant dense<0.000000e+00> : vector<4x256xf32>
    %206 = tpu.matmul %205, %203, %cst_53 {dimension_numbers = #tpu.dot_dimension_numbers<[1], [0], [0], [1], [0, 0, 1, 1], [], []>, precision = #tpu.contract_precision<fp32>} : vector<4x4xf32>, vector<4x256xf32>, vector<4x256xf32> -> vector<4x256xf32>
    %207 = arith.addf %198, %206 : vector<4x256xf32>
    %208 = vector.extract_strided_slice %134 {offsets = [0, 34], sizes = [4, 256], strides = [1, 1]} : vector<4x290xf32> to vector<4x256xf32>
    %209 = vector.extract_strided_slice %0 {offsets = [8, 0, 0], sizes = [1, 1, 256], strides = [1, 1, 1]} : vector<9x1x256xf32> to vector<1x1x256xf32>
    %210 = vector.shape_cast %209 : vector<1x1x256xf32> to vector<1x256xf32>
    %211 = vector.broadcast %210 : vector<1x256xf32> to vector<4x256xf32>
    %212 = arith.mulf %208, %211 : vector<4x256xf32>
    %213 = vector.extract_strided_slice %135 {offsets = [8, 0, 0], sizes = [1, 4, 4], strides = [1, 1, 1]} : vector<9x4x4xf32> to vector<1x4x4xf32>
    %214 = vector.shape_cast %213 : vector<1x4x4xf32> to vector<4x4xf32>
    %cst_54 = arith.constant dense<0.000000e+00> : vector<4x256xf32>
    %215 = tpu.matmul %214, %212, %cst_54 {dimension_numbers = #tpu.dot_dimension_numbers<[1], [0], [0], [1], [0, 0, 1, 1], [], []>, precision = #tpu.contract_precision<fp32>} : vector<4x4xf32>, vector<4x256xf32>, vector<4x256xf32> -> vector<4x256xf32>
    %216 = arith.addf %207, %215 : vector<4x256xf32>
    %217 = vector.broadcast %136 : vector<4x1xf32> to vector<4x256xf32>
    %218 = arith.addf %216, %217 : vector<4x256xf32>
    %c0_55 = arith.constant 0 : index
    %c0_56 = arith.constant 0 : index
    %c0_57 = arith.constant 0 : index
    %219 = vector.load %arg7[%c0_55, %c0_56, %c0_57] : memref<1x4x256xf32, #tpu.memory_space<vmem>>, vector<1x4x256xf32>
    %220 = vector.shape_cast %219 : vector<1x4x256xf32> to vector<4x256xf32>
    %221 = vector.shape_cast %218 : vector<4x256xf32> to vector<1x4x256xf32>
    tpu.vector_store %arg7[%c0_55, %c0_56, %c0_57], %221 {strides = array<i32>} : memref<1x4x256xf32, #tpu.memory_space<vmem>>, vector<1x4x256xf32>,
    return
  }
  func.func @transform_0(%arg0: i32) -> (i32, i32, i32) {
    %c0_i32 = arith.constant 0 : i32
    %c0_i32_0 = arith.constant 0 : i32
    %c0_i32_1 = arith.constant 0 : i32
    return %arg0, %c0_i32, %c0_i32_0 : i32, i32, i32
  }
  func.func @transform_1(%arg0: i32) -> (i32, i32, i32) {
    %c0_i32 = arith.constant 0 : i32
    %c0_i32_0 = arith.constant 0 : i32
    %c0_i32_1 = arith.constant 0 : i32
    %c0_i32_2 = arith.constant 0 : i32
    return %c0_i32, %c0_i32_0, %c0_i32_1 : i32, i32, i32
  }
  func.func @transform_2(%arg0: i32) -> (i32, i32, i32) {
    %c0_i32 = arith.constant 0 : i32
    %c0_i32_0 = arith.constant 0 : i32
    %c0_i32_1 = arith.constant 0 : i32
    %c0_i32_2 = arith.constant 0 : i32
    return %c0_i32, %c0_i32_0, %c0_i32_1 : i32, i32, i32
  }
  func.func @transform_3(%arg0: i32) -> (i32, i32) {
    %c0_i32 = arith.constant 0 : i32
    %c0_i32_0 = arith.constant 0 : i32
    %c0_i32_1 = arith.constant 0 : i32
    return %c0_i32, %c0_i32_0 : i32, i32
  }
  func.func @transform_4(%arg0: i32) -> (i32, i32, i32) {
    %c0_i32 = arith.constant 0 : i32
    %c0_i32_0 = arith.constant 0 : i32
    %c0_i32_1 = arith.constant 0 : i32
    %c0_i32_2 = arith.constant 0 : i32
    return %c0_i32, %c0_i32_0, %c0_i32_1 : i32, i32, i32
  }
  func.func @transform_5(%arg0: i32) -> (i32, i32) {
    %c0_i32 = arith.constant 0 : i32
    %c0_i32_0 = arith.constant 0 : i32
    %c0_i32_1 = arith.constant 0 : i32
    return %c0_i32, %c0_i32_0 : i32, i32
  }
  func.func @transform_6(%arg0: i32) -> (i32, i32, i32) {
    %c0_i32 = arith.constant 0 : i32
    %c0_i32_0 = arith.constant 0 : i32
    %c0_i32_1 = arith.constant 0 : i32
    return %arg0, %c0_i32, %c0_i32_0 : i32, i32, i32
  }
}

module attributes {stable_mosaic.version = 11 : i64} {
  func.func @_proj_ln_kernel(%arg0: i32, %arg1: memref<1x4x16x16xf32, #tpu.memory_space<vmem>>, %arg2: memref<1x1x16xf32, #tpu.memory_space<vmem>>, %arg3: memref<1x1x16xf32, #tpu.memory_space<vmem>>, %arg4: memref<4x8x16xf32, #tpu.memory_space<vmem>>, %arg5: memref<4x16x8xf32, #tpu.memory_space<vmem>>, %arg6: memref<1x4x8x16xf32, #tpu.memory_space<vmem>>, %arg7: memref<1x4x16x8xf32, #tpu.memory_space<vmem>>) attributes {dimension_semantics = [#tpu.dimension_semantics<parallel>], iteration_bounds = array<i64: 2>, scalar_prefetch = 0 : i64, scratch_operands = 0 : i64, tpu.core_type = #tpu.core_type<tc>, window_params = [{transform_indices = @transform_0, window_bounds = array<i64: 1, 4, 16, 16>}, {pipeline_mode = #tpu.pipeline_mode<synchronous>, transform_indices = @transform_1, window_bounds = array<i64: 1, 1, 16>}, {pipeline_mode = #tpu.pipeline_mode<synchronous>, transform_indices = @transform_2, window_bounds = array<i64: 1, 1, 16>}, {pipeline_mode = #tpu.pipeline_mode<synchronous>, transform_indices = @transform_3, window_bounds = array<i64: 4, 8, 16>}, {pipeline_mode = #tpu.pipeline_mode<synchronous>, transform_indices = @transform_4, window_bounds = array<i64: 4, 16, 8>}, {transform_indices = @transform_5, window_bounds = array<i64: 1, 4, 8, 16>}, {transform_indices = @transform_6, window_bounds = array<i64: 1, 4, 16, 8>}]} {
    %c0 = arith.constant 0 : index
    %c0_0 = arith.constant 0 : index
    %c0_1 = arith.constant 0 : index
    %c0_2 = arith.constant 0 : index
    %0 = vector.load %arg1[%c0, %c0_0, %c0_1, %c0_2] : memref<1x4x16x16xf32, #tpu.memory_space<vmem>>, vector<1x4x16x16xf32>
    %1 = vector.shape_cast %0 : vector<1x4x16x16xf32> to vector<4x16x16xf32>
    %cst = arith.constant dense<0.000000e+00> : vector<4x16xf32>
    %2 = vector.multi_reduction <add>, %1, %cst [2] : vector<4x16x16xf32> to vector<4x16xf32>
    %3 = vector.shape_cast %2 : vector<4x16xf32> to vector<4x16x1xf32>
    %cst_3 = arith.constant 1.600000e+01 : f32
    %4 = vector.broadcast %cst_3 : f32 to vector<4x16x1xf32>
    %5 = arith.divf %3, %4 : vector<4x16x1xf32>
    %6 = vector.broadcast %5 : vector<4x16x1xf32> to vector<4x16x16xf32>
    %7 = arith.subf %1, %6 : vector<4x16x16xf32>
    %8 = arith.mulf %7, %7 : vector<4x16x16xf32>
    %cst_4 = arith.constant dense<0.000000e+00> : vector<4x16xf32>
    %9 = vector.multi_reduction <add>, %8, %cst_4 [2] : vector<4x16x16xf32> to vector<4x16xf32>
    %10 = vector.shape_cast %9 : vector<4x16xf32> to vector<4x16x1xf32>
    %cst_5 = arith.constant 1.600000e+01 : f32
    %11 = vector.broadcast %cst_5 : f32 to vector<4x16x1xf32>
    %12 = arith.divf %10, %11 : vector<4x16x1xf32>
    %13 = vector.broadcast %5 : vector<4x16x1xf32> to vector<4x16x16xf32>
    %14 = arith.subf %1, %13 : vector<4x16x16xf32>
    %cst_6 = arith.constant 1.600000e+01 : f32
    %15 = vector.broadcast %cst_6 : f32 to vector<4x16x1xf32>
    %16 = arith.addf %12, %15 : vector<4x16x1xf32>
    %17 = math.rsqrt %16 : vector<4x16x1xf32>
    %18 = vector.broadcast %17 : vector<4x16x1xf32> to vector<4x16x16xf32>
    %19 = arith.mulf %14, %18 : vector<4x16x16xf32>
    %c0_7 = arith.constant 0 : index
    %c0_8 = arith.constant 0 : index
    %c0_9 = arith.constant 0 : index
    %20 = vector.load %arg2[%c0_7, %c0_8, %c0_9] : memref<1x1x16xf32, #tpu.memory_space<vmem>>, vector<1x1x16xf32>
    %21 = vector.broadcast %20 : vector<1x1x16xf32> to vector<4x16x16xf32>
    %22 = arith.mulf %19, %21 : vector<4x16x16xf32>
    %c0_10 = arith.constant 0 : index
    %c0_11 = arith.constant 0 : index
    %c0_12 = arith.constant 0 : index
    %23 = vector.load %arg3[%c0_10, %c0_11, %c0_12] : memref<1x1x16xf32, #tpu.memory_space<vmem>>, vector<1x1x16xf32>
    %24 = vector.broadcast %23 : vector<1x1x16xf32> to vector<4x16x16xf32>
    %25 = arith.addf %22, %24 : vector<4x16x16xf32>
    %c0_13 = arith.constant 0 : index
    %c0_14 = arith.constant 0 : index
    %c0_15 = arith.constant 0 : index
    %26 = vector.load %arg4[%c0_13, %c0_14, %c0_15] : memref<4x8x16xf32, #tpu.memory_space<vmem>>, vector<4x8x16xf32>
    "tpu.trace_start"() <{level = 10 : i32, message = "clh,chw->clw"}> : () -> ()
    %cst_16 = arith.constant dense<0.000000e+00> : vector<4x8x16xf32>
    %27 = tpu.matmul %26, %25, %cst_16 {dimension_numbers = #tpu.dot_dimension_numbers<[2], [1], [1], [2], [0, 0, 0, 1, 1, 2], [0], [0]>, precision = #tpu.contract_precision<fp32>} : vector<4x8x16xf32>, vector<4x16x16xf32>, vector<4x8x16xf32> -> vector<4x8x16xf32>
    "tpu.trace_stop"() : () -> ()
    %c0_17 = arith.constant 0 : index
    %c0_18 = arith.constant 0 : index
    %c0_19 = arith.constant 0 : index
    %28 = vector.load %arg5[%c0_17, %c0_18, %c0_19] : memref<4x16x8xf32, #tpu.memory_space<vmem>>, vector<4x16x8xf32>
    "tpu.trace_start"() <{level = 10 : i32, message = "chw,cwl->chl"}> : () -> ()
    %cst_20 = arith.constant dense<0.000000e+00> : vector<4x16x8xf32>
    %29 = tpu.matmul %25, %28, %cst_20 {dimension_numbers = #tpu.dot_dimension_numbers<[2], [1], [1], [2], [0, 0, 0, 1, 1, 2], [0], [0]>, precision = #tpu.contract_precision<fp32>} : vector<4x16x16xf32>, vector<4x16x8xf32>, vector<4x16x8xf32> -> vector<4x16x8xf32>
    "tpu.trace_stop"() : () -> ()
    %c0_21 = arith.constant 0 : index
    %c0_22 = arith.constant 0 : index
    %c0_23 = arith.constant 0 : index
    %c0_24 = arith.constant 0 : index
    %30 = vector.load %arg6[%c0_21, %c0_22, %c0_23, %c0_24] : memref<1x4x8x16xf32, #tpu.memory_space<vmem>>, vector<1x4x8x16xf32>
    %31 = vector.shape_cast %30 : vector<1x4x8x16xf32> to vector<4x8x16xf32>
    %32 = vector.shape_cast %27 : vector<4x8x16xf32> to vector<1x4x8x16xf32>
    tpu.vector_store %arg6[%c0_21, %c0_22, %c0_23, %c0_24], %32 {strides = array<i32>} : memref<1x4x8x16xf32, #tpu.memory_space<vmem>>, vector<1x4x8x16xf32>,
    %c0_25 = arith.constant 0 : index
    %c0_26 = arith.constant 0 : index
    %c0_27 = arith.constant 0 : index
    %c0_28 = arith.constant 0 : index
    %33 = vector.load %arg7[%c0_25, %c0_26, %c0_27, %c0_28] : memref<1x4x16x8xf32, #tpu.memory_space<vmem>>, vector<1x4x16x8xf32>
    %34 = vector.shape_cast %33 : vector<1x4x16x8xf32> to vector<4x16x8xf32>
    %35 = vector.shape_cast %29 : vector<4x16x8xf32> to vector<1x4x16x8xf32>
    tpu.vector_store %arg7[%c0_25, %c0_26, %c0_27, %c0_28], %35 {strides = array<i32>} : memref<1x4x16x8xf32, #tpu.memory_space<vmem>>, vector<1x4x16x8xf32>,
    return
  }
  func.func @transform_0(%arg0: i32) -> (i32, i32, i32, i32) {
    %c0_i32 = arith.constant 0 : i32
    %c0_i32_0 = arith.constant 0 : i32
    %c0_i32_1 = arith.constant 0 : i32
    %c0_i32_2 = arith.constant 0 : i32
    return %arg0, %c0_i32, %c0_i32_0, %c0_i32_1 : i32, i32, i32, i32
  }
  func.func @transform_1(%arg0: i32) -> (i32, i32, i32) {
    %c0_i32 = arith.constant 0 : i32
    %c0_i32_0 = arith.constant 0 : i32
    %c0_i32_1 = arith.constant 0 : i32
    %c0_i32_2 = arith.constant 0 : i32
    return %c0_i32, %c0_i32_0, %c0_i32_1 : i32, i32, i32
  }
  func.func @transform_2(%arg0: i32) -> (i32, i32, i32) {
    %c0_i32 = arith.constant 0 : i32
    %c0_i32_0 = arith.constant 0 : i32
    %c0_i32_1 = arith.constant 0 : i32
    %c0_i32_2 = arith.constant 0 : i32
    return %c0_i32, %c0_i32_0, %c0_i32_1 : i32, i32, i32
  }
  func.func @transform_3(%arg0: i32) -> (i32, i32, i32) {
    %c0_i32 = arith.constant 0 : i32
    %c0_i32_0 = arith.constant 0 : i32
    %c0_i32_1 = arith.constant 0 : i32
    %c0_i32_2 = arith.constant 0 : i32
    return %c0_i32, %c0_i32_0, %c0_i32_1 : i32, i32, i32
  }
  func.func @transform_4(%arg0: i32) -> (i32, i32, i32) {
    %c0_i32 = arith.constant 0 : i32
    %c0_i32_0 = arith.constant 0 : i32
    %c0_i32_1 = arith.constant 0 : i32
    %c0_i32_2 = arith.constant 0 : i32
    return %c0_i32, %c0_i32_0, %c0_i32_1 : i32, i32, i32
  }
  func.func @transform_5(%arg0: i32) -> (i32, i32, i32, i32) {
    %c0_i32 = arith.constant 0 : i32
    %c0_i32_0 = arith.constant 0 : i32
    %c0_i32_1 = arith.constant 0 : i32
    %c0_i32_2 = arith.constant 0 : i32
    return %arg0, %c0_i32, %c0_i32_0, %c0_i32_1 : i32, i32, i32, i32
  }
  func.func @transform_6(%arg0: i32) -> (i32, i32, i32, i32) {
    %c0_i32 = arith.constant 0 : i32
    %c0_i32_0 = arith.constant 0 : i32
    %c0_i32_1 = arith.constant 0 : i32
    %c0_i32_2 = arith.constant 0 : i32
    return %arg0, %c0_i32, %c0_i32_0, %c0_i32_1 : i32, i32, i32, i32
  }
}

module attributes {stable_mosaic.version = 11 : i64} {
  func.func @_msa_kernel(%arg0: i32, %arg1: memref<1x4x128xf32, #tpu.memory_space<vmem>>, %arg2: memref<1x4x128xf32, #tpu.memory_space<vmem>>, %arg3: memref<16x128xf32, #tpu.memory_space<vmem>>, %arg4: memref<16x128xf32, #tpu.memory_space<vmem>>, %arg5: memref<16x128xf32, #tpu.memory_space<vmem>>, %arg6: memref<128x16xf32, #tpu.memory_space<vmem>>, %arg7: memref<1x128xf32, #tpu.memory_space<vmem>>, %arg8: memref<1x4x128xf32, #tpu.memory_space<vmem>>, %arg9: memref<4x16xf32, #tpu.memory_space<vmem>>) attributes {dimension_semantics = [#tpu.dimension_semantics<parallel>], iteration_bounds = array<i64: 2>, scalar_prefetch = 0 : i64, scratch_operands = 1 : i64, tpu.core_type = #tpu.core_type<tc>, window_params = [{transform_indices = @transform_0, window_bounds = array<i64: 1, 4, 128>}, {transform_indices = @transform_1, window_bounds = array<i64: 1, 4, 128>}, {pipeline_mode = #tpu.pipeline_mode<synchronous>, transform_indices = @transform_2, window_bounds = array<i64: 16, 128>}, {pipeline_mode = #tpu.pipeline_mode<synchronous>, transform_indices = @transform_3, window_bounds = array<i64: 16, 128>}, {pipeline_mode = #tpu.pipeline_mode<synchronous>, transform_indices = @transform_4, window_bounds = array<i64: 16, 128>}, {pipeline_mode = #tpu.pipeline_mode<synchronous>, transform_indices = @transform_5, window_bounds = array<i64: 128, 16>}, {pipeline_mode = #tpu.pipeline_mode<synchronous>, transform_indices = @transform_6, window_bounds = array<i64: 1, 128>}, {transform_indices = @transform_7, window_bounds = array<i64: 1, 4, 128>}]} {
    %c0 = arith.constant 0 : index
    %c0_0 = arith.constant 0 : index
    %c0_1 = arith.constant 0 : index
    %0 = vector.load %arg1[%c0, %c0_0, %c0_1] : memref<1x4x128xf32, #tpu.memory_space<vmem>>, vector<1x4x128xf32>
    %1 = vector.shape_cast %0 : vector<1x4x128xf32> to vector<4x128xf32>
    %c0_2 = arith.constant 0 : index
    %c0_3 = arith.constant 0 : index
    %c0_4 = arith.constant 0 : index
    %2 = vector.load %arg2[%c0_2, %c0_3, %c0_4] : memref<1x4x128xf32, #tpu.memory_space<vmem>>, vector<1x4x128xf32>
    %3 = vector.shape_cast %2 : vector<1x4x128xf32> to vector<4x128xf32>
    %c0_5 = arith.constant 0 : index
    %c0_6 = arith.constant 0 : index
    %4 = vector.load %arg3[%c0_5, %c0_6] : memref<16x128xf32, #tpu.memory_space<vmem>>, vector<16x128xf32>
    %cst = arith.constant dense<0.000000e+00> : vector<16x4xf32>
    %5 = tpu.matmul %4, %1, %cst {dimension_numbers = #tpu.dot_dimension_numbers<[1], [1], [0], [0], [0, 0, 1, 0], [], []>, precision = #tpu.contract_precision<fp32>} : vector<16x128xf32>, vector<4x128xf32>, vector<16x4xf32> -> vector<16x4xf32>
    %c0_7 = arith.constant 0 : index
    %c0_8 = arith.constant 0 : index
    %6 = vector.load %arg4[%c0_7, %c0_8] : memref<16x128xf32, #tpu.memory_space<vmem>>, vector<16x128xf32>
    %cst_9 = arith.constant dense<0.000000e+00> : vector<16x4xf32>
    %7 = tpu.matmul %6, %3, %cst_9 {dimension_numbers = #tpu.dot_dimension_numbers<[1], [1], [0], [0], [0, 0, 1, 0], [], []>, precision = #tpu.contract_precision<fp32>} : vector<16x128xf32>, vector<4x128xf32>, vector<16x4xf32> -> vector<16x4xf32>
    %c0_10 = arith.constant 0 : index
    %c0_11 = arith.constant 0 : index
    %8 = vector.load %arg5[%c0_10, %c0_11] : memref<16x128xf32, #tpu.memory_space<vmem>>, vector<16x128xf32>
    %cst_12 = arith.constant dense<0.000000e+00> : vector<4x16xf32>
    %9 = tpu.matmul %3, %8, %cst_12 {dimension_numbers = #tpu.dot_dimension_numbers<[1], [1], [0], [0], [0, 0, 1, 0], [], []>, precision = #tpu.contract_precision<fp32>} : vector<4x128xf32>, vector<16x128xf32>, vector<4x16xf32> -> vector<4x16xf32>
    %10 = vector.extract_strided_slice %5 {offsets = [0, 0], sizes = [8, 4], strides = [1, 1]} : vector<16x4xf32> to vector<8x4xf32>
    %11 = vector.extract_strided_slice %7 {offsets = [0, 0], sizes = [8, 4], strides = [1, 1]} : vector<16x4xf32> to vector<8x4xf32>
    %12 = vector.extract_strided_slice %9 {offsets = [0, 0], sizes = [4, 8], strides = [1, 1]} : vector<4x16xf32> to vector<4x8xf32>
    %13 = arith.mulf %10, %10 : vector<8x4xf32>
    %cst_13 = arith.constant dense<0.000000e+00> : vector<8xf32>
    %14 = vector.multi_reduction <add>, %13, %cst_13 [1] : vector<8x4xf32> to vector<8xf32>
    %15 = vector.shape_cast %14 : vector<8xf32> to vector<8x1xf32>
    %cst_14 = arith.constant 1.000000e-24 : f32
    %16 = vector.broadcast %cst_14 : f32 to vector<8x1xf32>
    %17 = arith.maximumf %15, %16 : vector<8x1xf32>
    %18 = math.rsqrt %17 : vector<8x1xf32>
    %19 = vector.broadcast %18 : vector<8x1xf32> to vector<8x4xf32>
    %20 = arith.mulf %10, %19 : vector<8x4xf32>
    %21 = arith.mulf %11, %11 : vector<8x4xf32>
    %cst_15 = arith.constant dense<0.000000e+00> : vector<8xf32>
    %22 = vector.multi_reduction <add>, %21, %cst_15 [1] : vector<8x4xf32> to vector<8xf32>
    %23 = vector.shape_cast %22 : vector<8xf32> to vector<8x1xf32>
    %cst_16 = arith.constant 1.000000e-24 : f32
    %24 = vector.broadcast %cst_16 : f32 to vector<8x1xf32>
    %25 = arith.maximumf %23, %24 : vector<8x1xf32>
    %26 = math.rsqrt %25 : vector<8x1xf32>
    %27 = vector.broadcast %26 : vector<8x1xf32> to vector<8x4xf32>
    %28 = arith.mulf %11, %27 : vector<8x4xf32>
    %cst_17 = arith.constant dense<0.000000e+00> : vector<8x8xf32>
    %29 = tpu.matmul %28, %20, %cst_17 {dimension_numbers = #tpu.dot_dimension_numbers<[1], [1], [0], [0], [0, 0, 1, 0], [], []>, precision = #tpu.contract_precision<fp32>} : vector<8x4xf32>, vector<8x4xf32>, vector<8x8xf32> -> vector<8x8xf32>
    %cst_18 = arith.constant dense<0xFF800000> : vector<8xf32>
    %30 = vector.multi_reduction <maximumf>, %29, %cst_18 [1] : vector<8x8xf32> to vector<8xf32>
    %31 = vector.shape_cast %30 : vector<8xf32> to vector<8x1xf32>
    %32 = vector.broadcast %31 : vector<8x1xf32> to vector<8x8xf32>
    %33 = arith.subf %29, %32 : vector<8x8xf32>
    %34 = math.exp %33 : vector<8x8xf32>
    %cst_19 = arith.constant dense<0.000000e+00> : vector<8xf32>
    %35 = vector.multi_reduction <add>, %34, %cst_19 [1] : vector<8x8xf32> to vector<8xf32>
    %36 = vector.shape_cast %35 : vector<8xf32> to vector<8x1xf32>
    %37 = vector.broadcast %36 : vector<8x1xf32> to vector<8x8xf32>
    %38 = arith.divf %34, %37 : vector<8x8xf32>
    %cst_20 = arith.constant dense<0.000000e+00> : vector<4x8xf32>
    %39 = tpu.matmul %12, %38, %cst_20 {dimension_numbers = #tpu.dot_dimension_numbers<[1], [1], [0], [0], [0, 0, 1, 0], [], []>, precision = #tpu.contract_precision<fp32>} : vector<4x8xf32>, vector<8x8xf32>, vector<4x8xf32> -> vector<4x8xf32>
    %c0_21 = arith.constant 0 : index
    %c0_22 = arith.constant 0 : index
    %40 = vector.load %arg9[%c0_21, %c0_22] : memref<4x16xf32, #tpu.memory_space<vmem>>, vector<4x8xf32>
    tpu.vector_store %arg9[%c0_21, %c0_22], %39 {strides = array<i32>} : memref<4x16xf32, #tpu.memory_space<vmem>>, vector<4x8xf32>,
    %41 = vector.extract_strided_slice %5 {offsets = [8, 0], sizes = [8, 4], strides = [1, 1]} : vector<16x4xf32> to vector<8x4xf32>
    %42 = vector.extract_strided_slice %7 {offsets = [8, 0], sizes = [8, 4], strides = [1, 1]} : vector<16x4xf32> to vector<8x4xf32>
    %43 = vector.extract_strided_slice %9 {offsets = [0, 8], sizes = [4, 8], strides = [1, 1]} : vector<4x16xf32> to vector<4x8xf32>
    %44 = arith.mulf %41, %41 : vector<8x4xf32>
    %cst_23 = arith.constant dense<0.000000e+00> : vector<8xf32>
    %45 = vector.multi_reduction <add>, %44, %cst_23 [1] : vector<8x4xf32> to vector<8xf32>
    %46 = vector.shape_cast %45 : vector<8xf32> to vector<8x1xf32>
    %cst_24 = arith.constant 1.000000e-24 : f32
    %47 = vector.broadcast %cst_24 : f32 to vector<8x1xf32>
    %48 = arith.maximumf %46, %47 : vector<8x1xf32>
    %49 = math.rsqrt %48 : vector<8x1xf32>
    %50 = vector.broadcast %49 : vector<8x1xf32> to vector<8x4xf32>
    %51 = arith.mulf %41, %50 : vector<8x4xf32>
    %52 = arith.mulf %42, %42 : vector<8x4xf32>
    %cst_25 = arith.constant dense<0.000000e+00> : vector<8xf32>
    %53 = vector.multi_reduction <add>, %52, %cst_25 [1] : vector<8x4xf32> to vector<8xf32>
    %54 = vector.shape_cast %53 : vector<8xf32> to vector<8x1xf32>
    %cst_26 = arith.constant 1.000000e-24 : f32
    %55 = vector.broadcast %cst_26 : f32 to vector<8x1xf32>
    %56 = arith.maximumf %54, %55 : vector<8x1xf32>
    %57 = math.rsqrt %56 : vector<8x1xf32>
    %58 = vector.broadcast %57 : vector<8x1xf32> to vector<8x4xf32>
    %59 = arith.mulf %42, %58 : vector<8x4xf32>
    %cst_27 = arith.constant dense<0.000000e+00> : vector<8x8xf32>
    %60 = tpu.matmul %59, %51, %cst_27 {dimension_numbers = #tpu.dot_dimension_numbers<[1], [1], [0], [0], [0, 0, 1, 0], [], []>, precision = #tpu.contract_precision<fp32>} : vector<8x4xf32>, vector<8x4xf32>, vector<8x8xf32> -> vector<8x8xf32>
    %cst_28 = arith.constant dense<0xFF800000> : vector<8xf32>
    %61 = vector.multi_reduction <maximumf>, %60, %cst_28 [1] : vector<8x8xf32> to vector<8xf32>
    %62 = vector.shape_cast %61 : vector<8xf32> to vector<8x1xf32>
    %63 = vector.broadcast %62 : vector<8x1xf32> to vector<8x8xf32>
    %64 = arith.subf %60, %63 : vector<8x8xf32>
    %65 = math.exp %64 : vector<8x8xf32>
    %cst_29 = arith.constant dense<0.000000e+00> : vector<8xf32>
    %66 = vector.multi_reduction <add>, %65, %cst_29 [1] : vector<8x8xf32> to vector<8xf32>
    %67 = vector.shape_cast %66 : vector<8xf32> to vector<8x1xf32>
    %68 = vector.broadcast %67 : vector<8x1xf32> to vector<8x8xf32>
    %69 = arith.divf %65, %68 : vector<8x8xf32>
    %cst_30 = arith.constant dense<0.000000e+00> : vector<4x8xf32>
    %70 = tpu.matmul %43, %69, %cst_30 {dimension_numbers = #tpu.dot_dimension_numbers<[1], [1], [0], [0], [0, 0, 1, 0], [], []>, precision = #tpu.contract_precision<fp32>} : vector<4x8xf32>, vector<8x8xf32>, vector<4x8xf32> -> vector<4x8xf32>
    %c0_31 = arith.constant 0 : index
    %c8 = arith.constant 8 : index
    %71 = vector.load %arg9[%c0_31, %c8] : memref<4x16xf32, #tpu.memory_space<vmem>>, vector<4x8xf32>
    tpu.vector_store %arg9[%c0_31, %c8], %70 {strides = array<i32>} : memref<4x16xf32, #tpu.memory_space<vmem>>, vector<4x8xf32>,
    %c0_32 = arith.constant 0 : index
    %c0_33 = arith.constant 0 : index
    %72 = vector.load %arg9[%c0_32, %c0_33] : memref<4x16xf32, #tpu.memory_space<vmem>>, vector<4x16xf32>
    %c0_34 = arith.constant 0 : index
    %c0_35 = arith.constant 0 : index
    %73 = vector.load %arg6[%c0_34, %c0_35] : memref<128x16xf32, #tpu.memory_space<vmem>>, vector<128x16xf32>
    %cst_36 = arith.constant dense<0.000000e+00> : vector<4x128xf32>
    %74 = tpu.matmul %72, %73, %cst_36 {dimension_numbers = #tpu.dot_dimension_numbers<[1], [1], [0], [0], [0, 0, 1, 0], [], []>, precision = #tpu.contract_precision<fp32>} : vector<4x16xf32>, vector<128x16xf32>, vector<4x128xf32> -> vector<4x128xf32>
    %c0_37 = arith.constant 0 : index
    %c0_38 = arith.constant 0 : index
    %75 = vector.load %arg7[%c0_37, %c0_38] : memref<1x128xf32, #tpu.memory_space<vmem>>, vector<1x128xf32>
    %76 = vector.broadcast %75 : vector<1x128xf32> to vector<4x128xf32>
    %77 = arith.addf %74, %76 : vector<4x128xf32>
    %cst_39 = arith.constant 5.000000e-01 : f32
    %78 = vector.broadcast %cst_39 : f32 to vector<4x128xf32>
    %79 = arith.mulf %78, %77 : vector<4x128xf32>
    %cst_40 = arith.constant 0.707106769 : f32
    %80 = vector.broadcast %cst_40 : f32 to vector<4x128xf32>
    %81 = arith.mulf %77, %80 : vector<4x128xf32>
    %cst_41 = arith.constant 0.000000e+00 : f32
    %82 = vector.broadcast %cst_41 : f32 to vector<4x128xf32>
    %83 = arith.cmpf oge, %81, %82 : vector<4x128xf32>
    %cst_42 = arith.constant 0.000000e+00 : f32
    %84 = vector.broadcast %cst_42 : f32 to vector<4x128xf32>
    %85 = arith.subf %84, %81 : vector<4x128xf32>
    %86 = arith.select %83, %81, %85 : vector<4x128xi1>, vector<4x128xf32>
    %cst_43 = arith.constant 0.327591091 : f32
    %87 = vector.broadcast %cst_43 : f32 to vector<4x128xf32>
    %88 = arith.mulf %87, %86 : vector<4x128xf32>
    %cst_44 = arith.constant 1.000000e+00 : f32
    %89 = vector.broadcast %cst_44 : f32 to vector<4x128xf32>
    %90 = arith.addf %89, %88 : vector<4x128xf32>
    %cst_45 = arith.constant 1.000000e+00 : f32
    %91 = vector.broadcast %cst_45 : f32 to vector<4x128xf32>
    %92 = arith.divf %91, %90 : vector<4x128xf32>
    %cst_46 = arith.constant 1.06140542 : f32
    %93 = vector.broadcast %cst_46 : f32 to vector<4x128xf32>
    %94 = arith.mulf %93, %92 : vector<4x128xf32>
    %cst_47 = arith.constant 1.45315206 : f32
    %95 = vector.broadcast %cst_47 : f32 to vector<4x128xf32>
    %96 = arith.subf %94, %95 : vector<4x128xf32>
    %97 = arith.mulf %96, %92 : vector<4x128xf32>
    %cst_48 = arith.constant 1.42141378 : f32
    %98 = vector.broadcast %cst_48 : f32 to vector<4x128xf32>
    %99 = arith.addf %97, %98 : vector<4x128xf32>
    %100 = arith.mulf %99, %92 : vector<4x128xf32>
    %cst_49 = arith.constant 0.284496725 : f32
    %101 = vector.broadcast %cst_49 : f32 to vector<4x128xf32>
    %102 = arith.subf %100, %101 : vector<4x128xf32>
    %103 = arith.mulf %102, %92 : vector<4x128xf32>
    %cst_50 = arith.constant 0.254829586 : f32
    %104 = vector.broadcast %cst_50 : f32 to vector<4x128xf32>
    %105 = arith.addf %103, %104 : vector<4x128xf32>
    %106 = arith.mulf %105, %92 : vector<4x128xf32>
    %107 = arith.mulf %86, %86 : vector<4x128xf32>
    %cst_51 = arith.constant 0.000000e+00 : f32
    %108 = vector.broadcast %cst_51 : f32 to vector<4x128xf32>
    %109 = arith.subf %108, %107 : vector<4x128xf32>
    %110 = math.exp %109 : vector<4x128xf32>
    %111 = arith.mulf %106, %110 : vector<4x128xf32>
    %cst_52 = arith.constant 1.000000e+00 : f32
    %112 = vector.broadcast %cst_52 : f32 to vector<4x128xf32>
    %113 = arith.subf %112, %111 : vector<4x128xf32>
    %cst_53 = arith.constant 0.000000e+00 : f32
    %114 = vector.broadcast %cst_53 : f32 to vector<4x128xf32>
    %115 = arith.cmpf oge, %81, %114 : vector<4x128xf32>
    %cst_54 = arith.constant 0.000000e+00 : f32
    %116 = vector.broadcast %cst_54 : f32 to vector<4x128xf32>
    %117 = arith.subf %116, %113 : vector<4x128xf32>
    %118 = arith.select %115, %113, %117 : vector<4x128xi1>, vector<4x128xf32>
    %cst_55 = arith.constant 1.000000e+00 : f32
    %119 = vector.broadcast %cst_55 : f32 to vector<4x128xf32>
    %120 = arith.addf %119, %118 : vector<4x128xf32>
    %121 = arith.mulf %79, %120 : vector<4x128xf32>
    %c0_56 = arith.constant 0 : index
    %c0_57 = arith.constant 0 : index
    %c0_58 = arith.constant 0 : index
    %122 = vector.load %arg8[%c0_56, %c0_57, %c0_58] : memref<1x4x128xf32, #tpu.memory_space<vmem>>, vector<1x4x128xf32>
    %123 = vector.shape_cast %122 : vector<1x4x128xf32> to vector<4x128xf32>
    %124 = vector.shape_cast %121 : vector<4x128xf32> to vector<1x4x128xf32>
    tpu.vector_store %arg8[%c0_56, %c0_57, %c0_58], %124 {strides = array<i32>} : memref<1x4x128xf32, #tpu.memory_space<vmem>>, vector<1x4x128xf32>,
    return
  }
  func.func @transform_0(%arg0: i32) -> (i32, i32, i32) {
    %c0_i32 = arith.constant 0 : i32
    %c0_i32_0 = arith.constant 0 : i32
    %c0_i32_1 = arith.constant 0 : i32
    return %arg0, %c0_i32, %c0_i32_0 : i32, i32, i32
  }
  func.func @transform_1(%arg0: i32) -> (i32, i32, i32) {
    %c0_i32 = arith.constant 0 : i32
    %c0_i32_0 = arith.constant 0 : i32
    %c0_i32_1 = arith.constant 0 : i32
    return %arg0, %c0_i32, %c0_i32_0 : i32, i32, i32
  }
  func.func @transform_2(%arg0: i32) -> (i32, i32) {
    %c0_i32 = arith.constant 0 : i32
    %c0_i32_0 = arith.constant 0 : i32
    %c0_i32_1 = arith.constant 0 : i32
    return %c0_i32, %c0_i32_0 : i32, i32
  }
  func.func @transform_3(%arg0: i32) -> (i32, i32) {
    %c0_i32 = arith.constant 0 : i32
    %c0_i32_0 = arith.constant 0 : i32
    %c0_i32_1 = arith.constant 0 : i32
    return %c0_i32, %c0_i32_0 : i32, i32
  }
  func.func @transform_4(%arg0: i32) -> (i32, i32) {
    %c0_i32 = arith.constant 0 : i32
    %c0_i32_0 = arith.constant 0 : i32
    %c0_i32_1 = arith.constant 0 : i32
    return %c0_i32, %c0_i32_0 : i32, i32
  }
  func.func @transform_5(%arg0: i32) -> (i32, i32) {
    %c0_i32 = arith.constant 0 : i32
    %c0_i32_0 = arith.constant 0 : i32
    %c0_i32_1 = arith.constant 0 : i32
    return %c0_i32, %c0_i32_0 : i32, i32
  }
  func.func @transform_6(%arg0: i32) -> (i32, i32) {
    %c0_i32 = arith.constant 0 : i32
    %c0_i32_0 = arith.constant 0 : i32
    %c0_i32_1 = arith.constant 0 : i32
    return %c0_i32, %c0_i32_0 : i32, i32
  }
  func.func @transform_7(%arg0: i32) -> (i32, i32, i32) {
    %c0_i32 = arith.constant 0 : i32
    %c0_i32_0 = arith.constant 0 : i32
    %c0_i32_1 = arith.constant 0 : i32
    return %arg0, %c0_i32, %c0_i32_0 : i32, i32, i32
  }
}

module attributes {stable_mosaic.version = 11 : i64} {
  func.func @_combine_kernel(%arg0: i32, %arg1: memref<1x4x16x8xf32, #tpu.memory_space<vmem>>, %arg2: memref<1x4x8x16xf32, #tpu.memory_space<vmem>>, %arg3: memref<1x4x16x16xf32, #tpu.memory_space<vmem>>, %arg4: memref<1x4x16x16xf32, #tpu.memory_space<vmem>>, %arg5: memref<1x1x16xf32, #tpu.memory_space<vmem>>, %arg6: memref<1x1x16xf32, #tpu.memory_space<vmem>>, %arg7: memref<1x4x16x16xf32, #tpu.memory_space<vmem>>, %arg8: memref<1x4x16x16xf32, #tpu.memory_space<vmem>>) attributes {dimension_semantics = [#tpu.dimension_semantics<parallel>], iteration_bounds = array<i64: 2>, scalar_prefetch = 0 : i64, scratch_operands = 0 : i64, tpu.core_type = #tpu.core_type<tc>, window_params = [{transform_indices = @transform_0, window_bounds = array<i64: 1, 4, 16, 8>}, {transform_indices = @transform_1, window_bounds = array<i64: 1, 4, 8, 16>}, {transform_indices = @transform_2, window_bounds = array<i64: 1, 4, 16, 16>}, {transform_indices = @transform_3, window_bounds = array<i64: 1, 4, 16, 16>}, {pipeline_mode = #tpu.pipeline_mode<synchronous>, transform_indices = @transform_4, window_bounds = array<i64: 1, 1, 16>}, {pipeline_mode = #tpu.pipeline_mode<synchronous>, transform_indices = @transform_5, window_bounds = array<i64: 1, 1, 16>}, {transform_indices = @transform_6, window_bounds = array<i64: 1, 4, 16, 16>}, {transform_indices = @transform_7, window_bounds = array<i64: 1, 4, 16, 16>}]} {
    %c0 = arith.constant 0 : index
    %c0_0 = arith.constant 0 : index
    %c0_1 = arith.constant 0 : index
    %c0_2 = arith.constant 0 : index
    %0 = vector.load %arg1[%c0, %c0_0, %c0_1, %c0_2] : memref<1x4x16x8xf32, #tpu.memory_space<vmem>>, vector<1x4x16x8xf32>
    %1 = vector.shape_cast %0 : vector<1x4x16x8xf32> to vector<4x16x8xf32>
    %c0_3 = arith.constant 0 : index
    %c0_4 = arith.constant 0 : index
    %c0_5 = arith.constant 0 : index
    %c0_6 = arith.constant 0 : index
    %2 = vector.load %arg2[%c0_3, %c0_4, %c0_5, %c0_6] : memref<1x4x8x16xf32, #tpu.memory_space<vmem>>, vector<1x4x8x16xf32>
    %3 = vector.shape_cast %2 : vector<1x4x8x16xf32> to vector<4x8x16xf32>
    "tpu.trace_start"() <{level = 10 : i32, message = "chl,clw->chw"}> : () -> ()
    %cst = arith.constant dense<0.000000e+00> : vector<4x16x16xf32>
    %4 = tpu.matmul %1, %3, %cst {dimension_numbers = #tpu.dot_dimension_numbers<[2], [1], [1], [2], [0, 0, 0, 1, 1, 2], [0], [0]>, precision = #tpu.contract_precision<fp32>} : vector<4x16x8xf32>, vector<4x8x16xf32>, vector<4x16x16xf32> -> vector<4x16x16xf32>
    "tpu.trace_stop"() : () -> ()
    %c0_7 = arith.constant 0 : index
    %c0_8 = arith.constant 0 : index
    %c0_9 = arith.constant 0 : index
    %c0_10 = arith.constant 0 : index
    %5 = vector.load %arg3[%c0_7, %c0_8, %c0_9, %c0_10] : memref<1x4x16x16xf32, #tpu.memory_space<vmem>>, vector<1x4x16x16xf32>
    %6 = vector.shape_cast %5 : vector<1x4x16x16xf32> to vector<4x16x16xf32>
    %7 = arith.addf %4, %6 : vector<4x16x16xf32>
    %c0_11 = arith.constant 0 : index
    %c0_12 = arith.constant 0 : index
    %c0_13 = arith.constant 0 : index
    %c0_14 = arith.constant 0 : index
    %8 = vector.load %arg4[%c0_11, %c0_12, %c0_13, %c0_14] : memref<1x4x16x16xf32, #tpu.memory_space<vmem>>, vector<1x4x16x16xf32>
    %9 = vector.shape_cast %8 : vector<1x4x16x16xf32> to vector<4x16x16xf32>
    %10 = arith.addf %7, %9 : vector<4x16x16xf32>
    %cst_15 = arith.constant dense<0.000000e+00> : vector<4x16xf32>
    %11 = vector.multi_reduction <add>, %10, %cst_15 [2] : vector<4x16x16xf32> to vector<4x16xf32>
    %12 = vector.shape_cast %11 : vector<4x16xf32> to vector<4x16x1xf32>
    %cst_16 = arith.constant 1.600000e+01 : f32
    %13 = vector.broadcast %cst_16 : f32 to vector<4x16x1xf32>
    %14 = arith.divf %12, %13 : vector<4x16x1xf32>
    %15 = vector.broadcast %14 : vector<4x16x1xf32> to vector<4x16x16xf32>
    %16 = arith.subf %10, %15 : vector<4x16x16xf32>
    %17 = arith.mulf %16, %16 : vector<4x16x16xf32>
    %cst_17 = arith.constant dense<0.000000e+00> : vector<4x16xf32>
    %18 = vector.multi_reduction <add>, %17, %cst_17 [2] : vector<4x16x16xf32> to vector<4x16xf32>
    %19 = vector.shape_cast %18 : vector<4x16xf32> to vector<4x16x1xf32>
    %cst_18 = arith.constant 1.600000e+01 : f32
    %20 = vector.broadcast %cst_18 : f32 to vector<4x16x1xf32>
    %21 = arith.divf %19, %20 : vector<4x16x1xf32>
    %22 = vector.broadcast %14 : vector<4x16x1xf32> to vector<4x16x16xf32>
    %23 = arith.subf %10, %22 : vector<4x16x16xf32>
    %cst_19 = arith.constant 1.600000e+01 : f32
    %24 = vector.broadcast %cst_19 : f32 to vector<4x16x1xf32>
    %25 = arith.addf %21, %24 : vector<4x16x1xf32>
    %26 = math.rsqrt %25 : vector<4x16x1xf32>
    %27 = vector.broadcast %26 : vector<4x16x1xf32> to vector<4x16x16xf32>
    %28 = arith.mulf %23, %27 : vector<4x16x16xf32>
    %c0_20 = arith.constant 0 : index
    %c0_21 = arith.constant 0 : index
    %c0_22 = arith.constant 0 : index
    %29 = vector.load %arg5[%c0_20, %c0_21, %c0_22] : memref<1x1x16xf32, #tpu.memory_space<vmem>>, vector<1x1x16xf32>
    %30 = vector.broadcast %29 : vector<1x1x16xf32> to vector<4x16x16xf32>
    %31 = arith.mulf %28, %30 : vector<4x16x16xf32>
    %c0_23 = arith.constant 0 : index
    %c0_24 = arith.constant 0 : index
    %c0_25 = arith.constant 0 : index
    %32 = vector.load %arg6[%c0_23, %c0_24, %c0_25] : memref<1x1x16xf32, #tpu.memory_space<vmem>>, vector<1x1x16xf32>
    %33 = vector.broadcast %32 : vector<1x1x16xf32> to vector<4x16x16xf32>
    %34 = arith.addf %31, %33 : vector<4x16x16xf32>
    %c0_26 = arith.constant 0 : index
    %c0_27 = arith.constant 0 : index
    %c0_28 = arith.constant 0 : index
    %c0_29 = arith.constant 0 : index
    %35 = vector.load %arg7[%c0_26, %c0_27, %c0_28, %c0_29] : memref<1x4x16x16xf32, #tpu.memory_space<vmem>>, vector<1x4x16x16xf32>
    %36 = vector.shape_cast %35 : vector<1x4x16x16xf32> to vector<4x16x16xf32>
    %37 = vector.shape_cast %10 : vector<4x16x16xf32> to vector<1x4x16x16xf32>
    tpu.vector_store %arg7[%c0_26, %c0_27, %c0_28, %c0_29], %37 {strides = array<i32>} : memref<1x4x16x16xf32, #tpu.memory_space<vmem>>, vector<1x4x16x16xf32>,
    %c0_30 = arith.constant 0 : index
    %c0_31 = arith.constant 0 : index
    %c0_32 = arith.constant 0 : index
    %c0_33 = arith.constant 0 : index
    %38 = vector.load %arg8[%c0_30, %c0_31, %c0_32, %c0_33] : memref<1x4x16x16xf32, #tpu.memory_space<vmem>>, vector<1x4x16x16xf32>
    %39 = vector.shape_cast %38 : vector<1x4x16x16xf32> to vector<4x16x16xf32>
    %40 = vector.shape_cast %34 : vector<4x16x16xf32> to vector<1x4x16x16xf32>
    tpu.vector_store %arg8[%c0_30, %c0_31, %c0_32, %c0_33], %40 {strides = array<i32>} : memref<1x4x16x16xf32, #tpu.memory_space<vmem>>, vector<1x4x16x16xf32>,
    return
  }
  func.func @transform_0(%arg0: i32) -> (i32, i32, i32, i32) {
    %c0_i32 = arith.constant 0 : i32
    %c0_i32_0 = arith.constant 0 : i32
    %c0_i32_1 = arith.constant 0 : i32
    %c0_i32_2 = arith.constant 0 : i32
    return %arg0, %c0_i32, %c0_i32_0, %c0_i32_1 : i32, i32, i32, i32
  }
  func.func @transform_1(%arg0: i32) -> (i32, i32, i32, i32) {
    %c0_i32 = arith.constant 0 : i32
    %c0_i32_0 = arith.constant 0 : i32
    %c0_i32_1 = arith.constant 0 : i32
    %c0_i32_2 = arith.constant 0 : i32
    return %arg0, %c0_i32, %c0_i32_0, %c0_i32_1 : i32, i32, i32, i32
  }
  func.func @transform_2(%arg0: i32) -> (i32, i32, i32, i32) {
    %c0_i32 = arith.constant 0 : i32
    %c0_i32_0 = arith.constant 0 : i32
    %c0_i32_1 = arith.constant 0 : i32
    %c0_i32_2 = arith.constant 0 : i32
    return %arg0, %c0_i32, %c0_i32_0, %c0_i32_1 : i32, i32, i32, i32
  }
  func.func @transform_3(%arg0: i32) -> (i32, i32, i32, i32) {
    %c0_i32 = arith.constant 0 : i32
    %c0_i32_0 = arith.constant 0 : i32
    %c0_i32_1 = arith.constant 0 : i32
    %c0_i32_2 = arith.constant 0 : i32
    return %arg0, %c0_i32, %c0_i32_0, %c0_i32_1 : i32, i32, i32, i32
  }
  func.func @transform_4(%arg0: i32) -> (i32, i32, i32) {
    %c0_i32 = arith.constant 0 : i32
    %c0_i32_0 = arith.constant 0 : i32
    %c0_i32_1 = arith.constant 0 : i32
    %c0_i32_2 = arith.constant 0 : i32
    return %c0_i32, %c0_i32_0, %c0_i32_1 : i32, i32, i32
  }
  func.func @transform_5(%arg0: i32) -> (i32, i32, i32) {
    %c0_i32 = arith.constant 0 : i32
    %c0_i32_0 = arith.constant 0 : i32
    %c0_i32_1 = arith.constant 0 : i32
    %c0_i32_2 = arith.constant 0 : i32
    return %c0_i32, %c0_i32_0, %c0_i32_1 : i32, i32, i32
  }
  func.func @transform_6(%arg0: i32) -> (i32, i32, i32, i32) {
    %c0_i32 = arith.constant 0 : i32
    %c0_i32_0 = arith.constant 0 : i32
    %c0_i32_1 = arith.constant 0 : i32
    %c0_i32_2 = arith.constant 0 : i32
    return %arg0, %c0_i32, %c0_i32_0, %c0_i32_1 : i32, i32, i32, i32
  }
  func.func @transform_7(%arg0: i32) -> (i32, i32, i32, i32) {
    %c0_i32 = arith.constant 0 : i32
    %c0_i32_0 = arith.constant 0 : i32
    %c0_i32_1 = arith.constant 0 : i32
    %c0_i32_2 = arith.constant 0 : i32
    return %arg0, %c0_i32, %c0_i32_0, %c0_i32_1 : i32, i32, i32, i32
  }
}

module attributes {stable_mosaic.version = 11 : i64} {
  func.func @_ffn_kernel(%arg0: i32, %arg1: memref<1x4x256xf32, #tpu.memory_space<vmem>>, %arg2: memref<1x4x256xf32, #tpu.memory_space<vmem>>, %arg3: memref<9x1x256xf32, #tpu.memory_space<vmem>>, %arg4: memref<4x4xf32, #tpu.memory_space<vmem>>, %arg5: memref<9x4x1xf32, #tpu.memory_space<vmem>>, %arg6: memref<4x4xf32, #tpu.memory_space<vmem>>, %arg7: memref<1x4x256xf32, #tpu.memory_space<vmem>>, %arg8: memref<4x290xf32, #tpu.memory_space<vmem>>) attributes {dimension_semantics = [#tpu.dimension_semantics<parallel>], iteration_bounds = array<i64: 2>, scalar_prefetch = 0 : i64, scratch_operands = 1 : i64, tpu.core_type = #tpu.core_type<tc>, window_params = [{transform_indices = @transform_0, window_bounds = array<i64: 1, 4, 256>}, {transform_indices = @transform_1, window_bounds = array<i64: 1, 4, 256>}, {pipeline_mode = #tpu.pipeline_mode<synchronous>, transform_indices = @transform_2, window_bounds = array<i64: 9, 1, 256>}, {pipeline_mode = #tpu.pipeline_mode<synchronous>, transform_indices = @transform_3, window_bounds = array<i64: 4, 4>}, {pipeline_mode = #tpu.pipeline_mode<synchronous>, transform_indices = @transform_4, window_bounds = array<i64: 9, 4, 1>}, {pipeline_mode = #tpu.pipeline_mode<synchronous>, transform_indices = @transform_5, window_bounds = array<i64: 4, 4>}, {transform_indices = @transform_6, window_bounds = array<i64: 1, 4, 256>}]} {
    %c0 = arith.constant 0 : index
    %c0_0 = arith.constant 0 : index
    %c0_1 = arith.constant 0 : index
    %0 = vector.load %arg1[%c0, %c0_0, %c0_1] : memref<1x4x256xf32, #tpu.memory_space<vmem>>, vector<1x4x256xf32>
    %1 = vector.shape_cast %0 : vector<1x4x256xf32> to vector<4x256xf32>
    %c0_2 = arith.constant 0 : index
    %c0_3 = arith.constant 0 : index
    %2 = vector.load %arg4[%c0_2, %c0_3] : memref<4x4xf32, #tpu.memory_space<vmem>>, vector<4x4xf32>
    %cst = arith.constant dense<0.000000e+00> : vector<4x256xf32>
    %3 = tpu.matmul %2, %1, %cst {dimension_numbers = #tpu.dot_dimension_numbers<[1], [0], [0], [1], [0, 0, 1, 1], [], []>, precision = #tpu.contract_precision<fp32>} : vector<4x4xf32>, vector<4x256xf32>, vector<4x256xf32> -> vector<4x256xf32>
    %cst_4 = arith.constant 0.000000e+00 : f32
    %4 = vector.broadcast %cst_4 : f32 to vector<4x256xf32>
    %5 = arith.cmpf oge, %3, %4 : vector<4x256xf32>
    %cst_5 = arith.constant 1.000000e-01 : f32
    %6 = vector.broadcast %cst_5 : f32 to vector<4x256xf32>
    %7 = arith.mulf %6, %3 : vector<4x256xf32>
    %8 = arith.select %5, %3, %7 : vector<4x256xi1>, vector<4x256xf32>
    %cst_6 = arith.constant 0.000000e+00 : f32
    %9 = vector.broadcast %cst_6 : f32 to vector<4x290xf32>
    %c0_7 = arith.constant 0 : index
    %c0_8 = arith.constant 0 : index
    %10 = vector.load %arg8[%c0_7, %c0_8] : memref<4x290xf32, #tpu.memory_space<vmem>>, vector<4x290xf32>
    tpu.vector_store %arg8[%c0_7, %c0_8], %9 {strides = array<i32>} : memref<4x290xf32, #tpu.memory_space<vmem>>, vector<4x290xf32>,
    %c0_9 = arith.constant 0 : index
    %c17 = arith.constant 17 : index
    %11 = vector.load %arg8[%c0_9, %c17] : memref<4x290xf32, #tpu.memory_space<vmem>>, vector<4x256xf32>
    tpu.vector_store %arg8[%c0_9, %c17], %8 {strides = array<i32>} : memref<4x290xf32, #tpu.memory_space<vmem>>, vector<4x256xf32>,
    %c0_10 = arith.constant 0 : index
    %c0_11 = arith.constant 0 : index
    %12 = vector.load %arg8[%c0_10, %c0_11] : memref<4x290xf32, #tpu.memory_space<vmem>>, vector<4x290xf32>
    %c0_12 = arith.constant 0 : index
    %c0_13 = arith.constant 0 : index
    %c0_14 = arith.constant 0 : index
    %13 = vector.load %arg3[%c0_12, %c0_13, %c0_14] : memref<9x1x256xf32, #tpu.memory_space<vmem>>, vector<9x1x256xf32>
    %c0_15 = arith.constant 0 : index
    %c0_16 = arith.constant 0 : index
    %c0_17 = arith.constant 0 : index
    %14 = vector.load %arg5[%c0_15, %c0_16, %c0_17] : memref<9x4x1xf32, #tpu.memory_space<vmem>>, vector<9x4x1xf32>
    %cst_18 = arith.constant 0.000000e+00 : f32
    %15 = vector.broadcast %cst_18 : f32 to vector<4x256xf32>
    %16 = vector.extract_strided_slice %14 {offsets = [0, 0, 0], sizes = [1, 4, 1], strides = [1, 1, 1]} : vector<9x4x1xf32> to vector<1x4x1xf32>
    %17 = vector.shape_cast %16 : vector<1x4x1xf32> to vector<4x1xf32>
    %18 = vector.extract_strided_slice %12 {offsets = [0, 0], sizes = [4, 256], strides = [1, 1]} : vector<4x290xf32> to vector<4x256xf32>
    %19 = vector.extract_strided_slice %13 {offsets = [0, 0, 0], sizes = [1, 1, 256], strides = [1, 1, 1]} : vector<9x1x256xf32> to vector<1x1x256xf32>
    %20 = vector.shape_cast %19 : vector<1x1x256xf32> to vector<1x256xf32>
    %21 = vector.broadcast %20 : vector<1x256xf32> to vector<4x256xf32>
    %22 = arith.mulf %18, %21 : vector<4x256xf32>
    %23 = vector.broadcast %17 : vector<4x1xf32> to vector<4x256xf32>
    %24 = arith.mulf %23, %22 : vector<4x256xf32>
    %25 = arith.addf %15, %24 : vector<4x256xf32>
    %26 = vector.extract_strided_slice %14 {offsets = [1, 0, 0], sizes = [1, 4, 1], strides = [1, 1, 1]} : vector<9x4x1xf32> to vector<1x4x1xf32>
    %27 = vector.shape_cast %26 : vector<1x4x1xf32> to vector<4x1xf32>
    %28 = vector.extract_strided_slice %12 {offsets = [0, 1], sizes = [4, 256], strides = [1, 1]} : vector<4x290xf32> to vector<4x256xf32>
    %29 = vector.extract_strided_slice %13 {offsets = [1, 0, 0], sizes = [1, 1, 256], strides = [1, 1, 1]} : vector<9x1x256xf32> to vector<1x1x256xf32>
    %30 = vector.shape_cast %29 : vector<1x1x256xf32> to vector<1x256xf32>
    %31 = vector.broadcast %30 : vector<1x256xf32> to vector<4x256xf32>
    %32 = arith.mulf %28, %31 : vector<4x256xf32>
    %33 = vector.broadcast %27 : vector<4x1xf32> to vector<4x256xf32>
    %34 = arith.mulf %33, %32 : vector<4x256xf32>
    %35 = arith.addf %25, %34 : vector<4x256xf32>
    %36 = vector.extract_strided_slice %14 {offsets = [2, 0, 0], sizes = [1, 4, 1], strides = [1, 1, 1]} : vector<9x4x1xf32> to vector<1x4x1xf32>
    %37 = vector.shape_cast %36 : vector<1x4x1xf32> to vector<4x1xf32>
    %38 = vector.extract_strided_slice %12 {offsets = [0, 2], sizes = [4, 256], strides = [1, 1]} : vector<4x290xf32> to vector<4x256xf32>
    %39 = vector.extract_strided_slice %13 {offsets = [2, 0, 0], sizes = [1, 1, 256], strides = [1, 1, 1]} : vector<9x1x256xf32> to vector<1x1x256xf32>
    %40 = vector.shape_cast %39 : vector<1x1x256xf32> to vector<1x256xf32>
    %41 = vector.broadcast %40 : vector<1x256xf32> to vector<4x256xf32>
    %42 = arith.mulf %38, %41 : vector<4x256xf32>
    %43 = vector.broadcast %37 : vector<4x1xf32> to vector<4x256xf32>
    %44 = arith.mulf %43, %42 : vector<4x256xf32>
    %45 = arith.addf %35, %44 : vector<4x256xf32>
    %46 = vector.extract_strided_slice %14 {offsets = [3, 0, 0], sizes = [1, 4, 1], strides = [1, 1, 1]} : vector<9x4x1xf32> to vector<1x4x1xf32>
    %47 = vector.shape_cast %46 : vector<1x4x1xf32> to vector<4x1xf32>
    %48 = vector.extract_strided_slice %12 {offsets = [0, 16], sizes = [4, 256], strides = [1, 1]} : vector<4x290xf32> to vector<4x256xf32>
    %49 = vector.extract_strided_slice %13 {offsets = [3, 0, 0], sizes = [1, 1, 256], strides = [1, 1, 1]} : vector<9x1x256xf32> to vector<1x1x256xf32>
    %50 = vector.shape_cast %49 : vector<1x1x256xf32> to vector<1x256xf32>
    %51 = vector.broadcast %50 : vector<1x256xf32> to vector<4x256xf32>
    %52 = arith.mulf %48, %51 : vector<4x256xf32>
    %53 = vector.broadcast %47 : vector<4x1xf32> to vector<4x256xf32>
    %54 = arith.mulf %53, %52 : vector<4x256xf32>
    %55 = arith.addf %45, %54 : vector<4x256xf32>
    %56 = vector.extract_strided_slice %14 {offsets = [4, 0, 0], sizes = [1, 4, 1], strides = [1, 1, 1]} : vector<9x4x1xf32> to vector<1x4x1xf32>
    %57 = vector.shape_cast %56 : vector<1x4x1xf32> to vector<4x1xf32>
    %58 = vector.extract_strided_slice %12 {offsets = [0, 17], sizes = [4, 256], strides = [1, 1]} : vector<4x290xf32> to vector<4x256xf32>
    %59 = vector.extract_strided_slice %13 {offsets = [4, 0, 0], sizes = [1, 1, 256], strides = [1, 1, 1]} : vector<9x1x256xf32> to vector<1x1x256xf32>
    %60 = vector.shape_cast %59 : vector<1x1x256xf32> to vector<1x256xf32>
    %61 = vector.broadcast %60 : vector<1x256xf32> to vector<4x256xf32>
    %62 = arith.mulf %58, %61 : vector<4x256xf32>
    %63 = vector.broadcast %57 : vector<4x1xf32> to vector<4x256xf32>
    %64 = arith.mulf %63, %62 : vector<4x256xf32>
    %65 = arith.addf %55, %64 : vector<4x256xf32>
    %66 = vector.extract_strided_slice %14 {offsets = [5, 0, 0], sizes = [1, 4, 1], strides = [1, 1, 1]} : vector<9x4x1xf32> to vector<1x4x1xf32>
    %67 = vector.shape_cast %66 : vector<1x4x1xf32> to vector<4x1xf32>
    %68 = vector.extract_strided_slice %12 {offsets = [0, 18], sizes = [4, 256], strides = [1, 1]} : vector<4x290xf32> to vector<4x256xf32>
    %69 = vector.extract_strided_slice %13 {offsets = [5, 0, 0], sizes = [1, 1, 256], strides = [1, 1, 1]} : vector<9x1x256xf32> to vector<1x1x256xf32>
    %70 = vector.shape_cast %69 : vector<1x1x256xf32> to vector<1x256xf32>
    %71 = vector.broadcast %70 : vector<1x256xf32> to vector<4x256xf32>
    %72 = arith.mulf %68, %71 : vector<4x256xf32>
    %73 = vector.broadcast %67 : vector<4x1xf32> to vector<4x256xf32>
    %74 = arith.mulf %73, %72 : vector<4x256xf32>
    %75 = arith.addf %65, %74 : vector<4x256xf32>
    %76 = vector.extract_strided_slice %14 {offsets = [6, 0, 0], sizes = [1, 4, 1], strides = [1, 1, 1]} : vector<9x4x1xf32> to vector<1x4x1xf32>
    %77 = vector.shape_cast %76 : vector<1x4x1xf32> to vector<4x1xf32>
    %78 = vector.extract_strided_slice %12 {offsets = [0, 32], sizes = [4, 256], strides = [1, 1]} : vector<4x290xf32> to vector<4x256xf32>
    %79 = vector.extract_strided_slice %13 {offsets = [6, 0, 0], sizes = [1, 1, 256], strides = [1, 1, 1]} : vector<9x1x256xf32> to vector<1x1x256xf32>
    %80 = vector.shape_cast %79 : vector<1x1x256xf32> to vector<1x256xf32>
    %81 = vector.broadcast %80 : vector<1x256xf32> to vector<4x256xf32>
    %82 = arith.mulf %78, %81 : vector<4x256xf32>
    %83 = vector.broadcast %77 : vector<4x1xf32> to vector<4x256xf32>
    %84 = arith.mulf %83, %82 : vector<4x256xf32>
    %85 = arith.addf %75, %84 : vector<4x256xf32>
    %86 = vector.extract_strided_slice %14 {offsets = [7, 0, 0], sizes = [1, 4, 1], strides = [1, 1, 1]} : vector<9x4x1xf32> to vector<1x4x1xf32>
    %87 = vector.shape_cast %86 : vector<1x4x1xf32> to vector<4x1xf32>
    %88 = vector.extract_strided_slice %12 {offsets = [0, 33], sizes = [4, 256], strides = [1, 1]} : vector<4x290xf32> to vector<4x256xf32>
    %89 = vector.extract_strided_slice %13 {offsets = [7, 0, 0], sizes = [1, 1, 256], strides = [1, 1, 1]} : vector<9x1x256xf32> to vector<1x1x256xf32>
    %90 = vector.shape_cast %89 : vector<1x1x256xf32> to vector<1x256xf32>
    %91 = vector.broadcast %90 : vector<1x256xf32> to vector<4x256xf32>
    %92 = arith.mulf %88, %91 : vector<4x256xf32>
    %93 = vector.broadcast %87 : vector<4x1xf32> to vector<4x256xf32>
    %94 = arith.mulf %93, %92 : vector<4x256xf32>
    %95 = arith.addf %85, %94 : vector<4x256xf32>
    %96 = vector.extract_strided_slice %14 {offsets = [8, 0, 0], sizes = [1, 4, 1], strides = [1, 1, 1]} : vector<9x4x1xf32> to vector<1x4x1xf32>
    %97 = vector.shape_cast %96 : vector<1x4x1xf32> to vector<4x1xf32>
    %98 = vector.extract_strided_slice %12 {offsets = [0, 34], sizes = [4, 256], strides = [1, 1]} : vector<4x290xf32> to vector<4x256xf32>
    %99 = vector.extract_strided_slice %13 {offsets = [8, 0, 0], sizes = [1, 1, 256], strides = [1, 1, 1]} : vector<9x1x256xf32> to vector<1x1x256xf32>
    %100 = vector.shape_cast %99 : vector<1x1x256xf32> to vector<1x256xf32>
    %101 = vector.broadcast %100 : vector<1x256xf32> to vector<4x256xf32>
    %102 = arith.mulf %98, %101 : vector<4x256xf32>
    %103 = vector.broadcast %97 : vector<4x1xf32> to vector<4x256xf32>
    %104 = arith.mulf %103, %102 : vector<4x256xf32>
    %105 = arith.addf %95, %104 : vector<4x256xf32>
    %cst_19 = arith.constant 0.000000e+00 : f32
    %106 = vector.broadcast %cst_19 : f32 to vector<4x256xf32>
    %107 = arith.cmpf oge, %105, %106 : vector<4x256xf32>
    %cst_20 = arith.constant 1.000000e-01 : f32
    %108 = vector.broadcast %cst_20 : f32 to vector<4x256xf32>
    %109 = arith.mulf %108, %105 : vector<4x256xf32>
    %110 = arith.select %107, %105, %109 : vector<4x256xi1>, vector<4x256xf32>
    %c0_21 = arith.constant 0 : index
    %c0_22 = arith.constant 0 : index
    %111 = vector.load %arg6[%c0_21, %c0_22] : memref<4x4xf32, #tpu.memory_space<vmem>>, vector<4x4xf32>
    %cst_23 = arith.constant dense<0.000000e+00> : vector<4x256xf32>
    %112 = tpu.matmul %111, %110, %cst_23 {dimension_numbers = #tpu.dot_dimension_numbers<[1], [0], [0], [1], [0, 0, 1, 1], [], []>, precision = #tpu.contract_precision<fp32>} : vector<4x4xf32>, vector<4x256xf32>, vector<4x256xf32> -> vector<4x256xf32>
    %c0_24 = arith.constant 0 : index
    %c0_25 = arith.constant 0 : index
    %c0_26 = arith.constant 0 : index
    %113 = vector.load %arg2[%c0_24, %c0_25, %c0_26] : memref<1x4x256xf32, #tpu.memory_space<vmem>>, vector<1x4x256xf32>
    %114 = vector.shape_cast %113 : vector<1x4x256xf32> to vector<4x256xf32>
    %115 = arith.addf %112, %114 : vector<4x256xf32>
    %c0_27 = arith.constant 0 : index
    %c0_28 = arith.constant 0 : index
    %c0_29 = arith.constant 0 : index
    %116 = vector.load %arg7[%c0_27, %c0_28, %c0_29] : memref<1x4x256xf32, #tpu.memory_space<vmem>>, vector<1x4x256xf32>
    %117 = vector.shape_cast %116 : vector<1x4x256xf32> to vector<4x256xf32>
    %118 = vector.shape_cast %115 : vector<4x256xf32> to vector<1x4x256xf32>
    tpu.vector_store %arg7[%c0_27, %c0_28, %c0_29], %118 {strides = array<i32>} : memref<1x4x256xf32, #tpu.memory_space<vmem>>, vector<1x4x256xf32>,
    return
  }
  func.func @transform_0(%arg0: i32) -> (i32, i32, i32) {
    %c0_i32 = arith.constant 0 : i32
    %c0_i32_0 = arith.constant 0 : i32
    %c0_i32_1 = arith.constant 0 : i32
    return %arg0, %c0_i32, %c0_i32_0 : i32, i32, i32
  }
  func.func @transform_1(%arg0: i32) -> (i32, i32, i32) {
    %c0_i32 = arith.constant 0 : i32
    %c0_i32_0 = arith.constant 0 : i32
    %c0_i32_1 = arith.constant 0 : i32
    return %arg0, %c0_i32, %c0_i32_0 : i32, i32, i32
  }
  func.func @transform_2(%arg0: i32) -> (i32, i32, i32) {
    %c0_i32 = arith.constant 0 : i32
    %c0_i32_0 = arith.constant 0 : i32
    %c0_i32_1 = arith.constant 0 : i32
    %c0_i32_2 = arith.constant 0 : i32
    return %c0_i32, %c0_i32_0, %c0_i32_1 : i32, i32, i32
  }
  func.func @transform_3(%arg0: i32) -> (i32, i32) {
    %c0_i32 = arith.constant 0 : i32
    %c0_i32_0 = arith.constant 0 : i32
    %c0_i32_1 = arith.constant 0 : i32
    return %c0_i32, %c0_i32_0 : i32, i32
  }
  func.func @transform_4(%arg0: i32) -> (i32, i32, i32) {
    %c0_i32 = arith.constant 0 : i32
    %c0_i32_0 = arith.constant 0 : i32
    %c0_i32_1 = arith.constant 0 : i32
    %c0_i32_2 = arith.constant 0 : i32
    return %c0_i32, %c0_i32_0, %c0_i32_1 : i32, i32, i32
  }
  func.func @transform_5(%arg0: i32) -> (i32, i32) {
    %c0_i32 = arith.constant 0 : i32
    %c0_i32_0 = arith.constant 0 : i32
    %c0_i32_1 = arith.constant 0 : i32
    return %c0_i32, %c0_i32_0 : i32, i32
  }
  func.func @transform_6(%arg0: i32) -> (i32, i32, i32) {
    %c0_i32 = arith.constant 0 : i32
    %c0_i32_0 = arith.constant 0 : i32
    %c0_i32_1 = arith.constant 0 : i32
    return %arg0, %c0_i32, %c0_i32_0 : i32, i32, i32
  }
}

</mosaic_0001>

<bundles_post_ra>
// kernel: guided_spatial_sr.7
= control target key start
LH: loop header
LB: loop body
LE: loop exit
PB: predicated region body
PF: predicated region fallthrough
CT: control target
= control target key end

     0   :  { %s5245_s21 = smov 0   ;;  %s5861_s0 = inlined_call_operand.vmem [shape: f32[2,4,16,16], index: 0, kind: input, shape index: {}]   ;;  %s5862_s1 = inlined_call_operand.vmem [shape: f32[1,1,16], index: 1, kind: input, shape index: {}]   ;;  %s5863_s2 = inlined_call_operand.vmem [shape: f32[1,1,16], index: 2, kind: input, shape index: {}]   ;;  %s5864_s3 = inlined_call_operand.vmem [shape: f32[4,8,16], index: 3, kind: input, shape index: {}]   ;;  %s5865_s4 = inlined_call_operand.vmem [shape: f32[4,16,8], index: 4, kind: input, shape index: {}]   ;;  %s5866_s5 = inlined_call_operand.vmem [shape: f32[2,4,8,16], index: 5, kind: output, shape index: {0}]   ;;  %s5867_s6 = inlined_call_operand.vmem [shape: f32[2,4,16,8], index: 6, kind: output, shape index: {1}]  }
   0x1 LB: > { %s4402_s22 = sadd.s32 4294967295, %s5205_s21   ;;  %p4406_p0 = scmp.ge.s32.totalorder %s5205_s21, 1  ;;  %s5205_s21 = sphi %s5245_s21, %s17_s21  }
   0x2   : > { %p215_p1 = scmp.lt.s32.totalorder %s5205_s21, 3 }
   0x4   : > { %p216_p2 = pnand %p4406_p0, %p215_p1 }
   0x5   : > { %p250_p3 = scmp.lt.s32.totalorder (!%p216_p2), %s4402_s22, 1  ;;  %vm273_vm0 = vcmask (!%p216_p2), 130048   ;;  %v5207_v56 = vmov (!%p216_p2), 0.0|0.0   ;;  %vm5208_vm1 = vmmov (!%p216_p2), 0   ;;  %v5209_v57 = vmov (!%p216_p2), 0.0  }
   0x6   : > { %219 = sbr.rel (%p216_p2) target bundleno = 731 (0x2db), region = 40  ;;  %4924 = vmatprep.subr.bf16.mxu0 (!%p216_p2), %v5207_v56  ;;  %4942 = vmatprep.subr.bf16.mxu1 (!%p216_p2), %v5207_v56  ;;  %vm4305_vm2 = vcmask (!%p216_p2), 64512  }
   0x7   : > { %4592 = vmatprep.mubr.msk.f32.mxu0 (!%p216_p2), %vm5208_vm1, %v5209_v57  ;;  %4634 = vmatprep.mubr.msk.f32.mxu1 (!%p216_p2), %vm5208_vm1, %v5209_v57 }
   0xd   : > { %s5869_s22 = smov (!%p250_p3, %s4402_s22), 1 }
   0xe   : > { %s4417_s23 = sshll.u32 %s5869_s22, 6  ;;  %s4418_s10 = sshll.u32 %s5869_s22, 5 }
   0xf   : > { %s254_s26 = scalar_lea.vmem %s5861_s0, %s4417_s23  ;;  %s259_s13 = scalar_lea.vmem %s5866_s5, %s4418_s10 }
  0x10   : > { %v265_v0 = vld [vmem:[%s254_s26] sm:$0xff]  ;;  %v267_v1 = vld [vmem:[%s254_s26 + $0x10] sm:$0xff]  ;;  %v266_v2 = vld [vmem:[%s254_s26 + $0x8] sm:$0xff]  ;;  %s264_s16 = scalar_lea.vmem %s5867_s6, %s4417_s23 }
  0x11   : > { %v274_v3 = vsel %vm273_vm0, %v265_v0, 0.0  ;;  %v280_v4 = vsel %vm273_vm0, %v267_v1, 0.0  ;;  %v268_v5 = vld [vmem:[%s254_s26 + $0x18] sm:$0xff]  ;;  %v277_v6 = vsel %vm273_vm0, %v266_v2, 0.0  ;;  %v269_v8 = vld [vmem:[%s254_s26 + $0x20] sm:$0xff]  ;;  %v270_v9 = vld [vmem:[%s254_s26 + $0x28] sm:$0xff] }
  0x12   : > { %275 = vadd.xlane.f32.xlu0 %v274_v3  ;;  %281 = vadd.xlane.f32.xlu1 %v280_v4  ;;  %v283_v7 = vsel %vm273_vm0, %v268_v5, 0.0  ;;  %v286_v10 = vsel %vm273_vm0, %v269_v8, 0.0  ;;  %v289_v11 = vsel %vm273_vm0, %v270_v9, 0.0  ;;  %v271_v12 = vld [vmem:[%s254_s26 + $0x30] sm:$0xff]  ;;  %v272_v13 = vld [vmem:[%s254_s26 + $0x38] sm:$0xff] }
  0x13   : > { %v292_v14 = vsel %vm273_vm0, %v271_v12, 0.0  ;;  %v295_v15 = vsel %vm273_vm0, %v272_v13, 0.0 }
  0x16   : > { %278 = vadd.xlane.f32.xlu0 %v277_v6  ;;  %284 = vadd.xlane.f32.xlu1 %v283_v7 }
  0x1a   : > { %287 = vadd.xlane.f32.xlu0 %v286_v10  ;;  %290 = vadd.xlane.f32.xlu1 %v289_v11 }
  0x1e   : > { %293 = vadd.xlane.f32.xlu0 %v292_v14  ;;  %296 = vadd.xlane.f32.xlu1 %v295_v15  ;;  %v5337_v15 = vld [vmem:[%s5863_s2] ss:$0 sm:$0xff] }
  0x9f   : > { %v276_v16 = vpop.xlane.xlu0 %275  ;;  %v282_v17 = vpop.xlane.xlu1 %281 }
  0xa0   : > { %v299_v18 = vmul.f32 0.0625, %v276_v16  ;;  %v301_v19 = vmul.f32 0.0625, %v282_v17 }
  0xa2   : > { %v5269_v20 = vsub.f32 %v265_v0, %v299_v18  ;;  %v5271_v21 = vsub.f32 %v267_v1, %v301_v19  ;;  %v409_v1 = vld [vmem:[%s5864_s3] sm:$0xff] }
  0xa3   : > { %v279_v22 = vpop.xlane.xlu0 %278  ;;  %v285_v23 = vpop.xlane.xlu1 %284  ;;  %v414_v6 = vsel %vm273_vm0, %v409_v1, 0 }
  0xa4   : > { %v300_v24 = vmul.f32 0.0625, %v279_v22  ;;  %v302_v25 = vmul.f32 0.0625, %v285_v23  ;;  %v315_v26 = vmul.f32 %v5269_v20, %v5269_v20  ;;  %v317_v27 = vmul.f32 %v5271_v21, %v5271_v21 }
  0xa6   : > { %v5277_v28 = vsub.f32 %v266_v2, %v300_v24  ;;  %v5279_v29 = vsub.f32 %v268_v5, %v302_v25  ;;  %v323_v30 = vsel %vm273_vm0, %v315_v26, 0.0  ;;  %v329_v33 = vsel %vm273_vm0, %v317_v27, 0.0 }
  0xa7   : > { %324 = vadd.xlane.f32.xlu0 %v323_v30  ;;  %v288_v31 = vpop.xlane.xlu0 %287  ;;  %v291_v32 = vpop.xlane.xlu1 %290 }
  0xa8   : > { %v303_v34 = vmul.f32 0.0625, %v288_v31  ;;  %v304_v35 = vmul.f32 0.0625, %v291_v32  ;;  %v316_v36 = vmul.f32 %v5277_v28, %v5277_v28  ;;  %v318_v37 = vmul.f32 %v5279_v29, %v5279_v29 }
  0xaa   : > { %v5287_v38 = vsub.f32 %v269_v8, %v303_v34  ;;  %v5289_v39 = vsub.f32 %v270_v9, %v304_v35  ;;  %v326_v40 = vsel %vm273_vm0, %v316_v36, 0.0  ;;  %v332_v43 = vsel %vm273_vm0, %v318_v37, 0.0  ;;  %v410_v8 = vld [vmem:[%s5864_s3 + $0x8] sm:$0xff] }
  0xab   : > { %330 = vadd.xlane.f32.xlu0 %v329_v33  ;;  %327 = vadd.xlane.f32.xlu1 %v326_v40  ;;  %v294_v41 = vpop.xlane.xlu0 %293  ;;  %v297_v42 = vpop.xlane.xlu1 %296  ;;  %v5322_v9 = vand.u32 4294901760, %v414_v6  ;;  %v876_v10 = vsel %vm273_vm0, %v410_v8, 0 }
  0xac   : > { %v305_v44 = vmul.f32 0.0625, %v294_v41  ;;  %v306_v45 = vmul.f32 0.0625, %v297_v42  ;;  %v319_v46 = vmul.f32 %v5287_v38, %v5287_v38  ;;  %v320_v47 = vmul.f32 %v5289_v39, %v5289_v39 }
  0xad   : > { %v5332_v14 = vsub.f32 %v414_v6, %v5322_v9  ;;  %v5339_v16 = vand.u32 4294901760, %v876_v10 }
  0xae   : > { %v5297_v48 = vsub.f32 %v271_v12, %v305_v44  ;;  %v5299_v49 = vsub.f32 %v272_v13, %v306_v45  ;;  %v335_v50 = vsel %vm273_vm0, %v319_v46, 0.0  ;;  %v338_v51 = vsel %vm273_vm0, %v320_v47, 0.0  ;;  %v5328_v12 = vld [vmem:[%s5862_s1] ss:$0 sm:$0xff] }
  0xaf   : > { %333 = vadd.xlane.f32.xlu1 %v332_v43  ;;  %336 = vadd.xlane.f32.xlu0 %v335_v50  ;;  %v485_v25 = vand.u32 4294901760, %v5332_v14  ;;  %v5349_v27 = vsub.f32 %v876_v10, %v5339_v16 }
  0xb0   : > { %v321_v52 = vmul.f32 %v5297_v48, %v5297_v48  ;;  %v322_v53 = vmul.f32 %v5299_v49, %v5299_v49 }
  0xb1   : > { %v947_v42 = vand.u32 4294901760, %v5349_v27 }
  0xb2   : > { %v341_v54 = vsel %vm273_vm0, %v321_v52, 0.0  ;;  %v344_v55 = vsel %vm273_vm0, %v322_v53, 0.0 }
  0xb3   : > { %339 = vadd.xlane.f32.xlu1 %v338_v51  ;;  %342 = vadd.xlane.f32.xlu0 %v341_v54 }
  0xb7   : > { %345 = vadd.xlane.f32.xlu1 %v344_v55 }
 0x134   : > { %v325_v58 = vpop.xlane.xlu0 %324 }
 0x135   : > { %v347_v59 = vmul.f32 0.0625, %v325_v58 }
 0x137   : > { %v355_v60 = vadd.f32 16.0, %v347_v59 }
 0x138   : > { %v328_v61 = vpop.xlane.xlu1 %327  ;;  %v331_v62 = vpop.xlane.xlu0 %330 }
 0x139   : > { %5183 = vrsqrt.f32 %v355_v60  ;;  %v348_v63 = vmul.f32 0.0625, %v328_v61  ;;  %v349_v0 = vmul.f32 0.0625, %v331_v62  ;;  %v948_v60 = vsub.f32 %v5349_v27, %v947_v42 }
 0x13b   : > { %v356_v2 = vadd.f32 16.0, %v348_v63  ;;  %v357_v3 = vadd.f32 16.0, %v349_v0  ;;  %v949_v6 = vand.u32 4294901760, %v948_v60 }
 0x13c   : > { %v334_v4 = vpop.xlane.xlu1 %333  ;;  %v337_v24 = vpop.xlane.xlu0 %336 }
 0x13d   : > { %5185 = vrsqrt.f32 %v356_v2  ;;  %v350_v5 = vmul.f32 0.0625, %v334_v4  ;;  %v351_v40 = vmul.f32 0.0625, %v337_v24 }
 0x13e   : > { %5187 = vrsqrt.f32 %v357_v3 }
 0x13f   : > { %v358_v7 = vadd.f32 16.0, %v350_v5  ;;  %v359_v55 = vadd.f32 16.0, %v351_v40 }
 0x140   : > { %v340_v17 = vpop.xlane.xlu1 %339  ;;  %v343_v43 = vpop.xlane.xlu0 %342 }
 0x141   : > { %5189 = vrsqrt.f32 %v358_v7  ;;  %v352_v33 = vmul.f32 0.0625, %v340_v17  ;;  %v353_v58 = vmul.f32 0.0625, %v343_v43 }
 0x143   : > { %v5184_v11 = vpop.eup %5183  ;;  %v360_v46 = vadd.f32 16.0, %v352_v33  ;;  %v361_v5 = vadd.f32 16.0, %v353_v58 }
 0x144   : > { %v371_v13 = vmul.f32 %v5184_v11, %v5269_v20  ;;  %v346_v35 = vpop.xlane.xlu1 %345 }
 0x145   : > { %v354_v47 = vmul.f32 0.0625, %v346_v35  ;;  %5191 = vrsqrt.f32 %v360_v46 }
 0x146   : > { %v386_v18 = vmul.f32 %v5328_v12, %v371_v13  ;;  %5193 = vrsqrt.f32 %v359_v55 }
 0x147   : > { %v5186_v19 = vpop.eup %5185  ;;  %v362_v0 = vadd.f32 16.0, %v354_v47 }
 0x148   : > { %v5188_v22 = vpop.eup %5187  ;;  %v372_v23 = vmul.f32 %v5186_v19, %v5277_v28  ;;  %v5344_v20 = vadd.f32 %v5337_v15, %v386_v18 }
 0x149   : > { %v373_v26 = vmul.f32 %v5188_v22, %v5271_v21  ;;  %v486_v21 = vsub.f32 %v5332_v14, %v485_v25  ;;  %5195 = vrsqrt.f32 %v362_v0 }
 0x14a   : > { %v387_v30 = vmul.f32 %v5328_v12, %v372_v23  ;;  %v417_v31 = vand.u32 4294901760, %v5344_v20  ;;  %5197 = vrsqrt.f32 %v361_v5 }
 0x14b   : > { %v5190_v32 = vpop.eup %5189  ;;  %v388_v34 = vmul.f32 %v5328_v12, %v373_v26  ;;  %v487_v53 = vand.u32 4294901760, %v486_v21 }
 0x14c   : > { %v374_v28 = vmul.f32 %v5190_v32, %v5279_v29  ;;  %v5356_v36 = vadd.f32 %v5337_v15, %v387_v30  ;;  %v5359_v37 = vsub.f32 %v5344_v20, %v417_v31 }
 0x14d   : > { %v5365_v41 = vadd.f32 %v5337_v15, %v388_v34 }
 0x14e   : > { %v420_v29 = vand.u32 4294901760, %v5356_v36  ;;  %v389_v44 = vmul.f32 %v5328_v12, %v374_v28  ;;  %v496_v45 = vand.u32 4294901760, %v5359_v37 }
 0x14f   : > { %v879_v50 = vand.u32 4294901760, %v5365_v41  ;;  %v5192_v24 = vpop.eup %5191 }
 0x150   : > { %v5372_v51 = vpack.c.bf16 %v420_v29, %v417_v31  ;;  %v5375_v52 = vsub.f32 %v5356_v36, %v420_v29  ;;  %v5378_v54 = vadd.f32 %v5337_v15, %v389_v44  ;;  %v497_v62 = vsub.f32 %v5359_v37, %v496_v45  ;;  %v5194_v26 = vpop.eup %5193  ;;  %v412_v44 = vld [vmem:[%s5864_s3 + $0x18] sm:$0xff] }
 0x151   : > { %v5381_v59 = vsub.f32 %v5365_v41, %v879_v50  ;;  %v376_v30 = vmul.f32 %v5192_v24, %v5289_v39  ;;  %v375_v33 = vmul.f32 %v5194_v26, %v5287_v38  ;;  %v411_v38 = vld [vmem:[%s5864_s3 + $0x10] sm:$0xff]  ;;  %v2261_v26 = vld [vmem:[%s5865_s4] sm:$0xff] }
 0x152   : > { %4926 = vmatpush3.bf16.msra.mxu0 %v5372_v51  ;;  %v882_v61 = vand.u32 4294901760, %v5378_v54  ;;  %v503_v63 = vand.u32 4294901760, %v5375_v52  ;;  %v498_v7 = vand.u32 4294901760, %v497_v62  ;;  %v4931_v22 = vpack.c.bf16 %v5375_v52, %v5359_v37 }
 0x153   : > { %4927 = vmatprep.subr.bf16.mxu0 %v5207_v56  ;;  %v958_v1 = vand.u32 4294901760, %v5381_v59  ;;  %v5196_v32 = vpop.eup %5195  ;;  %v391_v28 = vmul.f32 %v5328_v12, %v376_v30  ;;  %v390_v35 = vmul.f32 %v5328_v12, %v375_v33  ;;  %v1338_v29 = vsel %vm273_vm0, %v411_v38, 0  ;;  %v2262_v30 = vld [vmem:[%s5865_s4 + $0x8] sm:$0xff]  ;;  %v2263_v33 = vld [vmem:[%s5865_s4 + $0x10] sm:$0xff] }
 0x154   : > { %v5394_v2 = vpack.c.bf16 %v882_v61, %v879_v50  ;;  %v5397_v3 = vsub.f32 %v5378_v54, %v882_v61  ;;  %v504_v4 = vsub.f32 %v5375_v52, %v503_v63  ;;  %v5198_v34 = vpop.eup %5197  ;;  %v378_v39 = vmul.f32 %v5196_v32, %v5299_v49 }
 0x155   : > { %4593 = vmatmul.mubr.f32.vlgmr.msra.gmra.mrb[0].mxu0 %v487_v53  ;;  %v959_v10 = vsub.f32 %v5381_v59, %v958_v1  ;;  %v377_v21 = vmul.f32 %v5198_v34, %v5297_v48  ;;  %v5443_v49 = vadd.f32 %v5337_v15, %v391_v28  ;;  %v5451_v43 = vadd.f32 %v5337_v15, %v390_v35  ;;  %v2264_v28 = vld [vmem:[%s5865_s4 + $0x18] sm:$0xff] }
 0x156   : > { %4944 = vmatpush3.bf16.msra.mxu1 %v5394_v2  ;;  %v505_v8 = vand.u32 4294901760, %v504_v4  ;;  %4599 = vmatprep.mubr.msk.f32.mxu0 %vm5208_vm1, %v5209_v57  ;;  %v965_v11 = vand.u32 4294901760, %v5397_v3  ;;  %v4949_v31 = vpack.c.bf16 %v5397_v3, %v5381_v59  ;;  %v393_v40 = vmul.f32 %v5328_v12, %v378_v39 }
 0x157   : > { %4945 = vmatprep.subr.bf16.mxu1 %v5207_v56  ;;  %v960_v18 = vand.u32 4294901760, %v959_v10  ;;  %v392_v48 = vmul.f32 %v5328_v12, %v377_v21  ;;  %v4937_v12 = vpack.c.bf16 %v503_v63, %v496_v45  ;;  %v1344_v46 = vand.u32 4294901760, %v5443_v49 }
 0x158   : > { %v4928_v13 = vpack.c.bf16 %v505_v8, %v498_v7  ;;  %v966_v17 = vsub.f32 %v5397_v3, %v965_v11  ;;  %v5464_v47 = vadd.f32 %v5337_v15, %v393_v40  ;;  %v5468_v50 = vand.u32 4294901760, %v1338_v29 }
 0x159   : > { %4635 = vmatmul.mubr.f32.vlgmr.msra.gmra.mrb[0].mxu1 %v949_v6  ;;  %v1341_v53 = vand.u32 4294901760, %v5451_v43  ;;  %v5474_v37 = vadd.f32 %v5337_v15, %v392_v48  ;;  %v1800_v45 = vsel %vm273_vm0, %v412_v44, 0  ;;  %v4955_v52 = vpack.c.bf16 %v965_v11, %v958_v1 }
 0x15a   : > { %4929 = vmatpush3.bf16.msra.mxu0 %v4928_v13  ;;  %v967_v19 = vand.u32 4294901760, %v966_v17  ;;  %4641 = vmatprep.mubr.msk.f32.mxu1 %vm5208_vm1, %v5209_v57  ;;  %v5487_v55 = vsub.f32 %v1338_v29, %v5468_v50  ;;  %v5489_v15 = vand.u32 4294901760, %v1800_v45  ;;  %v2279_v32 = vand.u32 4294901760, %v2262_v30 }
 0x15b   : > { %4930 = vmatprep.subr.bf16.mxu0 %v5207_v56  ;;  %v5494_v58 = vsub.f32 %v5451_v43, %v1341_v53  ;;  %v1803_v59 = vand.u32 4294901760, %v5474_v37  ;;  %v5532_v6 = vpack.c.bf16 %v1344_v46, %v1341_v53  ;;  %v2270_v34 = vsel %vm273_vm0, %v5344_v20, 0 }
 0x15c   : > { %v4946_v23 = vpack.c.bf16 %v967_v19, %v960_v18  ;;  %v5505_v61 = vsub.f32 %v1800_v45, %v5489_v15  ;;  %v2784_v39 = vand.u32 4294901760, %v2263_v33  ;;  %v5599_v21 = vsub.f32 %v2262_v30, %v2279_v32 }
 0x15d   : > { %4600 = vmatmul.mubr.f32.vlgmr.msra.gmra.mrb[0].mxu0 %v5322_v9  ;;  %v1420_v62 = vand.u32 4294901760, %v5494_v58  ;;  %v5512_v63 = vsub.f32 %v5474_v37, %v1803_v59  ;;  %v5605_v38 = vand.u32 4294901760, %v2270_v34  ;;  %v2273_v40 = vsel %vm273_vm0, %v5356_v36, 0 }
 0x15e   : > { %4932 = vmatpush3.bf16.msra.mxu0 %v4931_v22  ;;  %4947 = vmatpush3.bf16.msra.mxu1 %v4946_v23  ;;  %v1871_v3 = vand.u32 4294901760, %v5505_v61  ;;  %v2787_v48 = vand.u32 4294901760, %v2264_v28  ;;  %v2778_v29 = vsel %vm273_vm0, %v5365_v41, 0  ;;  %v5616_v44 = vand.u32 4294901760, %v2273_v40 }
 0x15f   : > { %4948 = vmatprep.subr.bf16.mxu1 %v5207_v56  ;;  %4606 = vmatprep.mubr.msk.f32.mxu0 %vm5208_vm1, %v5209_v57  ;;  %v1421_v4 = vsub.f32 %v5494_v58, %v1420_v62  ;;  %v1882_v5 = vand.u32 4294901760, %v5512_v63  ;;  %v5620_v36 = vsub.f32 %v2263_v33, %v2784_v39  ;;  %v5627_v45 = vsub.f32 %v2270_v34, %v5605_v38  ;;  %v2268_v33 = vld [vmem:[%s5865_s4 + $0x38] sm:$0xff] }
 0x160   : > { %4933 = vmatprep.subr.bf16.mxu0 %v5207_v56  ;;  %v1872_v10 = vsub.f32 %v5505_v61, %v1871_v3  ;;  %v2781_v41 = vsel %vm273_vm0, %v5378_v54, 0 }
 0x161   : > { %4642 = vmatmul.mubr.f32.vlgmr.msra.gmra.mrb[0].mxu1 %v5339_v16  ;;  %v1422_v11 = vand.u32 4294901760, %v1421_v4  ;;  %v1883_v13 = vsub.f32 %v5512_v63, %v1882_v5 }
 0x162   : > { %4950 = vmatpush3.bf16.msra.mxu1 %v4949_v31  ;;  %4648 = vmatprep.mubr.msk.f32.mxu1 %vm5208_vm1, %v5209_v57  ;;  %v1873_v19 = vand.u32 4294901760, %v1872_v10  ;;  %v2276_v31 = vand.u32 4294901760, %v2261_v26 }
 0x163   : > { %4951 = vmatprep.subr.bf16.mxu1 %v5207_v56  ;;  %v1884_v22 = vand.u32 4294901760, %v1883_v13 }
 0x164   : > { %v5597_v35 = vsub.f32 %v2261_v26, %v2276_v31 }
 0x165   : > { %4607 = vmatmul.mubr.f32.vlgmr.msra.gmra.mrb[0].mxu0 %v5332_v14  ;;  %v5481_v14 = vsub.f32 %v5443_v49, %v1344_v46  ;;  %v2372_v46 = vand.u32 4294901760, %v5599_v21 }
 0x166   : > { %4935 = vmatpush3.bf16.msra.mxu0 %v5372_v51  ;;  %4613 = vmatprep.mubr.msk.f32.mxu0 %vm5208_vm1, %v5209_v57 }
 0x167   : > { %4936 = vmatprep.subr.bf16.mxu0 %v5207_v56  ;;  %v1427_v60 = vand.u32 4294901760, %v5481_v14 }
 0x169   : > { %4649 = vmatmul.mubr.f32.vlgmr.msra.gmra.mrb[0].mxu1 %v5349_v27  ;;  %v1428_v0 = vsub.f32 %v5481_v14, %v1427_v60  ;;  %v4973_v20 = vpack.c.bf16 %v1427_v60, %v1420_v62  ;;  %v2344_v60 = vand.u32 4294901760, %v5627_v45 }
 0x16a   : > { %4953 = vmatpush3.bf16.msra.mxu1 %v5394_v2  ;;  %4655 = vmatprep.mubr.msk.f32.mxu1 %vm5208_vm1, %v5209_v57 }
 0x16b   : > { %4954 = vmatprep.subr.bf16.mxu1 %v5207_v56  ;;  %v1429_v7 = vand.u32 4294901760, %v1428_v0 }
 0x16d   : > { %4614 = vmatmul.mubr.f32.vlgmr.msra.gmra.mrb[0].mxu0 %v485_v25  ;;  %v1806_v25 = vand.u32 4294901760, %v5464_v47  ;;  %v4964_v17 = vpack.c.bf16 %v1429_v7, %v1422_v11 }
 0x16e   : > { %4938 = vmatpush3.bf16.msra.mxu0 %v4937_v12  ;;  %4620 = vmatprep.mubr.msk.f32.mxu0 %vm5208_vm1, %v5209_v57  ;;  %v2365_v12 = vand.u32 4294901760, %v5597_v35 }
 0x16f   : > { %4939 = vmatprep.subr.bf16.mxu0 %v5207_v56  ;;  %v5500_v27 = vsub.f32 %v5464_v47, %v1806_v25  ;;  %v5548_v18 = vpack.c.bf16 %v1806_v25, %v1803_v59  ;;  %v5639_v25 = vpack.c.bf16 %v2279_v32, %v2276_v31  ;;  %v5651_v59 = vand.u32 4294901760, %v2781_v41  ;;  %v2267_v32 = vld [vmem:[%s5865_s4 + $0x30] sm:$0xff] }
 0x170   : > { %v2366_v54 = vsub.f32 %v5597_v35, %v2365_v12  ;;  %v3286_v31 = vsel %vm273_vm0, %v5451_v43, 0  ;;  %v3289_v43 = vsel %vm273_vm0, %v5443_v49, 0 }
 0x171   : > { %4656 = vmatmul.mubr.f32.vlgmr.msra.gmra.mrb[0].mxu1 %v947_v42  ;;  %v1409_v42 = vand.u32 4294901760, %v5487_v55  ;;  %v1889_v1 = vand.u32 4294901760, %v5500_v27  ;;  %v4985_v24 = vpack.c.bf16 %v5500_v27, %v5512_v63 }
 0x172   : > { %4956 = vmatpush3.bf16.msra.mxu1 %v4955_v52  ;;  %4662 = vmatprep.mubr.msk.f32.mxu1 %vm5208_vm1, %v5209_v57  ;;  %v5631_v52 = vsub.f32 %v2264_v28, %v2787_v48  ;;  %v2367_v63 = vand.u32 4294901760, %v2366_v54 }
 0x173   : > { %4957 = vmatprep.subr.bf16.mxu1 %v5207_v56  ;;  %v1890_v8 = vsub.f32 %v5500_v27, %v1889_v1  ;;  %v4991_v53 = vpack.c.bf16 %v1889_v1, %v1882_v5  ;;  %v2873_v27 = vand.u32 4294901760, %v5620_v36  ;;  %v5668_v1 = vsub.f32 %v2781_v41, %v5651_v59 }
 0x175   : > { %4621 = vmatmul.mubr.f32.vlgmr.msra.gmra.mrb[0].mxu0 %v5322_v9 }
 0x176   : > { %4941 = vmatpush3.bf16.msra.mxu0 %v5372_v51  ;;  %4627 = vmatprep.mubr.msk.f32.mxu0 %vm5208_vm1, %v5209_v57  ;;  %v1410_v51 = vsub.f32 %v5487_v55, %v1409_v42 }
 0x177   : > { %4960 = vmatprep.subr.bf16.mxu0 %v5207_v56 }
 0x179   : > { %4663 = vmatmul.mubr.f32.vlgmr.msra.gmra.mrb[0].mxu1 %v5339_v16 }
 0x17a   : > { %4959 = vmatpush3.bf16.msra.mxu1 %v5394_v2  ;;  %4669 = vmatprep.mubr.msk.f32.mxu1 %vm5208_vm1, %v5209_v57  ;;  %v1411_v2 = vand.u32 4294901760, %v1410_v51  ;;  %v2345_v51 = vsub.f32 %v5627_v45, %v2344_v60 }
 0x17b   : > { %4978 = vmatprep.subr.bf16.mxu1 %v5207_v56 }
 0x17d   : > { %4628 = vmatmul.mubr.f32.vlgmr.msra.gmra.mrb[0].mxu0 %v5322_v9  ;;  %v1891_v9 = vand.u32 4294901760, %v1890_v8  ;;  %v2862_v8 = vand.u32 4294901760, %v5668_v1 }
 0x17e   : > { %4962 = vmatpush3.bf16.msra.mxu0 %v5532_v6  ;;  %4676 = vmatprep.mubr.msk.f32.mxu0 %vm5208_vm1, %v5209_v57 }
 0x17f   : > { %4963 = vmatprep.subr.bf16.mxu0 %v5207_v56  ;;  %v4982_v23 = vpack.c.bf16 %v1891_v9, %v1884_v22  ;;  %v5004_v9 = vpack.c.bf16 %v5599_v21, %v5597_v35  ;;  %v5028_v22 = vpack.c.bf16 %v5631_v52, %v5620_v36  ;;  %v3800_v35 = vand.u32 4294901760, %v2267_v32 }
 0x181   : > { %4670 = vmatmul.mubr.f32.vlgmr.msra.gmra.mrb[0].mxu1 %v5339_v16  ;;  %4677 = vmatmul.mubr.f32.vlgmr.msra.gmra.mrb[2].mxu0 %v1411_v2  ;;  %v4967_v16 = vpack.c.bf16 %v5481_v14, %v5494_v58  ;;  %v5635_v14 = vand.u32 4294901760, %v2778_v29  ;;  %v2373_v58 = vsub.f32 %v5599_v21, %v2372_v46  ;;  %v2346_v2 = vand.u32 4294901760, %v2345_v51 }
 0x182   : > { %4965 = vmatpush3.bf16.msra.mxu0 %v4964_v17  ;;  %4980 = vmatpush3.bf16.msra.mxu1 %v5548_v18  ;;  %v2863_v17 = vsub.f32 %v5668_v1, %v2862_v8  ;;  %v3803_v21 = vand.u32 4294901760, %v2268_v33 }
 0x183   : > { %4718 = vmatprep.mubr.msk.f32.mxu1 %vm5208_vm1, %v5209_v57  ;;  %4981 = vmatprep.subr.bf16.mxu1 %v5207_v56  ;;  %v2374_v0 = vand.u32 4294901760, %v2373_v58 }
 0x184   : > { %4683 = vmatprep.mubr.msk.f32.mxu0 %vm5208_vm1, %v5209_v57  ;;  %4966 = vmatprep.subr.bf16.mxu0 %v5207_v56 }
 0x185   : > { %4719 = vmatmul.mubr.f32.vlgmr.msra.gmra.mrb[2].mxu1 %v1873_v19  ;;  %v5000_v7 = vpack.c.bf16 %v2374_v0, %v2367_v63 }
 0x186   : > { %4983 = vmatpush3.bf16.msra.mxu1 %v4982_v23  ;;  %4725 = vmatprep.mubr.msk.f32.mxu1 %vm5208_vm1, %v5209_v57  ;;  %v2265_v23 = vld [vmem:[%s5865_s4 + $0x20] sm:$0xff] }
 0x187   : > { %4984 = vmatprep.subr.bf16.mxu1 %v5207_v56  ;;  %v3292_v26 = vand.u32 4294901760, %v2265_v23 }
 0x189   : > { %4684 = vmatmul.mubr.f32.vlgmr.msra.gmra.mrb[2].mxu0 %v5468_v50  ;;  %v5733_v34 = vsub.f32 %v2265_v23, %v3292_v26 }
 0x18a   : > { %4968 = vmatpush3.bf16.msra.mxu0 %v4967_v16  ;;  %4690 = vmatprep.mubr.msk.f32.mxu0 %vm5208_vm1, %v5209_v57  ;;  %v2266_v16 = vld [vmem:[%s5865_s4 + $0x28] sm:$0xff] }
 0x18b   : > { %4969 = vmatprep.subr.bf16.mxu0 %v5207_v56  ;;  %v3295_v30 = vand.u32 4294901760, %v2266_v16 }
 0x18d   : > { %4726 = vmatmul.mubr.f32.vlgmr.msra.gmra.mrb[2].mxu1 %v5489_v15  ;;  %v5735_v28 = vsub.f32 %v2266_v16, %v3295_v30 }
 0x18e   : > { %4986 = vmatpush3.bf16.msra.mxu1 %v4985_v24  ;;  %4732 = vmatprep.mubr.msk.f32.mxu1 %vm5208_vm1, %v5209_v57 }
 0x18f   : > { %4987 = vmatprep.subr.bf16.mxu1 %v5207_v56 }
 0x191   : > { %4691 = vmatmul.mubr.f32.vlgmr.msra.gmra.mrb[2].mxu0 %v5487_v55  ;;  %v5643_v55 = vsub.f32 %v2273_v40, %v5616_v44  ;;  %v5747_v40 = vand.u32 4294901760, %v3289_v43 }
 0x192   : > { %4971 = vmatpush3.bf16.msra.mxu0 %v5532_v6  ;;  %4697 = vmatprep.mubr.msk.f32.mxu0 %vm5208_vm1, %v5209_v57 }
 0x193   : > { %4972 = vmatprep.subr.bf16.mxu0 %v5207_v56  ;;  %v2354_v62 = vand.u32 4294901760, %v5643_v55 }
 0x195   : > { %4733 = vmatmul.mubr.f32.vlgmr.msra.gmra.mrb[2].mxu1 %v5505_v61  ;;  %v5663_v61 = vpack.c.bf16 %v2787_v48, %v2784_v39  ;;  %v5737_v39 = vand.u32 4294901760, %v3286_v31  ;;  %v3381_v48 = vand.u32 4294901760, %v5733_v34 }
 0x196   : > { %4989 = vmatpush3.bf16.msra.mxu1 %v5548_v18  ;;  %4739 = vmatprep.mubr.msk.f32.mxu1 %vm5208_vm1, %v5209_v57 }
 0x197   : > { %4990 = vmatprep.subr.bf16.mxu1 %v5207_v56  ;;  %v5752_v49 = vsub.f32 %v3286_v31, %v5737_v39 }
 0x199   : > { %4698 = vmatmul.mubr.f32.vlgmr.msra.gmra.mrb[2].mxu0 %v1409_v42  ;;  %v2880_v42 = vand.u32 4294901760, %v5631_v52 }
 0x19a   : > { %4974 = vmatpush3.bf16.msra.mxu0 %v4973_v20  ;;  %4704 = vmatprep.mubr.msk.f32.mxu0 %vm5208_vm1, %v5209_v57  ;;  %v3794_v20 = vsel %vm273_vm0, %v5474_v37, 0 }
 0x19b   : > { %4975 = vmatprep.subr.bf16.mxu0 %v5207_v56  ;;  %v2881_v4 = vsub.f32 %v5631_v52, %v2880_v42  ;;  %v5036_v24 = vpack.c.bf16 %v2880_v42, %v2873_v27  ;;  %v5762_v37 = vand.u32 4294901760, %v3794_v20 }
 0x19d   : > { %4740 = vmatmul.mubr.f32.vlgmr.msra.gmra.mrb[2].mxu1 %v1871_v3  ;;  %v2874_v3 = vsub.f32 %v5620_v36, %v2873_v27  ;;  %v2882_v11 = vand.u32 4294901760, %v2881_v4  ;;  %v5758_v36 = vsub.f32 %v2268_v33, %v3803_v21  ;;  %v5786_v27 = vpack.c.bf16 %v3803_v21, %v3800_v35 }
 0x19e   : > { %4992 = vmatpush3.bf16.msra.mxu1 %v4991_v53  ;;  %4746 = vmatprep.mubr.msk.f32.mxu1 %vm5208_vm1, %v5209_v57  ;;  %v5765_v53 = vpack.c.bf16 %v3295_v30, %v3292_v26 }
 0x19f   : > { %4993 = vmatprep.subr.bf16.mxu1 %v5207_v56  ;;  %v5658_v56 = vsub.f32 %v2778_v29, %v5635_v14  ;;  %v2875_v10 = vand.u32 4294901760, %v2874_v3  ;;  %v3388_v29 = vand.u32 4294901760, %v5735_v28  ;;  %v3896_v58 = vand.u32 4294901760, %v5758_v36 }
 0x1a1   : > { %4705 = vmatmul.mubr.f32.vlgmr.msra.gmra.mrb[2].mxu0 %v5468_v50  ;;  %v2852_v5 = vand.u32 4294901760, %v5658_v56  ;;  %v3389_v41 = vsub.f32 %v5735_v28, %v3388_v29 }
 0x1a2   : > { %4977 = vmatpush3.bf16.msra.mxu0 %v5532_v6  ;;  %4711 = vmatprep.mubr.msk.f32.mxu0 %vm5208_vm1, %v5209_v57  ;;  %v2355_v6 = vsub.f32 %v5643_v55, %v2354_v62 }
 0x1a3   : > { %4997 = vmatprep.subr.bf16.mxu0 %v5639_v25  ;;  %v2853_v13 = vsub.f32 %v5658_v56, %v2852_v5 }
 0x1a5   : > { %4747 = vmatmul.mubr.f32.vlgmr.msra.gmra.mrb[2].mxu1 %v5489_v15  ;;  %v2854_v19 = vand.u32 4294901760, %v2853_v13 }
 0x1a6   : > { %4995 = vmatpush3.bf16.msra.mxu1 %v5548_v18  ;;  %4753 = vmatprep.mubr.msk.f32.mxu1 %vm5208_vm1, %v5209_v57  ;;  %v2356_v57 = vand.u32 4294901760, %v2355_v6  ;;  %v5024_v18 = vpack.c.bf16 %v2882_v11, %v2875_v10 }
 0x1a7   : > { %5021 = vmatprep.subr.bf16.mxu1 %v5663_v61 }
 0x1a9   : > { %4712 = vmatmul.mubr.f32.vlgmr.msra.gmra.mrb[2].mxu0 %v5468_v50  ;;  %v2864_v50 = vand.u32 4294901760, %v2863_v17 }
 0x1aa   : > { %4999 = vmatpush3.bf16.msra.mxu0 %v5639_v25  ;;  %4760 = vmatprep.mubr.f32.mxu0 %v2346_v2 }
 0x1ab   : > { %5001 = vmatprep.subr.bf16.mxu0 %v5000_v7 }
 0x1ad   : > { %4754 = vmatmul.mubr.f32.vlgmr.msra.gmra.mrb[2].mxu1 %v5489_v15  ;;  %4761 = vmatmul.mubr.f32.vlgmr.msra.gmra.mrb[4].mxu0 %v2356_v57  ;;  %v5012_v15 = vpack.c.bf16 %v2372_v46, %v2365_v12  ;;  %v3797_v12 = vsel %vm273_vm0, %v5464_v47, 0  ;;  %v5756_v46 = vsub.f32 %v2267_v32, %v3800_v35  ;;  %v3382_v47 = vsub.f32 %v5733_v34, %v3381_v48 }
 0x1ae   : > { %4767 = vmatprep.mubr.f32.mxu0 %v5605_v38  ;;  %5023 = vmatpush3.bf16.msra.mxu1 %v5663_v61  ;;  %v5777_v52 = vand.u32 4294901760, %v3797_v12 }
 0x1af   : > { %4802 = vmatprep.mubr.f32.mxu1 %v2854_v19  ;;  %5003 = vmatpush3.bf16.msra.mxu0 %v5000_v7  ;;  %v3889_v54 = vand.u32 4294901760, %v5756_v46  ;;  %v5076_v13 = vpack.c.bf16 %v5758_v36, %v5756_v46 }
 0x1b0   : > { %5025 = vmatprep.subr.bf16.mxu1 %v5024_v18  ;;  %5005 = vmatprep.subr.bf16.mxu0 %v5004_v9  ;;  %v3877_v63 = vsub.f32 %v3797_v12, %v5777_v52 }
 0x1b1   : > { %4803 = vmatmul.mubr.f32.vlgmr.msra.gmra.mrb[4].mxu1 %v2864_v50  ;;  %v5084_v57 = vpack.c.bf16 %v3896_v58, %v3889_v54 }
 0x1b2   : > { %4809 = vmatprep.mubr.f32.mxu1 %v5635_v14  ;;  %5027 = vmatpush3.bf16.msra.mxu1 %v5024_v18  ;;  %v3878_v4 = vand.u32 4294901760, %v3877_v63 }
 0x1b3   : > { %5029 = vmatprep.subr.bf16.mxu1 %v5028_v22 }
 0x1b5   : > { %4768 = vmatmul.mubr.f32.vlgmr.msra.gmra.mrb[4].mxu0 %v5616_v44 }
 0x1b6   : > { %4774 = vmatprep.mubr.f32.mxu0 %v5627_v45  ;;  %5007 = vmatpush3.bf16.msra.mxu0 %v5004_v9  ;;  %v5769_v45 = vsub.f32 %v3289_v43, %v5747_v40 }
 0x1b7   : > { %5009 = vmatprep.subr.bf16.mxu0 %v5639_v25 }
 0x1b8   : > { %v3370_v42 = vand.u32 4294901760, %v5769_v45 }
 0x1b9   : > { %4810 = vmatmul.mubr.f32.vlgmr.msra.gmra.mrb[4].mxu1 %v5651_v59 }
 0x1ba   : > { %4816 = vmatprep.mubr.f32.mxu1 %v5658_v56  ;;  %5031 = vmatpush3.bf16.msra.mxu1 %v5028_v22  ;;  %v3383_v56 = vand.u32 4294901760, %v3382_v47  ;;  %v3371_v51 = vsub.f32 %v5769_v45, %v3370_v42 }
 0x1bb   : > { %5033 = vmatprep.subr.bf16.mxu1 %v5663_v61 }
 0x1bc   : > { %v3372_v2 = vand.u32 4294901760, %v3371_v51 }
 0x1bd   : > { %4775 = vmatmul.mubr.f32.vlgmr.msra.gmra.mrb[4].mxu0 %v5643_v55  ;;  %v3360_v55 = vand.u32 4294901760, %v5752_v49 }
 0x1be   : > { %4781 = vmatprep.mubr.f32.mxu0 %v2344_v60  ;;  %5011 = vmatpush3.bf16.msra.mxu0 %v5639_v25  ;;  %v3867_v60 = vsub.f32 %v3794_v20, %v5762_v37 }
 0x1bf   : > { %5013 = vmatprep.subr.bf16.mxu0 %v5012_v15  ;;  %v3361_v0 = vsub.f32 %v5752_v49, %v3360_v55 }
 0x1c1   : > { %4817 = vmatmul.mubr.f32.vlgmr.msra.gmra.mrb[4].mxu1 %v5668_v1  ;;  %v3890_v1 = vsub.f32 %v5756_v46, %v3889_v54 }
 0x1c2   : > { %4823 = vmatprep.mubr.f32.mxu1 %v2852_v5  ;;  %5035 = vmatpush3.bf16.msra.mxu1 %v5663_v61  ;;  %v3362_v5 = vand.u32 4294901760, %v3361_v0 }
 0x1c3   : > { %5037 = vmatprep.subr.bf16.mxu1 %v5036_v24  ;;  %v3891_v6 = vand.u32 4294901760, %v3890_v1 }
 0x1c5   : > { %4782 = vmatmul.mubr.f32.vlgmr.msra.gmra.mrb[4].mxu0 %v2354_v62  ;;  %v3390_v62 = vand.u32 4294901760, %v3389_v41 }
 0x1c6   : > { %4788 = vmatprep.mubr.f32.mxu0 %v5605_v38  ;;  %5015 = vmatpush3.bf16.msra.mxu0 %v5012_v15 }
 0x1c7   : > { %5017 = vmatprep.subr.bf16.mxu0 %v5639_v25  ;;  %v5048_v3 = vpack.c.bf16 %v3390_v62, %v3383_v56 }
 0x1c9   : > { %4824 = vmatmul.mubr.f32.vlgmr.msra.gmra.mrb[4].mxu1 %v2862_v8 }
 0x1ca   : > { %4830 = vmatprep.mubr.f32.mxu1 %v5635_v14  ;;  %5039 = vmatpush3.bf16.msra.mxu1 %v5036_v24 }
 0x1cb   : > { %5041 = vmatprep.subr.bf16.mxu1 %v5663_v61 }
 0x1cd   : > { %4789 = vmatmul.mubr.f32.vlgmr.msra.gmra.mrb[4].mxu0 %v5616_v44 }
 0x1ce   : > { %4795 = vmatprep.mubr.f32.mxu0 %v5605_v38  ;;  %5019 = vmatpush3.bf16.msra.mxu0 %v5639_v25  ;;  %v3897_v38 = vsub.f32 %v5758_v36, %v3896_v58  ;;  %v3868_v25 = vand.u32 4294901760, %v3867_v60 }
 0x1cf   : > { %5045 = vmatprep.subr.bf16.mxu0 %v5765_v53 }
 0x1d0   : > { %v3898_v7 = vand.u32 4294901760, %v3897_v38  ;;  %v3869_v8 = vsub.f32 %v3867_v60, %v3868_v25 }
 0x1d1   : > { %4831 = vmatmul.mubr.f32.vlgmr.msra.gmra.mrb[4].mxu1 %v5651_v59 }
 0x1d2   : > { %4837 = vmatprep.mubr.f32.mxu1 %v5635_v14  ;;  %5043 = vmatpush3.bf16.msra.mxu1 %v5663_v61  ;;  %v3879_v14 = vsub.f32 %v3877_v63, %v3878_v4  ;;  %v5072_v10 = vpack.c.bf16 %v3898_v7, %v3891_v6  ;;  %v5052_v61 = vpack.c.bf16 %v5735_v28, %v5733_v34  ;;  %v3870_v11 = vand.u32 4294901760, %v3869_v8 }
 0x1d3   : > { %5069 = vmatprep.subr.bf16.mxu1 %v5786_v27 }
 0x1d5   : > { %4796 = vmatmul.mubr.f32.vlgmr.msra.gmra.mrb[4].mxu0 %v5616_v44  ;;  %v3880_v44 = vand.u32 4294901760, %v3879_v14 }
 0x1d6   : > { %5047 = vmatpush3.bf16.msra.mxu0 %v5765_v53  ;;  %4844 = vmatprep.mubr.f32.mxu0 %v3362_v5 }
 0x1d7   : > { %5049 = vmatprep.subr.bf16.mxu0 %v5048_v3 }
 0x1d9   : > { %4838 = vmatmul.mubr.f32.vlgmr.msra.gmra.mrb[4].mxu1 %v5651_v59  ;;  %4845 = vmatmul.mubr.f32.vlgmr.msra.gmra.mrb[6].mxu0 %v3372_v2  ;;  %v5060_v59 = vpack.c.bf16 %v3388_v29, %v3381_v48 }
 0x1da   : > { %4851 = vmatprep.mubr.f32.mxu0 %v5737_v39  ;;  %5071 = vmatpush3.bf16.msra.mxu1 %v5786_v27 }
 0x1db   : > { %4886 = vmatprep.mubr.f32.mxu1 %v3870_v11  ;;  %5051 = vmatpush3.bf16.msra.mxu0 %v5048_v3 }
 0x1dc   : > { %5073 = vmatprep.subr.bf16.mxu1 %v5072_v10  ;;  %5053 = vmatprep.subr.bf16.mxu0 %v5052_v61 }
 0x1dd   : > { %4887 = vmatmul.mubr.f32.vlgmr.msra.gmra.mrb[6].mxu1 %v3880_v44 }
 0x1de   : > { %4893 = vmatprep.mubr.f32.mxu1 %v5762_v37  ;;  %5075 = vmatpush3.bf16.msra.mxu1 %v5072_v10 }
 0x1df   : > { %5077 = vmatprep.subr.bf16.mxu1 %v5076_v13 }
 0x1e1   : > { %4852 = vmatmul.mubr.f32.vlgmr.msra.gmra.mrb[6].mxu0 %v5747_v40 }
 0x1e2   : > { %4858 = vmatprep.mubr.f32.mxu0 %v5752_v49  ;;  %5055 = vmatpush3.bf16.msra.mxu0 %v5052_v61 }
 0x1e3   : > { %5057 = vmatprep.subr.bf16.mxu0 %v5765_v53 }
 0x1e5   : > { %4894 = vmatmul.mubr.f32.vlgmr.msra.gmra.mrb[6].mxu1 %v5777_v52 }
 0x1e6   : > { %4900 = vmatprep.mubr.f32.mxu1 %v3867_v60  ;;  %5079 = vmatpush3.bf16.msra.mxu1 %v5076_v13 }
 0x1e7   : > { %5081 = vmatprep.subr.bf16.mxu1 %v5786_v27 }
 0x1e9   : > { %4859 = vmatmul.mubr.f32.vlgmr.msra.gmra.mrb[6].mxu0 %v5769_v45 }
 0x1ea   : > { %4865 = vmatprep.mubr.f32.mxu0 %v3360_v55  ;;  %5059 = vmatpush3.bf16.msra.mxu0 %v5765_v53 }
 0x1eb   : > { %5061 = vmatprep.subr.bf16.mxu0 %v5060_v59 }
 0x1ed   : > { %4901 = vmatmul.mubr.f32.vlgmr.msra.gmra.mrb[6].mxu1 %v3877_v63 }
 0x1ee   : > { %4907 = vmatprep.mubr.f32.mxu1 %v3868_v25  ;;  %5083 = vmatpush3.bf16.msra.mxu1 %v5786_v27 }
 0x1ef   : > { %5085 = vmatprep.subr.bf16.mxu1 %v5084_v57 }
 0x1f1   : > { %4866 = vmatmul.mubr.f32.vlgmr.msra.gmra.mrb[6].mxu0 %v3370_v42 }
 0x1f2   : > { %4872 = vmatprep.mubr.f32.mxu0 %v5737_v39  ;;  %5063 = vmatpush3.bf16.msra.mxu0 %v5060_v59 }
 0x1f3   : > { %5065 = vmatprep.subr.bf16.mxu0 %v5765_v53 }
 0x1f5   : > { %4908 = vmatmul.mubr.f32.vlgmr.msra.gmra.mrb[6].mxu1 %v3878_v4 }
 0x1f6   : > { %4914 = vmatprep.mubr.f32.mxu1 %v5762_v37  ;;  %5087 = vmatpush3.bf16.msra.mxu1 %v5084_v57 }
 0x1f7   : > { %5089 = vmatprep.subr.bf16.mxu1 %v5786_v27 }
 0x1f9   : > { %4873 = vmatmul.mubr.f32.vlgmr.msra.gmra.mrb[6].mxu0 %v5747_v40 }
 0x1fa   : > { %4879 = vmatprep.mubr.f32.mxu0 %v5737_v39  ;;  %5067 = vmatpush3.bf16.msra.mxu0 %v5765_v53 }
 0x1fd   : > { %4915 = vmatmul.mubr.f32.vlgmr.msra.gmra.mrb[6].mxu1 %v5777_v52 }
 0x1fe   : > { %4921 = vmatprep.mubr.f32.mxu1 %v5762_v37  ;;  %5091 = vmatpush3.bf16.msra.mxu1 %v5786_v27 }
 0x201   : > { %4880 = vmatmul.mubr.f32.vlgmr.msra.gmra.mrb[6].mxu0 %v5747_v40 }
 0x205   : > { %4922 = vmatmul.mubr.f32.vlgmr.msra.gmra.mrb[6].mxu1 %v5777_v52 }
 0x250   : > { %v871_v17 = vpop.f32.mrb[0].mxu0 }
 0x251   : > { %4301 = vst.msk [vmem:[%s259_s13] sm:$0xff] %vm273_vm0, %v871_v17  ;;  %v4629_v18 = vpop.f32.mrb[1].mxu0 }
 0x254   : > { %v1333_v9 = vpop.f32.mrb[0].mxu1 }
 0x255   : > { %4302 = vst.msk [vmem:[%s259_s13 + $0x8] sm:$0xff] %vm273_vm0, %v1333_v9  ;;  %v4671_v19 = vpop.f32.mrb[1].mxu1 }
 0x27c   : > { %v1795_v50 = vpop.f32.mrb[2].mxu0 }
 0x27d   : > { %4303 = vst.msk [vmem:[%s259_s13 + $0x10] sm:$0xff] %vm273_vm0, %v1795_v50  ;;  %v4713_v22 = vpop.f32.mrb[3].mxu0 }
 0x280   : > { %v2257_v15 = vpop.f32.mrb[2].mxu1 }
 0x281   : > { %4304 = vst.msk [vmem:[%s259_s13 + $0x18] sm:$0xff] %vm273_vm0, %v2257_v15  ;;  %v4755_v23 = vpop.f32.mrb[3].mxu1 }
 0x2a8   : > { %v4797_v16 = vpop.f32.mrb[4].mxu0 }
 0x2a9   : > { %4307 = vst.msk [vmem:[%s264_s16 + $0x8] sm:$0xff] %vm4305_vm2, %v4797_v16  ;;  %v2767_v24 = vpop.f32.mrb[5].mxu0 }
 0x2aa   : > { %4306 = vst.msk [vmem:[%s264_s16] sm:$0xff] %vm4305_vm2, %v2767_v24 }
 0x2ac   : > { %v4839_v26 = vpop.f32.mrb[4].mxu1 }
 0x2ad   : > { %4309 = vst.msk [vmem:[%s264_s16 + $0x18] sm:$0xff] %vm4305_vm2, %v4839_v26  ;;  %v3275_v30 = vpop.f32.mrb[5].mxu1 }
 0x2ae   : > { %4308 = vst.msk [vmem:[%s264_s16 + $0x10] sm:$0xff] %vm4305_vm2, %v3275_v30 }
 0x2d4   : > { %v4881_v31 = vpop.f32.mrb[6].mxu0 }
 0x2d5   : > { %4311 = vst.msk [vmem:[%s264_s16 + $0x28] sm:$0xff] %vm4305_vm2, %v4881_v31  ;;  %v3783_v32 = vpop.f32.mrb[7].mxu0 }
 0x2d6   : > { %4310 = vst.msk [vmem:[%s264_s16 + $0x20] sm:$0xff] %vm4305_vm2, %v3783_v32 }
 0x2d8   : > { %v4923_v33 = vpop.f32.mrb[6].mxu1 }
 0x2d9   : > { %4313 = vst.msk [vmem:[%s264_s16 + $0x38] sm:$0xff] %vm4305_vm2, %v4923_v33  ;;  %v4291_v34 = vpop.f32.mrb[7].mxu1 }
 0x2da   : > { %4312 = vst.msk [vmem:[%s264_s16 + $0x30] sm:$0xff] %vm4305_vm2, %v4291_v34 }
 0x2db PF: > { %s17_s21 = sadd.s32 1, %s5205_s21  }
 0x2dc   : > { %p14_p4 = scmp.ge.s32.totalorder %s17_s21, 4  }
 0x2de   :  { %16 = sbr.rel (!%p14_p4) target bundleno = 1 (0x1), region = 82 }

// kernel: guided_spatial_sr.8
= control target key start
LH: loop header
LB: loop body
LE: loop exit
PB: predicated region body
PF: predicated region fallthrough
CT: control target
= control target key end

     0   :  { %s5333_s24 = smov 0   ;;  %s5976_s0 = inlined_call_operand.vmem [shape: f32[2,4,16,16], index: 0, kind: input, shape index: {}]   ;;  %s5977_s1 = inlined_call_operand.vmem [shape: f32[1,1,16], index: 1, kind: input, shape index: {}]   ;;  %s5978_s2 = inlined_call_operand.vmem [shape: f32[1,1,16], index: 2, kind: input, shape index: {}]   ;;  %s5979_s3 = inlined_call_operand.vmem [shape: f32[4,8,16], index: 3, kind: input, shape index: {}]   ;;  %s5980_s4 = inlined_call_operand.vmem [shape: f32[4,16,8], index: 4, kind: input, shape index: {}]   ;;  %s5981_s5 = inlined_call_operand.vmem [shape: f32[2,4,8,16], index: 5, kind: output, shape index: {0}]   ;;  %s5982_s6 = inlined_call_operand.vmem [shape: f32[2,4,16,8], index: 6, kind: output, shape index: {1}]   ;;  %s5983_s7 = inlined_call_operand.vmem [shape: f32[2,4,16,16], index: 7, kind: output, shape index: {2}]  }
   0x1 LB: > { %s4482_s25 = sadd.s32 4294967295, %s5288_s24   ;;  %p4486_p0 = scmp.ge.s32.totalorder %s5288_s24, 1  ;;  %s5288_s24 = sphi %s5333_s24, %s18_s24  }
   0x2   : > { %p242_p1 = scmp.lt.s32.totalorder %s5288_s24, 3 }
   0x4   : > { %p243_p2 = pnand %p4486_p0, %p242_p1 }
   0x5   : > { %p284_p3 = scmp.lt.s32.totalorder (!%p243_p2), %s4482_s25, 1  ;;  %vm312_vm0 = vcmask (!%p243_p2), 130048   ;;  %v5290_v56 = vmov (!%p243_p2), 0.0|0.0   ;;  %vm5291_vm1 = vmmov (!%p243_p2), 0   ;;  %v5292_v57 = vmov (!%p243_p2), 0.0  }
   0x6   : > { %246 = sbr.rel (%p243_p2) target bundleno = 731 (0x2db), region = 40  ;;  %5007 = vmatprep.subr.bf16.mxu0 (!%p243_p2), %v5290_v56  ;;  %5025 = vmatprep.subr.bf16.mxu1 (!%p243_p2), %v5290_v56  ;;  %vm4344_vm2 = vcmask (!%p243_p2), 64512  }
   0x7   : > { %4675 = vmatprep.mubr.msk.f32.mxu0 (!%p243_p2), %vm5291_vm1, %v5292_v57  ;;  %4717 = vmatprep.mubr.msk.f32.mxu1 (!%p243_p2), %vm5291_vm1, %v5292_v57 }
   0xd   : > { %s5985_s25 = smov (!%p284_p3, %s4482_s25), 1 }
   0xe   : > { %s5344_s26 = sshll.u32 %s5985_s25, 6  ;;  %s4500_s18 = sshll.u32 %s5985_s25, 5 }
   0xf   : > { %s288_s29 = scalar_lea.vmem %s5976_s0, %s5344_s26  ;;  %s5435_s17 = scalar_lea.vmem %s5983_s7, %s5344_s26 }
  0x10   : > { %v304_v0 = vld [vmem:[%s288_s29] sm:$0xff]  ;;  %v306_v1 = vld [vmem:[%s288_s29 + $0x10] sm:$0xff]  ;;  %v305_v2 = vld [vmem:[%s288_s29 + $0x8] sm:$0xff]  ;;  %s293_s21 = scalar_lea.vmem %s5981_s5, %s4500_s18  ;;  %s298_s23 = scalar_lea.vmem %s5982_s6, %s5344_s26 }
  0x11   : > { %v313_v3 = vsel %vm312_vm0, %v304_v0, 0.0  ;;  %v319_v4 = vsel %vm312_vm0, %v306_v1, 0.0  ;;  %v307_v5 = vld [vmem:[%s288_s29 + $0x18] sm:$0xff]  ;;  %v316_v6 = vsel %vm312_vm0, %v305_v2, 0.0  ;;  %v308_v8 = vld [vmem:[%s288_s29 + $0x20] sm:$0xff]  ;;  %v309_v9 = vld [vmem:[%s288_s29 + $0x28] sm:$0xff] }
  0x12   : > { %314 = vadd.xlane.f32.xlu0 %v313_v3  ;;  %320 = vadd.xlane.f32.xlu1 %v319_v4  ;;  %v322_v7 = vsel %vm312_vm0, %v307_v5, 0.0  ;;  %v325_v10 = vsel %vm312_vm0, %v308_v8, 0.0  ;;  %v328_v11 = vsel %vm312_vm0, %v309_v9, 0.0  ;;  %v310_v12 = vld [vmem:[%s288_s29 + $0x30] sm:$0xff]  ;;  %v311_v13 = vld [vmem:[%s288_s29 + $0x38] sm:$0xff] }
  0x13   : > { %v331_v14 = vsel %vm312_vm0, %v310_v12, 0.0  ;;  %v334_v15 = vsel %vm312_vm0, %v311_v13, 0.0 }
  0x16   : > { %317 = vadd.xlane.f32.xlu0 %v316_v6  ;;  %323 = vadd.xlane.f32.xlu1 %v322_v7 }
  0x1a   : > { %326 = vadd.xlane.f32.xlu0 %v325_v10  ;;  %329 = vadd.xlane.f32.xlu1 %v328_v11 }
  0x1e   : > { %332 = vadd.xlane.f32.xlu0 %v331_v14  ;;  %335 = vadd.xlane.f32.xlu1 %v334_v15 }
  0x9f   : > { %v315_v16 = vpop.xlane.xlu0 %314  ;;  %v321_v17 = vpop.xlane.xlu1 %320 }
  0xa0   : > { %v338_v18 = vmul.f32 0.0625, %v315_v16  ;;  %v340_v19 = vmul.f32 0.0625, %v321_v17 }
  0xa2   : > { %v5358_v20 = vsub.f32 %v304_v0, %v338_v18  ;;  %v5360_v21 = vsub.f32 %v306_v1, %v340_v19  ;;  %v448_v1 = vld [vmem:[%s5979_s3] sm:$0xff] }
  0xa3   : > { %v318_v22 = vpop.xlane.xlu0 %317  ;;  %v324_v23 = vpop.xlane.xlu1 %323  ;;  %v453_v6 = vsel %vm312_vm0, %v448_v1, 0  ;;  %v5417_v19 = vld [vmem:[%s5977_s1] ss:$0 sm:$0xff] }
  0xa4   : > { %v339_v24 = vmul.f32 0.0625, %v318_v22  ;;  %v341_v25 = vmul.f32 0.0625, %v324_v23  ;;  %v354_v26 = vmul.f32 %v5358_v20, %v5358_v20  ;;  %v356_v27 = vmul.f32 %v5360_v21, %v5360_v21 }
  0xa5   : > { %v5408_v11 = vand.u32 4294901760, %v453_v6 }
  0xa6   : > { %v5366_v28 = vsub.f32 %v305_v2, %v339_v24  ;;  %v5368_v29 = vsub.f32 %v307_v5, %v341_v25  ;;  %v362_v30 = vsel %vm312_vm0, %v354_v26, 0.0  ;;  %v368_v33 = vsel %vm312_vm0, %v356_v27, 0.0  ;;  %v5426_v27 = vld [vmem:[%s5978_s2] ss:$0 sm:$0xff] }
  0xa7   : > { %363 = vadd.xlane.f32.xlu0 %v362_v30  ;;  %v327_v31 = vpop.xlane.xlu0 %326  ;;  %v330_v32 = vpop.xlane.xlu1 %329  ;;  %v5420_v24 = vsub.f32 %v453_v6, %v5408_v11 }
  0xa8   : > { %v342_v34 = vmul.f32 0.0625, %v327_v31  ;;  %v343_v35 = vmul.f32 0.0625, %v330_v32  ;;  %v355_v36 = vmul.f32 %v5366_v28, %v5366_v28  ;;  %v357_v37 = vmul.f32 %v5368_v29, %v5368_v29 }
  0xaa   : > { %v5376_v38 = vsub.f32 %v308_v8, %v342_v34  ;;  %v5378_v39 = vsub.f32 %v309_v9, %v343_v35  ;;  %v365_v40 = vsel %vm312_vm0, %v355_v36, 0.0  ;;  %v371_v43 = vsel %vm312_vm0, %v357_v37, 0.0 }
  0xab   : > { %369 = vadd.xlane.f32.xlu0 %v368_v33  ;;  %366 = vadd.xlane.f32.xlu1 %v365_v40  ;;  %v333_v41 = vpop.xlane.xlu0 %332  ;;  %v336_v42 = vpop.xlane.xlu1 %335  ;;  %v524_v34 = vand.u32 4294901760, %v5420_v24 }
  0xac   : > { %v344_v44 = vmul.f32 0.0625, %v333_v41  ;;  %v345_v45 = vmul.f32 0.0625, %v336_v42  ;;  %v358_v46 = vmul.f32 %v5376_v38, %v5376_v38  ;;  %v359_v47 = vmul.f32 %v5378_v39, %v5378_v39 }
  0xae   : > { %v5386_v48 = vsub.f32 %v310_v12, %v344_v44  ;;  %v5388_v49 = vsub.f32 %v311_v13, %v345_v45  ;;  %v374_v50 = vsel %vm312_vm0, %v358_v46, 0.0  ;;  %v377_v51 = vsel %vm312_vm0, %v359_v47, 0.0  ;;  %v449_v12 = vld [vmem:[%s5979_s3 + $0x8] sm:$0xff] }
  0xaf   : > { %372 = vadd.xlane.f32.xlu1 %v371_v43  ;;  %375 = vadd.xlane.f32.xlu0 %v374_v50  ;;  %v915_v17 = vsel %vm312_vm0, %v449_v12, 0 }
  0xb0   : > { %v360_v52 = vmul.f32 %v5386_v48, %v5386_v48  ;;  %v361_v53 = vmul.f32 %v5388_v49, %v5388_v49  ;;  %v5428_v31 = vand.u32 4294901760, %v915_v17 }
  0xb2   : > { %v380_v54 = vsel %vm312_vm0, %v360_v52, 0.0  ;;  %v383_v55 = vsel %vm312_vm0, %v361_v53, 0.0  ;;  %v5444_v41 = vsub.f32 %v915_v17, %v5428_v31 }
  0xb3   : > { %378 = vadd.xlane.f32.xlu1 %v377_v51  ;;  %381 = vadd.xlane.f32.xlu0 %v380_v54 }
  0xb4   : > { %v986_v53 = vand.u32 4294901760, %v5444_v41 }
  0xb7   : > { %384 = vadd.xlane.f32.xlu1 %v383_v55 }
 0x134   : > { %v364_v58 = vpop.xlane.xlu0 %363 }
 0x135   : > { %v386_v59 = vmul.f32 0.0625, %v364_v58 }
 0x137   : > { %v394_v60 = vadd.f32 16.0, %v386_v59 }
 0x138   : > { %v367_v61 = vpop.xlane.xlu1 %366  ;;  %v370_v62 = vpop.xlane.xlu0 %369 }
 0x139   : > { %5266 = vrsqrt.f32 %v394_v60  ;;  %v387_v63 = vmul.f32 0.0625, %v367_v61  ;;  %v388_v0 = vmul.f32 0.0625, %v370_v62 }
 0x13b   : > { %v395_v2 = vadd.f32 16.0, %v387_v63  ;;  %v396_v3 = vadd.f32 16.0, %v388_v0 }
 0x13c   : > { %v373_v4 = vpop.xlane.xlu1 %372  ;;  %v376_v5 = vpop.xlane.xlu0 %375 }
 0x13d   : > { %5268 = vrsqrt.f32 %v395_v2  ;;  %v389_v7 = vmul.f32 0.0625, %v373_v4  ;;  %v390_v8 = vmul.f32 0.0625, %v376_v5 }
 0x13e   : > { %5270 = vrsqrt.f32 %v396_v3 }
 0x13f   : > { %v397_v9 = vadd.f32 16.0, %v389_v7  ;;  %v398_v10 = vadd.f32 16.0, %v390_v8 }
 0x140   : > { %v379_v13 = vpop.xlane.xlu1 %378  ;;  %v382_v14 = vpop.xlane.xlu0 %381 }
 0x141   : > { %5272 = vrsqrt.f32 %v397_v9  ;;  %v391_v15 = vmul.f32 0.0625, %v379_v13  ;;  %v392_v16 = vmul.f32 0.0625, %v382_v14 }
 0x142   : > { %5274 = vrsqrt.f32 %v398_v10 }
 0x143   : > { %v5267_v18 = vpop.eup %5266  ;;  %v399_v22 = vadd.f32 16.0, %v391_v15  ;;  %v400_v23 = vadd.f32 16.0, %v392_v16 }
 0x144   : > { %v410_v25 = vmul.f32 %v5267_v18, %v5358_v20  ;;  %v385_v26 = vpop.xlane.xlu1 %384 }
 0x145   : > { %5276 = vrsqrt.f32 %v399_v22  ;;  %v393_v30 = vmul.f32 0.0625, %v385_v26 }
 0x146   : > { %v425_v32 = vmul.f32 %v5417_v19, %v410_v25  ;;  %5278 = vrsqrt.f32 %v400_v23 }
 0x147   : > { %v5269_v33 = vpop.eup %5268  ;;  %v401_v20 = vadd.f32 16.0, %v393_v30 }
 0x148   : > { %v5271_v35 = vpop.eup %5270  ;;  %v411_v36 = vmul.f32 %v5269_v33, %v5366_v28  ;;  %v5440_v37 = vadd.f32 %v5426_v27, %v425_v32 }
 0x149   : > { %v412_v40 = vmul.f32 %v5271_v35, %v5360_v21  ;;  %5280 = vrsqrt.f32 %v401_v20  ;;  %v525_v21 = vsub.f32 %v5420_v24, %v524_v34 }
 0x14a   : > { %v426_v42 = vmul.f32 %v5417_v19, %v411_v36  ;;  %v456_v43 = vand.u32 4294901760, %v5440_v37  ;;  %4353 = vst.msk [vmem:[%s5435_s17] sm:$0xff] %vm312_vm0, %v5440_v37 }
 0x14b   : > { %v5273_v44 = vpop.eup %5272  ;;  %v427_v28 = vmul.f32 %v5417_v19, %v412_v40  ;;  %v526_v59 = vand.u32 4294901760, %v525_v21  ;;  %v450_v40 = vld [vmem:[%s5979_s3 + $0x10] sm:$0xff] }
 0x14c   : > { %v5275_v45 = vpop.eup %5274  ;;  %v413_v46 = vmul.f32 %v5273_v44, %v5368_v29  ;;  %v5457_v47 = vadd.f32 %v5426_v27, %v426_v42  ;;  %v5460_v50 = vsub.f32 %v5440_v37, %v456_v43  ;;  %v1377_v42 = vsel %vm312_vm0, %v450_v40, 0 }
 0x14d   : > { %v414_v51 = vmul.f32 %v5275_v45, %v5376_v38  ;;  %v5464_v52 = vadd.f32 %v5426_v27, %v427_v28  ;;  %v5579_v21 = vand.u32 4294901760, %v1377_v42 }
 0x14e   : > { %v428_v54 = vmul.f32 %v5417_v19, %v413_v46  ;;  %v459_v55 = vand.u32 4294901760, %v5457_v47  ;;  %4354 = vst.msk [vmem:[%s5435_s17 + $0x8] sm:$0xff] %vm312_vm0, %v5457_v47  ;;  %v535_v38 = vand.u32 4294901760, %v5460_v50 }
 0x14f   : > { %v5277_v29 = vpop.eup %5276  ;;  %v429_v58 = vmul.f32 %v5417_v19, %v414_v51  ;;  %v918_v60 = vand.u32 4294901760, %v5464_v52  ;;  %4355 = vst.msk [vmem:[%s5435_s17 + $0x10] sm:$0xff] %vm312_vm0, %v5464_v52 }
 0x150   : > { %v5279_v61 = vpop.eup %5278  ;;  %v415_v62 = vmul.f32 %v5277_v29, %v5378_v39  ;;  %v5479_v63 = vpack.c.bf16 %v459_v55, %v456_v43  ;;  %v5482_v0 = vsub.f32 %v5457_v47, %v459_v55  ;;  %v5485_v1 = vadd.f32 %v5426_v27, %v428_v54  ;;  %v451_v43 = vld [vmem:[%s5979_s3 + $0x18] sm:$0xff] }
 0x151   : > { %v5488_v2 = vadd.f32 %v5426_v27, %v429_v58  ;;  %v416_v3 = vmul.f32 %v5279_v61, %v5386_v48  ;;  %v5492_v4 = vsub.f32 %v5464_v52, %v918_v60  ;;  %v987_v39 = vsub.f32 %v5444_v41, %v986_v53 }
 0x152   : > { %v430_v5 = vmul.f32 %v5417_v19, %v415_v62  ;;  %5009 = vmatpush3.bf16.msra.mxu0 %v5479_v63  ;;  %v921_v6 = vand.u32 4294901760, %v5485_v1  ;;  %4356 = vst.msk [vmem:[%s5435_s17 + $0x18] sm:$0xff] %vm312_vm0, %v5485_v1  ;;  %v542_v7 = vand.u32 4294901760, %v5482_v0  ;;  %v536_v9 = vsub.f32 %v5460_v50, %v535_v38 }
 0x153   : > { %v5281_v48 = vpop.eup %5280  ;;  %4357 = vst.msk [vmem:[%s5435_s17 + $0x20] sm:$0xff] %vm312_vm0, %v5488_v2  ;;  %v431_v8 = vmul.f32 %v5417_v19, %v416_v3  ;;  %5010 = vmatprep.subr.bf16.mxu0 %v5290_v56  ;;  %v997_v10 = vand.u32 4294901760, %v5492_v4  ;;  %v988_v17 = vand.u32 4294901760, %v987_v39  ;;  %v5014_v36 = vpack.c.bf16 %v5482_v0, %v5460_v50 }
 0x154   : > { %v5514_v12 = vadd.f32 %v5426_v27, %v430_v5  ;;  %v417_v13 = vmul.f32 %v5281_v48, %v5388_v49  ;;  %v5517_v14 = vpack.c.bf16 %v921_v6, %v918_v60  ;;  %v1003_v15 = vsub.f32 %v5485_v1, %v921_v6 }
 0x155   : > { %v5521_v16 = vadd.f32 %v5426_v27, %v431_v8  ;;  %4676 = vmatmul.mubr.f32.vlgmr.msra.gmra.mrb[0].mxu0 %v526_v59  ;;  %v543_v18 = vsub.f32 %v5482_v0, %v542_v7  ;;  %v998_v49 = vsub.f32 %v5492_v4, %v997_v10  ;;  %v537_v25 = vand.u32 4294901760, %v536_v9 }
 0x156   : > { %4358 = vst.msk [vmem:[%s5435_s17 + $0x28] sm:$0xff] %vm312_vm0, %v5514_v12  ;;  %v432_v22 = vmul.f32 %v5417_v19, %v417_v13  ;;  %5027 = vmatpush3.bf16.msra.mxu1 %v5517_v14  ;;  %4682 = vmatprep.mubr.msk.f32.mxu0 %vm5291_vm1, %v5292_v57  ;;  %v1004_v23 = vand.u32 4294901760, %v1003_v15  ;;  %v5020_v44 = vpack.c.bf16 %v542_v7, %v535_v38  ;;  %v1383_v28 = vand.u32 4294901760, %v5514_v12 }
 0x157   : > { %4359 = vst.msk [vmem:[%s5435_s17 + $0x30] sm:$0xff] %vm312_vm0, %v5521_v16  ;;  %v544_v26 = vand.u32 4294901760, %v543_v18  ;;  %5028 = vmatprep.subr.bf16.mxu1 %v5290_v56  ;;  %v999_v33 = vand.u32 4294901760, %v998_v49  ;;  %v1839_v45 = vsel %vm312_vm0, %v451_v43, 0  ;;  %v1380_v46 = vand.u32 4294901760, %v5488_v2  ;;  %v2301_v49 = vld [vmem:[%s5980_s4 + $0x8] sm:$0xff] }
 0x158   : > { %v5537_v30 = vadd.f32 %v5426_v27, %v432_v22  ;;  %v1005_v32 = vsub.f32 %v1003_v15, %v1004_v23  ;;  %v5032_v27 = vpack.c.bf16 %v1003_v15, %v5492_v4  ;;  %v5038_v51 = vpack.c.bf16 %v1004_v23, %v997_v10  ;;  %v2300_v22 = vld [vmem:[%s5980_s4] sm:$0xff] }
 0x159   : > { %4718 = vmatmul.mubr.f32.vlgmr.msra.gmra.mrb[0].mxu1 %v988_v17  ;;  %v5011_v19 = vpack.c.bf16 %v544_v26, %v537_v25  ;;  %v5597_v54 = vsub.f32 %v1377_v42, %v5579_v21  ;;  %v1842_v55 = vand.u32 4294901760, %v5521_v16  ;;  %v5602_v29 = vsub.f32 %v5488_v2, %v1380_v46  ;;  %v2302_v26 = vld [vmem:[%s5980_s4 + $0x10] sm:$0xff] }
 0x15a   : > { %4360 = vst.msk [vmem:[%s5435_s17 + $0x38] sm:$0xff] %vm312_vm0, %v5537_v30  ;;  %v1006_v20 = vand.u32 4294901760, %v1005_v32  ;;  %4724 = vmatprep.mubr.msk.f32.mxu1 %vm5291_vm1, %v5292_v57  ;;  %v1845_v50 = vand.u32 4294901760, %v5537_v30  ;;  %v5641_v5 = vpack.c.bf16 %v1383_v28, %v1380_v46  ;;  %v2315_v23 = vand.u32 4294901760, %v2300_v22  ;;  %v2303_v32 = vld [vmem:[%s5980_s4 + $0x18] sm:$0xff] }
 0x15b   : > { %5012 = vmatpush3.bf16.msra.mxu0 %v5011_v19  ;;  %v1448_v59 = vand.u32 4294901760, %v5597_v54  ;;  %v5614_v60 = vsub.f32 %v5521_v16, %v1842_v55  ;;  %v1459_v38 = vand.u32 4294901760, %v5602_v29  ;;  %v2318_v25 = vand.u32 4294901760, %v2301_v49 }
 0x15c   : > { %5013 = vmatprep.subr.bf16.mxu0 %v5290_v56  ;;  %v5029_v35 = vpack.c.bf16 %v1006_v20, %v999_v33  ;;  %v5654_v10 = vpack.c.bf16 %v1845_v50, %v1842_v55  ;;  %v2309_v19 = vsel %vm312_vm0, %v5440_v37, 0  ;;  %v2823_v33 = vand.u32 4294901760, %v2302_v26 }
 0x15d   : > { %v1921_v3 = vand.u32 4294901760, %v5614_v60  ;;  %v1460_v4 = vsub.f32 %v5602_v29, %v1459_v38  ;;  %v5703_v20 = vsub.f32 %v2300_v22, %v2315_v23  ;;  %v5711_v40 = vand.u32 4294901760, %v2309_v19 }
 0x15e   : > { %4683 = vmatmul.mubr.f32.vlgmr.msra.gmra.mrb[0].mxu0 %v5408_v11  ;;  %5030 = vmatpush3.bf16.msra.mxu1 %v5029_v35  ;;  %v5705_v35 = vsub.f32 %v2301_v49, %v2318_v25  ;;  %v2312_v42 = vsel %vm312_vm0, %v5457_v47, 0  ;;  %v2817_v37 = vsel %vm312_vm0, %v5464_v52, 0  ;;  %v2820_v52 = vsel %vm312_vm0, %v5485_v1, 0 }
 0x15f   : > { %5015 = vmatpush3.bf16.msra.mxu0 %v5014_v36  ;;  %5031 = vmatprep.subr.bf16.mxu1 %v5290_v56  ;;  %v1922_v8 = vsub.f32 %v5614_v60, %v1921_v3  ;;  %v1461_v9 = vand.u32 4294901760, %v1460_v4  ;;  %v2826_v36 = vand.u32 4294901760, %v2303_v32  ;;  %v2404_v43 = vand.u32 4294901760, %v5703_v20 }
 0x160   : > { %4689 = vmatprep.mubr.msk.f32.mxu0 %vm5291_vm1, %v5292_v57  ;;  %5016 = vmatprep.subr.bf16.mxu0 %v5290_v56 }
 0x161   : > { %4725 = vmatmul.mubr.f32.vlgmr.msra.gmra.mrb[0].mxu1 %v5428_v31  ;;  %v1923_v15 = vand.u32 4294901760, %v1922_v8  ;;  %v5734_v46 = vsub.f32 %v2303_v32, %v2826_v36  ;;  %v2405_v1 = vsub.f32 %v5703_v20, %v2404_v43 }
 0x162   : > { %5033 = vmatpush3.bf16.msra.mxu1 %v5032_v27  ;;  %4731 = vmatprep.mubr.msk.f32.mxu1 %vm5291_vm1, %v5292_v57 }
 0x163   : > { %5034 = vmatprep.subr.bf16.mxu1 %v5290_v56 }
 0x166   : > { %4690 = vmatmul.mubr.f32.vlgmr.msra.gmra.mrb[0].mxu0 %v5420_v24  ;;  %v5590_v24 = vsub.f32 %v5514_v12, %v1383_v28  ;;  %v5723_v28 = vsub.f32 %v2302_v26, %v2823_v33  ;;  %v3325_v26 = vsel %vm312_vm0, %v5488_v2, 0 }
 0x167   : > { %5018 = vmatpush3.bf16.msra.mxu0 %v5479_v63  ;;  %4696 = vmatprep.mubr.msk.f32.mxu0 %vm5291_vm1, %v5292_v57 }
 0x168   : > { %5019 = vmatprep.subr.bf16.mxu0 %v5290_v56 }
 0x169   : > { %4732 = vmatmul.mubr.f32.vlgmr.msra.gmra.mrb[0].mxu1 %v5444_v41  ;;  %v5605_v41 = vsub.f32 %v5537_v30, %v1845_v50  ;;  %v5741_v50 = vand.u32 4294901760, %v2817_v37 }
 0x16a   : > { %5036 = vmatpush3.bf16.msra.mxu1 %v5517_v14  ;;  %4738 = vmatprep.mubr.msk.f32.mxu1 %vm5291_vm1, %v5292_v57 }
 0x16b   : > { %5037 = vmatprep.subr.bf16.mxu1 %v5290_v56  ;;  %v1928_v61 = vand.u32 4294901760, %v5605_v41  ;;  %v5068_v18 = vpack.c.bf16 %v5605_v41, %v5614_v60  ;;  %v2406_v60 = vand.u32 4294901760, %v2405_v1 }
 0x16d   : > { %v1929_v39 = vsub.f32 %v5605_v41, %v1928_v61  ;;  %v5074_v47 = vpack.c.bf16 %v1928_v61, %v1921_v3  ;;  %v2912_v41 = vand.u32 4294901760, %v5723_v28 }
 0x16e   : > { %4697 = vmatmul.mubr.f32.vlgmr.msra.gmra.mrb[0].mxu0 %v524_v34  ;;  %v5592_v34 = vand.u32 4294901760, %v1839_v45 }
 0x16f   : > { %5021 = vmatpush3.bf16.msra.mxu0 %v5020_v44  ;;  %4703 = vmatprep.mubr.msk.f32.mxu0 %vm5291_vm1, %v5292_v57  ;;  %v1930_v13 = vand.u32 4294901760, %v1929_v39  ;;  %v2411_v44 = vand.u32 4294901760, %v5705_v35 }
 0x170   : > { %5022 = vmatprep.subr.bf16.mxu0 %v5290_v56  ;;  %v5609_v58 = vsub.f32 %v1839_v45, %v5592_v34  ;;  %v5730_v45 = vand.u32 4294901760, %v2312_v42 }
 0x171   : > { %4739 = vmatmul.mubr.f32.vlgmr.msra.gmra.mrb[0].mxu1 %v986_v53  ;;  %v1466_v53 = vand.u32 4294901760, %v5590_v24  ;;  %v5065_v17 = vpack.c.bf16 %v1930_v13, %v1923_v15  ;;  %v5111_v15 = vpack.c.bf16 %v5734_v46, %v5723_v28 }
 0x172   : > { %5039 = vmatpush3.bf16.msra.mxu1 %v5038_v51  ;;  %4745 = vmatprep.mubr.msk.f32.mxu1 %vm5291_vm1, %v5292_v57  ;;  %v1910_v0 = vand.u32 4294901760, %v5609_v58  ;;  %v5739_v51 = vsub.f32 %v2309_v19, %v5711_v40  ;;  %v5754_v55 = vsub.f32 %v2312_v42, %v5730_v45  ;;  %v3328_v19 = vsel %vm312_vm0, %v5514_v12, 0 }
 0x173   : > { %5040 = vmatprep.subr.bf16.mxu1 %v5290_v56  ;;  %v1467_v62 = vsub.f32 %v5590_v24, %v1466_v53  ;;  %v5056_v27 = vpack.c.bf16 %v1466_v53, %v1459_v38  ;;  %v2919_v53 = vand.u32 4294901760, %v5734_v46  ;;  %v5852_v2 = vand.u32 4294901760, %v3328_v19 }
 0x174   : > { %v1911_v7 = vsub.f32 %v5609_v58, %v1910_v0  ;;  %v2393_v61 = vand.u32 4294901760, %v5754_v55 }
 0x175   : > { %v1468_v6 = vand.u32 4294901760, %v1467_v62 }
 0x176   : > { %4704 = vmatmul.mubr.f32.vlgmr.msra.gmra.mrb[0].mxu0 %v5408_v11 }
 0x177   : > { %5024 = vmatpush3.bf16.msra.mxu0 %v5479_v63  ;;  %4710 = vmatprep.mubr.msk.f32.mxu0 %vm5291_vm1, %v5292_v57  ;;  %v1449_v63 = vsub.f32 %v5597_v54, %v1448_v59 }
 0x178   : > { %5043 = vmatprep.subr.bf16.mxu0 %v5290_v56 }
 0x179   : > { %4746 = vmatmul.mubr.f32.vlgmr.msra.gmra.mrb[0].mxu1 %v5428_v31  ;;  %v1450_v48 = vand.u32 4294901760, %v1449_v63  ;;  %v2920_v63 = vsub.f32 %v5734_v46, %v2919_v53 }
 0x17a   : > { %5042 = vmatpush3.bf16.msra.mxu1 %v5517_v14  ;;  %4752 = vmatprep.mubr.msk.f32.mxu1 %vm5291_vm1, %v5292_v57  ;;  %v5047_v14 = vpack.c.bf16 %v1468_v6, %v1461_v9 }
 0x17b   : > { %5061 = vmatprep.subr.bf16.mxu1 %v5290_v56 }
 0x17e   : > { %4711 = vmatmul.mubr.f32.vlgmr.msra.gmra.mrb[0].mxu0 %v5408_v11  ;;  %v1912_v11 = vand.u32 4294901760, %v1911_v7 }
 0x17f   : > { %5045 = vmatpush3.bf16.msra.mxu0 %v5641_v5  ;;  %4759 = vmatprep.mubr.msk.f32.mxu0 %vm5291_vm1, %v5292_v57 }
 0x180   : > { %5046 = vmatprep.subr.bf16.mxu0 %v5290_v56 }
 0x181   : > { %4753 = vmatmul.mubr.f32.vlgmr.msra.gmra.mrb[0].mxu1 %v5428_v31  ;;  %v5050_v31 = vpack.c.bf16 %v5590_v24, %v5602_v29  ;;  %v5746_v24 = vpack.c.bf16 %v2318_v25, %v2315_v23  ;;  %v2412_v29 = vsub.f32 %v5705_v35, %v2411_v44  ;;  %v2306_v23 = vld [vmem:[%s5980_s4 + $0x30] sm:$0xff]  ;;  %v2307_v25 = vld [vmem:[%s5980_s4 + $0x38] sm:$0xff] }
 0x182   : > { %4760 = vmatmul.mubr.f32.vlgmr.msra.gmra.mrb[2].mxu0 %v1450_v48  ;;  %5063 = vmatpush3.bf16.msra.mxu1 %v5654_v10  ;;  %v2921_v48 = vand.u32 4294901760, %v2920_v63 }
 0x183   : > { %5048 = vmatpush3.bf16.msra.mxu0 %v5047_v14  ;;  %4801 = vmatprep.mubr.msk.f32.mxu1 %vm5291_vm1, %v5292_v57  ;;  %v2413_v62 = vand.u32 4294901760, %v2412_v29 }
 0x184   : > { %5064 = vmatprep.subr.bf16.mxu1 %v5290_v56  ;;  %4766 = vmatprep.mubr.msk.f32.mxu0 %vm5291_vm1, %v5292_v57 }
 0x185   : > { %4802 = vmatmul.mubr.f32.vlgmr.msra.gmra.mrb[2].mxu1 %v1912_v11  ;;  %5049 = vmatprep.subr.bf16.mxu0 %v5290_v56  ;;  %v5083_v6 = vpack.c.bf16 %v2413_v62, %v2406_v60  ;;  %v5087_v11 = vpack.c.bf16 %v5705_v35, %v5703_v20  ;;  %v3842_v20 = vand.u32 4294901760, %v2307_v25 }
 0x186   : > { %5066 = vmatpush3.bf16.msra.mxu1 %v5065_v17  ;;  %4808 = vmatprep.mubr.msk.f32.mxu1 %vm5291_vm1, %v5292_v57  ;;  %v2304_v17 = vld [vmem:[%s5980_s4 + $0x20] sm:$0xff] }
 0x187   : > { %5067 = vmatprep.subr.bf16.mxu1 %v5290_v56  ;;  %v3331_v22 = vand.u32 4294901760, %v2304_v17 }
 0x189   : > { %v5839_v32 = vsub.f32 %v2304_v17, %v3331_v22 }
 0x18a   : > { %4767 = vmatmul.mubr.f32.vlgmr.msra.gmra.mrb[2].mxu0 %v5579_v21 }
 0x18b   : > { %5051 = vmatpush3.bf16.msra.mxu0 %v5050_v31  ;;  %4773 = vmatprep.mubr.msk.f32.mxu0 %vm5291_vm1, %v5292_v57  ;;  %v2305_v31 = vld [vmem:[%s5980_s4 + $0x28] sm:$0xff]  ;;  %v3420_v42 = vand.u32 4294901760, %v5839_v32 }
 0x18c   : > { %5052 = vmatprep.subr.bf16.mxu0 %v5290_v56  ;;  %v3334_v49 = vand.u32 4294901760, %v2305_v31 }
 0x18d   : > { %4809 = vmatmul.mubr.f32.vlgmr.msra.gmra.mrb[2].mxu1 %v5592_v34  ;;  %v3421_v46 = vsub.f32 %v5839_v32, %v3420_v42 }
 0x18e   : > { %5069 = vmatpush3.bf16.msra.mxu1 %v5068_v18  ;;  %4815 = vmatprep.mubr.msk.f32.mxu1 %vm5291_vm1, %v5292_v57  ;;  %v5119_v18 = vpack.c.bf16 %v2919_v53, %v2912_v41  ;;  %v5843_v35 = vsub.f32 %v2305_v31, %v3334_v49 }
 0x18f   : > { %5070 = vmatprep.subr.bf16.mxu1 %v5290_v56  ;;  %v3422_v60 = vand.u32 4294901760, %v3421_v46 }
 0x190   : > { %v3427_v12 = vand.u32 4294901760, %v5843_v35 }
 0x192   : > { %4774 = vmatmul.mubr.f32.vlgmr.msra.gmra.mrb[2].mxu0 %v5597_v54  ;;  %v5751_v54 = vand.u32 4294901760, %v2820_v52 }
 0x193   : > { %5054 = vmatpush3.bf16.msra.mxu0 %v5641_v5  ;;  %4780 = vmatprep.mubr.msk.f32.mxu0 %vm5291_vm1, %v5292_v57 }
 0x194   : > { %5055 = vmatprep.subr.bf16.mxu0 %v5290_v56  ;;  %v5772_v38 = vsub.f32 %v2820_v52, %v5751_v54 }
 0x195   : > { %4816 = vmatmul.mubr.f32.vlgmr.msra.gmra.mrb[2].mxu1 %v5609_v58  ;;  %v5763_v58 = vsub.f32 %v2817_v37, %v5741_v50  ;;  %v3836_v37 = vsel %vm312_vm0, %v5537_v30, 0  ;;  %v5875_v30 = vsub.f32 %v3328_v19, %v5852_v2 }
 0x196   : > { %5072 = vmatpush3.bf16.msra.mxu1 %v5654_v10  ;;  %4822 = vmatprep.mubr.msk.f32.mxu1 %vm5291_vm1, %v5292_v57  ;;  %v2901_v39 = vand.u32 4294901760, %v5772_v38  ;;  %v5877_v52 = vand.u32 4294901760, %v3836_v37 }
 0x197   : > { %5073 = vmatprep.subr.bf16.mxu1 %v5290_v56  ;;  %v2891_v4 = vand.u32 4294901760, %v5763_v58  ;;  %v3409_v53 = vand.u32 4294901760, %v5875_v30 }
 0x199   : > { %v2892_v9 = vsub.f32 %v5763_v58, %v2891_v4  ;;  %v3410_v63 = vsub.f32 %v5875_v30, %v3409_v53 }
 0x19a   : > { %4781 = vmatmul.mubr.f32.vlgmr.msra.gmra.mrb[2].mxu0 %v1448_v59  ;;  %v5769_v59 = vpack.c.bf16 %v2826_v36, %v2823_v33  ;;  %v3839_v33 = vand.u32 4294901760, %v2306_v23  ;;  %v5845_v36 = vand.u32 4294901760, %v3325_v26 }
 0x19b   : > { %5057 = vmatpush3.bf16.msra.mxu0 %v5056_v27  ;;  %4787 = vmatprep.mubr.msk.f32.mxu0 %vm5291_vm1, %v5292_v57  ;;  %v2893_v14 = vand.u32 4294901760, %v2892_v9  ;;  %v3833_v27 = vsel %vm312_vm0, %v5521_v16, 0 }
 0x19c   : > { %5058 = vmatprep.subr.bf16.mxu0 %v5290_v56  ;;  %v5866_v16 = vsub.f32 %v3325_v26, %v5845_v36 }
 0x19d   : > { %4823 = vmatmul.mubr.f32.vlgmr.msra.gmra.mrb[2].mxu1 %v1910_v0  ;;  %v2913_v0 = vsub.f32 %v5723_v28, %v2912_v41  ;;  %v5868_v28 = vand.u32 4294901760, %v3833_v27 }
 0x19e   : > { %5075 = vmatpush3.bf16.msra.mxu1 %v5074_v47  ;;  %4829 = vmatprep.mubr.msk.f32.mxu1 %vm5291_vm1, %v5292_v57  ;;  %v5872_v47 = vpack.c.bf16 %v3334_v49, %v3331_v22  ;;  %v3399_v29 = vand.u32 4294901760, %v5866_v16 }
 0x19f   : > { %5076 = vmatprep.subr.bf16.mxu1 %v5290_v56  ;;  %v2383_v56 = vand.u32 4294901760, %v5739_v51  ;;  %v2914_v7 = vand.u32 4294901760, %v2913_v0  ;;  %v5889_v41 = vsub.f32 %v3833_v27, %v5868_v28 }
 0x1a1   : > { %v2384_v3 = vsub.f32 %v5739_v51, %v2383_v56  ;;  %v5107_v13 = vpack.c.bf16 %v2921_v48, %v2914_v7 }
 0x1a2   : > { %4788 = vmatmul.mubr.f32.vlgmr.msra.gmra.mrb[2].mxu0 %v5579_v21 }
 0x1a3   : > { %5060 = vmatpush3.bf16.msra.mxu0 %v5641_v5  ;;  %4794 = vmatprep.mubr.msk.f32.mxu0 %vm5291_vm1, %v5292_v57  ;;  %v2394_v5 = vsub.f32 %v5754_v55, %v2393_v61  ;;  %v2385_v8 = vand.u32 4294901760, %v2384_v3 }
 0x1a4   : > { %5080 = vmatprep.subr.bf16.mxu0 %v5746_v24 }
 0x1a5   : > { %4830 = vmatmul.mubr.f32.vlgmr.msra.gmra.mrb[2].mxu1 %v5592_v34 }
 0x1a6   : > { %5078 = vmatpush3.bf16.msra.mxu1 %v5654_v10  ;;  %4836 = vmatprep.mubr.msk.f32.mxu1 %vm5291_vm1, %v5292_v57  ;;  %v2902_v57 = vsub.f32 %v5772_v38, %v2901_v39  ;;  %v2395_v10 = vand.u32 4294901760, %v2394_v5 }
 0x1a7   : > { %5104 = vmatprep.subr.bf16.mxu1 %v5769_v59 }
 0x1aa   : > { %4795 = vmatmul.mubr.f32.vlgmr.msra.gmra.mrb[2].mxu0 %v5579_v21  ;;  %v2903_v21 = vand.u32 4294901760, %v2902_v57 }
 0x1ab   : > { %5082 = vmatpush3.bf16.msra.mxu0 %v5746_v24  ;;  %4843 = vmatprep.mubr.f32.mxu0 %v2385_v8  ;;  %v5135_v8 = vpack.c.bf16 %v5843_v35, %v5839_v32 }
 0x1ac   : > { %5084 = vmatprep.subr.bf16.mxu0 %v5083_v6 }
 0x1ad   : > { %4837 = vmatmul.mubr.f32.vlgmr.msra.gmra.mrb[2].mxu1 %v5592_v34  ;;  %v5095_v34 = vpack.c.bf16 %v2411_v44, %v2404_v43  ;;  %v5859_v43 = vsub.f32 %v2306_v23, %v3839_v33  ;;  %v5861_v44 = vsub.f32 %v2307_v25, %v3842_v20 }
 0x1ae   : > { %4844 = vmatmul.mubr.f32.vlgmr.msra.gmra.mrb[4].mxu0 %v2395_v10  ;;  %5106 = vmatpush3.bf16.msra.mxu1 %v5769_v59 }
 0x1af   : > { %4850 = vmatprep.mubr.f32.mxu0 %v5711_v40  ;;  %4885 = vmatprep.mubr.f32.mxu1 %v2893_v14  ;;  %v3928_v1 = vand.u32 4294901760, %v5859_v43  ;;  %v5159_v9 = vpack.c.bf16 %v5861_v44, %v5859_v43 }
 0x1b0   : > { %5086 = vmatpush3.bf16.msra.mxu0 %v5083_v6  ;;  %5108 = vmatprep.subr.bf16.mxu1 %v5107_v13 }
 0x1b1   : > { %4886 = vmatmul.mubr.f32.vlgmr.msra.gmra.mrb[4].mxu1 %v2903_v21  ;;  %5088 = vmatprep.subr.bf16.mxu0 %v5087_v11 }
 0x1b2   : > { %4892 = vmatprep.mubr.f32.mxu1 %v5741_v50  ;;  %5110 = vmatpush3.bf16.msra.mxu1 %v5107_v13 }
 0x1b3   : > { %5112 = vmatprep.subr.bf16.mxu1 %v5111_v15 }
 0x1b6   : > { %4851 = vmatmul.mubr.f32.vlgmr.msra.gmra.mrb[4].mxu0 %v5730_v45 }
 0x1b7   : > { %4857 = vmatprep.mubr.f32.mxu0 %v5739_v51  ;;  %5090 = vmatpush3.bf16.msra.mxu0 %v5087_v11  ;;  %v3428_v51 = vsub.f32 %v5843_v35, %v3427_v12 }
 0x1b8   : > { %5092 = vmatprep.subr.bf16.mxu0 %v5746_v24 }
 0x1b9   : > { %4893 = vmatmul.mubr.f32.vlgmr.msra.gmra.mrb[4].mxu1 %v5751_v54 }
 0x1ba   : > { %4899 = vmatprep.mubr.f32.mxu1 %v5763_v58  ;;  %5114 = vmatpush3.bf16.msra.mxu1 %v5111_v15  ;;  %v5898_v58 = vsub.f32 %v3836_v37, %v5877_v52 }
 0x1bb   : > { %5116 = vmatprep.subr.bf16.mxu1 %v5769_v59 }
 0x1bc   : > { %v3917_v0 = vand.u32 4294901760, %v5898_v58 }
 0x1be   : > { %4858 = vmatmul.mubr.f32.vlgmr.msra.gmra.mrb[4].mxu0 %v5754_v55  ;;  %v3935_v55 = vand.u32 4294901760, %v5861_v44 }
 0x1bf   : > { %4864 = vmatprep.mubr.f32.mxu0 %v2383_v56  ;;  %5094 = vmatpush3.bf16.msra.mxu0 %v5746_v24  ;;  %v5895_v56 = vpack.c.bf16 %v3842_v20, %v3839_v33 }
 0x1c0   : > { %5096 = vmatprep.subr.bf16.mxu0 %v5095_v34  ;;  %v3936_v62 = vsub.f32 %v5861_v44, %v3935_v55  ;;  %v5167_v57 = vpack.c.bf16 %v3935_v55, %v3928_v1 }
 0x1c1   : > { %4900 = vmatmul.mubr.f32.vlgmr.msra.gmra.mrb[4].mxu1 %v5772_v38  ;;  %v3429_v38 = vand.u32 4294901760, %v3428_v51 }
 0x1c2   : > { %4906 = vmatprep.mubr.f32.mxu1 %v2891_v4  ;;  %5118 = vmatpush3.bf16.msra.mxu1 %v5769_v59 }
 0x1c3   : > { %5120 = vmatprep.subr.bf16.mxu1 %v5119_v18  ;;  %v5131_v3 = vpack.c.bf16 %v3429_v38, %v3422_v60 }
 0x1c6   : > { %4865 = vmatmul.mubr.f32.vlgmr.msra.gmra.mrb[4].mxu0 %v2393_v61  ;;  %v3929_v61 = vsub.f32 %v5859_v43, %v3928_v1 }
 0x1c7   : > { %4871 = vmatprep.mubr.f32.mxu0 %v5711_v40  ;;  %5098 = vmatpush3.bf16.msra.mxu0 %v5095_v34 }
 0x1c8   : > { %5100 = vmatprep.subr.bf16.mxu0 %v5746_v24  ;;  %v3930_v4 = vand.u32 4294901760, %v3929_v61 }
 0x1c9   : > { %4907 = vmatmul.mubr.f32.vlgmr.msra.gmra.mrb[4].mxu1 %v2901_v39  ;;  %v3937_v39 = vand.u32 4294901760, %v3936_v62 }
 0x1ca   : > { %4913 = vmatprep.mubr.f32.mxu1 %v5741_v50  ;;  %5122 = vmatpush3.bf16.msra.mxu1 %v5119_v18 }
 0x1cb   : > { %5124 = vmatprep.subr.bf16.mxu1 %v5769_v59  ;;  %v5155_v7 = vpack.c.bf16 %v3937_v39, %v3930_v4 }
 0x1ce   : > { %4872 = vmatmul.mubr.f32.vlgmr.msra.gmra.mrb[4].mxu0 %v5730_v45 }
 0x1cf   : > { %4878 = vmatprep.mubr.f32.mxu0 %v5711_v40  ;;  %5102 = vmatpush3.bf16.msra.mxu0 %v5746_v24  ;;  %v3400_v40 = vsub.f32 %v5866_v16, %v3399_v29  ;;  %v3907_v24 = vand.u32 4294901760, %v5889_v41 }
 0x1d0   : > { %5128 = vmatprep.subr.bf16.mxu0 %v5872_v47 }
 0x1d1   : > { %4914 = vmatmul.mubr.f32.vlgmr.msra.gmra.mrb[4].mxu1 %v5751_v54  ;;  %v3401_v5 = vand.u32 4294901760, %v3400_v40  ;;  %v3908_v6 = vsub.f32 %v5889_v41, %v3907_v24 }
 0x1d2   : > { %4920 = vmatprep.mubr.f32.mxu1 %v5741_v50  ;;  %5126 = vmatpush3.bf16.msra.mxu1 %v5769_v59  ;;  %v3918_v50 = vsub.f32 %v5898_v58, %v3917_v0  ;;  %v3411_v59 = vand.u32 4294901760, %v3410_v63 }
 0x1d3   : > { %5152 = vmatprep.subr.bf16.mxu1 %v5895_v56  ;;  %v3909_v48 = vand.u32 4294901760, %v3908_v6 }
 0x1d6   : > { %4879 = vmatmul.mubr.f32.vlgmr.msra.gmra.mrb[4].mxu0 %v5730_v45  ;;  %v3919_v45 = vand.u32 4294901760, %v3918_v50 }
 0x1d7   : > { %5130 = vmatpush3.bf16.msra.mxu0 %v5872_v47  ;;  %4927 = vmatprep.mubr.f32.mxu0 %v3401_v5 }
 0x1d8   : > { %5132 = vmatprep.subr.bf16.mxu0 %v5131_v3 }
 0x1d9   : > { %4921 = vmatmul.mubr.f32.vlgmr.msra.gmra.mrb[4].mxu1 %v5751_v54  ;;  %v5143_v54 = vpack.c.bf16 %v3427_v12, %v3420_v42 }
 0x1da   : > { %4928 = vmatmul.mubr.f32.vlgmr.msra.gmra.mrb[6].mxu0 %v3411_v59  ;;  %5154 = vmatpush3.bf16.msra.mxu1 %v5895_v56 }
 0x1db   : > { %4934 = vmatprep.mubr.f32.mxu0 %v5845_v36  ;;  %4969 = vmatprep.mubr.f32.mxu1 %v3909_v48 }
 0x1dc   : > { %5134 = vmatpush3.bf16.msra.mxu0 %v5131_v3  ;;  %5156 = vmatprep.subr.bf16.mxu1 %v5155_v7 }
 0x1dd   : > { %4970 = vmatmul.mubr.f32.vlgmr.msra.gmra.mrb[6].mxu1 %v3919_v45  ;;  %5136 = vmatprep.subr.bf16.mxu0 %v5135_v8 }
 0x1de   : > { %4976 = vmatprep.mubr.f32.mxu1 %v5868_v28  ;;  %5158 = vmatpush3.bf16.msra.mxu1 %v5155_v7 }
 0x1df   : > { %5160 = vmatprep.subr.bf16.mxu1 %v5159_v9 }
 0x1e2   : > { %4935 = vmatmul.mubr.f32.vlgmr.msra.gmra.mrb[6].mxu0 %v5852_v2 }
 0x1e3   : > { %4941 = vmatprep.mubr.f32.mxu0 %v5866_v16  ;;  %5138 = vmatpush3.bf16.msra.mxu0 %v5135_v8 }
 0x1e4   : > { %5140 = vmatprep.subr.bf16.mxu0 %v5872_v47 }
 0x1e5   : > { %4977 = vmatmul.mubr.f32.vlgmr.msra.gmra.mrb[6].mxu1 %v5877_v52 }
 0x1e6   : > { %4983 = vmatprep.mubr.f32.mxu1 %v5889_v41  ;;  %5162 = vmatpush3.bf16.msra.mxu1 %v5159_v9 }
 0x1e7   : > { %5164 = vmatprep.subr.bf16.mxu1 %v5895_v56 }
 0x1ea   : > { %4942 = vmatmul.mubr.f32.vlgmr.msra.gmra.mrb[6].mxu0 %v5875_v30 }
 0x1eb   : > { %4948 = vmatprep.mubr.f32.mxu0 %v3399_v29  ;;  %5142 = vmatpush3.bf16.msra.mxu0 %v5872_v47 }
 0x1ec   : > { %5144 = vmatprep.subr.bf16.mxu0 %v5143_v54 }
 0x1ed   : > { %4984 = vmatmul.mubr.f32.vlgmr.msra.gmra.mrb[6].mxu1 %v5898_v58 }
 0x1ee   : > { %4990 = vmatprep.mubr.f32.mxu1 %v3907_v24  ;;  %5166 = vmatpush3.bf16.msra.mxu1 %v5895_v56 }
 0x1ef   : > { %5168 = vmatprep.subr.bf16.mxu1 %v5167_v57 }
 0x1f2   : > { %4949 = vmatmul.mubr.f32.vlgmr.msra.gmra.mrb[6].mxu0 %v3409_v53 }
 0x1f3   : > { %4955 = vmatprep.mubr.f32.mxu0 %v5845_v36  ;;  %5146 = vmatpush3.bf16.msra.mxu0 %v5143_v54 }
 0x1f4   : > { %5148 = vmatprep.subr.bf16.mxu0 %v5872_v47 }
 0x1f5   : > { %4991 = vmatmul.mubr.f32.vlgmr.msra.gmra.mrb[6].mxu1 %v3917_v0 }
 0x1f6   : > { %4997 = vmatprep.mubr.f32.mxu1 %v5868_v28  ;;  %5170 = vmatpush3.bf16.msra.mxu1 %v5167_v57 }
 0x1f7   : > { %5172 = vmatprep.subr.bf16.mxu1 %v5895_v56 }
 0x1fa   : > { %4956 = vmatmul.mubr.f32.vlgmr.msra.gmra.mrb[6].mxu0 %v5852_v2 }
 0x1fb   : > { %4962 = vmatprep.mubr.f32.mxu0 %v5845_v36  ;;  %5150 = vmatpush3.bf16.msra.mxu0 %v5872_v47 }
 0x1fd   : > { %4998 = vmatmul.mubr.f32.vlgmr.msra.gmra.mrb[6].mxu1 %v5877_v52 }
 0x1fe   : > { %5004 = vmatprep.mubr.f32.mxu1 %v5868_v28  ;;  %5174 = vmatpush3.bf16.msra.mxu1 %v5895_v56 }
 0x202   : > { %4963 = vmatmul.mubr.f32.vlgmr.msra.gmra.mrb[6].mxu0 %v5852_v2 }
 0x205   : > { %5005 = vmatmul.mubr.f32.vlgmr.msra.gmra.mrb[6].mxu1 %v5877_v52 }
 0x251   : > { %v910_v10 = vpop.f32.mrb[0].mxu0 }
 0x252   : > { %4340 = vst.msk [vmem:[%s293_s21] sm:$0xff] %vm312_vm0, %v910_v10  ;;  %v4712_v13 = vpop.f32.mrb[1].mxu0 }
 0x254   : > { %v1372_v14 = vpop.f32.mrb[0].mxu1 }
 0x255   : > { %4341 = vst.msk [vmem:[%s293_s21 + $0x8] sm:$0xff] %vm312_vm0, %v1372_v14  ;;  %v4754_v11 = vpop.f32.mrb[1].mxu1 }
 0x27d   : > { %v1834_v21 = vpop.f32.mrb[2].mxu0 }
 0x27e   : > { %4342 = vst.msk [vmem:[%s293_s21 + $0x10] sm:$0xff] %vm312_vm0, %v1834_v21  ;;  %v4796_v15 = vpop.f32.mrb[3].mxu0 }
 0x280   : > { %v2296_v34 = vpop.f32.mrb[2].mxu1 }
 0x281   : > { %4343 = vst.msk [vmem:[%s293_s21 + $0x18] sm:$0xff] %vm312_vm0, %v2296_v34  ;;  %v4838_v17 = vpop.f32.mrb[3].mxu1 }
 0x2a9   : > { %v4880_v31 = vpop.f32.mrb[4].mxu0 }
 0x2aa   : > { %4346 = vst.msk [vmem:[%s298_s23 + $0x8] sm:$0xff] %vm4344_vm2, %v4880_v31  ;;  %v2806_v18 = vpop.f32.mrb[5].mxu0 }
 0x2ab   : > { %4345 = vst.msk [vmem:[%s298_s23] sm:$0xff] %vm4344_vm2, %v2806_v18 }
 0x2ac   : > { %v4922_v22 = vpop.f32.mrb[4].mxu1 }
 0x2ad   : > { %4348 = vst.msk [vmem:[%s298_s23 + $0x18] sm:$0xff] %vm4344_vm2, %v4922_v22  ;;  %v3314_v49 = vpop.f32.mrb[5].mxu1 }
 0x2ae   : > { %4347 = vst.msk [vmem:[%s298_s23 + $0x10] sm:$0xff] %vm4344_vm2, %v3314_v49 }
 0x2d5   : > { %v4964_v23 = vpop.f32.mrb[6].mxu0 }
 0x2d6   : > { %4350 = vst.msk [vmem:[%s298_s23 + $0x28] sm:$0xff] %vm4344_vm2, %v4964_v23  ;;  %v3822_v25 = vpop.f32.mrb[7].mxu0 }
 0x2d7   : > { %4349 = vst.msk [vmem:[%s298_s23 + $0x20] sm:$0xff] %vm4344_vm2, %v3822_v25 }
 0x2d8   : > { %v5006_v26 = vpop.f32.mrb[6].mxu1 }
 0x2d9   : > { %4352 = vst.msk [vmem:[%s298_s23 + $0x38] sm:$0xff] %vm4344_vm2, %v5006_v26  ;;  %v4330_v32 = vpop.f32.mrb[7].mxu1 }
 0x2da   : > { %4351 = vst.msk [vmem:[%s298_s23 + $0x30] sm:$0xff] %vm4344_vm2, %v4330_v32 }
 0x2db PF: > { %s18_s24 = sadd.s32 1, %s5288_s24  }
 0x2dc   : > { %p15_p4 = scmp.ge.s32.totalorder %s18_s24, 4  }
 0x2de   :  { %17 = sbr.rel (!%p15_p4) target bundleno = 1 (0x1), region = 94 }

// kernel: guided_spatial_sr.10
= control target key start
LH: loop header
LB: loop body
LE: loop exit
PB: predicated region body
PF: predicated region fallthrough
CT: control target
= control target key end

     0   :  { %s5393_s24 = smov 0   ;;  %s5864_s0 = inlined_call_operand.vmem [shape: f32[2,4,128], index: 0, kind: input, shape index: {}]   ;;  %s5865_s1 = inlined_call_operand.vmem [shape: f32[2,4,128], index: 1, kind: input, shape index: {}]   ;;  %s5866_s2 = inlined_call_operand.vmem [shape: f32[16,128], index: 2, kind: input, shape index: {}]   ;;  %s5867_s3 = inlined_call_operand.vmem [shape: f32[16,128], index: 3, kind: input, shape index: {}]   ;;  %s5868_s4 = inlined_call_operand.vmem [shape: f32[16,128], index: 4, kind: input, shape index: {}]   ;;  %s5869_s5 = inlined_call_operand.vmem [shape: f32[128,16], index: 5, kind: input, shape index: {}]   ;;  %s5870_s6 = inlined_call_operand.vmem [shape: f32[1,128], index: 6, kind: input, shape index: {}]   ;;  %s5871_s7 = inlined_call_operand.vmem [shape: f32[2,4,128], index: 7, kind: output, shape index: {}]  }
   0x1 LB: > { %s4416_s25 = sadd.s32 4294967295, %s5346_s24   ;;  %p4420_p0 = scmp.ge.s32.totalorder %s5346_s24, 1  ;;  %s5346_s24 = sphi %s5393_s24, %s17_s24  }
   0x2   : > { %p245_p1 = scmp.lt.s32.totalorder %s5346_s24, 3 }
   0x4   : > { %p246_p2 = pnand %p4420_p0, %p245_p1 }
   0x5   : > { %p279_p3 = scmp.lt.s32.totalorder (!%p246_p2), %s4416_s25, 1  ;;  %v293_v0 = vld [vmem:[%s5866_s2] sm:$0xff] (!%p246_p2)  ;;  %v294_v2 = vld [vmem:[%s5866_s2 + $0x8] sm:$0xff] (!%p246_p2)  ;;  %v5348_v38 = vmov (!%p246_p2), 0.0|0.0   ;;  %vm5349_vm0 = vmmov (!%p246_p2), 0   ;;  %v5350_v41 = vmov (!%p246_p2), 0.0  }
   0x6   : > { %249 = sbr.rel (%p246_p2) target bundleno = 1844 (0x734), region = 48  ;;  %v784_v1 = vld [vmem:[%s5867_s3] sm:$0xff] (!%p246_p2)  ;;  %v5410_v3 = vand.u32 (!%p246_p2), 4294901760, %v293_v0  ;;  %v5414_v5 = vand.u32 (!%p246_p2), 4294901760, %v294_v2  ;;  %v785_v6 = vld [vmem:[%s5867_s3 + $0x8] sm:$0xff] (!%p246_p2)  ;;  %vm1737_vm1 = vcmask (!%p246_p2), 31744  }
   0x7   : > { %v5412_v4 = vand.u32 (!%p246_p2), 4294901760, %v784_v1  ;;  %v5419_v7 = vand.u32 (!%p246_p2), 4294901760, %v785_v6  ;;  %v1275_v36 = vld [vmem:[%s5868_s4] sm:$0xff] (!%p246_p2)  ;;  %v1276_v37 = vld [vmem:[%s5868_s4 + $0x8] sm:$0xff] (!%p246_p2)  ;;  %vm2203_vm2 = vcmask (!%p246_p2), 64512   ;;  %s5351_s22 = smov (!%p246_p2), 120  }
   0x8   : > { %v362_v8 = vsub.f32 (!%p246_p2), %v293_v0, %v5410_v3  ;;  %v372_v10 = vsub.f32 (!%p246_p2), %v294_v2, %v5414_v5  ;;  %v1278_v39 = vand.u32 (!%p246_p2), 4294901760, %v1275_v36  ;;  %v1281_v40 = vand.u32 (!%p246_p2), 4294901760, %v1276_v37  ;;  %s5352_s13 = smov (!%p246_p2), 8  }
   0x9   : > { %v853_v9 = vsub.f32 (!%p246_p2), %v784_v1, %v5412_v4  ;;  %v863_v11 = vsub.f32 (!%p246_p2), %v785_v6, %v5419_v7  ;;  %vm3629_vm3 = vcmask (!%p246_p2), 130048   ;;  %vm2667_vm4 = vcmask (!%p246_p2), 60416  }
   0xa   : > { %v363_v12 = vand.u32 (!%p246_p2), 4294901760, %v362_v8  ;;  %v373_v14 = vand.u32 (!%p246_p2), 4294901760, %v372_v10  ;;  %v5066_v42 = vpack.c.bf16 (!%p246_p2), %v1281_v40, %v1278_v39  ;;  %v1356_v43 = vsub.f32 (!%p246_p2), %v1275_v36, %v1278_v39 }
   0xb   : > { %v854_v13 = vand.u32 (!%p246_p2), 4294901760, %v853_v9  ;;  %v864_v17 = vand.u32 (!%p246_p2), 4294901760, %v863_v11  ;;  %v1363_v44 = vsub.f32 (!%p246_p2), %v1276_v37, %v1281_v40  ;;  %vm3603_vm5 = vcmask (!%p246_p2), 126016  }
   0xc   : > { %v364_v20 = vsub.f32 (!%p246_p2), %v362_v8, %v363_v12  ;;  %v374_v22 = vsub.f32 (!%p246_p2), %v372_v10, %v373_v14  ;;  %v1357_v45 = vand.u32 (!%p246_p2), 4294901760, %v1356_v43 }
   0xd   : > { %s5873_s25 = smov (!%p279_p3, %s4416_s25), 1  ;;  %v855_v21 = vsub.f32 %v853_v9, %v854_v13  ;;  %v865_v23 = vsub.f32 %v863_v11, %v864_v17  ;;  %v1364_v46 = vand.u32 4294901760, %v1363_v44  ;;  %v5072_v52 = vpack.c.bf16 %v1363_v44, %v1356_v43 }
   0xe   : > { %s5424_s11 = sshll.u32 %s5873_s25, 2  ;;  %v365_v24 = vand.u32 4294901760, %v364_v20  ;;  %v375_v28 = vand.u32 4294901760, %v374_v22  ;;  %v1358_v47 = vsub.f32 %v1356_v43, %v1357_v45 }
   0xf   : > { %s282_s14 = scalar_lea.vmem %s5864_s0, %s5424_s11  ;;  %s286_s17 = scalar_lea.vmem %s5865_s1, %s5424_s11  ;;  %v856_v25 = vand.u32 4294901760, %v855_v21  ;;  %v866_v29 = vand.u32 4294901760, %v865_v23  ;;  %v1365_v48 = vsub.f32 %v1363_v44, %v1364_v46  ;;  %v5078_v1 = vpack.c.bf16 %v1364_v46, %v1357_v45 }
  0x10   : > { %v291_v15 = vld [vmem:[%s282_s14] sm:$0xf]  ;;  %4635 = vmatprep.mubr.f32.mxu0 %v365_v24  ;;  %v1359_v49 = vand.u32 4294901760, %v1358_v47  ;;  %s290_s18 = scalar_lea.vmem %s5871_s7, %s5424_s11 }
  0x11   : > { %v292_v16 = vld [vmem:[%s286_s17] sm:$0xf]  ;;  %v296_v18 = vand.u32 4294901760, %v291_v15  ;;  %4665 = vmatprep.mubr.f32.mxu1 %v856_v25  ;;  %v1366_v50 = vand.u32 4294901760, %v1365_v48 }
  0x12   : > { %v5435_v19 = vand.u32 4294901760, %v292_v16 }
  0x13   : > { %4633 = vmatprep.subr.mxu0 %v296_v18  ;;  %v383_v26 = vsub.f32 %v291_v15, %v296_v18  ;;  %v5069_v51 = vpack.c.bf16 %v1366_v50, %v1359_v49 }
  0x14   : > { %4663 = vmatprep.subr.mxu1 %v5435_v19  ;;  %v5439_v27 = vsub.f32 %v292_v16, %v5435_v19  ;;  %4634 = vmatpush3.xpose.msra.mxu0 %v296_v18 }
  0x15   : > { %4664 = vmatpush3.xpose.msra.mxu1 %v5435_v19  ;;  %v384_v30 = vand.u32 4294901760, %v383_v26 }
  0x16   : > { %v5443_v31 = vand.u32 4294901760, %v5439_v27 }
  0x17   : > { %4636 = vmatmul.mubr.f32.vlgmr.msra.gmra.mrb[0].mxu0 %v375_v28  ;;  %v385_v32 = vsub.f32 %v383_v26, %v384_v30 }
  0x18   : > { %4666 = vmatmul.mubr.f32.vlgmr.msra.gmra.mrb[0].mxu1 %v866_v29  ;;  %v876_v33 = vsub.f32 %v5439_v27, %v5443_v31  ;;  %4640 = vmatprep.mubr.f32.mxu0 %v5410_v3 }
  0x19   : > { %4670 = vmatprep.mubr.f32.mxu1 %v5412_v4  ;;  %v386_v34 = vand.u32 4294901760, %v385_v32 }
  0x1a   : > { %v877_v35 = vand.u32 4294901760, %v876_v33 }
  0x1b   : > { %4638 = vmatprep.subr.mxu0 %v386_v34 }
  0x1c   : > { %4668 = vmatprep.subr.mxu1 %v877_v35  ;;  %4639 = vmatpush3.xpose.msra.mxu0 %v386_v34 }
  0x1d   : > { %4669 = vmatpush3.xpose.msra.mxu1 %v877_v35  ;;  %4643 = vmatprep.subr.mxu0 %v383_v26 }
  0x1e   : > { %4673 = vmatprep.subr.mxu1 %v5439_v27 }
  0x1f   : > { %4641 = vmatmul.mubr.f32.vlgmr.msra.gmra.mrb[0].mxu0 %v5414_v5 }
  0x20   : > { %4671 = vmatmul.mubr.f32.vlgmr.msra.gmra.mrb[0].mxu1 %v5419_v7  ;;  %4644 = vmatpush3.xpose.msra.mxu0 %v383_v26 }
  0x21   : > { %4674 = vmatpush3.xpose.msra.mxu1 %v5439_v27  ;;  %4645 = vmatprep.mubr.f32.mxu0 %v362_v8 }
  0x22   : > { %4675 = vmatprep.mubr.f32.mxu1 %v853_v9  ;;  %4648 = vmatprep.subr.mxu0 %v296_v18 }
  0x23   : > { %4678 = vmatprep.subr.mxu1 %v5435_v19 }
  0x27   : > { %4646 = vmatmul.mubr.f32.vlgmr.msra.gmra.mrb[0].mxu0 %v372_v10 }
  0x28   : > { %4676 = vmatmul.mubr.f32.vlgmr.msra.gmra.mrb[0].mxu1 %v863_v11  ;;  %4649 = vmatpush3.xpose.msra.mxu0 %v296_v18 }
  0x29   : > { %4679 = vmatpush3.xpose.msra.mxu1 %v5435_v19  ;;  %4650 = vmatprep.mubr.f32.mxu0 %v363_v12 }
  0x2a   : > { %4680 = vmatprep.mubr.f32.mxu1 %v854_v13  ;;  %4653 = vmatprep.subr.mxu0 %v384_v30 }
  0x2b   : > { %4683 = vmatprep.subr.mxu1 %v5443_v31 }
  0x2f   : > { %4651 = vmatmul.mubr.f32.vlgmr.msra.gmra.mrb[0].mxu0 %v373_v14 }
  0x30   : > { %4681 = vmatmul.mubr.f32.vlgmr.msra.gmra.mrb[0].mxu1 %v864_v17  ;;  %4654 = vmatpush3.xpose.msra.mxu0 %v384_v30 }
  0x31   : > { %4684 = vmatpush3.xpose.msra.mxu1 %v5443_v31  ;;  %4655 = vmatprep.mubr.f32.mxu0 %v5410_v3 }
  0x32   : > { %4685 = vmatprep.mubr.f32.mxu1 %v5412_v4  ;;  %4658 = vmatprep.subr.mxu0 %v296_v18 }
  0x33   : > { %4688 = vmatprep.subr.mxu1 %v5435_v19 }
  0x37   : > { %4656 = vmatmul.mubr.f32.vlgmr.msra.gmra.mrb[0].mxu0 %v5414_v5 }
  0x38   : > { %4686 = vmatmul.mubr.f32.vlgmr.msra.gmra.mrb[0].mxu1 %v5419_v7  ;;  %4659 = vmatpush3.xpose.msra.mxu0 %v296_v18 }
  0x39   : > { %4689 = vmatpush3.xpose.msra.mxu1 %v5435_v19  ;;  %4660 = vmatprep.mubr.f32.mxu0 %v5410_v3 }
  0x3a   : > { %4690 = vmatprep.mubr.f32.mxu1 %v5412_v4  ;;  %5065 = vmatprep.subr.bf16.mxu0 %v5348_v38 }
  0x3b   : > { %4735 = vmatprep.subr.mxu1 %v5350_v41 }
  0x3f   : > { %4661 = vmatmul.mubr.f32.vlgmr.msra.gmra.mrb[0].mxu0 %v5414_v5 }
  0x40   : > { %4691 = vmatmul.mubr.f32.vlgmr.msra.gmra.mrb[0].mxu1 %v5419_v7  ;;  %4697 = vmatprep.mubr.msk.f32.mxu0 %vm5349_vm0, %v5350_v41 }
  0x41   : > { %4737 = vmatprep.mubr.msk.f32.mxu1 %vm5349_vm0, %v5350_v41  ;;  %5067 = vmatpush3.bf16.xpose.msra.mxu0 %v5066_v42 }
  0x42   : > { %5068 = vmatprep.subr.bf16.mxu0 %v5348_v38 }
  0x48   : > { %4698 = vmatmul.mubr.f32.vlgmr.msra.gmra.mrb[2].mxu0 %v877_v35 }
  0x49   : > { %5070 = vmatpush3.bf16.xpose.msra.mxu0 %v5069_v51  ;;  %4704 = vmatprep.mubr.msk.f32.mxu0 %vm5349_vm0, %v5350_v41 }
  0x4a   : > { %5071 = vmatprep.subr.bf16.mxu0 %v5348_v38 }
  0x50   : > { %4705 = vmatmul.mubr.f32.vlgmr.msra.gmra.mrb[2].mxu0 %v5435_v19 }
  0x51   : > { %5073 = vmatpush3.bf16.xpose.msra.mxu0 %v5072_v52  ;;  %4711 = vmatprep.mubr.msk.f32.mxu0 %vm5349_vm0, %v5350_v41 }
  0x52   : > { %5074 = vmatprep.subr.bf16.mxu0 %v5348_v38 }
  0x58   : > { %4712 = vmatmul.mubr.f32.vlgmr.msra.gmra.mrb[2].mxu0 %v5439_v27 }
  0x59   : > { %5076 = vmatpush3.bf16.xpose.msra.mxu0 %v5066_v42  ;;  %4718 = vmatprep.mubr.msk.f32.mxu0 %vm5349_vm0, %v5350_v41 }
  0x5a   : > { %5077 = vmatprep.subr.bf16.mxu0 %v5348_v38 }
  0x60   : > { %4719 = vmatmul.mubr.f32.vlgmr.msra.gmra.mrb[2].mxu0 %v5443_v31 }
  0x61   : > { %4725 = vmatprep.mubr.msk.f32.mxu0 %vm5349_vm0, %v5350_v41  ;;  %5079 = vmatpush3.bf16.xpose.msra.mxu0 %v5078_v1 }
  0x62   : > { %5080 = vmatprep.subr.bf16.mxu0 %v5348_v38 }
  0x68   : > { %4726 = vmatmul.mubr.f32.vlgmr.msra.gmra.mrb[2].mxu0 %v5435_v19 }
  0x69   : > { %5082 = vmatpush3.bf16.xpose.msra.mxu0 %v5066_v42  ;;  %4732 = vmatprep.mubr.msk.f32.mxu0 %vm5349_vm0, %v5350_v41 }
  0x6a   : > { %4795 = vmatprep.subr.mxu0 %v5350_v41 }
  0x70   : > { %4733 = vmatmul.mubr.f32.vlgmr.msra.gmra.mrb[2].mxu0 %v5435_v19 }
  0x71   : > { %4797 = vmatprep.mubr.msk.f32.mxu0 %vm5349_vm0, %v5350_v41 }
 0x112   : > { %v4662_v53 = vpop.f32.mrb[0].mxu0 }
 0x113   : > { %v4692_v54 = vpop.f32.mrb[0].mxu1  ;;  %v774_v55 = vpop.f32.mrb[1].mxu0  ;;  %v2669_v59 = vmul.f32 %v4662_v53, %v4662_v53 }
 0x114   : > { %v1265_v56 = vpop.f32.mrb[1].mxu1  ;;  %v2676_v57 = vmul.f32 %v4692_v54, %v4692_v54  ;;  %v1736_v61 = vmul.f32 %v774_v55, %v774_v55 }
 0x115   : > { %v1744_v58 = vmul.f32 %v1265_v56, %v1265_v56  ;;  %v2670_v63 = vsel %vm1737_vm1, %v2669_v59, 0.0 }
 0x116   : > { %v2677_v60 = vsel %vm1737_vm1, %v2676_v57, 0.0  ;;  %v1738_v0 = vsel %vm1737_vm1, %v1736_v61, 0.0 }
 0x117   : > { %2678 = vadd.xlane.f32.xlu1 %v2677_v60  ;;  %v1745_v62 = vsel %vm1737_vm1, %v1744_v58, 0.0 }
 0x118   : > { %1746 = vadd.xlane.f32.xlu0 %v1745_v62 }
 0x11b   : > { %2671 = vadd.xlane.f32.xlu1 %v2670_v63 }
 0x11c   : > { %1739 = vadd.xlane.f32.xlu0 %v1738_v0 }
 0x143   : > { %v1732_v44 = vpop.f32.mrb[2].mxu0 }
 0x144   : > { %v4734_v45 = vpop.f32.mrb[3].mxu0  ;;  %v2216_v62 = vsel %vm2203_vm2, %v1732_v44, 0 }
 0x145   : > { %v2287_v0 = vand.u32 4294901760, %v2216_v62  ;;  %v3613_v45 = vld [vmem:[%s5869_s5 + $0x38] sm:$0xff] }
 0x147   : > { %v2288_v1 = vsub.f32 %v2216_v62, %v2287_v0 }
 0x1a4   : > { %v2679_v2 = vpop.xlane.xlu1 %2678 }
 0x1a5   : > { %v2680_v3 = vmax.f32 %v2679_v2, 1e-24  ;;  %v1747_v4 = vpop.xlane.xlu0 %1746  ;;  %v2289_v2 = vand.u32 4294901760, %v2288_v1 }
 0x1a6   : > { %v1748_v5 = vmax.f32 %v1747_v4, 1e-24 }
 0x1a7   : > { %5320 = vrsqrt.f32 %v2680_v3 }
 0x1a8   : > { %5322 = vrsqrt.f32 %v1748_v5  ;;  %v2672_v6 = vpop.xlane.xlu1 %2671  ;;  %v2290_v5 = vsub.f32 %v2288_v1, %v2289_v2 }
 0x1a9   : > { %v2673_v7 = vmax.f32 %v2672_v6, 1e-24  ;;  %v1740_v8 = vpop.xlane.xlu0 %1739 }
 0x1aa   : > { %v1741_v9 = vmax.f32 %v1740_v8, 1e-24 }
 0x1ab   : > { %5324 = vrsqrt.f32 %v2673_v7 }
 0x1ac   : > { %5326 = vrsqrt.f32 %v1741_v9  ;;  %v2291_v9 = vand.u32 4294901760, %v2290_v5 }
 0x1b1   : > { %v5321_v10 = vpop.eup %5320 }
 0x1b2   : > { %v5323_v11 = vpop.eup %5322  ;;  %v2682_v12 = vmul.f32 %v5321_v10, %v4692_v54 }
 0x1b3   : > { %v1750_v13 = vmul.f32 %v5323_v11, %v1265_v56 }
 0x1b4   : > { %v2684_v14 = vsel %vm1737_vm1, %v2682_v12, 0 }
 0x1b5   : > { %v5325_v15 = vpop.eup %5324  ;;  %v5507_v16 = vand.u32 4294901760, %v2684_v14  ;;  %v1752_v17 = vsel %vm1737_vm1, %v1750_v13, 0 }
 0x1b6   : > { %v5327_v18 = vpop.eup %5326  ;;  %v2675_v19 = vmul.f32 %v5325_v15, %v4662_v53  ;;  %v5510_v20 = vand.u32 4294901760, %v1752_v17 }
 0x1b7   : > { %v1743_v21 = vmul.f32 %v5327_v18, %v774_v55  ;;  %v2756_v22 = vsub.f32 %v2684_v14, %v5507_v16 }
 0x1b8   : > { %v2687_v23 = vsel %vm1737_vm1, %v2675_v19, 0  ;;  %v1824_v24 = vsub.f32 %v1752_v17, %v5510_v20 }
 0x1b9   : > { %v2690_v25 = vand.u32 4294901760, %v2687_v23  ;;  %v1755_v26 = vsel %vm1737_vm1, %v1743_v21, 0  ;;  %v2757_v27 = vand.u32 4294901760, %v2756_v22 }
 0x1ba   : > { %v1758_v28 = vand.u32 4294901760, %v1755_v26  ;;  %v1825_v29 = vand.u32 4294901760, %v1824_v24 }
 0x1bb   : > { %4796 = vmatpush3.xpose.msra.mxu0 %v2690_v25  ;;  %v2767_v30 = vsub.f32 %v2687_v23, %v2690_v25  ;;  %v2758_v31 = vsub.f32 %v2756_v22, %v2757_v27 }
 0x1bc   : > { %4736 = vmatpush3.xpose.msra.mxu1 %v1758_v28  ;;  %v1835_v32 = vsub.f32 %v1755_v26, %v1758_v28  ;;  %v1826_v33 = vsub.f32 %v1824_v24, %v1825_v29  ;;  %4800 = vmatprep.subr.mxu0 %v5350_v41 }
 0x1bd   : > { %v2759_v34 = vand.u32 4294901760, %v2758_v31  ;;  %4740 = vmatprep.subr.mxu1 %v5350_v41  ;;  %v2768_v35 = vand.u32 4294901760, %v2767_v30  ;;  %v3608_v31 = vld [vmem:[%s5869_s5 + $0x10] sm:$0xff] }
 0x1be   : > { %v1827_v36 = vand.u32 4294901760, %v1826_v33  ;;  %v1836_v37 = vand.u32 4294901760, %v1835_v32 }
 0x1bf   : > { %4798 = vmatmul.mubr.f32.vlgmr.msra.gmra.mrb[4].mxu0 %v2759_v34  ;;  %v2769_v39 = vsub.f32 %v2767_v30, %v2768_v35  ;;  %v3609_v34 = vld [vmem:[%s5869_s5 + $0x18] sm:$0xff] }
 0x1c0   : > { %4738 = vmatmul.mubr.f32.vlgmr.msra.gmra.mrb[2].mxu1 %v1827_v36  ;;  %v1837_v40 = vsub.f32 %v1835_v32, %v1836_v37  ;;  %4802 = vmatprep.mubr.msk.f32.mxu0 %vm5349_vm0, %v5350_v41  ;;  %v3610_v36 = vld [vmem:[%s5869_s5 + $0x20] sm:$0xff] }
 0x1c1   : > { %v2770_v42 = vand.u32 4294901760, %v2769_v39  ;;  %4742 = vmatprep.mubr.msk.f32.mxu1 %vm5349_vm0, %v5350_v41 }
 0x1c2   : > { %v1838_v43 = vand.u32 4294901760, %v1837_v40 }
 0x1c3   : > { %4801 = vmatpush3.xpose.msra.mxu0 %v2770_v42  ;;  %v3643_v42 = vsel %vm3629_vm3, %v3609_v34, 0 }
 0x1c4   : > { %4741 = vmatpush3.xpose.msra.mxu1 %v1838_v43  ;;  %4805 = vmatprep.subr.mxu0 %v5350_v41 }
 0x1c5   : > { %4745 = vmatprep.subr.mxu1 %v5350_v41 }
 0x1c7   : > { %4803 = vmatmul.mubr.f32.vlgmr.msra.gmra.mrb[4].mxu0 %v5507_v16 }
 0x1c8   : > { %4806 = vmatpush3.xpose.msra.mxu0 %v2767_v30  ;;  %4743 = vmatmul.mubr.f32.vlgmr.msra.gmra.mrb[2].mxu1 %v5510_v20  ;;  %v3607_v30 = vld [vmem:[%s5869_s5 + $0x8] sm:$0xff] }
 0x1c9   : > { %4746 = vmatpush3.xpose.msra.mxu1 %v1835_v32  ;;  %4807 = vmatprep.mubr.msk.f32.mxu0 %vm5349_vm0, %v5350_v41  ;;  %v3637_v33 = vsel %vm3629_vm3, %v3607_v30, 0 }
 0x1ca   : > { %4810 = vmatprep.subr.mxu0 %v5350_v41  ;;  %4747 = vmatprep.mubr.msk.f32.mxu1 %vm5349_vm0, %v5350_v41  ;;  %v3685_v40 = vand.u32 4294901760, %v3637_v33 }
 0x1cb   : > { %4750 = vmatprep.subr.mxu1 %v5350_v41 }
 0x1cf   : > { %4808 = vmatmul.mubr.f32.vlgmr.msra.gmra.mrb[4].mxu0 %v2756_v22 }
 0x1d0   : > { %4811 = vmatpush3.xpose.msra.mxu0 %v2690_v25  ;;  %4748 = vmatmul.mubr.f32.vlgmr.msra.gmra.mrb[2].mxu1 %v1824_v24 }
 0x1d1   : > { %4751 = vmatpush3.xpose.msra.mxu1 %v1758_v28  ;;  %4812 = vmatprep.mubr.msk.f32.mxu0 %vm5349_vm0, %v5350_v41 }
 0x1d2   : > { %4815 = vmatprep.subr.mxu0 %v5350_v41  ;;  %4752 = vmatprep.mubr.msk.f32.mxu1 %vm5349_vm0, %v5350_v41 }
 0x1d3   : > { %4755 = vmatprep.subr.mxu1 %v5350_v41 }
 0x1d7   : > { %4813 = vmatmul.mubr.f32.vlgmr.msra.gmra.mrb[4].mxu0 %v2757_v27 }
 0x1d8   : > { %4816 = vmatpush3.xpose.msra.mxu0 %v2768_v35  ;;  %4753 = vmatmul.mubr.f32.vlgmr.msra.gmra.mrb[2].mxu1 %v1825_v29  ;;  %v3606_v29 = vld [vmem:[%s5869_s5] sm:$0xff]  ;;  %v3640_v35 = vsel %vm3629_vm3, %v3608_v31, 0 }
 0x1d9   : > { %4756 = vmatpush3.xpose.msra.mxu1 %v1836_v37  ;;  %4817 = vmatprep.mubr.msk.f32.mxu0 %vm5349_vm0, %v5350_v41  ;;  %v3634_v32 = vsel %vm3629_vm3, %v3606_v29, 0  ;;  %v3611_v37 = vld [vmem:[%s5869_s5 + $0x28] sm:$0xff]  ;;  %v3688_v43 = vand.u32 4294901760, %v3640_v35 }
 0x1da   : > { %4820 = vmatprep.subr.mxu0 %v5350_v41  ;;  %4757 = vmatprep.mubr.msk.f32.mxu1 %vm5349_vm0, %v5350_v41  ;;  %v3682_v39 = vand.u32 4294901760, %v3634_v32 }
 0x1db   : > { %4760 = vmatprep.subr.mxu1 %v5350_v41 }
 0x1df   : > { %4818 = vmatmul.mubr.f32.vlgmr.msra.gmra.mrb[4].mxu0 %v5507_v16 }
 0x1e0   : > { %4821 = vmatpush3.xpose.msra.mxu0 %v2690_v25  ;;  %4758 = vmatmul.mubr.f32.vlgmr.msra.gmra.mrb[2].mxu1 %v5510_v20 }
 0x1e1   : > { %4761 = vmatpush3.xpose.msra.mxu1 %v1758_v28  ;;  %4822 = vmatprep.mubr.msk.f32.mxu0 %vm5349_vm0, %v5350_v41 }
 0x1e2   : > { %4762 = vmatprep.mubr.msk.f32.mxu1 %vm5349_vm0, %v5350_v41  ;;  %4765 = vmatprep.subr.mxu1 %v5350_v41 }
 0x1e3   : > { %5155 = vmatprep.subr.bf16.mxu0 %v5348_v38 }
 0x1e7   : > { %4823 = vmatmul.mubr.f32.vlgmr.msra.gmra.mrb[4].mxu0 %v5507_v16 }
 0x1e8   : > { %4763 = vmatmul.mubr.f32.vlgmr.msra.gmra.mrb[2].mxu1 %v5510_v20  ;;  %4992 = vmatprep.mubr.msk.f32.mxu0 %vm5349_vm0, %v5350_v41 }
 0x1e9   : > { %4767 = vmatprep.mubr.msk.f32.mxu1 %vm5349_vm0, %v5350_v41 }
 0x2ba   : > { %v3131_v46 = vpop.f32.mrb[4].mxu0 }
 0x2bb   : > { %v2199_v47 = vpop.f32.mrb[2].mxu1  ;;  %v4824_v48 = vpop.f32.mrb[5].mxu0  ;;  %v3135_v49 = vsel %vm2203_vm2, %v3131_v46, -inf }
 0x2bc   : > { %v4764_v50 = vpop.f32.mrb[3].mxu1  ;;  %3136 = vmax.xlane.f32.xlu1 %v3135_v49  ;;  %v2204_v51 = vsel %vm2203_vm2, %v2199_v47, -inf  ;;  %v3649_v48 = vsel %vm3629_vm3, %v3611_v37, 0 }
 0x2bd   : > { %2205 = vmax.xlane.f32.xlu0 %v2204_v51  ;;  %v3614_v50 = vld [vmem:[%s5869_s5 + $0x40] sm:$0xff]  ;;  %v3615_v51 = vld [vmem:[%s5869_s5 + $0x48] sm:$0xff] }
 0x2be   : > { %v3658_v62 = vsel %vm3629_vm3, %v3614_v50, 0 }
 0x2bf   : > { %v3706_v5 = vand.u32 4294901760, %v3658_v62 }
 0x349   : > { %v3137_v52 = vpop.xlane.xlu1 %3136 }
 0x34a   : > { %v3138_v53 = vsub.f32 %v3131_v46, %v3137_v52  ;;  %v2206_v54 = vpop.xlane.xlu0 %2205  ;;  %v3691_v46 = vand.u32 4294901760, %v3643_v42  ;;  %v5639_v52 = vpack.c.bf16 %v3685_v40, %v3682_v39 }
 0x34b   : > { %v2207_v55 = vsub.f32 %v2199_v47, %v2206_v54  ;;  %v3646_v47 = vsel %vm3629_vm3, %v3610_v36, 0  ;;  %v5643_v54 = vsub.f32 %v3637_v33, %v3685_v40  ;;  %v3621_v33 = vld [vmem:[%s5869_s5 + $0x78] sm:$0xff] }
 0x34c   : > { %v3139_v56 = vmul.f32 1.442695, %v3138_v53  ;;  %v5641_v53 = vsub.f32 %v3634_v32, %v3682_v39  ;;  %5157 = vmatpush3.bf16.xpose.msra.mxu0 %v5639_v52  ;;  %v3620_v32 = vld [vmem:[%s5869_s5 + $0x70] sm:$0xff] }
 0x34d   : > { %v2208_v57 = vmul.f32 1.442695, %v2207_v55  ;;  %v5645_v55 = vsub.f32 %v3640_v35, %v3688_v43  ;;  %5158 = vmatprep.subr.bf16.mxu0 %v5348_v38  ;;  %v3676_v34 = vsel %vm3629_vm3, %v3620_v32, 0  ;;  %v3679_v35 = vsel %vm3629_vm3, %v3621_v33, 0 }
 0x34e   : > { %5328 = vpow2.f32 %v3139_v56  ;;  %v5647_v56 = vsub.f32 %v3643_v42, %v3691_v46  ;;  %v3724_v36 = vand.u32 4294901760, %v3676_v34  ;;  %v3727_v37 = vand.u32 4294901760, %v3679_v35 }
 0x34f   : > { %5330 = vpow2.f32 %v2208_v57  ;;  %v3694_v57 = vand.u32 4294901760, %v3646_v47 }
 0x350   : > { %v5736_v39 = vpack.c.bf16 %v3727_v37, %v3724_v36  ;;  %v5738_v40 = vsub.f32 %v3676_v34, %v3724_v36  ;;  %v5740_v42 = vsub.f32 %v3679_v35, %v3727_v37 }
 0x358   : > { %v5329_v58 = vpop.eup %5328 }
 0x359   : > { %v5331_v59 = vpop.eup %5330  ;;  %v3141_v60 = vsel %vm2203_vm2, %v5329_v58, 0.0 }
 0x35a   : > { %3142 = vadd.xlane.f32.xlu1 %v3141_v60  ;;  %v2210_v61 = vsel %vm2203_vm2, %v5331_v59, 0.0  ;;  %v3655_v60 = vsel %vm3629_vm3, %v3613_v45, 0 }
 0x35b   : > { %2211 = vadd.xlane.f32.xlu0 %v2210_v61 }
 0x371   : > { %3146 = vrot.lane.b32.xlu0 %v1732_v44, %s5351_s22  ;;  %v3612_v44 = vld [vmem:[%s5869_s5 + $0x30] sm:$0xff] }
 0x372   : > { %v3652_v49 = vsel %vm3629_vm3, %v3612_v44, 0 }
 0x373   : > { %v3700_v61 = vand.u32 4294901760, %v3652_v49 }
 0x3e7   : > { %v3143_v13 = vpop.xlane.xlu1 %3142 }
 0x3e8   : > { %v2212_v63 = vpop.xlane.xlu0 %2211 }
 0x3e9   : > { %5332 = vrcp.f32 %v2212_v63  ;;  %v3661_v63 = vsel %vm3629_vm3, %v3615_v51, 0 }
 0x3ea   : > { %5334 = vrcp.f32 %v3143_v13  ;;  %v5678_v13 = vpack.c.bf16 %v3691_v46, %v3688_v43  ;;  %v3775_v46 = vand.u32 4294901760, %v5641_v53 }
 0x3ec   : > { %v3147_v15 = vpop.permute.xlu0 %3146  ;;  %5160 = vmatpush3.bf16.xpose.msra.mxu0 %v5678_v13  ;;  %v3776_v50 = vsub.f32 %v5641_v53, %v3775_v46 }
 0x3ed   : > { %v3148_v17 = vsel %vm2203_vm2, %v3147_v15, 0  ;;  %5161 = vmatprep.subr.bf16.mxu0 %v5348_v38 }
 0x3ee   : > { %v3219_v19 = vand.u32 4294901760, %v3148_v17 }
 0x3f0   : > { %v3220_v21 = vsub.f32 %v3148_v17, %v3219_v19 }
 0x3f2   : > { %v3221_v23 = vand.u32 4294901760, %v3220_v21 }
 0x3f3   : > { %v5333_v3 = vpop.eup %5332 }
 0x3f4   : > { %v2214_v4 = vmul.f32 %v5333_v3, %v5331_v59  ;;  %v5335_v14 = vpop.eup %5334  ;;  %v3222_v25 = vsub.f32 %v3220_v21, %v3221_v23  ;;  %v3616_v59 = vld [vmem:[%s5869_s5 + $0x50] sm:$0xff]  ;;  %v3703_v3 = vand.u32 4294901760, %v3655_v60 }
 0x3f5   : > { %v3145_v16 = vmul.f32 %v5335_v14, %v5329_v58  ;;  %v3697_v58 = vand.u32 4294901760, %v3649_v48  ;;  %v5680_v14 = vsub.f32 %v3658_v62, %v3706_v5  ;;  %v3789_v62 = vand.u32 4294901760, %v5645_v55 }
 0x3f6   : > { %v2219_v6 = vsel %vm2203_vm2, %v2214_v4, 0  ;;  %v3223_v27 = vand.u32 4294901760, %v3222_v25  ;;  %v5666_v4 = vsub.f32 %v3652_v49, %v3700_v61 }
 0x3f7   : > { %v2222_v7 = vand.u32 4294901760, %v2219_v6  ;;  %v3151_v18 = vsel %vm2203_vm2, %v3145_v16, 0  ;;  %v5698_v25 = vpack.c.bf16 %v3697_v58, %v3694_v57 }
 0x3f8   : > { %v3154_v20 = vand.u32 4294901760, %v3151_v18  ;;  %v3817_v33 = vand.u32 4294901760, %v5666_v4 }
 0x3f9   : > { %4766 = vmatpush3.xpose.msra.mxu1 %v2222_v7  ;;  %v2299_v8 = vsub.f32 %v2219_v6, %v2222_v7  ;;  %v3709_v6 = vand.u32 4294901760, %v3661_v63  ;;  %5163 = vmatpush3.bf16.xpose.msra.mxu0 %v5698_v25 }
 0x3fa   : > { %4770 = vmatprep.subr.mxu1 %v5350_v41  ;;  %v3231_v22 = vsub.f32 %v3151_v18, %v3154_v20  ;;  %5164 = vmatprep.subr.bf16.mxu0 %v5348_v38  ;;  %v3818_v36 = vsub.f32 %v5666_v4, %v3817_v33 }
 0x3fb   : > { %v2300_v10 = vand.u32 4294901760, %v2299_v8  ;;  %v5682_v15 = vsub.f32 %v3661_v63, %v3709_v6  ;;  %v3796_v63 = vand.u32 4294901760, %v5647_v56 }
 0x3fc   : > { %4768 = vmatmul.mubr.f32.vlgmr.msra.gmra.mrb[4].mxu1 %v2291_v9  ;;  %v3232_v24 = vand.u32 4294901760, %v3231_v22  ;;  %v3619_v9 = vld [vmem:[%s5869_s5 + $0x68] sm:$0xff] }
 0x3fd   : > { %v2301_v11 = vsub.f32 %v2299_v8, %v2300_v10  ;;  %4772 = vmatprep.mubr.msk.f32.mxu1 %vm5349_vm0, %v5350_v41 }
 0x3fe   : > { %v3233_v26 = vsub.f32 %v3231_v22, %v3232_v24 }
 0x3ff   : > { %v2302_v12 = vand.u32 4294901760, %v2301_v11 }
 0x400   : > { %v3234_v28 = vand.u32 4294901760, %v3233_v26  ;;  %v5704_v26 = vpack.c.bf16 %v3703_v3, %v3700_v61 }
 0x401   : > { %4771 = vmatpush3.xpose.msra.mxu1 %v2302_v12 }
 0x402   : > { %4775 = vmatprep.subr.mxu1 %v5350_v41  ;;  %5166 = vmatpush3.bf16.xpose.msra.mxu0 %v5704_v26 }
 0x403   : > { %5167 = vmatprep.subr.bf16.mxu0 %v5348_v38 }
 0x404   : > { %4773 = vmatmul.mubr.f32.vlgmr.msra.gmra.mrb[4].mxu1 %v2287_v0 }
 0x405   : > { %4776 = vmatpush3.xpose.msra.mxu1 %v2299_v8  ;;  %4777 = vmatprep.mubr.msk.f32.mxu1 %vm5349_vm0, %v5350_v41  ;;  %v3618_v8 = vld [vmem:[%s5869_s5 + $0x60] sm:$0xff] }
 0x406   : > { %4780 = vmatprep.subr.mxu1 %v5350_v41  ;;  %v3670_v18 = vsel %vm3629_vm3, %v3618_v8, 0 }
 0x40c   : > { %4778 = vmatmul.mubr.f32.vlgmr.msra.gmra.mrb[4].mxu1 %v2288_v1  ;;  %v5662_v1 = vsub.f32 %v3646_v47, %v3694_v57  ;;  %v3782_v47 = vand.u32 4294901760, %v5643_v54 }
 0x40d   : > { %4781 = vmatpush3.xpose.msra.mxu1 %v2222_v7  ;;  %4782 = vmatprep.mubr.msk.f32.mxu1 %vm5349_vm0, %v5350_v41 }
 0x40e   : > { %4785 = vmatprep.subr.mxu1 %v5350_v41  ;;  %v3783_v51 = vsub.f32 %v5643_v54, %v3782_v47 }
 0x410   : > { %v3784_v61 = vand.u32 4294901760, %v3783_v51 }
 0x414   : > { %4783 = vmatmul.mubr.f32.vlgmr.msra.gmra.mrb[4].mxu1 %v2289_v2  ;;  %v5664_v2 = vsub.f32 %v3649_v48, %v3697_v58 }
 0x415   : > { %4786 = vmatpush3.xpose.msra.mxu1 %v2300_v10  ;;  %4787 = vmatprep.mubr.msk.f32.mxu1 %vm5349_vm0, %v5350_v41  ;;  %v5675_v10 = vsub.f32 %v3655_v60, %v3703_v3  ;;  %v3777_v60 = vand.u32 4294901760, %v3776_v50 }
 0x416   : > { %4790 = vmatprep.subr.mxu1 %v5350_v41 }
 0x417   : > { %v3824_v34 = vand.u32 4294901760, %v5675_v10 }
 0x419   : > { %v3825_v37 = vsub.f32 %v5675_v10, %v3824_v34 }
 0x41c   : > { %4788 = vmatmul.mubr.f32.vlgmr.msra.gmra.mrb[4].mxu1 %v2287_v0 }
 0x41d   : > { %4791 = vmatpush3.xpose.msra.mxu1 %v2222_v7  ;;  %4792 = vmatprep.mubr.msk.f32.mxu1 %vm5349_vm0, %v5350_v41  ;;  %v3664_v7 = vsel %vm3629_vm3, %v3616_v59, 0  ;;  %v5180_v59 = vpack.c.bf16 %v3782_v47, %v3775_v46  ;;  %v3831_v46 = vand.u32 4294901760, %v5680_v14  ;;  %v3838_v47 = vand.u32 4294901760, %v5682_v15 }
 0x41e   : > { %4825 = vmatprep.subr.mxu1 %v5350_v41  ;;  %v3712_v12 = vand.u32 4294901760, %v3664_v7 }
 0x41f   : > { %v3839_v50 = vsub.f32 %v5682_v15, %v3838_v47  ;;  %v5192_v51 = vpack.c.bf16 %v3838_v47, %v3831_v46 }
 0x420   : > { %v5684_v17 = vsub.f32 %v3664_v7, %v3712_v12  ;;  %v3797_v7 = vsub.f32 %v5647_v56, %v3796_v63 }
 0x424   : > { %4793 = vmatmul.mubr.f32.vlgmr.msra.gmra.mrb[4].mxu1 %v2287_v0  ;;  %v3617_v0 = vld [vmem:[%s5869_s5 + $0x58] sm:$0xff] }
 0x425   : > { %4826 = vmatpush3.xpose.msra.mxu1 %v3154_v20  ;;  %4827 = vmatprep.mubr.msk.f32.mxu1 %vm5349_vm0, %v5350_v41  ;;  %v3667_v11 = vsel %vm3629_vm3, %v3617_v0, 0 }
 0x426   : > { %4830 = vmatprep.subr.mxu1 %v5350_v41  ;;  %v3715_v16 = vand.u32 4294901760, %v3667_v11 }
 0x428   : > { %4828 = vmatmul.mubr.f32.vlgmr.msra.gmra.mrb[6].mxu1 %v3223_v27  ;;  %v5710_v27 = vpack.c.bf16 %v3709_v6, %v3706_v5  ;;  %v5108_v5 = vpack.c.bf16 %v3784_v61, %v3777_v60  ;;  %v3790_v6 = vsub.f32 %v5645_v55, %v3789_v62  ;;  %v3840_v60 = vand.u32 4294901760, %v3839_v50 }
 0x429   : > { %4831 = vmatpush3.xpose.msra.mxu1 %v3234_v28  ;;  %4832 = vmatprep.mubr.msk.f32.mxu1 %vm5349_vm0, %v5350_v41  ;;  %v5716_v28 = vpack.c.bf16 %v3715_v16, %v3712_v12  ;;  %v3798_v12 = vand.u32 4294901760, %v3797_v7  ;;  %v3845_v61 = vand.u32 4294901760, %v5684_v17 }
 0x42a   : > { %4835 = vmatprep.subr.mxu1 %v5350_v41  ;;  %5169 = vmatpush3.bf16.xpose.msra.mxu0 %v5710_v27 }
 0x42b   : > { %5170 = vmatprep.subr.bf16.mxu0 %v5348_v38 }
 0x430   : > { %4833 = vmatmul.mubr.f32.vlgmr.msra.gmra.mrb[6].mxu1 %v3219_v19 }
 0x431   : > { %4836 = vmatpush3.xpose.msra.mxu1 %v3231_v22  ;;  %4837 = vmatprep.mubr.msk.f32.mxu1 %vm5349_vm0, %v5350_v41 }
 0x432   : > { %4840 = vmatprep.subr.mxu1 %v5350_v41  ;;  %5172 = vmatpush3.bf16.xpose.msra.mxu0 %v5716_v28 }
 0x433   : > { %5173 = vmatprep.subr.bf16.mxu0 %v5348_v38 }
 0x438   : > { %4838 = vmatmul.mubr.f32.vlgmr.msra.gmra.mrb[6].mxu1 %v3220_v21  ;;  %v3718_v21 = vand.u32 4294901760, %v3670_v18 }
 0x439   : > { %4841 = vmatpush3.xpose.msra.mxu1 %v3154_v20  ;;  %4842 = vmatprep.mubr.msk.f32.mxu1 %vm5349_vm0, %v5350_v41 }
 0x43a   : > { %4845 = vmatprep.subr.mxu1 %v5350_v41 }
 0x440   : > { %4843 = vmatmul.mubr.f32.vlgmr.msra.gmra.mrb[6].mxu1 %v3221_v23  ;;  %v5692_v23 = vsub.f32 %v3670_v18, %v3718_v21  ;;  %v3810_v18 = vand.u32 4294901760, %v5664_v2 }
 0x441   : > { %4846 = vmatpush3.xpose.msra.mxu1 %v3232_v24  ;;  %4847 = vmatprep.mubr.msk.f32.mxu1 %vm5349_vm0, %v5350_v41 }
 0x442   : > { %4850 = vmatprep.subr.mxu1 %v5350_v41 }
 0x448   : > { %4848 = vmatmul.mubr.f32.vlgmr.msra.gmra.mrb[6].mxu1 %v3219_v19 }
 0x449   : > { %4851 = vmatpush3.xpose.msra.mxu1 %v3154_v20  ;;  %4852 = vmatprep.mubr.msk.f32.mxu1 %vm5349_vm0, %v5350_v41  ;;  %v5688_v20 = vsub.f32 %v3667_v11, %v3715_v16  ;;  %v3791_v11 = vand.u32 4294901760, %v3790_v6  ;;  %v3803_v16 = vand.u32 4294901760, %v5662_v1 }
 0x44a   : > { %5083 = vmatprep.subr.bf16.mxu1 %v5348_v38 }
 0x450   : > { %4853 = vmatmul.mubr.f32.vlgmr.msra.gmra.mrb[6].mxu1 %v3219_v19  ;;  %v3673_v19 = vsel %vm3629_vm3, %v3619_v9, 0  ;;  %v5183_v9 = vpack.c.bf16 %v3796_v63, %v3789_v62  ;;  %v3852_v62 = vand.u32 4294901760, %v5688_v20 }
 0x451   : > { %4887 = vmatprep.mubr.msk.f32.mxu1 %vm5349_vm0, %v5350_v41  ;;  %5085 = vmatpush3.bf16.xpose.msra.mxu1 %v5639_v52  ;;  %v3721_v22 = vand.u32 4294901760, %v3673_v19 }
 0x452   : > { %5086 = vmatprep.subr.bf16.mxu1 %v5348_v38 }
 0x453   : > { %v5694_v24 = vsub.f32 %v3673_v19, %v3721_v22  ;;  %v5722_v29 = vpack.c.bf16 %v3721_v22, %v3718_v21  ;;  %v5111_v19 = vpack.c.bf16 %v3798_v12, %v3791_v11  ;;  %v3804_v21 = vsub.f32 %v5662_v1, %v3803_v16 }
 0x454   : > { %v3811_v22 = vsub.f32 %v5664_v2, %v3810_v18 }
 0x455   : > { %5175 = vmatpush3.bf16.xpose.msra.mxu0 %v5722_v29 }
 0x456   : > { %5176 = vmatprep.subr.bf16.mxu0 %v5348_v38  ;;  %v3812_v32 = vand.u32 4294901760, %v3811_v22  ;;  %v3873_v22 = vand.u32 4294901760, %v5738_v40 }
 0x459   : > { %5088 = vmatpush3.bf16.xpose.msra.mxu1 %v5678_v13 }
 0x45a   : > { %5089 = vmatprep.subr.bf16.mxu1 %v5348_v38 }
 0x45d   : > { %5178 = vmatpush3.bf16.xpose.msra.mxu0 %v5736_v39 }
 0x45e   : > { %5179 = vmatprep.subr.bf16.mxu0 %v5348_v38 }
 0x461   : > { %5091 = vmatpush3.bf16.xpose.msra.mxu1 %v5698_v25 }
 0x462   : > { %5092 = vmatprep.subr.bf16.mxu1 %v5348_v38 }
 0x469   : > { %5094 = vmatpush3.bf16.xpose.msra.mxu1 %v5704_v26 }
 0x46a   : > { %5095 = vmatprep.subr.bf16.mxu1 %v5348_v38 }
 0x471   : > { %5097 = vmatpush3.bf16.xpose.msra.mxu1 %v5710_v27 }
 0x472   : > { %5098 = vmatprep.subr.bf16.mxu1 %v5348_v38 }
 0x479   : > { %5100 = vmatpush3.bf16.xpose.msra.mxu1 %v5716_v28 }
 0x47a   : > { %5101 = vmatprep.subr.bf16.mxu1 %v5348_v38 }
 0x481   : > { %5103 = vmatpush3.bf16.xpose.msra.mxu1 %v5722_v29 }
 0x482   : > { %5104 = vmatprep.subr.bf16.mxu1 %v5348_v38 }
 0x489   : > { %5106 = vmatpush3.bf16.xpose.msra.mxu1 %v5736_v39 }
 0x48a   : > { %5107 = vmatprep.subr.bf16.mxu1 %v5348_v38 }
 0x4f7   : > { %v2663_v30 = vpop.f32.mrb[4].mxu1 }
 0x4f8   : > { %2668 = vst.msk [vmem:[#allocation2] sm:$0xf] %vm2667_vm4, %v2663_v30  ;;  %v4794_v31 = vpop.f32.mrb[5].mxu1  ;;  %v5186_v30 = vpack.c.bf16 %v3810_v18, %v3803_v16 }
 0x4f9   : > { %v3805_v31 = vand.u32 4294901760, %v3804_v21 }
 0x4fb   : > { %v5114_v35 = vpack.c.bf16 %v3812_v32, %v3805_v31  ;;  %v3874_v32 = vsub.f32 %v5738_v40, %v3873_v22 }
 0x523   : > { %v3595_v43 = vpop.f32.mrb[6].mxu1 }
 0x524   : > { %3600 = vrot.lane.b32.xlu1 %v3595_v43, %s5352_s13  ;;  %v4854_v44 = vpop.f32.mrb[7].mxu1  ;;  %v5189_v43 = vpack.c.bf16 %v3824_v34, %v3817_v33 }
 0x525   : > { %v3819_v44 = vand.u32 4294901760, %v3818_v36 }
 0x596   : > { %v3601_v45 = vpop.permute.xlu1 %3600 }
 0x597   : > { %3604 = vst.msk [vmem:[#allocation2] sm:$0xf] %vm3603_vm5, %v3601_v45  ;;  %v3826_v45 = vand.u32 4294901760, %v3825_v37 }
 0x59e   : > { %v3605_v48 = vld [vmem:[#allocation2] sm:$0xf] }
 0x59f   : > { %v3631_v49 = vsel %vm3629_vm3, %v3605_v48, 0  ;;  %v5117_v48 = vpack.c.bf16 %v3826_v45, %v3819_v44 }
 0x5a0   : > { %v5751_v57 = vand.u32 4294901760, %v3631_v49 }
 0x5a2   : > { %v5754_v58 = vsub.f32 %v3631_v49, %v5751_v57  ;;  %v3832_v49 = vsub.f32 %v5680_v14, %v3831_v46 }
 0x5a4   : > { %v3764_v0 = vand.u32 4294901760, %v5754_v58 }
 0x5a6   : > { %4993 = vmatmul.mubr.f32.vlgmr.msra.gmra.mrb[6].mxu0 %v3764_v0  ;;  %v3765_v3 = vsub.f32 %v5754_v58, %v3764_v0  ;;  %v3846_v0 = vsub.f32 %v5684_v17, %v3845_v61 }
 0x5a7   : > { %5181 = vmatpush3.bf16.xpose.msra.mxu0 %v5180_v59  ;;  %5027 = vmatprep.mubr.msk.f32.mxu0 %vm5349_vm0, %v5350_v41  ;;  %v3833_v59 = vand.u32 4294901760, %v3832_v49 }
 0x5a8   : > { %v3766_v8 = vand.u32 4294901760, %v3765_v3  ;;  %5182 = vmatprep.subr.bf16.mxu0 %v5348_v38  ;;  %v3853_v3 = vsub.f32 %v5688_v20, %v3852_v62  ;;  %v3847_v6 = vand.u32 4294901760, %v3846_v0 }
 0x5a9   : > { %v5120_v63 = vpack.c.bf16 %v3840_v60, %v3833_v59 }
 0x5aa   : > { %4888 = vmatmul.mubr.f32.vlgmr.msra.gmra.mrb[8].mxu1 %v3766_v8  ;;  %v3854_v7 = vand.u32 4294901760, %v3853_v3  ;;  %v3859_v8 = vand.u32 4294901760, %v5692_v23 }
 0x5ab   : > { %5109 = vmatpush3.bf16.xpose.msra.mxu1 %v5108_v5  ;;  %4922 = vmatprep.mubr.msk.f32.mxu1 %vm5349_vm0, %v5350_v41  ;;  %v5195_v5 = vpack.c.bf16 %v3852_v62, %v3845_v61 }
 0x5ac   : > { %5110 = vmatprep.subr.bf16.mxu1 %v5348_v38  ;;  %v5123_v11 = vpack.c.bf16 %v3854_v7, %v3847_v6  ;;  %v3860_v12 = vsub.f32 %v5692_v23, %v3859_v8 }
 0x5af   : > { %5184 = vmatpush3.bf16.xpose.msra.mxu0 %v5183_v9  ;;  %v3866_v9 = vand.u32 4294901760, %v5694_v24 }
 0x5b0   : > { %5185 = vmatprep.subr.bf16.mxu0 %v5348_v38 }
 0x5b1   : > { %v3867_v16 = vsub.f32 %v5694_v24, %v3866_v9  ;;  %v5198_v18 = vpack.c.bf16 %v3866_v9, %v3859_v8 }
 0x5b3   : > { %5112 = vmatpush3.bf16.xpose.msra.mxu1 %v5111_v19  ;;  %v3861_v19 = vand.u32 4294901760, %v3860_v12  ;;  %v3868_v21 = vand.u32 4294901760, %v3867_v16 }
 0x5b4   : > { %5113 = vmatprep.subr.bf16.mxu1 %v5348_v38 }
 0x5b5   : > { %v5126_v31 = vpack.c.bf16 %v3868_v21, %v3861_v19 }
 0x5b7   : > { %5187 = vmatpush3.bf16.xpose.msra.mxu0 %v5186_v30  ;;  %v3880_v30 = vand.u32 4294901760, %v5740_v42 }
 0x5b8   : > { %5188 = vmatprep.subr.bf16.mxu0 %v5348_v38 }
 0x5b9   : > { %v3881_v33 = vsub.f32 %v5740_v42, %v3880_v30  ;;  %v5201_v34 = vpack.c.bf16 %v3880_v30, %v3873_v22 }
 0x5bb   : > { %5115 = vmatpush3.bf16.xpose.msra.mxu1 %v5114_v35  ;;  %v3875_v35 = vand.u32 4294901760, %v3874_v32  ;;  %v3882_v36 = vand.u32 4294901760, %v3881_v33 }
 0x5bc   : > { %5116 = vmatprep.subr.bf16.mxu1 %v5348_v38 }
 0x5bd   : > { %v5129_v37 = vpack.c.bf16 %v3882_v36, %v3875_v35 }
 0x5bf   : > { %5190 = vmatpush3.bf16.xpose.msra.mxu0 %v5189_v43  ;;  %v5132_v43 = vpack.c.bf16 %v5643_v54, %v5641_v53  ;;  %v5138_v53 = vpack.c.bf16 %v5664_v2, %v5662_v1  ;;  %v5144_v54 = vpack.c.bf16 %v5682_v15, %v5680_v14  ;;  %v5153_v1 = vpack.c.bf16 %v5740_v42, %v5738_v40 }
 0x5c0   : > { %5191 = vmatprep.subr.bf16.mxu0 %v5348_v38 }
 0x5c3   : > { %5118 = vmatpush3.bf16.xpose.msra.mxu1 %v5117_v48 }
 0x5c4   : > { %5119 = vmatprep.subr.bf16.mxu1 %v5348_v38 }
 0x5c7   : > { %5193 = vmatpush3.bf16.xpose.msra.mxu0 %v5192_v51 }
 0x5c8   : > { %5194 = vmatprep.subr.bf16.mxu0 %v5348_v38 }
 0x5cb   : > { %5121 = vmatpush3.bf16.xpose.msra.mxu1 %v5120_v63 }
 0x5cc   : > { %5122 = vmatprep.subr.bf16.mxu1 %v5348_v38 }
 0x5cf   : > { %5196 = vmatpush3.bf16.xpose.msra.mxu0 %v5195_v5 }
 0x5d0   : > { %5197 = vmatprep.subr.bf16.mxu0 %v5348_v38 }
 0x5d3   : > { %5124 = vmatpush3.bf16.xpose.msra.mxu1 %v5123_v11 }
 0x5d4   : > { %5125 = vmatprep.subr.bf16.mxu1 %v5348_v38 }
 0x5d7   : > { %5199 = vmatpush3.bf16.xpose.msra.mxu0 %v5198_v18 }
 0x5d8   : > { %5200 = vmatprep.subr.bf16.mxu0 %v5348_v38 }
 0x5db   : > { %5127 = vmatpush3.bf16.xpose.msra.mxu1 %v5126_v31 }
 0x5dc   : > { %5128 = vmatprep.subr.bf16.mxu1 %v5348_v38 }
 0x5df   : > { %5202 = vmatpush3.bf16.xpose.msra.mxu0 %v5201_v34 }
 0x5e0   : > { %5203 = vmatprep.subr.bf16.mxu0 %v5348_v38 }
 0x5e3   : > { %5130 = vmatpush3.bf16.xpose.msra.mxu1 %v5129_v37 }
 0x5e4   : > { %5131 = vmatprep.subr.bf16.mxu1 %v5348_v38 }
 0x5e6   : > { %5028 = vmatmul.mubr.f32.vlgmr.msra.gmra.mrb[6].mxu0 %v5751_v57 }
 0x5e7   : > { %5205 = vmatpush3.bf16.xpose.msra.mxu0 %v5639_v52  ;;  %5062 = vmatprep.mubr.msk.f32.mxu0 %vm5349_vm0, %v5350_v41  ;;  %v5135_v52 = vpack.c.bf16 %v5647_v56, %v5645_v55  ;;  %v5147_v55 = vpack.c.bf16 %v5688_v20, %v5684_v17  ;;  %v5150_v56 = vpack.c.bf16 %v5694_v24, %v5692_v23 }
 0x5e8   : > { %5206 = vmatprep.subr.bf16.mxu0 %v5348_v38 }
 0x5ea   : > { %4923 = vmatmul.mubr.f32.vlgmr.msra.gmra.mrb[8].mxu1 %v5751_v57 }
 0x5eb   : > { %5133 = vmatpush3.bf16.xpose.msra.mxu1 %v5132_v43  ;;  %4957 = vmatprep.mubr.msk.f32.mxu1 %vm5349_vm0, %v5350_v41  ;;  %v5141_v41 = vpack.c.bf16 %v5675_v10, %v5666_v4  ;;  %v4424_v10 = vld [vmem:[%s5870_s6] ss:$0 sm:$0xff] }
 0x5ec   : > { %5134 = vmatprep.subr.bf16.mxu1 %v5348_v38 }
 0x5ef   : > { %5208 = vmatpush3.bf16.xpose.msra.mxu0 %v5678_v13 }
 0x5f0   : > { %5209 = vmatprep.subr.bf16.mxu0 %v5348_v38 }
 0x5f3   : > { %5136 = vmatpush3.bf16.xpose.msra.mxu1 %v5135_v52 }
 0x5f4   : > { %5137 = vmatprep.subr.bf16.mxu1 %v5348_v38 }
 0x5f7   : > { %5211 = vmatpush3.bf16.xpose.msra.mxu0 %v5698_v25 }
 0x5f8   : > { %5212 = vmatprep.subr.bf16.mxu0 %v5348_v38 }
 0x5fb   : > { %5139 = vmatpush3.bf16.xpose.msra.mxu1 %v5138_v53 }
 0x5fc   : > { %5140 = vmatprep.subr.bf16.mxu1 %v5348_v38 }
 0x5ff   : > { %5214 = vmatpush3.bf16.xpose.msra.mxu0 %v5704_v26 }
 0x600   : > { %5215 = vmatprep.subr.bf16.mxu0 %v5348_v38 }
 0x603   : > { %5142 = vmatpush3.bf16.xpose.msra.mxu1 %v5141_v41 }
 0x604   : > { %5143 = vmatprep.subr.bf16.mxu1 %v5348_v38 }
 0x607   : > { %5217 = vmatpush3.bf16.xpose.msra.mxu0 %v5710_v27 }
 0x608   : > { %5218 = vmatprep.subr.bf16.mxu0 %v5348_v38 }
 0x60b   : > { %5145 = vmatpush3.bf16.xpose.msra.mxu1 %v5144_v54 }
 0x60c   : > { %5146 = vmatprep.subr.bf16.mxu1 %v5348_v38 }
 0x60f   : > { %5220 = vmatpush3.bf16.xpose.msra.mxu0 %v5716_v28 }
 0x610   : > { %5221 = vmatprep.subr.bf16.mxu0 %v5348_v38 }
 0x613   : > { %5148 = vmatpush3.bf16.xpose.msra.mxu1 %v5147_v55 }
 0x614   : > { %5149 = vmatprep.subr.bf16.mxu1 %v5348_v38 }
 0x617   : > { %5223 = vmatpush3.bf16.xpose.msra.mxu0 %v5722_v29 }
 0x618   : > { %5224 = vmatprep.subr.bf16.mxu0 %v5348_v38 }
 0x61b   : > { %5151 = vmatpush3.bf16.xpose.msra.mxu1 %v5150_v56 }
 0x61c   : > { %5152 = vmatprep.subr.bf16.mxu1 %v5348_v38 }
 0x61f   : > { %5226 = vmatpush3.bf16.xpose.msra.mxu0 %v5736_v39 }
 0x623   : > { %5154 = vmatpush3.bf16.xpose.msra.mxu1 %v5153_v1 }
 0x626   : > { %5063 = vmatmul.mubr.f32.vlgmr.msra.gmra.mrb[6].mxu0 %v5751_v57 }
 0x62a   : > { %4958 = vmatmul.mubr.f32.vlgmr.msra.gmra.mrb[8].mxu1 %v5754_v58 }
 0x6f9   : > { %v4318_v2 = vpop.f32.mrb[6].mxu0 }
 0x6fa   : > { %v5064_v4 = vpop.f32.mrb[7].mxu0 }
 0x6fd   : > { %v4023_v13 = vpop.f32.mrb[8].mxu1 }
 0x6fe   : > { %v5227_v14 = vadd.f32 %v4424_v10, %v4023_v13  ;;  %v4959_v15 = vpop.f32.mrb[9].mxu1 }
 0x700   : > { %v5228_v38 = vadd.f32 %v5227_v14, %v4318_v2 }
 0x702   : > { %v4323_v17 = vmul.f32 0.70710677, %v5228_v38  ;;  %v4322_v60 = vmul.f32 0.5, %v5228_v38 }
 0x704   : > { %vm4324_vm6 = vcmp.ge.f32.partialorder %v4323_v17, 0.0  ;;  %v4325_v20 = vsub.f32 0.0, %v4323_v17 }
 0x706   : > { %v4326_v23 = vsel %vm4324_vm6, %v4323_v17, %v4325_v20 }
 0x707   : > { %v4327_v24 = vmul.f32 0.3275911, %v4326_v23  ;;  %v4340_v26 = vmul.f32 %v4326_v23, %v4326_v23 }
 0x709   : > { %v4328_v25 = vadd.f32 1.0, %v4327_v24  ;;  %v4341_v28 = vsub.f32 0.0, %v4340_v26 }
 0x70b   : > { %5336 = vrcp.f32 %v4328_v25  ;;  %v4342_v40 = vmul.f32 1.442695, %v4341_v28 }
 0x70d   : > { %5338 = vpow2.f32 %v4342_v40 }
 0x715   : > { %v5337_v27 = vpop.eup %5336 }
 0x716   : > { %v4331_v29 = vmul.f32 1.0614054, %v5337_v27 }
 0x717   : > { %v5339_v48 = vpop.eup %5338 }
 0x718   : > { %v4425_v39 = vadd.f32 -1.4531521, %v4331_v29 }
 0x71a   : > { %v4333_v42 = vmul.f32 %v5337_v27, %v4425_v39 }
 0x71c   : > { %v4334_v57 = vadd.f32 1.4214138, %v4333_v42 }
 0x71e   : > { %v4335_v58 = vmul.f32 %v5337_v27, %v4334_v57 }
 0x720   : > { %v4426_v44 = vadd.f32 -0.28449672, %v4335_v58 }
 0x722   : > { %v4337_v45 = vmul.f32 %v5337_v27, %v4426_v44 }
 0x724   : > { %v4338_v46 = vadd.f32 0.2548296, %v4337_v45 }
 0x726   : > { %v4339_v47 = vmul.f32 %v5337_v27, %v4338_v46 }
 0x728   : > { %v4344_v49 = vmul.f32 %v5339_v48, %v4339_v47 }
 0x72a   : > { %v4345_v50 = vsub.f32 1.0, %v4344_v49 }
 0x72c   : > { %v4346_v51 = vsub.f32 0.0, %v4345_v50 }
 0x72e   : > { %v4347_v59 = vsel %vm4324_vm6, %v4345_v50, %v4346_v51 }
 0x72f   : > { %v4348_v61 = vadd.f32 1.0, %v4347_v59 }
 0x731   : > { %v4349_v62 = vmul.f32 %v4348_v61, %v4322_v60 }
 0x733   : > { %4350 = vst [vmem:[%s290_s18] sm:$0xf] %v4349_v62 }
 0x734 PF: > { %s17_s24 = sadd.s32 1, %s5346_s24  }
 0x735   : > { %p14_p4 = scmp.ge.s32.totalorder %s17_s24, 4  }
 0x737   :  { %16 = sbr.rel (!%p14_p4) target bundleno = 1 (0x1), region = 81 }

// kernel: guided_spatial_sr.11
= control target key start
LH: loop header
LB: loop body
LE: loop exit
PB: predicated region body
PF: predicated region fallthrough
CT: control target
= control target key end

     0   :  { %s9654_s21 = smov 0   ;;  %s10227_s0 = inlined_call_operand.vmem [shape: f32[2,4,290], index: 0, kind: input, shape index: {}]   ;;  %s10228_s1 = inlined_call_operand.vmem [shape: f32[9,1,256], index: 1, kind: input, shape index: {}]   ;;  %s10229_s2 = inlined_call_operand.vmem [shape: f32[9,4,4], index: 2, kind: input, shape index: {}]   ;;  %s10230_s3 = inlined_call_operand.vmem [shape: f32[4,1], index: 3, kind: input, shape index: {}]   ;;  %s10231_s4 = inlined_call_operand.vmem [shape: f32[9,4,4], index: 4, kind: input, shape index: {}]   ;;  %s10232_s5 = inlined_call_operand.vmem [shape: f32[4,1], index: 5, kind: input, shape index: {}]   ;;  %s10233_s6 = inlined_call_operand.vmem [shape: f32[2,4,256], index: 6, kind: output, shape index: {}]  }
   0x1 LB: > { %s9328_s22 = sadd.s32 4294967295, %s9599_s21   ;;  %p9332_p0 = scmp.ge.s32.totalorder %s9599_s21, 1  ;;  %s9599_s21 = sphi %s9654_s21, %s16_s21  }
   0x2   : > { %p212_p1 = scmp.lt.s32.totalorder %s9599_s21, 3 }
   0x4   : > { %p213_p2 = pnand %p9332_p0, %p212_p1 }
   0x5   : > { %v274_v0 = vlaneseq (!%p213_p2)  ;;  %v253_v2 = vld [vmem:[%s10228_s1 + $0x2] sm:$0x3] (!%p213_p2)  ;;  %s9601_s25 = smov (!%p213_p2), 1   ;;  %p242_p3 = scmp.lt.s32.totalorder (!%p213_p2), %s9328_s22, 1  ;;  %vm298_vm0 = vcmask (!%p213_p2), 7168   ;;  %v9602_v10 = vmov (!%p213_p2), 0.0  }
   0x6   : > { %216 = sbr.rel (%p213_p2) target bundleno = 1958 (0x7a6), region = 44  ;;  %391 = vmatprep.mubr.f32.mxu0 (!%p213_p2), %v9602_v10  ;;  %4862 = vst [vmem:[#allocation2] sm:$0xff] (!%p213_p2), %v9602_v10  ;;  %4979 = vmatprep.mubr.f32.mxu1 (!%p213_p2), %v9602_v10  ;;  %v254_v13 = vld [vmem:[%s10228_s1 + $0x4] sm:$0x3] (!%p213_p2)  ;;  %v255_v14 = vld [vmem:[%s10228_s1 + $0x6] sm:$0x3] (!%p213_p2) }
   0x7   : > { %v275_v1 = vshrl.u32 (!%p213_p2), %v274_v0, 7  ;;  %s9603_s10 = smov (!%p213_p2), 127   ;;  %s9604_s11 = smov (!%p213_p2), 2   ;;  %v264_v25 = vld [vmem:[%s10229_s2 + $0x4] sm:$0xf] (!%p213_p2)  ;;  %vm316_vm1 = vcmask (!%p213_p2), 31744  }
   0x8   : > { %s9605_s12 = smov (!%p213_p2), 16   ;;  %v318_v26 = vsel (!%p213_p2), %vm316_vm1, %v264_v25, 0  ;;  %vm313_vm2 = vcmask (!%p213_p2), 1039360   ;;  %vm320_vm3 = vcmask (!%p213_p2), 1043456   ;;  %v256_v37 = vld [vmem:[%s10228_s1 + $0x8] sm:$0x3] (!%p213_p2) }
   0x9   : > { %v9665_v3 = vsub.s32 (!%p213_p2), 0, %v275_v1  ;;  %v9667_v4 = vsub.s32 (!%p213_p2), 1, %v275_v1  ;;  %v9710_v27 = vand.u32 (!%p213_p2), 4294901760, %v318_v26  ;;  %vm1277_vm4 = vcmask (!%p213_p2), 15360   ;;  %v252_v53 = vld [vmem:[%s10228_s1] sm:$0x3] (!%p213_p2) }
   0xa   : > { %vm1782_vm5 = vcmask (!%p213_p2), 130048   ;;  %s9606_s19 = smov (!%p213_p2), 126   ;;  %v257_v0 = vld [vmem:[%s10228_s1 + $0xa] sm:$0x3] (!%p213_p2)  ;;  %s9607_s24 = smov (!%p213_p2), 17   ;;  %vm1292_vm6 = vcmask (!%p213_p2), 1031168  }
   0xb   : > { %v289_v5 = vrot.slane (!%p213_p2), %v253_v2, %v9665_v3  ;;  %v293_v6 = vrot.slane (!%p213_p2), %v253_v2, %v9667_v4  ;;  %v1268_v18 = vrot.slane (!%p213_p2), %v254_v13, %v9665_v3  ;;  %v1272_v19 = vrot.slane (!%p213_p2), %v254_v13, %v9667_v4  ;;  %s9610_s9 = smov (!%p213_p2), 111   ;;  %s9611_s13 = smov (!%p213_p2), 32  }
   0xc   : > { %v1773_v20 = vrot.slane (!%p213_p2), %v255_v14, %v9665_v3  ;;  %v1777_v21 = vrot.slane (!%p213_p2), %v255_v14, %v9667_v4  ;;  %v9713_v28 = vsub.f32 (!%p213_p2), %v318_v26, %v9710_v27  ;;  %v2278_v45 = vrot.slane (!%p213_p2), %v256_v37, %v9665_v3  ;;  %s9612_s14 = smov (!%p213_p2), 110   ;;  %s9613_s15 = smov (!%p213_p2), 33  }
   0xd   : > { %v294_v7 = vcombine.low %v289_v5, %v293_v6  ;;  %s10238_s22 = smov (!%p242_p3, %s9328_s22), 1  ;;  %v1273_v23 = vcombine.low %v1268_v18, %v1272_v19  ;;  %v2282_v46 = vrot.slane %v256_v37, %v9667_v4  ;;  %v277_v61 = vrot.slane %v252_v53, %v9665_v3  ;;  %s9614_s27 = smov 96  }
   0xe   : > { %s9555_s26 = smul.u32 12, %s10238_s22  ;;  %v1778_v24 = vcombine.low %v1773_v20, %v1777_v21  ;;  %v394_v29 = vand.u32 4294901760, %v9713_v28  ;;  %v281_v62 = vrot.slane %v252_v53, %v9667_v4  ;;  %v2783_v6 = vrot.slane %v257_v0, %v9665_v3  ;;  %v263_v20 = vld [vmem:[%s10229_s2] sm:$0xf]  ;;  %s9615_s28 = smov 34  }
   0xf   : > { %295 = vrot.lane.b32.xlu0 %v294_v7, %s9601_s25  ;;  %v2283_v57 = vcombine.low %v2278_v45, %v2282_v46  ;;  %v2787_v7 = vrot.slane %v257_v0, %v9667_v4  ;;  %s9608_s25 = smov 112   ;;  %v793_v21 = vsel %vm316_vm1, %v263_v20, 0  ;;  %vm2287_vm7 = vcmask 138240   ;;  %s9342_s18 = sshll.u32 %s10238_s22, 3 }
  0x10   : > { %s246_s29 = scalar_lea.vmem %s10227_s0, %s9555_s26  ;;  %v395_v31 = vsub.f32 %v9713_v28, %v394_v29  ;;  %s9609_s26 = smov 18   ;;  %vm2792_vm8 = vcmask 146432   ;;  %vm1797_vm9 = vcmask 916480   ;;  %vm2302_vm10 = vcmask 908288  }
  0x11   : > { %v9677_v9 = vld [vmem:[%s246_s29 + $0x8] sm:$0xf]  ;;  %v9682_v11 = vld [vmem:[%s246_s29] sm:$0xff]  ;;  %v2788_v14 = vcombine.low %v2783_v6, %v2787_v7  ;;  %vm3297_vm11 = vcmask 261120   ;;  %vm3802_vm12 = vcmask 269312   ;;  %s9616_s29 = smov 95  }
  0x12   : > { %v396_v40 = vand.u32 4294901760, %v395_v31  ;;  %vm2807_vm13 = vcmask 900096   ;;  %vm3312_vm14 = vcmask 785408   ;;  %vm4307_vm15 = vcmask 277504  }
  0x81   : > { %v296_v8 = vpop.permute.xlu0 %295 }
  0x82   : > { %v9684_v12 = vrot.slane %v296_v8, 4 }
  0x84   : > { %v9693_v15 = vsel %vm298_vm0, %v9684_v12, %v296_v8  ;;  %v303_v16 = vmul.f32 %v9684_v12, %v9677_v9  ;;  %v9768_v8 = vcombine.low %v277_v61, %v281_v62  ;;  %vm3817_vm0 = vcmask 777216  }
  0x85   : > { %v302_v17 = vmul.f32 %v9693_v15, %v9682_v11 }
  0x86   : > { %311 = vrot.lane.b32.xlu1 %v303_v16, %s9603_s10  ;;  %v284_v16 = vmul.f32 %v9768_v8, %v9682_v11 }
  0x87   : > { %v306_v22 = vcombine.high %v302_v17, %v302_v17 }
  0x89   : > { %309 = vrot.lane.b32.xlu0 %v306_v22, %s9603_s10  ;;  %v795_v22 = vsel %vm320_vm3, %v284_v16, 0 }
  0x8a   : > { %307 = vrot.lane.b32.xlu1 %v302_v17, %s9603_s10  ;;  %v791_v17 = vcombine.high %v284_v16, %v284_v16  ;;  %v801_v25 = vand.u32 4294901760, %v795_v22  ;;  %v259_v16 = vld [vmem:[%s10228_s1 + $0xe] sm:$0x3] }
  0x8c   : > { %v797_v18 = vsel %vm320_vm3, %v791_v17, 0 }
  0x8d   : > { %1274 = vrot.lane.b32.xlu0 %v1273_v23, %s9604_s11  ;;  %v799_v19 = vand.u32 4294901760, %v797_v18 }
  0x8e   : > { %1779 = vrot.lane.b32.xlu1 %v1778_v24, %s9605_s12  ;;  %v866_v24 = vand.u32 4294901760, %v793_v21  ;;  %s9617_s12 = smov 94  }
  0x8f   : > { %v878_v23 = vsub.f32 %v797_v18, %v799_v19 }
  0x91   : > { %v879_v26 = vand.u32 4294901760, %v878_v23 }
  0xf8   : > { %v312_v30 = vpop.permute.xlu1 %311 }
  0xfb   : > { %v310_v32 = vpop.permute.xlu0 %309 }
  0xfc   : > { %v315_v33 = vsel %vm313_vm2, %v310_v32, %v312_v30  ;;  %v308_v34 = vpop.permute.xlu1 %307  ;;  %v867_v30 = vsub.f32 %v793_v21, %v866_v24  ;;  %v3793_v21 = vrot.slane %v259_v16, %v9665_v3 }
  0xfd   : > { %v323_v35 = vsel %vm320_vm3, %v315_v33, 0  ;;  %v314_v36 = vsel %vm313_vm2, %v308_v34, %v310_v32 }
  0xfe   : > { %v9725_v38 = vand.u32 4294901760, %v323_v35  ;;  %v321_v39 = vsel %vm320_vm3, %v314_v36, 0  ;;  %v868_v31 = vand.u32 4294901760, %v867_v30 }
  0xff   : > { %v9728_v41 = vand.u32 4294901760, %v321_v39  ;;  %v1275_v42 = vpop.permute.xlu0 %1274 }
 0x100   : > { %v404_v43 = vsub.f32 %v323_v35, %v9725_v38  ;;  %v9731_v44 = vrot.slane %v1275_v42, 4  ;;  %326 = vmatprep.subr.mxu0 %v9725_v38  ;;  %v1780_v47 = vpop.permute.xlu1 %1779  ;;  %v869_v34 = vsub.f32 %v867_v30, %v868_v31 }
 0x101   : > { %v410_v48 = vsub.f32 %v321_v39, %v9728_v41  ;;  %328 = vmatpush1.msra.mxu0 %v9728_v41  ;;  %v9738_v49 = vrot.slane %v1780_v47, 4 }
 0x102   : > { %v9741_v50 = vsel %vm1277_vm4, %v9731_v44, %v1275_v42  ;;  %397 = vmatmul.mubr.f32.vlgmr.msra.gmra.mrb[0].mxu0 %v396_v40  ;;  %v1282_v51 = vmul.f32 %v9731_v44, %v9677_v9  ;;  %v405_v52 = vand.u32 4294901760, %v404_v43  ;;  %v870_v36 = vand.u32 4294901760, %v869_v34  ;;  %v258_v42 = vld [vmem:[%s10228_s1 + $0xc] sm:$0x3] }
 0x103   : > { %v411_v54 = vand.u32 4294901760, %v410_v48  ;;  %v1281_v55 = vmul.f32 %v9741_v50, %v9682_v11  ;;  %477 = vmatprep.mubr.f32.mxu0 %v9602_v10  ;;  %v9753_v58 = vsel %vm1782_vm5, %v9738_v49, %v1780_v47  ;;  %v1787_v5 = vmul.f32 %v9738_v49, %v9677_v9 }
 0x104   : > { %1290 = vrot.lane.b32.xlu1 %v1282_v51, %s9606_s19  ;;  %v406_v56 = vsub.f32 %v404_v43, %v405_v52  ;;  %v1786_v2 = vmul.f32 %v9753_v58, %v9682_v11  ;;  %v3292_v53 = vrot.slane %v258_v42, %v9667_v4  ;;  %vm10234_vm4 = vcmask 769024  }
 0x105   : > { %v1285_v59 = vcombine.high %v1281_v55, %v1281_v55  ;;  %v412_v60 = vsub.f32 %v410_v48, %v411_v54  ;;  %vm4863_vm5 = vcmask 273408  }
 0x106   : > { %v407_v63 = vand.u32 4294901760, %v406_v56  ;;  %v1790_v13 = vcombine.high %v1786_v2, %v1786_v2 }
 0x107   : > { %1288 = vrot.lane.b32.xlu0 %v1285_v59, %s9606_s19  ;;  %v413_v1 = vand.u32 4294901760, %v412_v60 }
 0x108   : > { %408 = vmatprep.subr.mxu0 %v407_v63  ;;  %2284 = vrot.lane.b32.xlu1 %v2283_v57, %s9607_s24 }
 0x109   : > { %414 = vmatpush1.msra.mxu0 %v413_v1 }
 0x10a   : > { %479 = vmatmul.mubr.f32.vlgmr.msra.gmra.mrb[0].mxu0 %v9710_v27  ;;  %487 = vmatprep.subr.mxu0 %v404_v43 }
 0x10b   : > { %490 = vmatpush1.msra.mxu0 %v410_v48  ;;  %1286 = vrot.lane.b32.xlu0 %v1281_v55, %s9606_s19  ;;  %v3288_v48 = vrot.slane %v258_v42, %v9665_v3 }
 0x10c   : > { %563 = vmatprep.subr.mxu0 %v9725_v38  ;;  %553 = vmatprep.mubr.f32.mxu0 %v9602_v10 }
 0x10d   : > { %1795 = vrot.lane.b32.xlu1 %v1787_v5, %s9608_s25  ;;  %v3293_v0 = vcombine.low %v3288_v48, %v3292_v53 }
 0x10f   : > { %1793 = vrot.lane.b32.xlu0 %v1790_v13, %s9608_s25 }
 0x111   : > { %2789 = vrot.lane.b32.xlu1 %v2788_v14, %s9609_s26 }
 0x112   : > { %556 = vmatmul.mubr.f32.vlgmr.msra.gmra.mrb[0].mxu0 %v9713_v28  ;;  %v884_v28 = vsub.f32 %v795_v22, %v801_v25 }
 0x113   : > { %565 = vmatpush1.msra.mxu0 %v9728_v41  ;;  %628 = vmatprep.mubr.f32.mxu0 %v9602_v10 }
 0x114   : > { %641 = vmatprep.subr.mxu0 %v405_v52  ;;  %1791 = vrot.lane.b32.xlu0 %v1786_v2, %s9608_s25  ;;  %v885_v32 = vand.u32 4294901760, %v884_v28 }
 0x116   : > { %v886_v35 = vsub.f32 %v884_v28, %v885_v32 }
 0x118   : > { %v887_v37 = vand.u32 4294901760, %v886_v35 }
 0x11a   : > { %632 = vmatmul.mubr.f32.vlgmr.msra.gmra.mrb[0].mxu0 %v394_v29  ;;  %v880_v29 = vsub.f32 %v878_v23, %v879_v26 }
 0x11b   : > { %645 = vmatpush1.msra.mxu0 %v411_v54  ;;  %708 = vmatprep.mubr.f32.mxu0 %v9602_v10 }
 0x11c   : > { %717 = vmatprep.subr.mxu0 %v9725_v38  ;;  %v881_v33 = vand.u32 4294901760, %v880_v29 }
 0x122   : > { %710 = vmatmul.mubr.f32.vlgmr.msra.gmra.mrb[0].mxu0 %v9710_v27 }
 0x123   : > { %719 = vmatpush1.msra.mxu0 %v9728_v41  ;;  %782 = vmatprep.mubr.f32.mxu0 %v9602_v10 }
 0x124   : > { %800 = vmatprep.subr.mxu0 %v799_v19 }
 0x12a   : > { %784 = vmatmul.mubr.f32.vlgmr.msra.gmra.mrb[0].mxu0 %v9710_v27  ;;  %v265_v27 = vld [vmem:[%s10229_s2 + $0x8] sm:$0xf] }
 0x12b   : > { %802 = vmatpush1.msra.mxu0 %v801_v25  ;;  %865 = vmatprep.mubr.f32.mxu0 %v9602_v10  ;;  %v1296_v38 = vsel %vm316_vm1, %v265_v27, 0 }
 0x12c   : > { %882 = vmatprep.subr.mxu0 %v881_v33  ;;  %v9807_v39 = vand.u32 4294901760, %v1296_v38 }
 0x12e   : > { %v9810_v40 = vsub.f32 %v1296_v38, %v9807_v39 }
 0x130   : > { %v1371_v43 = vand.u32 4294901760, %v9810_v40 }
 0x132   : > { %871 = vmatmul.mubr.f32.vlgmr.msra.gmra.mrb[0].mxu0 %v870_v36  ;;  %v1372_v54 = vsub.f32 %v9810_v40, %v1371_v43  ;;  %v266_v36 = vld [vmem:[%s10229_s2 + $0xc] sm:$0xf] }
 0x133   : > { %888 = vmatpush1.msra.mxu0 %v887_v37  ;;  %951 = vmatprep.mubr.f32.mxu0 %v9602_v10  ;;  %v1801_v27 = vsel %vm316_vm1, %v266_v36, 0 }
 0x134   : > { %961 = vmatprep.subr.mxu0 %v878_v23  ;;  %v1373_v1 = vand.u32 4294901760, %v1372_v54  ;;  %v1874_v42 = vand.u32 4294901760, %v1801_v27 }
 0x13a   : > { %953 = vmatmul.mubr.f32.vlgmr.msra.gmra.mrb[0].mxu0 %v866_v24 }
 0x13b   : > { %964 = vmatpush1.msra.mxu0 %v884_v28  ;;  %1027 = vmatprep.mubr.f32.mxu0 %v9602_v10 }
 0x13c   : > { %1037 = vmatprep.subr.mxu0 %v799_v19 }
 0x142   : > { %1030 = vmatmul.mubr.f32.vlgmr.msra.gmra.mrb[0].mxu0 %v867_v30 }
 0x143   : > { %1039 = vmatpush1.msra.mxu0 %v801_v25  ;;  %1102 = vmatprep.mubr.f32.mxu0 %v9602_v10 }
 0x144   : > { %1115 = vmatprep.subr.mxu0 %v879_v26 }
 0x14a   : > { %1106 = vmatmul.mubr.f32.vlgmr.msra.gmra.mrb[0].mxu0 %v868_v31 }
 0x14b   : > { %1119 = vmatpush1.msra.mxu0 %v885_v32  ;;  %1182 = vmatprep.mubr.f32.mxu0 %v9602_v10 }
 0x14c   : > { %1191 = vmatprep.subr.mxu0 %v799_v19 }
 0x152   : > { %1184 = vmatmul.mubr.f32.vlgmr.msra.gmra.mrb[0].mxu0 %v866_v24 }
 0x153   : > { %1193 = vmatpush1.msra.mxu0 %v801_v25  ;;  %1256 = vmatprep.mubr.f32.mxu0 %v9602_v10 }
 0x15a   : > { %1258 = vmatmul.mubr.f32.vlgmr.msra.gmra.mrb[0].mxu0 %v866_v24  ;;  %v3797_v24 = vrot.slane %v259_v16, %v9667_v4 }
 0x15b   : > { %1368 = vmatprep.mubr.f32.mxu0 %v9602_v10 }
 0x15c   : > { %v3798_v29 = vcombine.low %v3793_v21, %v3797_v24 }
 0x176   : > { %v1291_v41 = vpop.permute.xlu1 %1290 }
 0x179   : > { %v1289_v45 = vpop.permute.xlu0 %1288 }
 0x17a   : > { %v1294_v46 = vsel %vm1292_vm6, %v1289_v45, %v1291_v41  ;;  %v2285_v47 = vpop.permute.xlu1 %2284 }
 0x17b   : > { %v1300_v51 = vsel %vm320_vm3, %v1294_v46, 0  ;;  %v9819_v52 = vrot.slane %v2285_v47, 4 }
 0x17c   : > { %v9825_v55 = vand.u32 4294901760, %v1300_v51 }
 0x17d   : > { %v9829_v56 = vsel %vm2287_vm7, %v9819_v52, %v2285_v47  ;;  %v1287_v57 = vpop.permute.xlu0 %1286  ;;  %v2292_v59 = vmul.f32 %v9819_v52, %v9677_v9  ;;  %v1875_v47 = vsub.f32 %v1801_v27, %v1874_v42 }
 0x17e   : > { %v1381_v60 = vsub.f32 %v1300_v51, %v9825_v55  ;;  %v2291_v61 = vmul.f32 %v9829_v56, %v9682_v11  ;;  %v1293_v62 = vsel %vm1292_vm6, %v1287_v57, %v1289_v45  ;;  %1303 = vmatprep.subr.mxu0 %v9825_v55 }
 0x17f   : > { %v1298_v63 = vsel %vm320_vm3, %v1293_v62, 0  ;;  %2300 = vrot.lane.b32.xlu1 %v2292_v59, %s9610_s9  ;;  %v1796_v2 = vpop.permute.xlu1 %1795  ;;  %v1876_v48 = vand.u32 4294901760, %v1875_v47 }
 0x180   : > { %v9840_v5 = vand.u32 4294901760, %v1298_v63  ;;  %v2295_v6 = vcombine.high %v2291_v61, %v2291_v61  ;;  %v1382_v7 = vand.u32 4294901760, %v1381_v60 }
 0x181   : > { %v1794_v31 = vpop.permute.xlu0 %1793  ;;  %v1877_v54 = vsub.f32 %v1875_v47, %v1876_v48 }
 0x182   : > { %v1387_v13 = vsub.f32 %v1298_v63, %v9840_v5  ;;  %2298 = vrot.lane.b32.xlu0 %v2295_v6, %s9610_s9  ;;  %1305 = vmatpush1.msra.mxu0 %v9840_v5  ;;  %v1383_v14 = vsub.f32 %v1381_v60, %v1382_v7  ;;  %v1799_v32 = vsel %vm1797_vm9, %v1794_v31, %v1796_v2 }
 0x183   : > { %3294 = vrot.lane.b32.xlu1 %v3293_v0, %s9611_s13  ;;  %1374 = vmatmul.mubr.f32.vlgmr.msra.gmra.mrb[0].mxu0 %v1373_v1  ;;  %v2790_v17 = vpop.permute.xlu1 %2789  ;;  %v1805_v33 = vsel %vm320_vm3, %v1799_v32, 0  ;;  %v1878_v57 = vand.u32 4294901760, %v1877_v54  ;;  %v260_v0 = vld [vmem:[%s10228_s1 + $0x10] sm:$0x3]  ;;  %v268_v54 = vld [vmem:[%s10229_s2 + $0x14] sm:$0xf] }
 0x184   : > { %v1388_v18 = vand.u32 4294901760, %v1387_v13  ;;  %v1384_v19 = vand.u32 4294901760, %v1383_v14  ;;  %1454 = vmatprep.mubr.f32.mxu0 %v9602_v10  ;;  %v9849_v20 = vrot.slane %v2790_v17, 4  ;;  %v1807_v35 = vand.u32 4294901760, %v1805_v33 }
 0x185   : > { %v4302_v16 = vrot.slane %v260_v0, %v9667_v4 }
 0x186   : > { %2296 = vrot.lane.b32.xlu0 %v2291_v61, %s9610_s9  ;;  %1385 = vmatprep.subr.mxu0 %v1384_v19  ;;  %v1389_v22 = vsub.f32 %v1387_v13, %v1388_v18  ;;  %v9854_v23 = vsel %vm2792_vm8, %v9849_v20, %v2790_v17  ;;  %v2797_v26 = vmul.f32 %v9849_v20, %v9677_v9  ;;  %v1792_v34 = vpop.permute.xlu0 %1791 }
 0x187   : > { %v2796_v25 = vmul.f32 %v9854_v23, %v9682_v11  ;;  %v1798_v37 = vsel %vm1797_vm9, %v1792_v34, %v1794_v31  ;;  %v1886_v38 = vsub.f32 %v1805_v33, %v1807_v35 }
 0x188   : > { %v1390_v30 = vand.u32 4294901760, %v1389_v22  ;;  %2805 = vrot.lane.b32.xlu1 %v2797_v26, %s9612_s14  ;;  %v1803_v41 = vsel %vm320_vm3, %v1798_v37, 0 }
 0x189   : > { %v2800_v28 = vcombine.high %v2796_v25, %v2796_v25  ;;  %v1809_v45 = vand.u32 4294901760, %v1803_v41  ;;  %v1887_v46 = vand.u32 4294901760, %v1886_v38 }
 0x18a   : > { %1391 = vmatpush1.msra.mxu0 %v1390_v30 }
 0x18b   : > { %1456 = vmatmul.mubr.f32.vlgmr.msra.gmra.mrb[0].mxu0 %v9807_v39  ;;  %1464 = vmatprep.subr.mxu0 %v1381_v60 }
 0x18c   : > { %1467 = vmatpush1.msra.mxu0 %v1387_v13  ;;  %1530 = vmatprep.mubr.f32.mxu0 %v9602_v10 }
 0x18d   : > { %1540 = vmatprep.subr.mxu0 %v9825_v55  ;;  %2803 = vrot.lane.b32.xlu0 %v2800_v28, %s9612_s14 }
 0x18e   : > { %3799 = vrot.lane.b32.xlu1 %v3798_v29, %s9613_s15 }
 0x191   : > { %2801 = vrot.lane.b32.xlu0 %v2796_v25, %s9612_s14 }
 0x193   : > { %1533 = vmatmul.mubr.f32.vlgmr.msra.gmra.mrb[0].mxu0 %v9810_v40  ;;  %v1892_v40 = vsub.f32 %v1803_v41, %v1809_v45 }
 0x194   : > { %1542 = vmatpush1.msra.mxu0 %v9840_v5  ;;  %1605 = vmatprep.mubr.f32.mxu0 %v9602_v10 }
 0x195   : > { %1618 = vmatprep.subr.mxu0 %v1382_v7  ;;  %v1893_v51 = vand.u32 4294901760, %v1892_v40  ;;  %v4298_v7 = vrot.slane %v260_v0, %v9665_v3 }
 0x197   : > { %v4303_v26 = vcombine.low %v4298_v7, %v4302_v16 }
 0x19b   : > { %1609 = vmatmul.mubr.f32.vlgmr.msra.gmra.mrb[0].mxu0 %v1371_v43  ;;  %v1888_v43 = vsub.f32 %v1886_v38, %v1887_v46 }
 0x19c   : > { %1622 = vmatpush1.msra.mxu0 %v1388_v18  ;;  %1685 = vmatprep.mubr.f32.mxu0 %v9602_v10 }
 0x19d   : > { %1694 = vmatprep.subr.mxu0 %v9825_v55  ;;  %v1889_v53 = vand.u32 4294901760, %v1888_v43  ;;  %v1894_v55 = vsub.f32 %v1892_v40, %v1893_v51 }
 0x19f   : > { %v1895_v59 = vand.u32 4294901760, %v1894_v55 }
 0x1a3   : > { %1687 = vmatmul.mubr.f32.vlgmr.msra.gmra.mrb[0].mxu0 %v9807_v39 }
 0x1a4   : > { %1696 = vmatpush1.msra.mxu0 %v9840_v5  ;;  %1759 = vmatprep.mubr.f32.mxu0 %v9602_v10 }
 0x1a5   : > { %1808 = vmatprep.subr.mxu0 %v1807_v35 }
 0x1ab   : > { %1761 = vmatmul.mubr.f32.vlgmr.msra.gmra.mrb[0].mxu0 %v9807_v39  ;;  %v267_v39 = vld [vmem:[%s10229_s2 + $0x10] sm:$0xf] }
 0x1ac   : > { %1810 = vmatpush1.msra.mxu0 %v1809_v45  ;;  %1873 = vmatprep.mubr.f32.mxu0 %v9602_v10  ;;  %v2306_v60 = vsel %vm316_vm1, %v267_v39, 0 }
 0x1ad   : > { %1890 = vmatprep.subr.mxu0 %v1889_v53  ;;  %v9897_v61 = vand.u32 4294901760, %v2306_v60 }
 0x1af   : > { %v9900_v62 = vsub.f32 %v2306_v60, %v9897_v61 }
 0x1b1   : > { %v2381_v1 = vand.u32 4294901760, %v9900_v62 }
 0x1b3   : > { %1879 = vmatmul.mubr.f32.vlgmr.msra.gmra.mrb[0].mxu0 %v1878_v57  ;;  %v2382_v17 = vsub.f32 %v9900_v62, %v2381_v1  ;;  %v2811_v57 = vsel %vm316_vm1, %v268_v54, 0 }
 0x1b4   : > { %1896 = vmatpush1.msra.mxu0 %v1895_v59  ;;  %1959 = vmatprep.mubr.f32.mxu0 %v9602_v10  ;;  %v2884_v60 = vand.u32 4294901760, %v2811_v57 }
 0x1b5   : > { %1969 = vmatprep.subr.mxu0 %v1886_v38  ;;  %v2383_v30 = vand.u32 4294901760, %v2382_v17 }
 0x1bb   : > { %1961 = vmatmul.mubr.f32.vlgmr.msra.gmra.mrb[0].mxu0 %v1874_v42 }
 0x1bc   : > { %1972 = vmatpush1.msra.mxu0 %v1892_v40  ;;  %2035 = vmatprep.mubr.f32.mxu0 %v9602_v10 }
 0x1bd   : > { %2045 = vmatprep.subr.mxu0 %v1807_v35 }
 0x1c3   : > { %2038 = vmatmul.mubr.f32.vlgmr.msra.gmra.mrb[0].mxu0 %v1875_v47 }
 0x1c4   : > { %2047 = vmatpush1.msra.mxu0 %v1809_v45  ;;  %2110 = vmatprep.mubr.f32.mxu0 %v9602_v10 }
 0x1c5   : > { %2123 = vmatprep.subr.mxu0 %v1887_v46 }
 0x1cb   : > { %2114 = vmatmul.mubr.f32.vlgmr.msra.gmra.mrb[0].mxu0 %v1876_v48 }
 0x1cc   : > { %2127 = vmatpush1.msra.mxu0 %v1893_v51  ;;  %2190 = vmatprep.mubr.f32.mxu0 %v9602_v10 }
 0x1cd   : > { %2199 = vmatprep.subr.mxu0 %v1807_v35 }
 0x1d3   : > { %2192 = vmatmul.mubr.f32.vlgmr.msra.gmra.mrb[0].mxu0 %v1874_v42 }
 0x1d4   : > { %2201 = vmatpush1.msra.mxu0 %v1809_v45  ;;  %2264 = vmatprep.mubr.f32.mxu0 %v9602_v10 }
 0x1db   : > { %2266 = vmatmul.mubr.f32.vlgmr.msra.gmra.mrb[0].mxu0 %v1874_v42 }
 0x1dc   : > { %2378 = vmatprep.mubr.f32.mxu0 %v9602_v10 }
 0x1f1   : > { %v2301_v63 = vpop.permute.xlu1 %2300 }
 0x1f4   : > { %v2299_v2 = vpop.permute.xlu0 %2298 }
 0x1f5   : > { %v2304_v5 = vsel %vm2302_vm10, %v2299_v2, %v2301_v63  ;;  %v3295_v6 = vpop.permute.xlu1 %3294 }
 0x1f6   : > { %v2310_v13 = vsel %vm320_vm3, %v2304_v5, 0  ;;  %v9909_v14 = vrot.slane %v3295_v6, 4 }
 0x1f7   : > { %v9915_v18 = vand.u32 4294901760, %v2310_v13 }
 0x1f8   : > { %v9918_v19 = vsel %vm3297_vm11, %v9909_v14, %v3295_v6  ;;  %v2297_v21 = vpop.permute.xlu0 %2296  ;;  %v3302_v22 = vmul.f32 %v9909_v14, %v9677_v9 }
 0x1f9   : > { %v2391_v3 = vsub.f32 %v2310_v13, %v9915_v18  ;;  %v3301_v24 = vmul.f32 %v9918_v19, %v9682_v11  ;;  %v2303_v4 = vsel %vm2302_vm10, %v2297_v21, %v2299_v2  ;;  %2313 = vmatprep.subr.mxu0 %v9915_v18  ;;  %v2885_v2 = vsub.f32 %v2811_v57, %v2884_v60 }
 0x1fa   : > { %v2308_v25 = vsel %vm320_vm3, %v2303_v4, 0  ;;  %3310 = vrot.lane.b32.xlu1 %v3302_v22, %s9614_s27  ;;  %v2806_v32 = vpop.permute.xlu1 %2805 }
 0x1fb   : > { %v2314_v28 = vand.u32 4294901760, %v2308_v25  ;;  %v3305_v29 = vcombine.high %v3301_v24, %v3301_v24  ;;  %v2392_v31 = vand.u32 4294901760, %v2391_v3  ;;  %v2886_v5 = vand.u32 4294901760, %v2885_v2 }
 0x1fd   : > { %v2397_v33 = vsub.f32 %v2308_v25, %v2314_v28  ;;  %3308 = vrot.lane.b32.xlu0 %v3305_v29, %s9614_s27  ;;  %2315 = vmatpush1.msra.mxu0 %v2314_v28  ;;  %v2393_v34 = vsub.f32 %v2391_v3, %v2392_v31  ;;  %v2887_v13 = vsub.f32 %v2885_v2, %v2886_v5 }
 0x1fe   : > { %4304 = vrot.lane.b32.xlu1 %v4303_v26, %s9615_s28  ;;  %2384 = vmatmul.mubr.f32.vlgmr.msra.gmra.mrb[0].mxu0 %v2383_v30 }
 0x1ff   : > { %v2398_v35 = vand.u32 4294901760, %v2397_v33  ;;  %v2394_v36 = vand.u32 4294901760, %v2393_v34  ;;  %2464 = vmatprep.mubr.f32.mxu0 %v9602_v10  ;;  %v2804_v40 = vpop.permute.xlu0 %2803  ;;  %v2888_v17 = vand.u32 4294901760, %v2887_v13 }
 0x200   : > { %v3800_v37 = vpop.permute.xlu1 %3799  ;;  %v2809_v43 = vsel %vm2807_vm13, %v2804_v40, %v2806_v32 }
 0x201   : > { %3306 = vrot.lane.b32.xlu0 %v3301_v24, %s9614_s27  ;;  %2395 = vmatprep.subr.mxu0 %v2394_v36  ;;  %v2399_v27 = vsub.f32 %v2397_v33, %v2398_v35  ;;  %v9932_v38 = vrot.slane %v3800_v37, 4  ;;  %v2815_v48 = vsel %vm320_vm3, %v2809_v43, 0 }
 0x202   : > { %v2817_v53 = vand.u32 4294901760, %v2815_v48 }
 0x203   : > { %v2400_v41 = vand.u32 4294901760, %v2399_v27  ;;  %v9935_v42 = vsel %vm3802_vm12, %v9932_v38, %v3800_v37  ;;  %v3807_v45 = vmul.f32 %v9932_v38, %v9677_v9  ;;  %v2802_v51 = vpop.permute.xlu0 %2801  ;;  %vm4874_vm12 = vcmask 1043592  }
 0x204   : > { %v3806_v46 = vmul.f32 %v9935_v42, %v9682_v11  ;;  %v2808_v55 = vsel %vm2807_vm13, %v2802_v51, %v2804_v40  ;;  %v2896_v59 = vsub.f32 %v2815_v48, %v2817_v53 }
 0x205   : > { %2401 = vmatpush1.msra.mxu0 %v2400_v41  ;;  %3815 = vrot.lane.b32.xlu1 %v3807_v45, %s9616_s29  ;;  %v2813_v39 = vsel %vm320_vm3, %v2808_v55, 0 }
 0x206   : > { %2466 = vmatmul.mubr.f32.vlgmr.msra.gmra.mrb[0].mxu0 %v9897_v61  ;;  %2474 = vmatprep.subr.mxu0 %v2391_v3  ;;  %v3810_v47 = vcombine.high %v3806_v46, %v3806_v46  ;;  %v2819_v63 = vand.u32 4294901760, %v2813_v39  ;;  %v2897_v0 = vand.u32 4294901760, %v2896_v59 }
 0x207   : > { %2477 = vmatpush1.msra.mxu0 %v2397_v33  ;;  %2540 = vmatprep.mubr.f32.mxu0 %v9602_v10 }
 0x208   : > { %2550 = vmatprep.subr.mxu0 %v9915_v18  ;;  %3813 = vrot.lane.b32.xlu0 %v3810_v47, %s9616_s29 }
 0x20c   : > { %3811 = vrot.lane.b32.xlu0 %v3806_v46, %s9616_s29 }
 0x20e   : > { %2543 = vmatmul.mubr.f32.vlgmr.msra.gmra.mrb[0].mxu0 %v9900_v62  ;;  %v2902_v62 = vsub.f32 %v2813_v39, %v2819_v63 }
 0x20f   : > { %2552 = vmatpush1.msra.mxu0 %v2314_v28  ;;  %2615 = vmatprep.mubr.f32.mxu0 %v9602_v10 }
 0x210   : > { %2628 = vmatprep.subr.mxu0 %v2392_v31  ;;  %v2903_v6 = vand.u32 4294901760, %v2902_v62 }
 0x212   : > { %v2904_v16 = vsub.f32 %v2902_v62, %v2903_v6 }
 0x216   : > { %2619 = vmatmul.mubr.f32.vlgmr.msra.gmra.mrb[0].mxu0 %v2381_v1  ;;  %v2898_v1 = vsub.f32 %v2896_v59, %v2897_v0 }
 0x217   : > { %2632 = vmatpush1.msra.mxu0 %v2398_v35  ;;  %2695 = vmatprep.mubr.f32.mxu0 %v9602_v10 }
 0x218   : > { %2704 = vmatprep.subr.mxu0 %v9915_v18  ;;  %v2899_v7 = vand.u32 4294901760, %v2898_v1  ;;  %v2905_v18 = vand.u32 4294901760, %v2904_v16 }
 0x21e   : > { %2697 = vmatmul.mubr.f32.vlgmr.msra.gmra.mrb[0].mxu0 %v9897_v61 }
 0x21f   : > { %2706 = vmatpush1.msra.mxu0 %v2314_v28  ;;  %2769 = vmatprep.mubr.f32.mxu0 %v9602_v10 }
 0x220   : > { %2818 = vmatprep.subr.mxu0 %v2817_v53 }
 0x226   : > { %2771 = vmatmul.mubr.f32.vlgmr.msra.gmra.mrb[0].mxu0 %v9897_v61  ;;  %v269_v61 = vld [vmem:[%s10229_s2 + $0x18] sm:$0xf] }
 0x227   : > { %2820 = vmatpush1.msra.mxu0 %v2819_v63  ;;  %2883 = vmatprep.mubr.f32.mxu0 %v9602_v10  ;;  %v3316_v21 = vsel %vm316_vm1, %v269_v61, 0 }
 0x228   : > { %2900 = vmatprep.subr.mxu0 %v2899_v7  ;;  %v9975_v22 = vand.u32 4294901760, %v3316_v21 }
 0x22a   : > { %v3390_v3 = vsub.f32 %v3316_v21, %v9975_v22  ;;  %v9618_v21 = vmov 0  }
 0x22b   : > { %9582 = vset.pattern.permute.xlu0 %v9618_v21  ;;  %9583 = vset.pattern.permute.xlu1 %v9618_v21 }
 0x22c   : > { %v3391_v4 = vand.u32 4294901760, %v3390_v3 }
 0x22e   : > { %2889 = vmatmul.mubr.f32.vlgmr.msra.gmra.mrb[0].mxu0 %v2888_v17  ;;  %v3392_v31 = vsub.f32 %v3390_v3, %v3391_v4 }
 0x22f   : > { %2906 = vmatpush1.msra.mxu0 %v2905_v18  ;;  %2969 = vmatprep.mubr.f32.mxu0 %v9602_v10  ;;  %v272_v18 = vld [vmem:[%s10230_s3] sm:$0xf] }
 0x230   : > { %2979 = vmatprep.subr.mxu0 %v2896_v59  ;;  %v3393_v45 = vand.u32 4294901760, %v3392_v31 }
 0x236   : > { %2971 = vmatmul.mubr.f32.vlgmr.msra.gmra.mrb[0].mxu0 %v2884_v60 }
 0x237   : > { %2982 = vmatpush1.msra.mxu0 %v2902_v62  ;;  %3045 = vmatprep.mubr.f32.mxu0 %v9602_v10 }
 0x238   : > { %3055 = vmatprep.subr.mxu0 %v2817_v53 }
 0x23e   : > { %3048 = vmatmul.mubr.f32.vlgmr.msra.gmra.mrb[0].mxu0 %v2885_v2 }
 0x23f   : > { %3057 = vmatpush1.msra.mxu0 %v2819_v63  ;;  %3120 = vmatprep.mubr.f32.mxu0 %v9602_v10 }
 0x240   : > { %3133 = vmatprep.subr.mxu0 %v2897_v0 }
 0x246   : > { %3124 = vmatmul.mubr.f32.vlgmr.msra.gmra.mrb[0].mxu0 %v2886_v5 }
 0x247   : > { %3137 = vmatpush1.msra.mxu0 %v2903_v6  ;;  %3200 = vmatprep.mubr.f32.mxu0 %v9602_v10 }
 0x248   : > { %3209 = vmatprep.subr.mxu0 %v2817_v53 }
 0x24e   : > { %3202 = vmatmul.mubr.f32.vlgmr.msra.gmra.mrb[0].mxu0 %v2884_v60 }
 0x24f   : > { %3211 = vmatpush1.msra.mxu0 %v2819_v63  ;;  %3274 = vmatprep.mubr.f32.mxu0 %v9602_v10  ;;  %v270_v63 = vld [vmem:[%s10229_s2 + $0x1c] sm:$0xf] }
 0x250   : > { %v3821_v2 = vsel %vm316_vm1, %v270_v63, 0 }
 0x251   : > { %v3894_v5 = vand.u32 4294901760, %v3821_v2 }
 0x253   : > { %v3895_v13 = vsub.f32 %v3821_v2, %v3894_v5 }
 0x255   : > { %v3896_v61 = vand.u32 4294901760, %v3895_v13 }
 0x256   : > { %3276 = vmatmul.mubr.f32.vlgmr.msra.gmra.mrb[0].mxu0 %v2884_v60 }
 0x257   : > { %3388 = vmatprep.mubr.f32.mxu0 %v9602_v10 }
 0x26c   : > { %v3311_v24 = vpop.permute.xlu1 %3310 }
 0x26f   : > { %v3309_v25 = vpop.permute.xlu0 %3308 }
 0x270   : > { %v3314_v26 = vsel %vm3312_vm14, %v3309_v25, %v3311_v24  ;;  %v4305_v30 = vpop.permute.xlu1 %4304 }
 0x271   : > { %v3320_v28 = vsel %vm320_vm3, %v3314_v26, 0  ;;  %v9980_v29 = vrot.slane %v4305_v30, 4 }
 0x272   : > { %v3322_v32 = vand.u32 4294901760, %v3320_v28 }
 0x273   : > { %v9983_v33 = vsel %vm4307_vm15, %v9980_v29, %v4305_v30  ;;  %v3307_v34 = vpop.permute.xlu0 %3306  ;;  %v4312_v35 = vmul.f32 %v9980_v29, %v9677_v9  ;;  %vm4875_vm15 = vcmask 1047556  }
 0x274   : > { %v3401_v36 = vsub.f32 %v3320_v28, %v3322_v32  ;;  %v4311_v37 = vmul.f32 %v9983_v33, %v9682_v11  ;;  %v3313_v27 = vsel %vm3312_vm14, %v3307_v34, %v3309_v25  ;;  %3323 = vmatprep.subr.mxu0 %v3322_v32  ;;  %v10015_v28 = vld [vmem:[#allocation2] sm:$0xff] }
 0x275   : > { %v3318_v41 = vsel %vm320_vm3, %v3313_v27, 0  ;;  %4320 = vrot.lane.b32.xlu0 %v4312_v35, %s9617_s12  ;;  %4864 = vst.msk [vmem:[#allocation2 + $0x8] sm:$0xf] %vm4863_vm5, %v10015_v28  ;;  %vm4878_vm5 = vcmask 134144  }
 0x276   : > { %v3324_v46 = vand.u32 4294901760, %v3318_v41  ;;  %v4315_v47 = vcombine.high %v4311_v37, %v4311_v37  ;;  %v3402_v40 = vand.u32 4294901760, %v3401_v36 }
 0x277   : > { %v3816_v54 = vpop.permute.xlu1 %3815 }
 0x278   : > { %v3407_v43 = vsub.f32 %v3318_v41, %v3324_v46  ;;  %4318 = vrot.lane.b32.xlu1 %v4315_v47, %s9617_s12  ;;  %3325 = vmatpush1.msra.mxu0 %v3324_v46  ;;  %v3403_v9 = vsub.f32 %v3401_v36, %v3402_v40 }
 0x279   : > { %3394 = vmatmul.mubr.f32.vlgmr.msra.gmra.mrb[0].mxu0 %v3393_v45  ;;  %4801 = vperm.xlu0 %9582, %v272_v18  }
 0x27a   : > { %v3408_v48 = vand.u32 4294901760, %v3407_v43  ;;  %v3404_v11 = vand.u32 4294901760, %v3403_v9  ;;  %3474 = vmatprep.mubr.f32.mxu0 %v9602_v10  ;;  %v3814_v55 = vpop.permute.xlu0 %3813 }
 0x27b   : > { %v3819_v57 = vsel %vm3817_vm0, %v3814_v55, %v3816_v54 }
 0x27c   : > { %4316 = vrot.lane.b32.xlu1 %v4311_v37, %s9617_s12  ;;  %3405 = vmatprep.subr.mxu0 %v3404_v11  ;;  %v3409_v51 = vsub.f32 %v3407_v43, %v3408_v48  ;;  %v3825_v59 = vsel %vm320_vm3, %v3819_v57, 0 }
 0x27d   : > { %v3827_v60 = vand.u32 4294901760, %v3825_v59 }
 0x27e   : > { %v3410_v53 = vand.u32 4294901760, %v3409_v51  ;;  %v3812_v39 = vpop.permute.xlu0 %3811 }
 0x27f   : > { %v3818_v0 = vsel %vm3817_vm0, %v3812_v39, %v3814_v55  ;;  %v3906_v62 = vsub.f32 %v3825_v59, %v3827_v60 }
 0x280   : > { %3411 = vmatpush1.msra.mxu0 %v3410_v53  ;;  %v3823_v1 = vsel %vm320_vm3, %v3818_v0, 0 }
 0x281   : > { %3476 = vmatmul.mubr.f32.vlgmr.msra.gmra.mrb[0].mxu0 %v9975_v22  ;;  %3484 = vmatprep.subr.mxu0 %v3401_v36  ;;  %v3829_v6 = vand.u32 4294901760, %v3823_v1  ;;  %v3907_v7 = vand.u32 4294901760, %v3906_v62 }
 0x282   : > { %3487 = vmatpush1.msra.mxu0 %v3407_v43  ;;  %3550 = vmatprep.mubr.f32.mxu0 %v9602_v10 }
 0x283   : > { %3560 = vmatprep.subr.mxu0 %v3322_v32  ;;  %v3912_v16 = vsub.f32 %v3823_v1, %v3829_v6  ;;  %v3908_v17 = vsub.f32 %v3906_v62, %v3907_v7 }
 0x285   : > { %v3909_v24 = vand.u32 4294901760, %v3908_v17 }
 0x289   : > { %3553 = vmatmul.mubr.f32.vlgmr.msra.gmra.mrb[0].mxu0 %v3390_v3  ;;  %v3913_v3 = vand.u32 4294901760, %v3912_v16 }
 0x28a   : > { %3562 = vmatpush1.msra.mxu0 %v3324_v46  ;;  %3625 = vmatprep.mubr.f32.mxu0 %v9602_v10 }
 0x28b   : > { %3638 = vmatprep.subr.mxu0 %v3402_v40  ;;  %v3914_v25 = vsub.f32 %v3912_v16, %v3913_v3 }
 0x28d   : > { %v3915_v30 = vand.u32 4294901760, %v3914_v25 }
 0x291   : > { %3629 = vmatmul.mubr.f32.vlgmr.msra.gmra.mrb[0].mxu0 %v3391_v4  ;;  %v3897_v4 = vsub.f32 %v3895_v13, %v3896_v61 }
 0x292   : > { %3642 = vmatpush1.msra.mxu0 %v3408_v48  ;;  %3705 = vmatprep.mubr.f32.mxu0 %v9602_v10 }
 0x293   : > { %3714 = vmatprep.subr.mxu0 %v3322_v32  ;;  %v3898_v26 = vand.u32 4294901760, %v3897_v4 }
 0x299   : > { %3707 = vmatmul.mubr.f32.vlgmr.msra.gmra.mrb[0].mxu0 %v9975_v22 }
 0x29a   : > { %3716 = vmatpush1.msra.mxu0 %v3324_v46  ;;  %3779 = vmatprep.mubr.f32.mxu0 %v9602_v10 }
 0x29b   : > { %3828 = vmatprep.subr.mxu0 %v3827_v60 }
 0x2a1   : > { %3781 = vmatmul.mubr.f32.vlgmr.msra.gmra.mrb[0].mxu0 %v9975_v22 }
 0x2a2   : > { %3830 = vmatpush1.msra.mxu0 %v3829_v6  ;;  %3893 = vmatprep.mubr.f32.mxu0 %v9602_v10 }
 0x2a3   : > { %3910 = vmatprep.subr.mxu0 %v3909_v24 }
 0x2a9   : > { %3899 = vmatmul.mubr.f32.vlgmr.msra.gmra.mrb[0].mxu0 %v3898_v26 }
 0x2aa   : > { %3916 = vmatpush1.msra.mxu0 %v3915_v30  ;;  %3979 = vmatprep.mubr.f32.mxu0 %v9602_v10  ;;  %v271_v10 = vld [vmem:[%s10229_s2 + $0x20] sm:$0xf] }
 0x2ab   : > { %3989 = vmatprep.subr.mxu0 %v3906_v62  ;;  %v4326_v22 = vsel %vm316_vm1, %v271_v10, 0 }
 0x2ac   : > { %v4399_v31 = vand.u32 4294901760, %v4326_v22 }
 0x2ae   : > { %v4400_v32 = vsub.f32 %v4326_v22, %v4399_v31 }
 0x2b0   : > { %v4401_v34 = vand.u32 4294901760, %v4400_v32 }
 0x2b1   : > { %3981 = vmatmul.mubr.f32.vlgmr.msra.gmra.mrb[0].mxu0 %v3894_v5 }
 0x2b2   : > { %3992 = vmatpush1.msra.mxu0 %v3912_v16  ;;  %4055 = vmatprep.mubr.f32.mxu0 %v10015_v28  ;;  %v4402_v41 = vsub.f32 %v4400_v32, %v4401_v34 }
 0x2b3   : > { %4065 = vmatprep.subr.mxu0 %v3827_v60 }
 0x2b4   : > { %v4403_v9 = vand.u32 4294901760, %v4402_v41 }
 0x2b9   : > { %4058 = vmatmul.mubr.f32.vlgmr.msra.gmra.mrb[0].mxu0 %v3895_v13 }
 0x2ba   : > { %4067 = vmatpush1.msra.mxu0 %v3829_v6  ;;  %4130 = vmatprep.mubr.f32.mxu0 %v10015_v28 }
 0x2bb   : > { %4143 = vmatprep.subr.mxu0 %v3907_v7 }
 0x2c1   : > { %4134 = vmatmul.mubr.f32.vlgmr.msra.gmra.mrb[0].mxu0 %v3896_v61 }
 0x2c2   : > { %4147 = vmatpush1.msra.mxu0 %v3913_v3  ;;  %4210 = vmatprep.mubr.f32.mxu0 %v10015_v28 }
 0x2c3   : > { %4219 = vmatprep.subr.mxu0 %v3827_v60 }
 0x2c9   : > { %4212 = vmatmul.mubr.f32.vlgmr.msra.gmra.mrb[0].mxu0 %v3894_v5 }
 0x2ca   : > { %4221 = vmatpush1.msra.mxu0 %v3829_v6  ;;  %4284 = vmatprep.mubr.f32.mxu0 %v10015_v28 }
 0x2d1   : > { %4286 = vmatmul.mubr.f32.vlgmr.msra.gmra.mrb[0].mxu0 %v3894_v5 }
 0x2d2   : > { %4398 = vmatprep.mubr.f32.mxu0 %v10015_v28 }
 0x2e7   : > { %v4321_v35 = vpop.permute.xlu0 %4320 }
 0x2ea   : > { %v4319_v36 = vpop.permute.xlu1 %4318 }
 0x2eb   : > { %v4324_v37 = vsel %vm10234_vm4, %v4319_v36, %v4321_v35 }
 0x2ec   : > { %v4330_v27 = vsel %vm320_vm3, %v4324_v37, 0 }
 0x2ed   : > { %v4332_v45 = vand.u32 4294901760, %v4330_v27 }
 0x2ee   : > { %v4317_v46 = vpop.permute.xlu1 %4316 }
 0x2ef   : > { %v4411_v47 = vsub.f32 %v4330_v27, %v4332_v45  ;;  %v4323_v40 = vsel %vm10234_vm4, %v4317_v46, %v4319_v36  ;;  %4333 = vmatprep.subr.mxu0 %v4332_v45  ;;  %vm4876_vm4 = vmor %vm4875_vm15, %vm4874_vm12 }
 0x2f0   : > { %v4328_v43 = vsel %vm320_vm3, %v4323_v40, 0 }
 0x2f1   : > { %v4334_v48 = vand.u32 4294901760, %v4328_v43  ;;  %v4412_v11 = vand.u32 4294901760, %v4411_v47 }
 0x2f3   : > { %v4417_v51 = vsub.f32 %v4328_v43, %v4334_v48  ;;  %4335 = vmatpush1.msra.mxu0 %v4334_v48  ;;  %v4413_v53 = vsub.f32 %v4411_v47, %v4412_v11 }
 0x2f4   : > { %4404 = vmatmul.mubr.f32.vlgmr.msra.gmra.mrb[0].mxu0 %v4403_v9 }
 0x2f5   : > { %v4418_v54 = vand.u32 4294901760, %v4417_v51  ;;  %v4414_v55 = vand.u32 4294901760, %v4413_v53  ;;  %4484 = vmatprep.mubr.f32.mxu0 %v10015_v28 }
 0x2f7   : > { %4415 = vmatprep.subr.mxu0 %v4414_v55  ;;  %v4419_v57 = vsub.f32 %v4417_v51, %v4418_v54 }
 0x2f8   : > { %v4802_v39 = vpop.permute.xlu0 %4801 }
 0x2f9   : > { %v4420_v59 = vand.u32 4294901760, %v4419_v57 }
 0x2fb   : > { %4421 = vmatpush1.msra.mxu0 %v4420_v59 }
 0x2fc   : > { %4486 = vmatmul.mubr.f32.vlgmr.msra.gmra.mrb[0].mxu0 %v4399_v31  ;;  %4494 = vmatprep.subr.mxu0 %v4411_v47 }
 0x2fd   : > { %4497 = vmatpush1.msra.mxu0 %v4417_v51  ;;  %4560 = vmatprep.mubr.f32.mxu0 %v10015_v28 }
 0x2fe   : > { %4570 = vmatprep.subr.mxu0 %v4332_v45 }
 0x304   : > { %4563 = vmatmul.mubr.f32.vlgmr.msra.gmra.mrb[0].mxu0 %v4400_v32 }
 0x305   : > { %4572 = vmatpush1.msra.mxu0 %v4334_v48  ;;  %4635 = vmatprep.mubr.f32.mxu0 %v10015_v28 }
 0x306   : > { %4648 = vmatprep.subr.mxu0 %v4412_v11 }
 0x30c   : > { %4639 = vmatmul.mubr.f32.vlgmr.msra.gmra.mrb[0].mxu0 %v4401_v34 }
 0x30d   : > { %4652 = vmatpush1.msra.mxu0 %v4418_v54  ;;  %4715 = vmatprep.mubr.f32.mxu0 %v10015_v28 }
 0x30e   : > { %4724 = vmatprep.subr.mxu0 %v4332_v45 }
 0x314   : > { %4717 = vmatmul.mubr.f32.vlgmr.msra.gmra.mrb[0].mxu0 %v4399_v31 }
 0x315   : > { %4726 = vmatpush1.msra.mxu0 %v4334_v48  ;;  %4789 = vmatprep.mubr.f32.mxu0 %v10015_v28 }
 0x31c   : > { %4791 = vmatmul.mubr.f32.vlgmr.msra.gmra.mrb[0].mxu0 %v4399_v31 }
 0x3ef   : > { %v4792_v60 = vpop.f32.mrb[0].mxu0 }
 0x3f0   : > { %v4804_v63 = vadd.f32 %v4802_v39, %v4792_v60  ;;  %v4794_v0 = vpop.f32.mrb[1].mxu0 }
 0x3f1   : > { %v4805_v2 = vadd.f32 %v4802_v39, %v4794_v0 }
 0x3f2   : > { %v4808_v62 = vmul.f32 0.70710677, %v4804_v63 }
 0x3f3   : > { %v4809_v1 = vmul.f32 0.70710677, %v4805_v2 }
 0x3f4   : > { %vm4810_vm8 = vcmp.ge.f32.partialorder %v4808_v62, 0.0  ;;  %v4812_v5 = vsub.f32 0.0, %v4808_v62 }
 0x3f5   : > { %vm4811_vm11 = vcmp.ge.f32.partialorder %v4809_v1, 0.0  ;;  %v4813_v6 = vsub.f32 0.0, %v4809_v1 }
 0x3f6   : > { %v4814_v7 = vsel %vm4810_vm8, %v4808_v62, %v4812_v5 }
 0x3f7   : > { %v4816_v13 = vmul.f32 0.3275911, %v4814_v7  ;;  %v4815_v16 = vsel %vm4811_vm11, %v4809_v1, %v4813_v6  ;;  %v4842_v21 = vmul.f32 %v4814_v7, %v4814_v7  ;;  %v4806_v6 = vmul.f32 0.5, %v4804_v63 }
 0x3f8   : > { %v4817_v17 = vmul.f32 0.3275911, %v4815_v16  ;;  %v4843_v3 = vmul.f32 %v4815_v16, %v4815_v16  ;;  %v4807_v16 = vmul.f32 0.5, %v4805_v2 }
 0x3f9   : > { %v4818_v18 = vadd.f32 1.0, %v4816_v13  ;;  %v4844_v4 = vsub.f32 0.0, %v4842_v21 }
 0x3fa   : > { %v4819_v61 = vadd.f32 1.0, %v4817_v17  ;;  %v4845_v30 = vsub.f32 0.0, %v4843_v3 }
 0x3fb   : > { %9584 = vrcp.f32 %v4818_v18  ;;  %v4846_v31 = vmul.f32 1.442695, %v4844_v4 }
 0x3fc   : > { %9586 = vrcp.f32 %v4819_v61  ;;  %v4848_v35 = vmul.f32 1.442695, %v4845_v30 }
 0x3fd   : > { %9588 = vpow2.f32 %v4846_v31 }
 0x3fe   : > { %9590 = vpow2.f32 %v4848_v35 }
 0x405   : > { %v9585_v24 = vpop.eup %9584 }
 0x406   : > { %v9587_v25 = vpop.eup %9586  ;;  %v4824_v26 = vmul.f32 1.0614054, %v9585_v24 }
 0x407   : > { %v4825_v10 = vmul.f32 1.0614054, %v9587_v25  ;;  %v9589_v51 = vpop.eup %9588 }
 0x408   : > { %v9336_v22 = vadd.f32 -1.4531521, %v4824_v26  ;;  %v9591_v54 = vpop.eup %9590 }
 0x409   : > { %v9337_v32 = vadd.f32 -1.4531521, %v4825_v10 }
 0x40a   : > { %v4828_v34 = vmul.f32 %v9585_v24, %v9336_v22 }
 0x40b   : > { %v4829_v36 = vmul.f32 %v9587_v25, %v9337_v32 }
 0x40c   : > { %v4830_v37 = vadd.f32 1.4214138, %v4828_v34 }
 0x40d   : > { %v4831_v27 = vadd.f32 1.4214138, %v4829_v36 }
 0x40e   : > { %v4832_v41 = vmul.f32 %v9585_v24, %v4830_v37 }
 0x40f   : > { %v4833_v45 = vmul.f32 %v9587_v25, %v4831_v27 }
 0x410   : > { %v9338_v46 = vadd.f32 -0.28449672, %v4832_v41 }
 0x411   : > { %v9339_v47 = vadd.f32 -0.28449672, %v4833_v45 }
 0x412   : > { %v4836_v40 = vmul.f32 %v9585_v24, %v9338_v46 }
 0x413   : > { %v4837_v43 = vmul.f32 %v9587_v25, %v9339_v47 }
 0x414   : > { %v4838_v9 = vadd.f32 0.2548296, %v4836_v40 }
 0x415   : > { %v4839_v48 = vadd.f32 0.2548296, %v4837_v43 }
 0x416   : > { %v4840_v11 = vmul.f32 %v9585_v24, %v4838_v9 }
 0x417   : > { %v4841_v53 = vmul.f32 %v9587_v25, %v4839_v48 }
 0x418   : > { %v4850_v55 = vmul.f32 %v9589_v51, %v4840_v11 }
 0x419   : > { %v4851_v57 = vmul.f32 %v9591_v54, %v4841_v53 }
 0x41a   : > { %v4852_v59 = vsub.f32 1.0, %v4850_v55 }
 0x41b   : > { %v4853_v39 = vsub.f32 1.0, %v4851_v57 }
 0x41c   : > { %v4854_v60 = vsub.f32 0.0, %v4852_v59 }
 0x41d   : > { %v4855_v0 = vsub.f32 0.0, %v4853_v39 }
 0x41e   : > { %v4856_v5 = vsel %vm4810_vm8, %v4852_v59, %v4854_v60 }
 0x41f   : > { %v4858_v7 = vadd.f32 1.0, %v4856_v5  ;;  %v4857_v13 = vsel %vm4811_vm11, %v4853_v39, %v4855_v0 }
 0x420   : > { %v4859_v17 = vadd.f32 1.0, %v4857_v13  ;;  %v4882_v13 = vld [vmem:[%s10231_s4] sm:$0xf] }
 0x421   : > { %v4860_v18 = vmul.f32 %v4858_v7, %v4806_v6 }
 0x422   : > { %v4861_v61 = vmul.f32 %v4859_v17, %v4807_v16  ;;  %v5381_v17 = vsel %vm316_vm1, %v4882_v13, 0 }
 0x424   : > { %v4867_v21 = vcombine.low %v4860_v18, %v4861_v61  ;;  %v5454_v61 = vand.u32 4294901760, %v5381_v17 }
 0x426   : > { %4868 = vrot.lane.b32.xlu1 %v4867_v21, %s9607_s24 }
 0x498   : > { %v4869_v3 = vpop.permute.xlu1 %4868 }
 0x499   : > { %v4870_v24 = vrot.slane %v4869_v3, 4 }
 0x49b   : > { %v4871_v62 = vsel %vm2287_vm7, %v4870_v24, %v4869_v3  ;;  %4879 = vst.msk [vmem:[#allocation2 + $0x8] sm:$0xf] %vm4878_vm5, %v4870_v24  ;;  %v5455_v24 = vsub.f32 %v5381_v17, %v5454_v61 }
 0x49c   : > { %4877 = vst.msk [vmem:[#allocation2] sm:$0xff] %vm4876_vm4, %v4871_v62 }
 0x4a2   : > { %v4881_v63 = vld [vmem:[#allocation2 + $0x8] sm:$0xf] }
 0x4a3   : > { %v4894_v1 = vmul.f32 %v4881_v63, %v9684_v12  ;;  %v10043_v2 = vld [vmem:[#allocation2] sm:$0xff]  ;;  %v5853_v12 = vmul.f32 %v4881_v63, %v9731_v44  ;;  %v6340_v10 = vmul.f32 %v4881_v63, %v9738_v49  ;;  %v6827_v44 = vmul.f32 %v4881_v63, %v9819_v52 }
 0x4a4   : > { %v4893_v4 = vmul.f32 %v10043_v2, %v9693_v15  ;;  %v5852_v25 = vmul.f32 %v10043_v2, %v9741_v50  ;;  %v6339_v15 = vmul.f32 %v10043_v2, %v9753_v58  ;;  %v6826_v50 = vmul.f32 %v10043_v2, %v9829_v56 }
 0x4a5   : > { %4902 = vrot.lane.b32.xlu0 %v4894_v1, %s9603_s10  ;;  %v7313_v49 = vmul.f32 %v10043_v2, %v9854_v23  ;;  %v7314_v58 = vmul.f32 %v4881_v63, %v9849_v20  ;;  %v7800_v56 = vmul.f32 %v10043_v2, %v9918_v19  ;;  %v7801_v52 = vmul.f32 %v4881_v63, %v9909_v14 }
 0x4a6   : > { %v4897_v26 = vcombine.high %v4893_v4, %v4893_v4  ;;  %v5856_v30 = vcombine.high %v5852_v25, %v5852_v25  ;;  %v6343_v22 = vcombine.high %v6339_v15, %v6339_v15  ;;  %v6830_v31 = vcombine.high %v6826_v50, %v6826_v50 }
 0x4a7   : > { %v7317_v32 = vcombine.high %v7313_v49, %v7313_v49  ;;  %v7804_v34 = vcombine.high %v7800_v56, %v7800_v56  ;;  %v8287_v20 = vmul.f32 %v10043_v2, %v9935_v42  ;;  %v8288_v23 = vmul.f32 %v4881_v63, %v9932_v38  ;;  %v4883_v38 = vld [vmem:[%s10231_s4 + $0x4] sm:$0xf] }
 0x4a8   : > { %4900 = vrot.lane.b32.xlu1 %v4897_v26, %s9603_s10  ;;  %v8774_v19 = vmul.f32 %v10043_v2, %v9983_v33  ;;  %v8775_v14 = vmul.f32 %v4881_v63, %v9980_v29  ;;  %v4907_v42 = vsel %vm316_vm1, %v4883_v38, 0  ;;  %v4892_v5 = vmul.f32 %v10043_v2, %v9768_v8 }
 0x4a9   : > { %5859 = vrot.lane.b32.xlu0 %v5856_v30, %s9606_s19  ;;  %v8291_v35 = vcombine.high %v8287_v20, %v8287_v20  ;;  %v4980_v33 = vand.u32 4294901760, %v4907_v42  ;;  %v5456_v1 = vand.u32 4294901760, %v5455_v24 }
 0x4aa   : > { %v8778_v36 = vcombine.high %v8774_v19, %v8774_v19  ;;  %v5379_v6 = vcombine.high %v4892_v5, %v4892_v5  ;;  %v5383_v8 = vsel %vm320_vm3, %v4892_v5, 0 }
 0x4ab   : > { %v4981_v37 = vsub.f32 %v4907_v42, %v4980_v33  ;;  %v5389_v21 = vand.u32 4294901760, %v5383_v8 }
 0x4ac   : > { %4898 = vrot.lane.b32.xlu1 %v4893_v4, %s9603_s10  ;;  %v5385_v7 = vsel %vm320_vm3, %v5379_v6, 0 }
 0x4ad   : > { %5857 = vrot.lane.b32.xlu0 %v5852_v25, %s9606_s19  ;;  %v4982_v27 = vand.u32 4294901760, %v4981_v37  ;;  %v5387_v16 = vand.u32 4294901760, %v5385_v7  ;;  %v5472_v62 = vsub.f32 %v5383_v8, %v5389_v21  ;;  %v5457_v25 = vsub.f32 %v5455_v24, %v5456_v1 }
 0x4af   : > { %v4983_v40 = vsub.f32 %v4981_v37, %v4982_v27  ;;  %v5466_v18 = vsub.f32 %v5385_v7, %v5387_v16  ;;  %v5473_v2 = vand.u32 4294901760, %v5472_v62  ;;  %v5458_v30 = vand.u32 4294901760, %v5457_v25 }
 0x4b0   : > { %5861 = vrot.lane.b32.xlu1 %v5853_v12, %s9606_s19  ;;  %s251_s19 = scalar_lea.vmem %s10233_s6, %s9342_s18 }
 0x4b1   : > { %6348 = vrot.lane.b32.xlu0 %v6340_v10, %s9608_s25  ;;  %v4984_v51 = vand.u32 4294901760, %v4983_v40  ;;  %v5467_v3 = vand.u32 4294901760, %v5466_v18  ;;  %v5474_v26 = vsub.f32 %v5472_v62, %v5473_v2 }
 0x4b3   : > { %v5468_v63 = vsub.f32 %v5466_v18, %v5467_v3  ;;  %v5475_v12 = vand.u32 4294901760, %v5474_v26 }
 0x4b4   : > { %6346 = vrot.lane.b32.xlu1 %v6343_v22, %s9608_s25 }
 0x4b5   : > { %6833 = vrot.lane.b32.xlu0 %v6830_v31, %s9610_s9  ;;  %v5469_v4 = vand.u32 4294901760, %v5468_v63 }
 0x4b8   : > { %6344 = vrot.lane.b32.xlu1 %v6339_v15, %s9608_s25 }
 0x4b9   : > { %6831 = vrot.lane.b32.xlu0 %v6826_v50, %s9610_s9 }
 0x4bc   : > { %6835 = vrot.lane.b32.xlu1 %v6827_v44, %s9610_s9  ;;  %v4884_v44 = vld [vmem:[%s10231_s4 + $0x8] sm:$0xf] }
 0x4bd   : > { %7322 = vrot.lane.b32.xlu0 %v7314_v58, %s9612_s14 }
 0x4c0   : > { %7320 = vrot.lane.b32.xlu1 %v7317_v32, %s9612_s14 }
 0x4c1   : > { %7807 = vrot.lane.b32.xlu0 %v7804_v34, %s9614_s27 }
 0x4c4   : > { %7318 = vrot.lane.b32.xlu1 %v7313_v49, %s9612_s14 }
 0x4c5   : > { %7805 = vrot.lane.b32.xlu0 %v7800_v56, %s9614_s27  ;;  %v5866_v56 = vsel %vm316_vm1, %v4884_v44, 0 }
 0x4c8   : > { %7809 = vrot.lane.b32.xlu1 %v7801_v52, %s9614_s27  ;;  %v5939_v52 = vand.u32 4294901760, %v5866_v56 }
 0x4c9   : > { %8296 = vrot.lane.b32.xlu0 %v8288_v23, %s9616_s29 }
 0x4cc   : > { %8294 = vrot.lane.b32.xlu1 %v8291_v35, %s9616_s29 }
 0x4cd   : > { %8781 = vrot.lane.b32.xlu0 %v8778_v36, %s9617_s12 }
 0x4d0   : > { %8292 = vrot.lane.b32.xlu1 %v8287_v20, %s9616_s29 }
 0x4d1   : > { %8779 = vrot.lane.b32.xlu0 %v8774_v19, %s9617_s12  ;;  %v5940_v19 = vsub.f32 %v5866_v56, %v5939_v52 }
 0x4d4   : > { %8783 = vrot.lane.b32.xlu1 %v8775_v14, %s9617_s12  ;;  %v5941_v14 = vand.u32 4294901760, %v5940_v19 }
 0x517   : > { %v4903_v41 = vpop.permute.xlu0 %4902 }
 0x51a   : > { %v4901_v45 = vpop.permute.xlu1 %4900 }
 0x51b   : > { %v4905_v46 = vsel %vm313_vm2, %v4901_v45, %v4903_v41  ;;  %v5860_v10 = vpop.permute.xlu0 %5859 }
 0x51c   : > { %v4911_v47 = vsel %vm320_vm3, %v4905_v46, 0 }
 0x51d   : > { %v4913_v43 = vand.u32 4294901760, %v4911_v47 }
 0x51e   : > { %v4899_v29 = vpop.permute.xlu1 %4898 }
 0x51f   : > { %v4992_v9 = vsub.f32 %v4911_v47, %v4913_v43  ;;  %v4904_v48 = vsel %vm313_vm2, %v4899_v29, %v4901_v45  ;;  %4914 = vmatprep.subr.mxu1 %v4913_v43  ;;  %v5858_v31 = vpop.permute.xlu0 %5857  ;;  %v4885_v29 = vld [vmem:[%s10231_s4 + $0xc] sm:$0xf]  ;;  %vm10235_vm2 = vcmask 769024  }
 0x520   : > { %v4909_v11 = vsel %vm320_vm3, %v4904_v48, 0  ;;  %v5863_v58 = vsel %vm1292_vm6, %v5858_v31, %v5860_v10 }
 0x521   : > { %v4915_v53 = vand.u32 4294901760, %v4909_v11  ;;  %v4993_v54 = vand.u32 4294901760, %v4992_v9  ;;  %v5868_v32 = vsel %vm320_vm3, %v5863_v58, 0 }
 0x522   : > { %v5862_v15 = vpop.permute.xlu1 %5861  ;;  %v5874_v20 = vand.u32 4294901760, %v5868_v32 }
 0x523   : > { %v4998_v55 = vsub.f32 %v4909_v11, %v4915_v53  ;;  %4916 = vmatpush1.msra.mxu1 %v4915_v53  ;;  %v4994_v57 = vsub.f32 %v4992_v9, %v4993_v54  ;;  %v5864_v50 = vsel %vm1292_vm6, %v5860_v10, %v5862_v15  ;;  %v6349_v46 = vpop.permute.xlu0 %6348  ;;  %v6353_v11 = vsel %vm316_vm1, %v4885_v29, 0  ;;  %vm10236_vm6 = vmmov %vm10235_vm2 }
 0x524   : > { %4985 = vmatmul.mubr.f32.vlgmr.msra.gmra.mrb[0].mxu1 %v4984_v51  ;;  %v5870_v22 = vsel %vm320_vm3, %v5864_v50, 0  ;;  %v5957_v35 = vsub.f32 %v5868_v32, %v5874_v20 }
 0x525   : > { %v4999_v59 = vand.u32 4294901760, %v4998_v55  ;;  %v4995_v39 = vand.u32 4294901760, %v4994_v57  ;;  %5065 = vmatprep.mubr.f32.mxu1 %v10015_v28  ;;  %v5872_v49 = vand.u32 4294901760, %v5870_v22 }
 0x526   : > { %v5958_v38 = vand.u32 4294901760, %v5957_v35  ;;  %v6347_v45 = vpop.permute.xlu1 %6346 }
 0x527   : > { %4996 = vmatprep.subr.mxu1 %v4995_v39  ;;  %v5000_v60 = vsub.f32 %v4998_v55, %v4999_v59  ;;  %v5951_v34 = vsub.f32 %v5870_v22, %v5872_v49  ;;  %v6351_v47 = vsel %vm1797_vm9, %v6347_v45, %v6349_v46 }
 0x528   : > { %v6357_v40 = vsel %vm320_vm3, %v6351_v47, 0 }
 0x529   : > { %v5001_v0 = vand.u32 4294901760, %v5000_v60  ;;  %v5952_v23 = vand.u32 4294901760, %v5951_v34 }
 0x52b   : > { %5002 = vmatpush1.msra.mxu1 %v5001_v0  ;;  %v5953_v36 = vsub.f32 %v5951_v34, %v5952_v23 }
 0x52c   : > { %5067 = vmatmul.mubr.f32.vlgmr.msra.gmra.mrb[0].mxu1 %v4980_v33  ;;  %5075 = vmatprep.subr.mxu1 %v4992_v9  ;;  %v6359_v9 = vand.u32 4294901760, %v6357_v40 }
 0x52d   : > { %5078 = vmatpush1.msra.mxu1 %v4998_v55  ;;  %5141 = vmatprep.mubr.f32.mxu1 %v10015_v28  ;;  %v5954_v42 = vand.u32 4294901760, %v5953_v36 }
 0x52e   : > { %5151 = vmatprep.subr.mxu1 %v4913_v43  ;;  %v6438_v51 = vsub.f32 %v6357_v40, %v6359_v9 }
 0x530   : > { %v6439_v57 = vand.u32 4294901760, %v6438_v51 }
 0x532   : > { %v6440_v60 = vsub.f32 %v6438_v51, %v6439_v57 }
 0x534   : > { %5144 = vmatmul.mubr.f32.vlgmr.msra.gmra.mrb[0].mxu1 %v4981_v37  ;;  %v5959_v37 = vsub.f32 %v5957_v35, %v5958_v38  ;;  %v6441_v6 = vand.u32 4294901760, %v6440_v60 }
 0x535   : > { %5153 = vmatpush1.msra.mxu1 %v4915_v53  ;;  %5216 = vmatprep.mubr.f32.mxu1 %v10015_v28 }
 0x536   : > { %5229 = vmatprep.subr.mxu1 %v4993_v54  ;;  %v5960_v41 = vand.u32 4294901760, %v5959_v37  ;;  %v6426_v54 = vand.u32 4294901760, %v6353_v11 }
 0x53c   : > { %5220 = vmatmul.mubr.f32.vlgmr.msra.gmra.mrb[0].mxu1 %v4982_v27 }
 0x53d   : > { %5233 = vmatpush1.msra.mxu1 %v4999_v59  ;;  %5296 = vmatprep.mubr.f32.mxu1 %v10015_v28  ;;  %v6427_v59 = vsub.f32 %v6353_v11, %v6426_v54 }
 0x53e   : > { %5305 = vmatprep.subr.mxu1 %v4913_v43  ;;  %v6345_v43 = vpop.permute.xlu1 %6344 }
 0x53f   : > { %v6350_v48 = vsel %vm1797_vm9, %v6345_v43, %v6347_v45  ;;  %v6428_v0 = vand.u32 4294901760, %v6427_v59 }
 0x541   : > { %v6429_v7 = vsub.f32 %v6427_v59, %v6428_v0 }
 0x542   : > { %v6836_v8 = vpop.permute.xlu1 %6835 }
 0x544   : > { %5298 = vmatmul.mubr.f32.vlgmr.msra.gmra.mrb[0].mxu1 %v4980_v33 }
 0x545   : > { %5307 = vmatpush1.msra.mxu1 %v4915_v53  ;;  %5370 = vmatprep.mubr.f32.mxu1 %v10015_v28  ;;  %v6355_v53 = vsel %vm320_vm3, %v6350_v48, 0 }
 0x546   : > { %5388 = vmatprep.subr.mxu1 %v5387_v16  ;;  %v6361_v55 = vand.u32 4294901760, %v6355_v53  ;;  %v7321_v32 = vpop.permute.xlu1 %7320 }
 0x548   : > { %v6444_v39 = vsub.f32 %v6355_v53, %v6361_v55 }
 0x54a   : > { %v6445_v5 = vand.u32 4294901760, %v6444_v39 }
 0x54c   : > { %5372 = vmatmul.mubr.f32.vlgmr.msra.gmra.mrb[0].mxu1 %v4980_v33  ;;  %v5942_v33 = vsub.f32 %v5940_v19, %v5941_v14  ;;  %v6446_v13 = vsub.f32 %v6444_v39, %v6445_v5 }
 0x54d   : > { %5390 = vmatpush1.msra.mxu1 %v5389_v21  ;;  %5453 = vmatprep.mubr.f32.mxu1 %v10015_v28 }
 0x54e   : > { %5470 = vmatprep.subr.mxu1 %v5469_v4  ;;  %v5943_v27 = vand.u32 4294901760, %v5942_v33  ;;  %v6447_v17 = vand.u32 4294901760, %v6446_v13 }
 0x554   : > { %5459 = vmatmul.mubr.f32.vlgmr.msra.gmra.mrb[0].mxu1 %v5458_v30 }
 0x555   : > { %5476 = vmatpush1.msra.mxu1 %v5475_v12  ;;  %5539 = vmatprep.mubr.f32.mxu1 %v10015_v28 }
 0x556   : > { %5549 = vmatprep.subr.mxu1 %v5466_v18  ;;  %v6834_v18 = vpop.permute.xlu0 %6833 }
 0x55c   : > { %5541 = vmatmul.mubr.f32.vlgmr.msra.gmra.mrb[0].mxu1 %v5454_v61 }
 0x55d   : > { %5552 = vmatpush1.msra.mxu1 %v5472_v62  ;;  %5615 = vmatprep.mubr.f32.mxu1 %v10015_v28 }
 0x55e   : > { %5625 = vmatprep.subr.mxu1 %v5387_v16 }
 0x564   : > { %5618 = vmatmul.mubr.f32.vlgmr.msra.gmra.mrb[0].mxu1 %v5455_v24  ;;  %v4886_v24 = vld [vmem:[%s10231_s4 + $0x10] sm:$0xf] }
 0x565   : > { %5627 = vmatpush1.msra.mxu1 %v5389_v21  ;;  %5690 = vmatprep.mubr.f32.mxu1 %v10015_v28 }
 0x566   : > { %5703 = vmatprep.subr.mxu1 %v5467_v3  ;;  %v6832_v3 = vpop.permute.xlu0 %6831 }
 0x567   : > { %v6837_v63 = vsel %vm2302_vm10, %v6832_v3, %v6834_v18 }
 0x56c   : > { %5694 = vmatmul.mubr.f32.vlgmr.msra.gmra.mrb[0].mxu1 %v5456_v1  ;;  %v6840_v1 = vsel %vm316_vm1, %v4886_v24, 0 }
 0x56d   : > { %5707 = vmatpush1.msra.mxu1 %v5473_v2  ;;  %5770 = vmatprep.mubr.f32.mxu1 %v10015_v28  ;;  %v6842_v2 = vsel %vm320_vm3, %v6837_v63, 0  ;;  %v6913_v25 = vand.u32 4294901760, %v6840_v1 }
 0x56e   : > { %5779 = vmatprep.subr.mxu1 %v5387_v16  ;;  %v6430_v16 = vand.u32 4294901760, %v6429_v7  ;;  %v6848_v26 = vand.u32 4294901760, %v6842_v2 }
 0x56f   : > { %v6914_v12 = vsub.f32 %v6840_v1, %v6913_v25 }
 0x570   : > { %v6931_v15 = vsub.f32 %v6842_v2, %v6848_v26  ;;  %v4891_v2 = vld [vmem:[%s10232_s5] sm:$0xf] }
 0x571   : > { %v6915_v50 = vand.u32 4294901760, %v6914_v12  ;;  %9263 = vperm.xlu1 %9583, %v4891_v2  }
 0x572   : > { %v6932_v22 = vand.u32 4294901760, %v6931_v15 }
 0x573   : > { %v6916_v44 = vsub.f32 %v6914_v12, %v6915_v50 }
 0x574   : > { %5772 = vmatmul.mubr.f32.vlgmr.msra.gmra.mrb[0].mxu1 %v5454_v61 }
 0x575   : > { %5781 = vmatpush1.msra.mxu1 %v5389_v21  ;;  %5844 = vmatprep.mubr.f32.mxu1 %v10015_v28  ;;  %v6917_v58 = vand.u32 4294901760, %v6916_v44 }
 0x576   : > { %5873 = vmatprep.subr.mxu1 %v5872_v49 }
 0x57c   : > { %5846 = vmatmul.mubr.f32.vlgmr.msra.gmra.mrb[0].mxu1 %v5454_v61  ;;  %v6838_v61 = vsel %vm2302_vm10, %v6834_v18, %v6836_v8 }
 0x57d   : > { %5875 = vmatpush1.msra.mxu1 %v5874_v20  ;;  %5938 = vmatprep.mubr.f32.mxu1 %v10015_v28  ;;  %v6844_v21 = vsel %vm320_vm3, %v6838_v61, 0 }
 0x57e   : > { %5955 = vmatprep.subr.mxu1 %v5954_v42  ;;  %v6846_v62 = vand.u32 4294901760, %v6844_v21 }
 0x580   : > { %v6925_v4 = vsub.f32 %v6844_v21, %v6846_v62 }
 0x582   : > { %v6926_v30 = vand.u32 4294901760, %v6925_v4 }
 0x584   : > { %5944 = vmatmul.mubr.f32.vlgmr.msra.gmra.mrb[0].mxu1 %v5943_v27  ;;  %v6927_v10 = vsub.f32 %v6925_v4, %v6926_v30 }
 0x585   : > { %5961 = vmatpush1.msra.mxu1 %v5960_v41  ;;  %6024 = vmatprep.mubr.f32.mxu1 %v10015_v28 }
 0x586   : > { %6034 = vmatprep.subr.mxu1 %v5951_v34  ;;  %v6928_v31 = vand.u32 4294901760, %v6927_v10  ;;  %v7323_v34 = vpop.permute.xlu0 %7322 }
 0x58a   : > { %v7808_v53 = vpop.permute.xlu0 %7807 }
 0x58c   : > { %6026 = vmatmul.mubr.f32.vlgmr.msra.gmra.mrb[0].mxu1 %v5939_v52 }
 0x58d   : > { %6037 = vmatpush1.msra.mxu1 %v5957_v35  ;;  %6100 = vmatprep.mubr.f32.mxu1 %v10015_v28 }
 0x58e   : > { %6110 = vmatprep.subr.mxu1 %v5872_v49 }
 0x594   : > { %6103 = vmatmul.mubr.f32.vlgmr.msra.gmra.mrb[0].mxu1 %v5940_v19  ;;  %v4887_v19 = vld [vmem:[%s10231_s4 + $0x14] sm:$0xf] }
 0x595   : > { %6112 = vmatpush1.msra.mxu1 %v5874_v20  ;;  %6175 = vmatprep.mubr.f32.mxu1 %v10015_v28 }
 0x596   : > { %6188 = vmatprep.subr.mxu1 %v5952_v23  ;;  %v7319_v23 = vpop.permute.xlu1 %7318 }
 0x597   : > { %v7324_v36 = vsel %vm2807_vm13, %v7319_v23, %v7321_v32 }
 0x598   : > { %v7329_v42 = vsel %vm320_vm3, %v7324_v36, 0 }
 0x599   : > { %v7335_v37 = vand.u32 4294901760, %v7329_v42 }
 0x59b   : > { %v7418_v45 = vsub.f32 %v7329_v42, %v7335_v37 }
 0x59c   : > { %6179 = vmatmul.mubr.f32.vlgmr.msra.gmra.mrb[0].mxu1 %v5941_v14  ;;  %v7327_v14 = vsel %vm316_vm1, %v4887_v19, 0 }
 0x59d   : > { %6192 = vmatpush1.msra.mxu1 %v5958_v38  ;;  %6255 = vmatprep.mubr.f32.mxu1 %v10015_v28  ;;  %v7400_v33 = vand.u32 4294901760, %v7327_v14  ;;  %v7419_v40 = vand.u32 4294901760, %v7418_v45 }
 0x59e   : > { %6264 = vmatprep.subr.mxu1 %v5872_v49  ;;  %v6933_v49 = vsub.f32 %v6931_v15, %v6932_v22 }
 0x59f   : > { %v7401_v41 = vsub.f32 %v7327_v14, %v7400_v33 }
 0x5a0   : > { %v6934_v56 = vand.u32 4294901760, %v6933_v49 }
 0x5a1   : > { %v7402_v47 = vand.u32 4294901760, %v7401_v41 }
 0x5a3   : > { %v7403_v29 = vsub.f32 %v7401_v41, %v7402_v47 }
 0x5a4   : > { %6257 = vmatmul.mubr.f32.vlgmr.msra.gmra.mrb[0].mxu1 %v5939_v52 }
 0x5a5   : > { %6266 = vmatpush1.msra.mxu1 %v5874_v20  ;;  %6329 = vmatprep.mubr.f32.mxu1 %v10015_v28  ;;  %v7404_v48 = vand.u32 4294901760, %v7403_v29 }
 0x5a6   : > { %6360 = vmatprep.subr.mxu1 %v6359_v9 }
 0x5ac   : > { %6331 = vmatmul.mubr.f32.vlgmr.msra.gmra.mrb[0].mxu1 %v5939_v52  ;;  %v7325_v52 = vsel %vm2807_vm13, %v7321_v32, %v7323_v34 }
 0x5ad   : > { %6362 = vmatpush1.msra.mxu1 %v6361_v55  ;;  %6425 = vmatprep.mubr.f32.mxu1 %v10015_v28  ;;  %v7331_v20 = vsel %vm320_vm3, %v7325_v52, 0 }
 0x5ae   : > { %6442 = vmatprep.subr.mxu1 %v6441_v6  ;;  %v7333_v35 = vand.u32 4294901760, %v7331_v20 }
 0x5b0   : > { %v7412_v38 = vsub.f32 %v7331_v20, %v7333_v35 }
 0x5b2   : > { %v7413_v27 = vand.u32 4294901760, %v7412_v38 }
 0x5b4   : > { %6431 = vmatmul.mubr.f32.vlgmr.msra.gmra.mrb[0].mxu1 %v6430_v16  ;;  %v7414_v46 = vsub.f32 %v7412_v38, %v7413_v27 }
 0x5b5   : > { %6448 = vmatpush1.msra.mxu1 %v6447_v17  ;;  %6511 = vmatprep.mubr.f32.mxu1 %v10015_v28 }
 0x5b6   : > { %6521 = vmatprep.subr.mxu1 %v6438_v51  ;;  %v7415_v43 = vand.u32 4294901760, %v7414_v46  ;;  %v7810_v51 = vpop.permute.xlu1 %7809 }
 0x5bc   : > { %6513 = vmatmul.mubr.f32.vlgmr.msra.gmra.mrb[0].mxu1 %v6426_v54 }
 0x5bd   : > { %6524 = vmatpush1.msra.mxu1 %v6444_v39  ;;  %6587 = vmatprep.mubr.f32.mxu1 %v10015_v28 }
 0x5be   : > { %6597 = vmatprep.subr.mxu1 %v6359_v9 }
 0x5c4   : > { %6590 = vmatmul.mubr.f32.vlgmr.msra.gmra.mrb[0].mxu1 %v6427_v59  ;;  %v4888_v59 = vld [vmem:[%s10231_s4 + $0x18] sm:$0xf] }
 0x5c5   : > { %6599 = vmatpush1.msra.mxu1 %v6361_v55  ;;  %6662 = vmatprep.mubr.f32.mxu1 %v10015_v28 }
 0x5c6   : > { %6675 = vmatprep.subr.mxu1 %v6439_v57  ;;  %v7806_v57 = vpop.permute.xlu0 %7805 }
 0x5c7   : > { %v7811_v60 = vsel %vm3312_vm14, %v7806_v57, %v7808_v53 }
 0x5cc   : > { %6666 = vmatmul.mubr.f32.vlgmr.msra.gmra.mrb[0].mxu1 %v6428_v0  ;;  %v7814_v0 = vsel %vm316_vm1, %v4888_v59, 0 }
 0x5cd   : > { %6679 = vmatpush1.msra.mxu1 %v6445_v5  ;;  %6742 = vmatprep.mubr.f32.mxu1 %v10015_v28  ;;  %v7816_v5 = vsel %vm320_vm3, %v7811_v60, 0  ;;  %v7887_v7 = vand.u32 4294901760, %v7814_v0 }
 0x5ce   : > { %6751 = vmatprep.subr.mxu1 %v6359_v9  ;;  %v7420_v9 = vsub.f32 %v7418_v45, %v7419_v40  ;;  %v7822_v13 = vand.u32 4294901760, %v7816_v5 }
 0x5cf   : > { %v7888_v17 = vsub.f32 %v7814_v0, %v7887_v7 }
 0x5d0   : > { %v7421_v11 = vand.u32 4294901760, %v7420_v9  ;;  %v7905_v8 = vsub.f32 %v7816_v5, %v7822_v13 }
 0x5d1   : > { %v7889_v61 = vand.u32 4294901760, %v7888_v17 }
 0x5d2   : > { %v7906_v21 = vand.u32 4294901760, %v7905_v8 }
 0x5d3   : > { %v7890_v24 = vsub.f32 %v7888_v17, %v7889_v61 }
 0x5d4   : > { %6744 = vmatmul.mubr.f32.vlgmr.msra.gmra.mrb[0].mxu1 %v6426_v54 }
 0x5d5   : > { %6753 = vmatpush1.msra.mxu1 %v6361_v55  ;;  %6816 = vmatprep.mubr.f32.mxu1 %v10015_v28  ;;  %v7891_v63 = vand.u32 4294901760, %v7890_v24 }
 0x5d6   : > { %6847 = vmatprep.subr.mxu1 %v6846_v62 }
 0x5dc   : > { %6818 = vmatmul.mubr.f32.vlgmr.msra.gmra.mrb[0].mxu1 %v6426_v54  ;;  %v7812_v54 = vsel %vm3312_vm14, %v7808_v53, %v7810_v51 }
 0x5dd   : > { %6849 = vmatpush1.msra.mxu1 %v6848_v26  ;;  %6912 = vmatprep.mubr.f32.mxu1 %v10015_v28  ;;  %v7818_v55 = vsel %vm320_vm3, %v7812_v54, 0 }
 0x5de   : > { %6929 = vmatprep.subr.mxu1 %v6928_v31  ;;  %v7820_v39 = vand.u32 4294901760, %v7818_v55 }
 0x5e0   : > { %v7899_v6 = vsub.f32 %v7818_v55, %v7820_v39 }
 0x5e2   : > { %v7900_v16 = vand.u32 4294901760, %v7899_v6 }
 0x5e4   : > { %6918 = vmatmul.mubr.f32.vlgmr.msra.gmra.mrb[0].mxu1 %v6917_v58  ;;  %v7901_v18 = vsub.f32 %v7899_v6, %v7900_v16 }
 0x5e5   : > { %6935 = vmatpush1.msra.mxu1 %v6934_v56  ;;  %6998 = vmatprep.mubr.f32.mxu1 %v10015_v28 }
 0x5e6   : > { %7008 = vmatprep.subr.mxu1 %v6925_v4  ;;  %v7902_v3 = vand.u32 4294901760, %v7901_v18  ;;  %v8295_v4 = vpop.permute.xlu1 %8294 }
 0x5ec   : > { %7000 = vmatmul.mubr.f32.vlgmr.msra.gmra.mrb[0].mxu1 %v6913_v25 }
 0x5ed   : > { %7011 = vmatpush1.msra.mxu1 %v6931_v15  ;;  %7074 = vmatprep.mubr.f32.mxu1 %v10015_v28  ;;  %v4889_v15 = vld [vmem:[%s10231_s4 + $0x1c] sm:$0xf] }
 0x5ee   : > { %7084 = vmatprep.subr.mxu1 %v6846_v62 }
 0x5f4   : > { %7077 = vmatmul.mubr.f32.vlgmr.msra.gmra.mrb[0].mxu1 %v6914_v12  ;;  %v8293_v12 = vpop.permute.xlu1 %8292 }
 0x5f5   : > { %7086 = vmatpush1.msra.mxu1 %v6848_v26  ;;  %7149 = vmatprep.mubr.f32.mxu1 %v10015_v28 }
 0x5f6   : > { %7162 = vmatprep.subr.mxu1 %v6926_v30 }
 0x5f8   : > { %v8784_v42 = vpop.permute.xlu1 %8783 }
 0x5fc   : > { %7153 = vmatmul.mubr.f32.vlgmr.msra.gmra.mrb[0].mxu1 %v6915_v50  ;;  %v8298_v50 = vsel %vm3817_vm0, %v8293_v12, %v8295_v4 }
 0x5fd   : > { %7166 = vmatpush1.msra.mxu1 %v6932_v22  ;;  %7229 = vmatprep.mubr.f32.mxu1 %v10015_v28  ;;  %v8301_v22 = vsel %vm316_vm1, %v4889_v15, 0  ;;  %v8303_v44 = vsel %vm320_vm3, %v8298_v50, 0 }
 0x5fe   : > { %7238 = vmatprep.subr.mxu1 %v6846_v62  ;;  %v7907_v62 = vsub.f32 %v7905_v8, %v7906_v21  ;;  %v8374_v49 = vand.u32 4294901760, %v8301_v22  ;;  %v8309_v58 = vand.u32 4294901760, %v8303_v44 }
 0x600   : > { %v7908_v1 = vand.u32 4294901760, %v7907_v62  ;;  %v8375_v32 = vsub.f32 %v8301_v22, %v8374_v49  ;;  %v8392_v34 = vsub.f32 %v8303_v44, %v8309_v58 }
 0x602   : > { %v8376_v20 = vand.u32 4294901760, %v8375_v32  ;;  %v8393_v23 = vand.u32 4294901760, %v8392_v34 }
 0x604   : > { %7231 = vmatmul.mubr.f32.vlgmr.msra.gmra.mrb[0].mxu1 %v6913_v25  ;;  %v8394_v36 = vsub.f32 %v8392_v34, %v8393_v23 }
 0x605   : > { %7240 = vmatpush1.msra.mxu1 %v6848_v26  ;;  %7303 = vmatprep.mubr.f32.mxu1 %v10015_v28 }
 0x606   : > { %7334 = vmatprep.subr.mxu1 %v7333_v35 }
 0x60c   : > { %7305 = vmatmul.mubr.f32.vlgmr.msra.gmra.mrb[0].mxu1 %v6913_v25  ;;  %v8297_v25 = vpop.permute.xlu0 %8296 }
 0x60d   : > { %7336 = vmatpush1.msra.mxu1 %v7335_v37  ;;  %7399 = vmatprep.mubr.f32.mxu1 %v10015_v28  ;;  %v8299_v26 = vsel %vm3817_vm0, %v8295_v4, %v8297_v25 }
 0x60e   : > { %7416 = vmatprep.subr.mxu1 %v7415_v43  ;;  %v8305_v30 = vsel %vm320_vm3, %v8299_v26, 0 }
 0x60f   : > { %v8307_v10 = vand.u32 4294901760, %v8305_v30 }
 0x611   : > { %v8386_v31 = vsub.f32 %v8305_v30, %v8307_v10 }
 0x613   : > { %v8387_v56 = vand.u32 4294901760, %v8386_v31 }
 0x614   : > { %7405 = vmatmul.mubr.f32.vlgmr.msra.gmra.mrb[0].mxu1 %v7404_v48 }
 0x615   : > { %7422 = vmatpush1.msra.mxu1 %v7421_v11  ;;  %7485 = vmatprep.mubr.f32.mxu1 %v10015_v28  ;;  %v8388_v52 = vsub.f32 %v8386_v31, %v8387_v56 }
 0x616   : > { %7495 = vmatprep.subr.mxu1 %v7412_v38  ;;  %v8395_v38 = vand.u32 4294901760, %v8394_v36 }
 0x617   : > { %v8389_v19 = vand.u32 4294901760, %v8388_v52 }
 0x61c   : > { %7487 = vmatmul.mubr.f32.vlgmr.msra.gmra.mrb[0].mxu1 %v7400_v33 }
 0x61d   : > { %7498 = vmatpush1.msra.mxu1 %v7418_v45  ;;  %7561 = vmatprep.mubr.f32.mxu1 %v10015_v28  ;;  %v4890_v45 = vld [vmem:[%s10231_s4 + $0x20] sm:$0xf] }
 0x61e   : > { %7571 = vmatprep.subr.mxu1 %v7333_v35 }
 0x624   : > { %7564 = vmatmul.mubr.f32.vlgmr.msra.gmra.mrb[0].mxu1 %v7401_v41 }
 0x625   : > { %7573 = vmatpush1.msra.mxu1 %v7335_v37  ;;  %7636 = vmatprep.mubr.f32.mxu1 %v10015_v28 }
 0x626   : > { %7649 = vmatprep.subr.mxu1 %v7413_v27 }
 0x62c   : > { %7640 = vmatmul.mubr.f32.vlgmr.msra.gmra.mrb[0].mxu1 %v7402_v47 }
 0x62d   : > { %7653 = vmatpush1.msra.mxu1 %v7419_v40  ;;  %7716 = vmatprep.mubr.f32.mxu1 %v10015_v28  ;;  %v8788_v40 = vsel %vm316_vm1, %v4890_v45, 0 }
 0x62e   : > { %7725 = vmatprep.subr.mxu1 %v7333_v35  ;;  %v8377_v35 = vsub.f32 %v8375_v32, %v8376_v20  ;;  %v8861_v9 = vand.u32 4294901760, %v8788_v40 }
 0x630   : > { %v8378_v14 = vand.u32 4294901760, %v8377_v35  ;;  %v8862_v51 = vsub.f32 %v8788_v40, %v8861_v9 }
 0x632   : > { %v8863_v55 = vand.u32 4294901760, %v8862_v51 }
 0x634   : > { %7718 = vmatmul.mubr.f32.vlgmr.msra.gmra.mrb[0].mxu1 %v7400_v33 }
 0x635   : > { %7727 = vmatpush1.msra.mxu1 %v7335_v37  ;;  %7790 = vmatprep.mubr.f32.mxu1 %v10015_v28 }
 0x636   : > { %7821 = vmatprep.subr.mxu1 %v7820_v39 }
 0x63c   : > { %7792 = vmatmul.mubr.f32.vlgmr.msra.gmra.mrb[0].mxu1 %v7400_v33  ;;  %v8782_v33 = vpop.permute.xlu0 %8781 }
 0x63d   : > { %7823 = vmatpush1.msra.mxu1 %v7822_v13  ;;  %7886 = vmatprep.mubr.f32.mxu1 %v10015_v28  ;;  %v8786_v37 = vsel %vm10235_vm2, %v8782_v33, %v8784_v42 }
 0x63e   : > { %7903 = vmatprep.subr.mxu1 %v7902_v3  ;;  %v8792_v27 = vsel %vm320_vm3, %v8786_v37, 0 }
 0x63f   : > { %v8794_v46 = vand.u32 4294901760, %v8792_v27 }
 0x640   : > { %v8780_v41 = vpop.permute.xlu0 %8779 }
 0x641   : > { %v8785_v47 = vsel %vm10236_vm6, %v8780_v41, %v8782_v33  ;;  %v8873_v29 = vsub.f32 %v8792_v27, %v8794_v46 }
 0x642   : > { %v8790_v43 = vsel %vm320_vm3, %v8785_v47, 0 }
 0x643   : > { %v8796_v48 = vand.u32 4294901760, %v8790_v43  ;;  %v8874_v11 = vand.u32 4294901760, %v8873_v29 }
 0x644   : > { %7892 = vmatmul.mubr.f32.vlgmr.msra.gmra.mrb[0].mxu1 %v7891_v63 }
 0x645   : > { %7909 = vmatpush1.msra.mxu1 %v7908_v1  ;;  %7972 = vmatprep.mubr.f32.mxu1 %v10015_v28  ;;  %v8879_v53 = vsub.f32 %v8790_v43, %v8796_v48  ;;  %v8875_v54 = vsub.f32 %v8873_v29, %v8874_v11 }
 0x646   : > { %7982 = vmatprep.subr.mxu1 %v7899_v6  ;;  %v9264_v6 = vpop.permute.xlu1 %9263 }
 0x647   : > { %v8880_v57 = vand.u32 4294901760, %v8879_v53  ;;  %v8876_v59 = vand.u32 4294901760, %v8875_v54 }
 0x649   : > { %v8881_v60 = vsub.f32 %v8879_v53, %v8880_v57 }
 0x64b   : > { %v8882_v5 = vand.u32 4294901760, %v8881_v60 }
 0x64c   : > { %7974 = vmatmul.mubr.f32.vlgmr.msra.gmra.mrb[0].mxu1 %v7887_v7 }
 0x64d   : > { %7985 = vmatpush1.msra.mxu1 %v7905_v8  ;;  %8048 = vmatprep.mubr.f32.mxu1 %v10015_v28 }
 0x64e   : > { %8058 = vmatprep.subr.mxu1 %v7820_v39 }
 0x654   : > { %8051 = vmatmul.mubr.f32.vlgmr.msra.gmra.mrb[0].mxu1 %v7888_v17 }
 0x655   : > { %8060 = vmatpush1.msra.mxu1 %v7822_v13  ;;  %8123 = vmatprep.mubr.f32.mxu1 %v10015_v28 }
 0x656   : > { %8136 = vmatprep.subr.mxu1 %v7900_v16 }
 0x65c   : > { %8127 = vmatmul.mubr.f32.vlgmr.msra.gmra.mrb[0].mxu1 %v7889_v61 }
 0x65d   : > { %8140 = vmatpush1.msra.mxu1 %v7906_v21  ;;  %8203 = vmatprep.mubr.f32.mxu1 %v10015_v28 }
 0x65e   : > { %8212 = vmatprep.subr.mxu1 %v7820_v39  ;;  %v8864_v39 = vsub.f32 %v8862_v51, %v8863_v55 }
 0x660   : > { %v8865_v0 = vand.u32 4294901760, %v8864_v39 }
 0x664   : > { %8205 = vmatmul.mubr.f32.vlgmr.msra.gmra.mrb[0].mxu1 %v7887_v7 }
 0x665   : > { %8214 = vmatpush1.msra.mxu1 %v7822_v13  ;;  %8277 = vmatprep.mubr.f32.mxu1 %v10015_v28 }
 0x666   : > { %8308 = vmatprep.subr.mxu1 %v8307_v10 }
 0x66c   : > { %8279 = vmatmul.mubr.f32.vlgmr.msra.gmra.mrb[0].mxu1 %v7887_v7 }
 0x66d   : > { %8310 = vmatpush1.msra.mxu1 %v8309_v58  ;;  %8373 = vmatprep.mubr.f32.mxu1 %v10015_v28 }
 0x66e   : > { %8390 = vmatprep.subr.mxu1 %v8389_v19 }
 0x674   : > { %8379 = vmatmul.mubr.f32.vlgmr.msra.gmra.mrb[0].mxu1 %v8378_v14 }
 0x675   : > { %8396 = vmatpush1.msra.mxu1 %v8395_v38  ;;  %8459 = vmatprep.mubr.f32.mxu1 %v10015_v28 }
 0x676   : > { %8469 = vmatprep.subr.mxu1 %v8386_v31 }
 0x67c   : > { %8461 = vmatmul.mubr.f32.vlgmr.msra.gmra.mrb[0].mxu1 %v8374_v49 }
 0x67d   : > { %8472 = vmatpush1.msra.mxu1 %v8392_v34  ;;  %8535 = vmatprep.mubr.f32.mxu1 %v10015_v28 }
 0x67e   : > { %8545 = vmatprep.subr.mxu1 %v8307_v10 }
 0x684   : > { %8538 = vmatmul.mubr.f32.vlgmr.msra.gmra.mrb[0].mxu1 %v8375_v32 }
 0x685   : > { %8547 = vmatpush1.msra.mxu1 %v8309_v58  ;;  %8610 = vmatprep.mubr.f32.mxu1 %v10015_v28 }
 0x686   : > { %8623 = vmatprep.subr.mxu1 %v8387_v56 }
 0x68c   : > { %8614 = vmatmul.mubr.f32.vlgmr.msra.gmra.mrb[0].mxu1 %v8376_v20 }
 0x68d   : > { %8627 = vmatpush1.msra.mxu1 %v8393_v23  ;;  %8690 = vmatprep.mubr.f32.mxu1 %v10015_v28 }
 0x68e   : > { %8699 = vmatprep.subr.mxu1 %v8307_v10 }
 0x694   : > { %8692 = vmatmul.mubr.f32.vlgmr.msra.gmra.mrb[0].mxu1 %v8374_v49 }
 0x695   : > { %8701 = vmatpush1.msra.mxu1 %v8309_v58  ;;  %8764 = vmatprep.mubr.f32.mxu1 %v10015_v28 }
 0x696   : > { %8795 = vmatprep.subr.mxu1 %v8794_v46 }
 0x69c   : > { %8766 = vmatmul.mubr.f32.vlgmr.msra.gmra.mrb[0].mxu1 %v8374_v49 }
 0x69d   : > { %8797 = vmatpush1.msra.mxu1 %v8796_v48  ;;  %8860 = vmatprep.mubr.f32.mxu1 %v10015_v28 }
 0x69e   : > { %8877 = vmatprep.subr.mxu1 %v8876_v59 }
 0x6a4   : > { %8866 = vmatmul.mubr.f32.vlgmr.msra.gmra.mrb[0].mxu1 %v8865_v0 }
 0x6a5   : > { %8883 = vmatpush1.msra.mxu1 %v8882_v5  ;;  %8946 = vmatprep.mubr.f32.mxu1 %v10015_v28 }
 0x6a6   : > { %8956 = vmatprep.subr.mxu1 %v8873_v29 }
 0x6ac   : > { %8948 = vmatmul.mubr.f32.vlgmr.msra.gmra.mrb[0].mxu1 %v8861_v9 }
 0x6ad   : > { %8959 = vmatpush1.msra.mxu1 %v8879_v53  ;;  %9022 = vmatprep.mubr.f32.mxu1 %v10015_v28 }
 0x6ae   : > { %9032 = vmatprep.subr.mxu1 %v8794_v46 }
 0x6b4   : > { %9025 = vmatmul.mubr.f32.vlgmr.msra.gmra.mrb[0].mxu1 %v8862_v51 }
 0x6b5   : > { %9034 = vmatpush1.msra.mxu1 %v8796_v48  ;;  %9097 = vmatprep.mubr.f32.mxu1 %v10015_v28 }
 0x6b6   : > { %9110 = vmatprep.subr.mxu1 %v8874_v11 }
 0x6bc   : > { %9101 = vmatmul.mubr.f32.vlgmr.msra.gmra.mrb[0].mxu1 %v8863_v55 }
 0x6bd   : > { %9114 = vmatpush1.msra.mxu1 %v8880_v57  ;;  %9177 = vmatprep.mubr.f32.mxu1 %v10015_v28 }
 0x6be   : > { %9186 = vmatprep.subr.mxu1 %v8794_v46 }
 0x6c4   : > { %9179 = vmatmul.mubr.f32.vlgmr.msra.gmra.mrb[0].mxu1 %v8861_v9 }
 0x6c5   : > { %9188 = vmatpush1.msra.mxu1 %v8796_v48  ;;  %9251 = vmatprep.mubr.f32.mxu1 %v10015_v28 }
 0x6cc   : > { %9253 = vmatmul.mubr.f32.vlgmr.msra.gmra.mrb[0].mxu1 %v8861_v9 }
 0x79f   : > { %v9254_v7 = vpop.f32.mrb[0].mxu1 }
 0x7a0   : > { %v9266_v13 = vadd.f32 %v9264_v6, %v9254_v7  ;;  %v9256_v16 = vpop.f32.mrb[1].mxu1 }
 0x7a1   : > { %v9267_v17 = vadd.f32 %v9264_v6, %v9256_v16 }
 0x7a3   : > { %v9270_v8 = vcombine.low %v9266_v13, %v9267_v17 }
 0x7a5   : > { %9272 = vst [vmem:[%s251_s19] sm:$0xff] %v9270_v8 }
 0x7a6 PF: > { %s16_s21 = sadd.s32 1, %s9599_s21  }
 0x7a7   : > { %p13_p4 = scmp.ge.s32.totalorder %s16_s21, 4  }
 0x7a9   :  { %15 = sbr.rel (!%p13_p4) target bundleno = 1 (0x1), region = 74 }

// kernel: guided_spatial_sr.12
= control target key start
LH: loop header
LB: loop body
LE: loop exit
PB: predicated region body
PF: predicated region fallthrough
CT: control target
= control target key end

     0   :  { %s2984_s24 = smov 0   ;;  %s3256_s0 = inlined_call_operand.vmem [shape: f32[2,4,16,8], index: 0, kind: input, shape index: {}]   ;;  %s3257_s1 = inlined_call_operand.vmem [shape: f32[2,4,8,16], index: 1, kind: input, shape index: {}]   ;;  %s3258_s2 = inlined_call_operand.vmem [shape: f32[2,4,16,16], index: 2, kind: input, shape index: {}]   ;;  %s3259_s3 = inlined_call_operand.vmem [shape: f32[2,4,16,16], index: 3, kind: input, shape index: {}]   ;;  %s3260_s4 = inlined_call_operand.vmem [shape: f32[1,1,16], index: 4, kind: input, shape index: {}]   ;;  %s3261_s5 = inlined_call_operand.vmem [shape: f32[1,1,16], index: 5, kind: input, shape index: {}]   ;;  %s3262_s6 = inlined_call_operand.vmem [shape: f32[2,4,16,16], index: 6, kind: output, shape index: {0}]   ;;  %s3263_s7 = inlined_call_operand.vmem [shape: f32[2,4,16,16], index: 7, kind: output, shape index: {1}]  }
   0x1 LB: > { %s2645_s25 = sadd.s32 4294967295, %s2942_s24   ;;  %p2649_p0 = scmp.ge.s32.totalorder %s2942_s24, 1  ;;  %s2942_s24 = sphi %s2984_s24, %s18_s24  }
   0x2   : > { %p270_p1 = scmp.lt.s32.totalorder %s2942_s24, 3 }
   0x4   : > { %p271_p2 = pnand %p2649_p0, %p270_p1 }
   0x5   : > { %p322_p3 = scmp.lt.s32.totalorder (!%p271_p2), %s2645_s25, 1  ;;  %vm372_vm0 = vcmask (!%p271_p2), 64512   ;;  %vm2369_vm1 = vcmask (!%p271_p2), 130048  }
   0x6   : > { %274 = sbr.rel (%p271_p2) target bundleno = 649 (0x289), region = 44 }
   0xd   : > { %s3265_s25 = smov (!%p322_p3, %s2645_s25), 1 }
   0xe   : > { %s2667_s26 = sshll.u32 %s3265_s25, 5  ;;  %s2992_s27 = sshll.u32 %s3265_s25, 6 }
   0xf   : > { %s2997_s30 = scalar_lea.vmem %s3257_s1, %s2667_s26  ;;  %s3003_s10 = scalar_lea.vmem %s3256_s0, %s2992_s27 }
  0x10   : > { %v360_v0 = vld [vmem:[%s2997_s30] sm:$0xff]  ;;  %v361_v1 = vld [vmem:[%s2997_s30 + $0x8] sm:$0xff]  ;;  %v354_v6 = vld [vmem:[%s3003_s10 + $0x10] sm:$0xff]  ;;  %s3128_s13 = scalar_lea.vmem %s3258_s2, %s2992_s27  ;;  %s3134_s16 = scalar_lea.vmem %s3259_s3, %s2992_s27 }
  0x11   : > { %v352_v2 = vld [vmem:[%s3003_s10] sm:$0xff]  ;;  %v3008_v3 = vand.u32 4294901760, %v360_v0  ;;  %v3010_v4 = vand.u32 4294901760, %v361_v1  ;;  %v353_v7 = vld [vmem:[%s3003_s10 + $0x8] sm:$0xff]  ;;  %v355_v8 = vld [vmem:[%s3003_s10 + $0x18] sm:$0xff]  ;;  %v869_v10 = vsel %vm372_vm0, %v354_v6, 0  ;;  %s3147_s19 = scalar_lea.vmem %s3262_s6, %s2992_s27  ;;  %s3228_s28 = scalar_lea.vmem %s3263_s7, %s2992_s27 }
  0x12   : > { %v374_v5 = vsel %vm372_vm0, %v352_v2, 0  ;;  %v377_v11 = vsel %vm372_vm0, %v353_v7, 0  ;;  %v872_v12 = vsel %vm372_vm0, %v355_v8, 0  ;;  %v3024_v14 = vand.u32 4294901760, %v869_v10  ;;  %v356_v40 = vld [vmem:[%s3003_s10 + $0x20] sm:$0xff]  ;;  %v358_v41 = vld [vmem:[%s3003_s10 + $0x30] sm:$0xff] }
  0x13   : > { %v3016_v9 = vand.u32 4294901760, %v374_v5  ;;  %2744 = vmatprep.subr.mxu0 %v3008_v3  ;;  %2774 = vmatprep.subr.mxu1 %v3010_v4  ;;  %v467_v13 = vsub.f32 %v360_v0, %v3008_v3  ;;  %v3026_v15 = vand.u32 4294901760, %v377_v11  ;;  %v3028_v16 = vand.u32 4294901760, %v872_v12  ;;  %v357_v42 = vld [vmem:[%s3003_s10 + $0x28] sm:$0xff]  ;;  %v362_v43 = vld [vmem:[%s2997_s30 + $0x10] sm:$0xff]  ;;  %v359_v45 = vld [vmem:[%s3003_s10 + $0x38] sm:$0xff] }
  0x14   : > { %2745 = vmatpush3.msra.mxu0 %v3008_v3  ;;  %2775 = vmatpush3.msra.mxu1 %v3010_v4  ;;  %v962_v18 = vsub.f32 %v361_v1, %v3010_v4  ;;  %v941_v20 = vsub.f32 %v869_v10, %v3024_v14  ;;  %v1364_v44 = vsel %vm372_vm0, %v356_v40, 0  ;;  %v1859_v46 = vsel %vm372_vm0, %v358_v41, 0  ;;  %v363_v47 = vld [vmem:[%s2997_s30 + $0x18] sm:$0xff]  ;;  %v369_v40 = vld [vmem:[%s3128_s13 + $0x28] sm:$0xff] }
  0x15   : > { %v446_v17 = vsub.f32 %v374_v5, %v3016_v9  ;;  %v3034_v19 = vand.u32 4294901760, %v467_v13  ;;  %v456_v21 = vsub.f32 %v377_v11, %v3026_v15  ;;  %v3039_v22 = vsub.f32 %v872_v12, %v3028_v16  ;;  %v371_v41 = vld [vmem:[%s3128_s13 + $0x38] sm:$0xff] }
  0x16   : > { %v963_v24 = vand.u32 4294901760, %v962_v18  ;;  %v942_v26 = vand.u32 4294901760, %v941_v20  ;;  %v1367_v48 = vsel %vm372_vm0, %v357_v42, 0  ;;  %v3063_v49 = vand.u32 4294901760, %v362_v43  ;;  %v368_v42 = vld [vmem:[%s3128_s13 + $0x20] sm:$0xff] }
  0x17   : > { %v447_v23 = vand.u32 4294901760, %v446_v17  ;;  %v469_v25 = vsub.f32 %v467_v13, %v3034_v19  ;;  %v457_v27 = vand.u32 4294901760, %v456_v21  ;;  %v952_v28 = vand.u32 4294901760, %v3039_v22 }
  0x18   : > { %v964_v30 = vsub.f32 %v962_v18, %v963_v24  ;;  %v943_v32 = vsub.f32 %v941_v20, %v942_v26  ;;  %v3065_v50 = vand.u32 4294901760, %v1364_v44  ;;  %v1862_v51 = vsel %vm372_vm0, %v359_v45, 0  ;;  %v370_v45 = vld [vmem:[%s3128_s13 + $0x30] sm:$0xff] }
  0x19   : > { %v448_v29 = vsub.f32 %v446_v17, %v447_v23  ;;  %v470_v31 = vand.u32 4294901760, %v469_v25  ;;  %v458_v33 = vsub.f32 %v456_v21, %v457_v27  ;;  %v953_v34 = vsub.f32 %v3039_v22, %v952_v28 }
  0x1a   : > { %v965_v36 = vand.u32 4294901760, %v964_v30  ;;  %v944_v37 = vand.u32 4294901760, %v943_v32  ;;  %v3068_v52 = vand.u32 4294901760, %v1859_v46  ;;  %v3070_v53 = vand.u32 4294901760, %v363_v47  ;;  %v2355_v30 = vld [vmem:[%s3134_s16 + $0x10] sm:$0xff] }
  0x1b   : > { %v449_v35 = vand.u32 4294901760, %v448_v29  ;;  %2749 = vmatprep.subr.mxu0 %v470_v31  ;;  %v459_v38 = vand.u32 4294901760, %v458_v33  ;;  %v954_v39 = vand.u32 4294901760, %v953_v34  ;;  %v3072_v54 = vand.u32 4294901760, %v1367_v48 }
  0x1c   : > { %2779 = vmatprep.subr.mxu1 %v965_v36  ;;  %2776 = vmatprep.mubr.f32.mxu1 %v944_v37  ;;  %v3075_v55 = vand.u32 4294901760, %v1862_v51  ;;  %v3079_v56 = vsub.f32 %v1364_v44, %v3065_v50  ;;  %v1457_v57 = vsub.f32 %v362_v43, %v3063_v49  ;;  %v1931_v58 = vsub.f32 %v1859_v46, %v3068_v52  ;;  %v2358_v44 = vld [vmem:[%s3134_s16 + $0x28] sm:$0xff] }
  0x1d   : > { %2746 = vmatprep.mubr.f32.mxu0 %v449_v35  ;;  %2777 = vmatmul.mubr.f32.vlgmr.msra.gmra.mrb[0].mxu1 %v954_v39  ;;  %v1446_v59 = vsub.f32 %v1367_v48, %v3072_v54  ;;  %v1952_v60 = vsub.f32 %v363_v47, %v3070_v53  ;;  %v2360_v48 = vld [vmem:[%s3134_s16 + $0x38] sm:$0xff] }
  0x1e   : > { %2747 = vmatmul.mubr.f32.vlgmr.msra.gmra.mrb[0].mxu0 %v459_v38  ;;  %2780 = vmatpush3.msra.mxu1 %v965_v36  ;;  %v1941_v61 = vsub.f32 %v1862_v51, %v3075_v55  ;;  %v1437_v62 = vand.u32 4294901760, %v3079_v56  ;;  %v1458_v63 = vand.u32 4294901760, %v1457_v57  ;;  %v1932_v0 = vand.u32 4294901760, %v1931_v58 }
  0x1f   : > { %2750 = vmatpush3.msra.mxu0 %v470_v31  ;;  %2751 = vmatprep.mubr.f32.mxu0 %v3016_v9  ;;  %v1447_v1 = vand.u32 4294901760, %v1446_v59  ;;  %v1953_v2 = vand.u32 4294901760, %v1952_v60 }
  0x20   : > { %2754 = vmatprep.subr.mxu0 %v467_v13  ;;  %2781 = vmatprep.mubr.f32.mxu1 %v3024_v14  ;;  %v1942_v5 = vand.u32 4294901760, %v1941_v61  ;;  %v1438_v6 = vsub.f32 %v3079_v56, %v1437_v62  ;;  %v1459_v7 = vsub.f32 %v1457_v57, %v1458_v63  ;;  %v1933_v8 = vsub.f32 %v1931_v58, %v1932_v0 }
  0x21   : > { %2784 = vmatprep.subr.mxu1 %v962_v18  ;;  %v1448_v10 = vsub.f32 %v1446_v59, %v1447_v1  ;;  %v1954_v11 = vsub.f32 %v1952_v60, %v1953_v2 }
  0x22   : > { %v1439_v12 = vand.u32 4294901760, %v1438_v6 }
  0x25   : > { %2782 = vmatmul.mubr.f32.vlgmr.msra.gmra.mrb[0].mxu1 %v3028_v16 }
  0x26   : > { %2752 = vmatmul.mubr.f32.vlgmr.msra.gmra.mrb[0].mxu0 %v3026_v15  ;;  %2785 = vmatpush3.msra.mxu1 %v962_v18  ;;  %v364_v18 = vld [vmem:[%s3128_s13] sm:$0xff] }
  0x27   : > { %2755 = vmatpush3.msra.mxu0 %v467_v13  ;;  %2756 = vmatprep.mubr.f32.mxu0 %v446_v17  ;;  %v1460_v13 = vand.u32 4294901760, %v1459_v7  ;;  %v1934_v17 = vand.u32 4294901760, %v1933_v8 }
  0x28   : > { %2759 = vmatprep.subr.mxu0 %v3008_v3  ;;  %2786 = vmatprep.mubr.f32.mxu1 %v941_v20  ;;  %v2354_v20 = vld [vmem:[%s3134_s16 + $0x8] sm:$0xff] }
  0x29   : > { %2789 = vmatprep.subr.mxu1 %v3010_v4 }
  0x2d   : > { %2787 = vmatmul.mubr.f32.vlgmr.msra.gmra.mrb[0].mxu1 %v3039_v22 }
  0x2e   : > { %2757 = vmatmul.mubr.f32.vlgmr.msra.gmra.mrb[0].mxu0 %v456_v21  ;;  %2790 = vmatpush3.msra.mxu1 %v3010_v4  ;;  %v366_v21 = vld [vmem:[%s3128_s13 + $0x10] sm:$0xff] }
  0x2f   : > { %2760 = vmatpush3.msra.mxu0 %v3008_v3  ;;  %2761 = vmatprep.mubr.f32.mxu0 %v447_v23 }
  0x30   : > { %2764 = vmatprep.subr.mxu0 %v3034_v19  ;;  %2791 = vmatprep.mubr.f32.mxu1 %v942_v26  ;;  %v2353_v26 = vld [vmem:[%s3134_s16] sm:$0xff] }
  0x31   : > { %2794 = vmatprep.subr.mxu1 %v963_v24 }
  0x35   : > { %2792 = vmatmul.mubr.f32.vlgmr.msra.gmra.mrb[0].mxu1 %v952_v28 }
  0x36   : > { %2762 = vmatmul.mubr.f32.vlgmr.msra.gmra.mrb[0].mxu0 %v457_v27  ;;  %2795 = vmatpush3.msra.mxu1 %v963_v24  ;;  %v2356_v24 = vld [vmem:[%s3134_s16 + $0x18] sm:$0xff] }
  0x37   : > { %2765 = vmatpush3.msra.mxu0 %v3034_v19  ;;  %2766 = vmatprep.mubr.f32.mxu0 %v3016_v9 }
  0x38   : > { %2769 = vmatprep.subr.mxu0 %v3008_v3  ;;  %2796 = vmatprep.mubr.f32.mxu1 %v3024_v14 }
  0x39   : > { %2799 = vmatprep.subr.mxu1 %v3010_v4 }
  0x3d   : > { %2797 = vmatmul.mubr.f32.vlgmr.msra.gmra.mrb[0].mxu1 %v3028_v16 }
  0x3e   : > { %2767 = vmatmul.mubr.f32.vlgmr.msra.gmra.mrb[0].mxu0 %v3026_v15  ;;  %2800 = vmatpush3.msra.mxu1 %v3010_v4  ;;  %v1449_v4 = vand.u32 4294901760, %v1448_v10 }
  0x3f   : > { %2770 = vmatpush3.msra.mxu0 %v3008_v3  ;;  %2771 = vmatprep.mubr.f32.mxu0 %v3016_v9  ;;  %v1943_v3 = vsub.f32 %v1941_v61, %v1942_v5  ;;  %v1955_v9 = vand.u32 4294901760, %v1954_v11 }
  0x40   : > { %2801 = vmatprep.mubr.f32.mxu1 %v3024_v14  ;;  %2804 = vmatprep.subr.mxu0 %v3063_v49 }
  0x41   : > { %2834 = vmatprep.subr.mxu1 %v3070_v53  ;;  %v1944_v14 = vand.u32 4294901760, %v1943_v3 }
  0x45   : > { %2802 = vmatmul.mubr.f32.vlgmr.msra.gmra.mrb[0].mxu1 %v3028_v16  ;;  %v367_v16 = vld [vmem:[%s3128_s13 + $0x18] sm:$0xff] }
  0x46   : > { %2772 = vmatmul.mubr.f32.vlgmr.msra.gmra.mrb[0].mxu0 %v3026_v15  ;;  %2835 = vmatpush3.msra.mxu1 %v3070_v53  ;;  %v365_v15 = vld [vmem:[%s3128_s13 + $0x8] sm:$0xff] }
  0x47   : > { %2805 = vmatpush3.msra.mxu0 %v3063_v49  ;;  %2806 = vmatprep.mubr.f32.mxu0 %v1439_v12 }
  0x48   : > { %2809 = vmatprep.subr.mxu0 %v1460_v13  ;;  %2836 = vmatprep.mubr.f32.mxu1 %v1934_v17 }
  0x49   : > { %2839 = vmatprep.subr.mxu1 %v1955_v9  ;;  %2837 = vmatmul.mubr.f32.vlgmr.msra.gmra.mrb[2].mxu1 %v1944_v14 }
  0x4a   : > { %2807 = vmatmul.mubr.f32.vlgmr.msra.gmra.mrb[2].mxu0 %v1449_v4  ;;  %2840 = vmatpush3.msra.mxu1 %v1955_v9 }
  0x4b   : > { %2810 = vmatpush3.msra.mxu0 %v1460_v13  ;;  %2811 = vmatprep.mubr.f32.mxu0 %v3065_v50 }
  0x4c   : > { %2814 = vmatprep.subr.mxu0 %v1457_v57  ;;  %2841 = vmatprep.mubr.f32.mxu1 %v3068_v52 }
  0x4d   : > { %2844 = vmatprep.subr.mxu1 %v1952_v60 }
  0x51   : > { %2842 = vmatmul.mubr.f32.vlgmr.msra.gmra.mrb[2].mxu1 %v3075_v55 }
  0x52   : > { %2812 = vmatmul.mubr.f32.vlgmr.msra.gmra.mrb[2].mxu0 %v3072_v54  ;;  %2845 = vmatpush3.msra.mxu1 %v1952_v60 }
  0x53   : > { %2815 = vmatpush3.msra.mxu0 %v1457_v57  ;;  %2816 = vmatprep.mubr.f32.mxu0 %v3079_v56 }
  0x54   : > { %2819 = vmatprep.subr.mxu0 %v3063_v49  ;;  %2846 = vmatprep.mubr.f32.mxu1 %v1931_v58 }
  0x55   : > { %2849 = vmatprep.subr.mxu1 %v3070_v53 }
  0x59   : > { %2847 = vmatmul.mubr.f32.vlgmr.msra.gmra.mrb[2].mxu1 %v1941_v61 }
  0x5a   : > { %2817 = vmatmul.mubr.f32.vlgmr.msra.gmra.mrb[2].mxu0 %v1446_v59  ;;  %2850 = vmatpush3.msra.mxu1 %v3070_v53 }
  0x5b   : > { %2820 = vmatpush3.msra.mxu0 %v3063_v49  ;;  %2821 = vmatprep.mubr.f32.mxu0 %v1437_v62 }
  0x5c   : > { %2824 = vmatprep.subr.mxu0 %v1458_v63  ;;  %2851 = vmatprep.mubr.f32.mxu1 %v1932_v0 }
  0x5d   : > { %2854 = vmatprep.subr.mxu1 %v1953_v2 }
  0x61   : > { %2852 = vmatmul.mubr.f32.vlgmr.msra.gmra.mrb[2].mxu1 %v1942_v5 }
  0x62   : > { %2822 = vmatmul.mubr.f32.vlgmr.msra.gmra.mrb[2].mxu0 %v1447_v1  ;;  %2855 = vmatpush3.msra.mxu1 %v1953_v2 }
  0x63   : > { %2825 = vmatpush3.msra.mxu0 %v1458_v63  ;;  %2826 = vmatprep.mubr.f32.mxu0 %v3065_v50 }
  0x64   : > { %2829 = vmatprep.subr.mxu0 %v3063_v49  ;;  %2856 = vmatprep.mubr.f32.mxu1 %v3068_v52 }
  0x65   : > { %2859 = vmatprep.subr.mxu1 %v3070_v53 }
  0x69   : > { %2857 = vmatmul.mubr.f32.vlgmr.msra.gmra.mrb[2].mxu1 %v3075_v55 }
  0x6a   : > { %2827 = vmatmul.mubr.f32.vlgmr.msra.gmra.mrb[2].mxu0 %v3072_v54  ;;  %2860 = vmatpush3.msra.mxu1 %v3070_v53 }
  0x6b   : > { %2830 = vmatpush3.msra.mxu0 %v3063_v49  ;;  %2831 = vmatprep.mubr.f32.mxu0 %v3065_v50  ;;  %v2357_v50 = vld [vmem:[%s3134_s16 + $0x20] sm:$0xff] }
  0x6c   : > { %2861 = vmatprep.mubr.f32.mxu1 %v3068_v52 }
  0x71   : > { %2862 = vmatmul.mubr.f32.vlgmr.msra.gmra.mrb[2].mxu1 %v3075_v55 }
  0x72   : > { %2832 = vmatmul.mubr.f32.vlgmr.msra.gmra.mrb[2].mxu0 %v3072_v54  ;;  %v2359_v54 = vld [vmem:[%s3134_s16 + $0x30] sm:$0xff] }
 0x118   : > { %v2803_v23 = vpop.f32.mrb[0].mxu1 }
 0x119   : > { %v2773_v19 = vpop.f32.mrb[0].mxu0  ;;  %v2866_v27 = vadd.f32 %v2803_v23, %v367_v16  ;;  %v1353_v29 = vpop.f32.mrb[1].mxu1 }
 0x11a   : > { %v2864_v22 = vadd.f32 %v2773_v19, %v365_v15  ;;  %v858_v25 = vpop.f32.mrb[1].mxu0  ;;  %v2867_v32 = vadd.f32 %v1353_v29, %v366_v21 }
 0x11b   : > { %v2865_v28 = vadd.f32 %v858_v25, %v364_v18  ;;  %v2364_v33 = vadd.f32 %v2866_v27, %v2356_v24 }
 0x11c   : > { %v2362_v31 = vadd.f32 %v2864_v22, %v2354_v20  ;;  %v2363_v35 = vadd.f32 %v2867_v32, %v2355_v30 }
 0x11d   : > { %v2361_v34 = vadd.f32 %v2865_v28, %v2353_v26  ;;  %2508 = vst.msk [vmem:[%s3147_s19 + $0x18] sm:$0xff] %vm2369_vm1, %v2364_v33  ;;  %v2379_v37 = vsel %vm2369_vm1, %v2364_v33, 0.0 }
 0x11e   : > { %2506 = vst.msk [vmem:[%s3147_s19 + $0x8] sm:$0xff] %vm2369_vm1, %v2362_v31  ;;  %v2373_v36 = vsel %vm2369_vm1, %v2362_v31, 0.0  ;;  %2507 = vst.msk [vmem:[%s3147_s19 + $0x10] sm:$0xff] %vm2369_vm1, %v2363_v35  ;;  %2380 = vadd.xlane.f32.xlu1 %v2379_v37  ;;  %v2376_v39 = vsel %vm2369_vm1, %v2363_v35, 0.0 }
 0x11f   : > { %2505 = vst.msk [vmem:[%s3147_s19] sm:$0xff] %vm2369_vm1, %v2361_v34  ;;  %2374 = vadd.xlane.f32.xlu0 %v2373_v36  ;;  %v2370_v38 = vsel %vm2369_vm1, %v2361_v34, 0.0 }
 0x122   : > { %2377 = vadd.xlane.f32.xlu1 %v2376_v39 }
 0x123   : > { %2371 = vadd.xlane.f32.xlu0 %v2370_v38 }
 0x144   : > { %v2863_v47 = vpop.f32.mrb[2].mxu1 }
 0x145   : > { %v2833_v43 = vpop.f32.mrb[2].mxu0  ;;  %v2870_v51 = vadd.f32 %v2863_v47, %v371_v41  ;;  %v2343_v53 = vpop.f32.mrb[3].mxu1 }
 0x146   : > { %v2868_v46 = vadd.f32 %v2833_v43, %v369_v40  ;;  %v1848_v49 = vpop.f32.mrb[3].mxu0  ;;  %v2871_v56 = vadd.f32 %v2343_v53, %v370_v45  ;;  %v2662_v53 = vld [vmem:[%s3260_s4] ss:$0 sm:$0xff] }
 0x147   : > { %v2869_v52 = vadd.f32 %v1848_v49, %v368_v42  ;;  %v2368_v57 = vadd.f32 %v2870_v51, %v2360_v48 }
 0x148   : > { %v2366_v55 = vadd.f32 %v2868_v46, %v2358_v44  ;;  %v2367_v59 = vadd.f32 %v2871_v56, %v2359_v54 }
 0x149   : > { %v2365_v58 = vadd.f32 %v2869_v52, %v2357_v50  ;;  %2512 = vst.msk [vmem:[%s3147_s19 + $0x38] sm:$0xff] %vm2369_vm1, %v2368_v57  ;;  %v2391_v62 = vsel %vm2369_vm1, %v2368_v57, 0.0 }
 0x14a   : > { %2510 = vst.msk [vmem:[%s3147_s19 + $0x28] sm:$0xff] %vm2369_vm1, %v2366_v55  ;;  %v2385_v60 = vsel %vm2369_vm1, %v2366_v55, 0.0  ;;  %2511 = vst.msk [vmem:[%s3147_s19 + $0x30] sm:$0xff] %vm2369_vm1, %v2367_v59  ;;  %v2388_v63 = vsel %vm2369_vm1, %v2367_v59, 0.0 }
 0x14b   : > { %2509 = vst.msk [vmem:[%s3147_s19 + $0x20] sm:$0xff] %vm2369_vm1, %v2365_v58  ;;  %2386 = vadd.xlane.f32.xlu1 %v2385_v60  ;;  %v2382_v61 = vsel %vm2369_vm1, %v2365_v58, 0.0 }
 0x14c   : > { %2383 = vadd.xlane.f32.xlu0 %v2382_v61 }
 0x14f   : > { %2392 = vadd.xlane.f32.xlu1 %v2391_v62 }
 0x150   : > { %2389 = vadd.xlane.f32.xlu0 %v2388_v63 }
 0x1ab   : > { %v2381_v1 = vpop.xlane.xlu1 %2380 }
 0x1ac   : > { %v2375_v0 = vpop.xlane.xlu0 %2374  ;;  %v2398_v5 = vmul.f32 0.0625, %v2381_v1 }
 0x1ad   : > { %v2396_v2 = vmul.f32 0.0625, %v2375_v0 }
 0x1ae   : > { %v3182_v7 = vsub.f32 %v2364_v33, %v2398_v5 }
 0x1af   : > { %v2404_v6 = vsub.f32 %v2362_v31, %v2396_v2  ;;  %v2378_v10 = vpop.xlane.xlu1 %2377 }
 0x1b0   : > { %v2372_v8 = vpop.xlane.xlu0 %2371  ;;  %v2397_v12 = vmul.f32 0.0625, %v2378_v10  ;;  %v2414_v4 = vmul.f32 %v3182_v7, %v3182_v7 }
 0x1b1   : > { %v2395_v11 = vmul.f32 0.0625, %v2372_v8  ;;  %v2412_v3 = vmul.f32 %v2404_v6, %v2404_v6 }
 0x1b2   : > { %v3189_v9 = vsub.f32 %v2363_v35, %v2397_v12  ;;  %v2428_v15 = vsel %vm2369_vm1, %v2414_v4, 0.0 }
 0x1b3   : > { %v3184_v13 = vsub.f32 %v2361_v34, %v2395_v11  ;;  %v2422_v17 = vsel %vm2369_vm1, %v2412_v3, 0.0 }
 0x1b4   : > { %2423 = vadd.xlane.f32.xlu1 %v2422_v17  ;;  %v2413_v18 = vmul.f32 %v3189_v9, %v3189_v9 }
 0x1b5   : > { %v2411_v14 = vmul.f32 %v3184_v13, %v3184_v13 }
 0x1b6   : > { %v2425_v19 = vsel %vm2369_vm1, %v2413_v18, 0.0 }
 0x1b7   : > { %v2419_v16 = vsel %vm2369_vm1, %v2411_v14, 0.0 }
 0x1b8   : > { %2429 = vadd.xlane.f32.xlu1 %v2428_v15  ;;  %2420 = vadd.xlane.f32.xlu0 %v2419_v16 }
 0x1bc   : > { %2426 = vadd.xlane.f32.xlu0 %v2425_v19 }
 0x1d8   : > { %v2387_v20 = vpop.xlane.xlu1 %2386 }
 0x1d9   : > { %v2400_v21 = vmul.f32 0.0625, %v2387_v20  ;;  %v2384_v22 = vpop.xlane.xlu0 %2383 }
 0x1da   : > { %v2399_v23 = vmul.f32 0.0625, %v2384_v22 }
 0x1db   : > { %v3198_v24 = vsub.f32 %v2366_v55, %v2400_v21  ;;  %v2663_v55 = vld [vmem:[%s3261_s5] ss:$0 sm:$0xff] }
 0x1dc   : > { %v3200_v25 = vsub.f32 %v2365_v58, %v2399_v23  ;;  %v2393_v26 = vpop.xlane.xlu1 %2392 }
 0x1dd   : > { %v2402_v27 = vmul.f32 0.0625, %v2393_v26  ;;  %v2390_v28 = vpop.xlane.xlu0 %2389  ;;  %v2416_v29 = vmul.f32 %v3198_v24, %v3198_v24 }
 0x1de   : > { %v2401_v30 = vmul.f32 0.0625, %v2390_v28  ;;  %v2415_v31 = vmul.f32 %v3200_v25, %v3200_v25 }
 0x1df   : > { %v3206_v32 = vsub.f32 %v2368_v57, %v2402_v27  ;;  %v2434_v33 = vsel %vm2369_vm1, %v2416_v29, 0.0 }
 0x1e0   : > { %v3209_v34 = vsub.f32 %v2367_v59, %v2401_v30  ;;  %2435 = vadd.xlane.f32.xlu1 %v2434_v33  ;;  %v2431_v35 = vsel %vm2369_vm1, %v2415_v31, 0.0 }
 0x1e1   : > { %2432 = vadd.xlane.f32.xlu0 %v2431_v35  ;;  %v2418_v36 = vmul.f32 %v3206_v32, %v3206_v32 }
 0x1e2   : > { %v2417_v37 = vmul.f32 %v3209_v34, %v3209_v34 }
 0x1e3   : > { %v2440_v38 = vsel %vm2369_vm1, %v2418_v36, 0.0 }
 0x1e4   : > { %2441 = vadd.xlane.f32.xlu1 %v2440_v38  ;;  %v2437_v39 = vsel %vm2369_vm1, %v2417_v37, 0.0 }
 0x1e5   : > { %2438 = vadd.xlane.f32.xlu0 %v2437_v39 }
 0x241   : > { %v2424_v40 = vpop.xlane.xlu1 %2423 }
 0x242   : > { %v2444_v41 = vmul.f32 0.0625, %v2424_v40 }
 0x244   : > { %v2452_v42 = vadd.f32 16.0, %v2444_v41 }
 0x245   : > { %v2430_v43 = vpop.xlane.xlu1 %2429  ;;  %v2421_v44 = vpop.xlane.xlu0 %2420 }
 0x246   : > { %2920 = vrsqrt.f32 %v2452_v42  ;;  %v2446_v45 = vmul.f32 0.0625, %v2430_v43  ;;  %v2443_v46 = vmul.f32 0.0625, %v2421_v44 }
 0x248   : > { %v2454_v47 = vadd.f32 16.0, %v2446_v45  ;;  %v2451_v48 = vadd.f32 16.0, %v2443_v46 }
 0x249   : > { %v2427_v49 = vpop.xlane.xlu0 %2426 }
 0x24a   : > { %2922 = vrsqrt.f32 %v2454_v47  ;;  %v2445_v50 = vmul.f32 0.0625, %v2427_v49 }
 0x24b   : > { %2924 = vrsqrt.f32 %v2451_v48 }
 0x24c   : > { %v2453_v51 = vadd.f32 16.0, %v2445_v50 }
 0x24e   : > { %2926 = vrsqrt.f32 %v2453_v51 }
 0x250   : > { %v2921_v52 = vpop.eup %2920 }
 0x251   : > { %v2468_v54 = vmul.f32 %v2921_v52, %v2404_v6 }
 0x253   : > { %v2483_v56 = vmul.f32 %v2662_v53, %v2468_v54 }
 0x254   : > { %v2923_v57 = vpop.eup %2922 }
 0x255   : > { %v2925_v58 = vpop.eup %2924  ;;  %v2498_v59 = vadd.f32 %v2663_v55, %v2483_v56  ;;  %v2470_v60 = vmul.f32 %v2923_v57, %v3182_v7 }
 0x256   : > { %v2467_v61 = vmul.f32 %v2925_v58, %v3184_v13 }
 0x257   : > { %2514 = vst.msk [vmem:[%s3228_s28 + $0x8] sm:$0xff] %vm2369_vm1, %v2498_v59  ;;  %v2485_v62 = vmul.f32 %v2662_v53, %v2470_v60 }
 0x258   : > { %v2927_v63 = vpop.eup %2926  ;;  %v2482_v0 = vmul.f32 %v2662_v53, %v2467_v61 }
 0x259   : > { %v2500_v1 = vadd.f32 %v2663_v55, %v2485_v62  ;;  %v2469_v2 = vmul.f32 %v2927_v63, %v3189_v9 }
 0x25a   : > { %v2497_v5 = vadd.f32 %v2663_v55, %v2482_v0 }
 0x25b   : > { %2516 = vst.msk [vmem:[%s3228_s28 + $0x18] sm:$0xff] %vm2369_vm1, %v2500_v1  ;;  %v2484_v6 = vmul.f32 %v2662_v53, %v2469_v2 }
 0x25c   : > { %2513 = vst.msk [vmem:[%s3228_s28] sm:$0xff] %vm2369_vm1, %v2497_v5 }
 0x25d   : > { %v2499_v8 = vadd.f32 %v2663_v55, %v2484_v6 }
 0x25f   : > { %2515 = vst.msk [vmem:[%s3228_s28 + $0x10] sm:$0xff] %vm2369_vm1, %v2499_v8 }
 0x26d   : > { %v2436_v7 = vpop.xlane.xlu1 %2435 }
 0x26e   : > { %v2448_v10 = vmul.f32 0.0625, %v2436_v7  ;;  %v2433_v11 = vpop.xlane.xlu0 %2432 }
 0x26f   : > { %v2447_v3 = vmul.f32 0.0625, %v2433_v11 }
 0x270   : > { %v2456_v12 = vadd.f32 16.0, %v2448_v10 }
 0x271   : > { %v2455_v13 = vadd.f32 16.0, %v2447_v3  ;;  %v2442_v17 = vpop.xlane.xlu1 %2441 }
 0x272   : > { %2928 = vrsqrt.f32 %v2456_v12  ;;  %v2450_v4 = vmul.f32 0.0625, %v2442_v17  ;;  %v2439_v14 = vpop.xlane.xlu0 %2438 }
 0x273   : > { %2930 = vrsqrt.f32 %v2455_v13  ;;  %v2449_v9 = vmul.f32 0.0625, %v2439_v14 }
 0x274   : > { %v2458_v15 = vadd.f32 16.0, %v2450_v4 }
 0x275   : > { %v2457_v16 = vadd.f32 16.0, %v2449_v9 }
 0x276   : > { %2932 = vrsqrt.f32 %v2458_v15 }
 0x277   : > { %2934 = vrsqrt.f32 %v2457_v16 }
 0x27c   : > { %v2929_v18 = vpop.eup %2928 }
 0x27d   : > { %v2931_v19 = vpop.eup %2930  ;;  %v2472_v20 = vmul.f32 %v2929_v18, %v3198_v24 }
 0x27e   : > { %v2471_v21 = vmul.f32 %v2931_v19, %v3200_v25 }
 0x27f   : > { %v2487_v22 = vmul.f32 %v2662_v53, %v2472_v20 }
 0x280   : > { %v2933_v23 = vpop.eup %2932  ;;  %v2486_v26 = vmul.f32 %v2662_v53, %v2471_v21 }
 0x281   : > { %v2935_v27 = vpop.eup %2934  ;;  %v2502_v28 = vadd.f32 %v2663_v55, %v2487_v22  ;;  %v2474_v29 = vmul.f32 %v2933_v23, %v3206_v32 }
 0x282   : > { %v2501_v30 = vadd.f32 %v2663_v55, %v2486_v26  ;;  %v2473_v31 = vmul.f32 %v2935_v27, %v3209_v34 }
 0x283   : > { %2518 = vst.msk [vmem:[%s3228_s28 + $0x28] sm:$0xff] %vm2369_vm1, %v2502_v28  ;;  %v2489_v33 = vmul.f32 %v2662_v53, %v2474_v29 }
 0x284   : > { %2517 = vst.msk [vmem:[%s3228_s28 + $0x20] sm:$0xff] %vm2369_vm1, %v2501_v30  ;;  %v2488_v24 = vmul.f32 %v2662_v53, %v2473_v31 }
 0x285   : > { %v2504_v35 = vadd.f32 %v2663_v55, %v2489_v33 }
 0x286   : > { %v2503_v36 = vadd.f32 %v2663_v55, %v2488_v24 }
 0x287   : > { %2520 = vst.msk [vmem:[%s3228_s28 + $0x38] sm:$0xff] %vm2369_vm1, %v2504_v35 }
 0x288   : > { %2519 = vst.msk [vmem:[%s3228_s28 + $0x30] sm:$0xff] %vm2369_vm1, %v2503_v36 }
 0x289 PF: > { %s18_s24 = sadd.s32 1, %s2942_s24  }
 0x28a   : > { %p15_p4 = scmp.ge.s32.totalorder %s18_s24, 4  }
 0x28c   :  { %17 = sbr.rel (!%p15_p4) target bundleno = 1 (0x1), region = 95 }

// kernel: guided_spatial_sr.13
= control target key start
LH: loop header
LB: loop body
LE: loop exit
PB: predicated region body
PF: predicated region fallthrough
CT: control target
= control target key end

     0   :  { %s1840_s21 = smov 0   ;;  %s2057_s0 = inlined_call_operand.vmem [shape: f32[2,4,256], index: 0, kind: input, shape index: {}]   ;;  %s2058_s1 = inlined_call_operand.vmem [shape: f32[2,4,256], index: 1, kind: input, shape index: {}]   ;;  %s2059_s2 = inlined_call_operand.vmem [shape: f32[9,1,256], index: 2, kind: input, shape index: {}]   ;;  %s2060_s3 = inlined_call_operand.vmem [shape: f32[4,4], index: 3, kind: input, shape index: {}]   ;;  %s2061_s4 = inlined_call_operand.vmem [shape: f32[9,4,1], index: 4, kind: input, shape index: {}]   ;;  %s2062_s5 = inlined_call_operand.vmem [shape: f32[4,4], index: 5, kind: input, shape index: {}]   ;;  %s2063_s6 = inlined_call_operand.vmem [shape: f32[2,4,256], index: 6, kind: output, shape index: {}]  }
   0x1 LB: > { %s1711_s22 = sadd.s32 4294967295, %s1785_s21   ;;  %p1715_p0 = scmp.ge.s32.totalorder %s1785_s21, 1  ;;  %s1785_s21 = sphi %s1840_s21, %s16_s21  }
   0x2   : > { %p222_p1 = scmp.lt.s32.totalorder %s1785_s21, 3 }
   0x4   : > { %p223_p2 = pnand %p1715_p0, %p222_p1 }
   0x5   : > { %p257_p3 = scmp.lt.s32.totalorder (!%p223_p2), %s1711_s22, 1  ;;  %v273_v0 = vld [vmem:[%s2060_s3] sm:$0xf] (!%p223_p2)  ;;  %vm276_vm0 = vcmask (!%p223_p2), 31744   ;;  %v796_v1 = vlaneseq (!%p223_p2)  ;;  %v1787_v2 = vmov (!%p223_p2), 0.0   ;;  %vm280_vm1 = vcmask (!%p223_p2), 1043456  }
   0x6   : > { %226 = sbr.rel (%p223_p2) target bundleno = 847 (0x34f), region = 44  ;;  %351 = vmatprep.mubr.f32.mxu0 (!%p223_p2), %v1787_v2  ;;  %756 = vst [vmem:[#allocation2] sm:$0xff] (!%p223_p2), %v1787_v2  ;;  %v278_v3 = vsel (!%p223_p2), %vm276_vm0, %v273_v0, 0  ;;  %1240 = vmatprep.mubr.f32.mxu1 (!%p223_p2), %v1787_v2  ;;  %v779_v6 = vld [vmem:[%s2059_s2 + $0x4] sm:$0x3] (!%p223_p2)  ;;  %s1788_s11 = smov (!%p223_p2), 2  }
   0x7   : > { %v1855_v4 = vand.u32 (!%p223_p2), 4294901760, %v278_v3  ;;  %v797_v5 = vshrl.u32 (!%p223_p2), %v796_v1, 7  ;;  %v780_v7 = vld [vmem:[%s2059_s2 + $0x6] sm:$0x3] (!%p223_p2)  ;;  %v782_v16 = vld [vmem:[%s2059_s2 + $0xa] sm:$0x3] (!%p223_p2) }
   0x8   : > { %s1789_s12 = smov (!%p223_p2), 16   ;;  %s1790_s13 = smov (!%p223_p2), 18   ;;  %v784_v38 = vld [vmem:[%s2059_s2 + $0xe] sm:$0x3] (!%p223_p2)  ;;  %v786_v42 = vld [vmem:[%s2061_s4] sm:$0xf] (!%p223_p2) }
   0x9   : > { %v353_v8 = vsub.f32 (!%p223_p2), %v278_v3, %v1855_v4  ;;  %v1866_v9 = vsub.s32 (!%p223_p2), 0, %v797_v5  ;;  %v1868_v10 = vsub.s32 (!%p223_p2), 1, %v797_v5  ;;  %s1791_s16 = smov (!%p223_p2), 33   ;;  %v1792_v43 = vmov (!%p223_p2), 0   ;;  %v788_v44 = vld [vmem:[%s2061_s4 + $0x8] sm:$0xf] (!%p223_p2) }
   0xa   : > { %1775 = vset.pattern.permute.xlu1 (!%p223_p2), %v1792_v43  ;;  %1776 = vset.pattern.permute.xlu0 (!%p223_p2), %v1792_v43  ;;  %v789_v45 = vld [vmem:[%s2061_s4 + $0xc] sm:$0xf] (!%p223_p2)  ;;  %vm757_vm2 = vcmask (!%p223_p2), 273408   ;;  %v778_v47 = vld [vmem:[%s2059_s2 + $0x2] sm:$0x3] (!%p223_p2)  ;;  %s1793_s28 = smov (!%p223_p2), 17  }
   0xb   : > { %v354_v12 = vand.u32 (!%p223_p2), 4294901760, %v353_v8  ;;  %v865_v13 = vrot.slane (!%p223_p2), %v779_v6, %v1866_v9  ;;  %v869_v14 = vrot.slane (!%p223_p2), %v779_v6, %v1868_v10  ;;  %v907_v15 = vrot.slane (!%p223_p2), %v780_v7, %v1866_v9  ;;  %758 = vst.msk [vmem:[#allocation2 + $0x8] sm:$0xf] (!%p223_p2), %vm757_vm2, %v1787_v2  ;;  %v781_v55 = vld [vmem:[%s2059_s2 + $0x8] sm:$0x3] (!%p223_p2)  ;;  %s1797_s26 = smov (!%p223_p2), 95  }
   0xc   : > { %v911_v19 = vrot.slane (!%p223_p2), %v780_v7, %v1868_v10  ;;  %v990_v24 = vrot.slane (!%p223_p2), %v782_v16, %v1866_v9  ;;  %v994_v25 = vrot.slane (!%p223_p2), %v782_v16, %v1868_v10  ;;  %v1074_v39 = vrot.slane (!%p223_p2), %v784_v38, %v1866_v9  ;;  %v783_v60 = vld [vmem:[%s2059_s2 + $0xc] sm:$0x3] (!%p223_p2)  ;;  %v785_v0 = vld [vmem:[%s2059_s2 + $0x10] sm:$0x3] (!%p223_p2)  ;;  %v787_v6 = vld [vmem:[%s2061_s4 + $0x4] sm:$0xf] (!%p223_p2) }
   0xd   : > { %s2065_s22 = smov (!%p257_p3, %s1711_s22), 1  ;;  %v355_v21 = vsub.f32 %v353_v8, %v354_v12  ;;  %v870_v22 = vcombine.low %v865_v13, %v869_v14  ;;  %v1078_v40 = vrot.slane %v784_v38, %v1868_v10  ;;  %v823_v52 = vrot.slane %v778_v47, %v1866_v9  ;;  %v790_v7 = vld [vmem:[%s2061_s4 + $0x10] sm:$0xf]  ;;  %v794_v13 = vld [vmem:[%s2061_s4 + $0x20] sm:$0xf]  ;;  %s1798_s27 = smov 127  }
   0xe   : > { %s1863_s29 = sshll.u32 %s2065_s22, 3  ;;  %v912_v29 = vcombine.low %v907_v15, %v911_v19  ;;  %v995_v34 = vcombine.low %v990_v24, %v994_v25  ;;  %v827_v53 = vrot.slane %v778_v47, %v1868_v10  ;;  %v949_v58 = vrot.slane %v781_v55, %v1866_v9  ;;  %s1800_s30 = smov 96  }
   0xf   : > { %s261_s8 = scalar_lea.vmem %s2057_s0, %s1863_s29  ;;  %v356_v28 = vand.u32 4294901760, %v355_v21  ;;  %871 = vrot.lane.b32.xlu1 %v870_v22, %s1788_s11  ;;  %v1079_v41 = vcombine.low %v1074_v39, %v1078_v40  ;;  %v953_v59 = vrot.slane %v781_v55, %v1868_v10  ;;  %v1032_v62 = vrot.slane %v783_v60, %v1866_v9  ;;  %s1795_s11 = smov 32  }
  0x10   : > { %v272_v11 = vld [vmem:[%s261_s8] sm:$0xff]  ;;  %v828_v57 = vcombine.low %v823_v52, %v827_v53  ;;  %s1794_s8 = smov 1   ;;  %v1036_v63 = vrot.slane %v783_v60, %v1868_v10  ;;  %v1116_v3 = vrot.slane %v785_v0, %v1866_v9  ;;  %vm769_vm5 = vcmask 1043592   ;;  %s1801_s7 = smov 112  }
  0x11   : > { %v275_v17 = vcombine.high %v272_v11, %v272_v11  ;;  %v281_v18 = vsel %vm280_vm1, %v272_v11, 0  ;;  %v954_v61 = vcombine.low %v949_v58, %v953_v59  ;;  %v792_v11 = vld [vmem:[%s2061_s4 + $0x18] sm:$0xf]  ;;  %vm770_vm6 = vcmask 1047556   ;;  %s1803_s9 = smov 110   ;;  %s1804_s10 = smov 94  }
  0x12   : > { %v287_v20 = vand.u32 4294901760, %v281_v18  ;;  %v1037_v1 = vcombine.low %v1032_v62, %v1036_v63  ;;  %vm765_vm7 = vcmask 138240   ;;  %vm773_vm8 = vcmask 134144   ;;  %vm771_vm9 = vmor %vm770_vm6, %vm769_vm5  ;;  %s266_s17 = scalar_lea.vmem %s2058_s1, %s1863_s29  ;;  %s271_s20 = scalar_lea.vmem %s2063_s6, %s1863_s29 }
  0x13   : > { %v283_v23 = vsel %vm280_vm1, %v275_v17, 0  ;;  %913 = vrot.lane.b32.xlu1 %v912_v29, %s1789_s12  ;;  %s1796_s12 = smov 34   ;;  %vm832_vm10 = vcmask 7168   ;;  %vm1041_vm11 = vcmask 261120   ;;  %vm874_vm12 = vcmask 15360  }
  0x14   : > { %v285_v26 = vand.u32 4294901760, %v283_v23  ;;  %v370_v27 = vsub.f32 %v281_v18, %v287_v20  ;;  %vm916_vm13 = vcmask 130048   ;;  %vm999_vm14 = vcmask 146432  }
  0x15   : > { %vm1125_vm15 = vcmask 277504   ;;  %vm1083_vm2 = vcmask 269312   ;;  %vm936_vm5 = vcmask 916480   ;;  %vm977_vm6 = vcmask 908288  }
  0x16   : > { %286 = vmatprep.subr.mxu0 %v285_v26  ;;  %v364_v30 = vsub.f32 %v283_v23, %v285_v26  ;;  %v371_v31 = vand.u32 4294901760, %v370_v27 }
  0x17   : > { %288 = vmatpush1.msra.mxu0 %v287_v20  ;;  %996 = vrot.lane.b32.xlu1 %v995_v34, %s1790_s13 }
  0x18   : > { %357 = vmatmul.mubr.f32.vlgmr.msra.gmra.mrb[0].mxu0 %v356_v28  ;;  %v365_v32 = vand.u32 4294901760, %v364_v30  ;;  %v372_v33 = vsub.f32 %v370_v27, %v371_v31 }
  0x19   : > { %437 = vmatprep.mubr.f32.mxu0 %v1787_v2 }
  0x1a   : > { %v366_v35 = vsub.f32 %v364_v30, %v365_v32  ;;  %v373_v36 = vand.u32 4294901760, %v372_v33 }
  0x1b   : > { %1080 = vrot.lane.b32.xlu1 %v1079_v41, %s1791_s16 }
  0x1c   : > { %v367_v37 = vand.u32 4294901760, %v366_v35 }
  0x1e   : > { %368 = vmatprep.subr.mxu0 %v367_v37 }
  0x1f   : > { %374 = vmatpush1.msra.mxu0 %v373_v36  ;;  %809 = vperm.xlu1 %1775, %v786_v42  }
  0x20   : > { %439 = vmatmul.mubr.f32.vlgmr.msra.gmra.mrb[0].mxu0 %v1855_v4  ;;  %447 = vmatprep.subr.mxu0 %v364_v30 }
  0x21   : > { %450 = vmatpush1.msra.mxu0 %v370_v27  ;;  %513 = vmatprep.mubr.f32.mxu0 %v1787_v2 }
  0x22   : > { %523 = vmatprep.subr.mxu0 %v285_v26 }
  0x23   : > { %882 = vperm.xlu1 %1775, %v788_v44  }
  0x27   : > { %924 = vperm.xlu1 %1775, %v789_v45  }
  0x28   : > { %516 = vmatmul.mubr.f32.vlgmr.msra.gmra.mrb[0].mxu0 %v353_v8  ;;  %v791_v8 = vld [vmem:[%s2061_s4 + $0x14] sm:$0xf] }
  0x29   : > { %525 = vmatpush1.msra.mxu0 %v287_v20  ;;  %588 = vmatprep.mubr.f32.mxu0 %v1787_v2 }
  0x2a   : > { %601 = vmatprep.subr.mxu0 %v365_v32 }
  0x30   : > { %592 = vmatmul.mubr.f32.vlgmr.msra.gmra.mrb[0].mxu0 %v354_v12  ;;  %v793_v12 = vld [vmem:[%s2061_s4 + $0x1c] sm:$0xf] }
  0x31   : > { %605 = vmatpush1.msra.mxu0 %v371_v31  ;;  %668 = vmatprep.mubr.f32.mxu0 %v1787_v2 }
  0x32   : > { %677 = vmatprep.subr.mxu0 %v285_v26 }
  0x38   : > { %670 = vmatmul.mubr.f32.vlgmr.msra.gmra.mrb[0].mxu0 %v1855_v4 }
  0x39   : > { %679 = vmatpush1.msra.mxu0 %v287_v20  ;;  %742 = vmatprep.mubr.f32.mxu0 %v1787_v2 }
  0x40   : > { %744 = vmatmul.mubr.f32.vlgmr.msra.gmra.mrb[0].mxu0 %v1855_v4  ;;  %v1120_v4 = vrot.slane %v785_v0, %v1868_v10 }
  0x42   : > { %v1121_v5 = vcombine.low %v1116_v3, %v1120_v4 }
  0x81   : > { %v872_v14 = vpop.permute.xlu1 %871 }
  0x82   : > { %v873_v26 = vrot.slane %v872_v14, 4 }
  0x84   : > { %v875_v38 = vsel %vm874_vm12, %v873_v26, %v872_v14 }
  0x85   : > { %v914_v15 = vpop.permute.xlu1 %913 }
  0x86   : > { %v915_v32 = vrot.slane %v914_v15, 4 }
  0x88   : > { %v917_v43 = vsel %vm916_vm13, %v915_v32, %v914_v15 }
  0x89   : > { %v997_v16 = vpop.permute.xlu1 %996 }
  0x8a   : > { %v998_v44 = vrot.slane %v997_v16, 4 }
  0x8c   : > { %v1000_v52 = vsel %vm999_vm14, %v998_v44, %v997_v16 }
  0x8d   : > { %v1947_v21 = vpop.permute.xlu1 %1080 }
  0x8e   : > { %v1082_v22 = vrot.slane %v1947_v21, 4 }
  0x90   : > { %v1084_v63 = vsel %vm1083_vm2, %v1082_v22, %v1947_v21 }
 0x113   : > { %v745_v46 = vpop.f32.mrb[0].mxu0 }
 0x114   : > { %vm750_vm3 = vcmp.ge.f32.partialorder %v745_v46, 0.0  ;;  %v752_v48 = vmul.f32 0.1, %v745_v46  ;;  %v747_v49 = vpop.f32.mrb[1].mxu0 }
 0x115   : > { %vm751_vm4 = vcmp.ge.f32.partialorder %v747_v49, 0.0  ;;  %v753_v50 = vmul.f32 0.1, %v747_v49 }
 0x116   : > { %v754_v51 = vsel %vm750_vm3, %v745_v46, %v752_v48  ;;  %vm852_vm3 = vcmask 1039360  }
 0x117   : > { %v755_v54 = vsel %vm751_vm4, %v747_v49, %v753_v50  ;;  %vm894_vm4 = vcmask 1031168  }
 0x118   : > { %v761_v56 = vcombine.low %v754_v51, %v755_v54 }
 0x11a   : > { %762 = vrot.lane.b32.xlu0 %v761_v56, %s1793_s28 }
 0x11e   : > { %829 = vrot.lane.b32.xlu0 %v828_v57, %s1794_s8  ;;  %s1802_s8 = smov 111  }
 0x122   : > { %955 = vrot.lane.b32.xlu0 %v954_v61, %s1793_s28  ;;  %s1799_s28 = smov 126  }
 0x126   : > { %1038 = vrot.lane.b32.xlu0 %v1037_v1, %s1795_s11 }
 0x12a   : > { %1122 = vrot.lane.b32.xlu0 %v1121_v5, %s1796_s12 }
 0x12e   : > { %840 = vperm.xlu0 %1776, %v787_v6  }
 0x132   : > { %965 = vperm.xlu0 %1776, %v790_v7  }
 0x136   : > { %1007 = vperm.xlu0 %1776, %v791_v8   ;;  %v810_v8 = vpop.permute.xlu1 %809 }
 0x13a   : > { %1049 = vperm.xlu0 %1776, %v792_v11   ;;  %v883_v11 = vpop.permute.xlu1 %882 }
 0x13e   : > { %1091 = vperm.xlu0 %1776, %v793_v12  }
 0x142   : > { %1133 = vperm.xlu0 %1776, %v794_v13   ;;  %v925_v13 = vpop.permute.xlu1 %924 }
 0x18c   : > { %v763_v17 = vpop.permute.xlu0 %762 }
 0x18d   : > { %v764_v18 = vrot.slane %v763_v17, 4 }
 0x18f   : > { %v766_v19 = vsel %vm765_vm7, %v764_v18, %v763_v17  ;;  %774 = vst.msk [vmem:[#allocation2 + $0x8] sm:$0xf] %vm773_vm8, %v764_v18  ;;  %vm1061_vm8 = vcmask 785408  }
 0x190   : > { %772 = vst.msk [vmem:[#allocation2] sm:$0xff] %vm771_vm9, %v766_v19  ;;  %v830_v20 = vpop.permute.xlu0 %829  ;;  %vm1145_vm9 = vcmask 769024  }
 0x191   : > { %v831_v24 = vrot.slane %v830_v20, 4 }
 0x193   : > { %v833_v33 = vsel %vm832_vm10, %v831_v24, %v830_v20 }
 0x194   : > { %v956_v23 = vpop.permute.xlu0 %955 }
 0x195   : > { %v957_v39 = vrot.slane %v956_v23, 4 }
 0x196   : > { %v1950_v25 = vld [vmem:[#allocation2 + $0x8] sm:$0xf] }
 0x197   : > { %v837_v27 = vmul.f32 %v831_v24, %v1950_v25  ;;  %v1088_v28 = vmul.f32 %v1082_v22, %v1950_v25  ;;  %v1956_v30 = vld [vmem:[#allocation2] sm:$0xff]  ;;  %v879_v35 = vmul.f32 %v873_v26, %v1950_v25  ;;  %v921_v40 = vmul.f32 %v915_v32, %v1950_v25 }
 0x198   : > { %v1039_v29 = vpop.permute.xlu0 %1038  ;;  %v836_v36 = vmul.f32 %v833_v33, %v1956_v30  ;;  %v878_v42 = vmul.f32 %v875_v38, %v1956_v30  ;;  %v962_v45 = vmul.f32 %v957_v39, %v1950_v25  ;;  %v920_v47 = vmul.f32 %v917_v43, %v1956_v30 }
 0x199   : > { %v1040_v31 = vrot.slane %v1039_v29, 4  ;;  %1101 = vrot.lane.b32.xlu0 %v1088_v28, %s1797_s26  ;;  %850 = vrot.lane.b32.xlu1 %v837_v27, %s1798_s27  ;;  %v958_v48 = vsel %vm765_vm7, %v957_v39, %v956_v23  ;;  %v1004_v49 = vmul.f32 %v998_v44, %v1950_v25  ;;  %v1003_v55 = vmul.f32 %v1000_v52, %v1956_v30 }
 0x19a   : > { %v845_v41 = vcombine.high %v836_v36, %v836_v36  ;;  %v887_v46 = vcombine.high %v878_v42, %v878_v42  ;;  %v961_v50 = vmul.f32 %v958_v48, %v1956_v30  ;;  %v929_v51 = vcombine.high %v920_v47, %v920_v47 }
 0x19b   : > { %v1042_v34 = vsel %vm1041_vm11, %v1040_v31, %v1039_v29  ;;  %v1046_v54 = vmul.f32 %v1040_v31, %v1950_v25  ;;  %v1012_v58 = vcombine.high %v1003_v55, %v1003_v55  ;;  %v1087_v0 = vmul.f32 %v1084_v63, %v1956_v30 }
 0x19c   : > { %v1045_v37 = vmul.f32 %v1042_v34, %v1956_v30  ;;  %v1123_v53 = vpop.permute.xlu0 %1122  ;;  %v970_v56 = vcombine.high %v961_v50, %v961_v50  ;;  %vm1019_vm7 = vcmask 900096  }
 0x19d   : > { %892 = vrot.lane.b32.xlu1 %v879_v35, %s1799_s28  ;;  %v1124_v57 = vrot.slane %v1123_v53, 4  ;;  %v1096_v1 = vcombine.high %v1087_v0, %v1087_v0 }
 0x19e   : > { %1055 = vrot.lane.b32.xlu0 %v1045_v37, %s1800_s30  ;;  %v1054_v61 = vcombine.high %v1045_v37, %v1045_v37 }
 0x19f   : > { %v1126_v59 = vsel %vm1125_vm15, %v1124_v57, %v1123_v53  ;;  %v1130_v3 = vmul.f32 %v1124_v57, %v1950_v25  ;;  %v777_v25 = vld [vmem:[%s2059_s2] sm:$0x3] }
 0x1a0   : > { %v1129_v60 = vmul.f32 %v1126_v59, %v1956_v30  ;;  %v799_v28 = vrot.slane %v777_v25, %v1866_v9  ;;  %v803_v29 = vrot.slane %v777_v25, %v1868_v10 }
 0x1a1   : > { %934 = vrot.lane.b32.xlu1 %v921_v40, %s1801_s7 }
 0x1a2   : > { %848 = vrot.lane.b32.xlu0 %v845_v41, %s1798_s27  ;;  %v1138_v62 = vcombine.high %v1129_v60, %v1129_v60  ;;  %v804_v32 = vcombine.low %v799_v28, %v803_v29 }
 0x1a4   : > { %v806_v35 = vmul.f32 %v804_v32, %v1956_v30 }
 0x1a5   : > { %975 = vrot.lane.b32.xlu1 %v962_v45, %s1802_s8 }
 0x1a6   : > { %890 = vrot.lane.b32.xlu0 %v887_v46, %s1799_s28  ;;  %v813_v41 = vcombine.high %v806_v35, %v806_v35  ;;  %v815_v43 = vmul.f32 %v810_v8, %v806_v35 }
 0x1a9   : > { %1017 = vrot.lane.b32.xlu1 %v1004_v49, %s1803_s9  ;;  %v1160_v49 = vld [vmem:[%s2062_s5] sm:$0xf] }
 0x1aa   : > { %932 = vrot.lane.b32.xlu0 %v929_v51, %s1801_s7  ;;  %v1166_v59 = vsel %vm276_vm0, %v1160_v49, 0  ;;  %vm1103_vm0 = vcmask 777216  }
 0x1ad   : > { %1059 = vrot.lane.b32.xlu1 %v1046_v54, %s1800_s30  ;;  %v841_v4 = vpop.permute.xlu0 %840 }
 0x1ae   : > { %973 = vrot.lane.b32.xlu0 %v970_v56, %s1802_s8 }
 0x1b1   : > { %846 = vrot.lane.b32.xlu1 %v836_v36, %s1798_s27  ;;  %v1994_v5 = vpop.permute.xlu0 %965 }
 0x1b2   : > { %1015 = vrot.lane.b32.xlu0 %v1012_v58, %s1803_s9 }
 0x1b5   : > { %888 = vrot.lane.b32.xlu1 %v878_v42, %s1799_s28  ;;  %v1996_v6 = vpop.permute.xlu0 %1007 }
 0x1b6   : > { %1057 = vrot.lane.b32.xlu0 %v1054_v61, %s1800_s30 }
 0x1b9   : > { %930 = vrot.lane.b32.xlu1 %v920_v47, %s1801_s7  ;;  %v1998_v7 = vpop.permute.xlu0 %1049 }
 0x1ba   : > { %1141 = vrot.lane.b32.xlu0 %v1138_v62, %s1804_s10 }
 0x1bd   : > { %971 = vrot.lane.b32.xlu1 %v961_v50, %s1802_s8  ;;  %v2000_v12 = vpop.permute.xlu0 %1091  ;;  %v816_v50 = vmul.f32 %v813_v41, %v810_v8 }
 0x1be   : > { %1139 = vrot.lane.b32.xlu0 %v1129_v60, %s1804_s10 }
 0x1c1   : > { %1013 = vrot.lane.b32.xlu1 %v1003_v55, %s1803_s9  ;;  %v2002_v14 = vpop.permute.xlu0 %1133 }
 0x1c5   : > { %1097 = vrot.lane.b32.xlu1 %v1087_v0, %s1797_s26 }
 0x1c9   : > { %1099 = vrot.lane.b32.xlu1 %v1096_v1, %s1797_s26 }
 0x1cd   : > { %1143 = vrot.lane.b32.xlu1 %v1130_v3, %s1804_s10 }
 0x20b   : > { %v851_v15 = vpop.permute.xlu1 %850  ;;  %v2004_v16 = vpop.permute.xlu0 %1101 }
 0x20f   : > { %v893_v17 = vpop.permute.xlu1 %892 }
 0x210   : > { %v1056_v18 = vpop.permute.xlu0 %1055 }
 0x213   : > { %v935_v19 = vpop.permute.xlu1 %934 }
 0x214   : > { %v849_v20 = vpop.permute.xlu0 %848 }
 0x215   : > { %v854_v42 = vsel %vm852_vm3, %v849_v20, %v851_v15 }
 0x216   : > { %v858_v47 = vmul.f32 %v854_v42, %v841_v4 }
 0x217   : > { %v976_v21 = vpop.permute.xlu1 %975 }
 0x218   : > { %v891_v22 = vpop.permute.xlu0 %890  ;;  %v860_v60 = vadd.f32 %v858_v47, %v816_v50 }
 0x219   : > { %v896_v45 = vsel %vm894_vm4, %v891_v22, %v893_v17  ;;  %v2023_v17 = vand.u32 4294901760, %v1166_v59 }
 0x21a   : > { %v900_v52 = vmul.f32 %v896_v45, %v883_v11 }
 0x21b   : > { %v1018_v23 = vpop.permute.xlu1 %1017 }
 0x21c   : > { %v933_v24 = vpop.permute.xlu0 %932  ;;  %v902_v1 = vadd.f32 %v900_v52, %v860_v60 }
 0x21d   : > { %v938_v51 = vsel %vm936_vm5, %v933_v24, %v935_v19 }
 0x21e   : > { %v942_v61 = vmul.f32 %v938_v51, %v925_v13 }
 0x21f   : > { %v1060_v26 = vpop.permute.xlu1 %1059 }
 0x220   : > { %v974_v27 = vpop.permute.xlu0 %973  ;;  %v944_v19 = vadd.f32 %v942_v61, %v902_v1 }
 0x221   : > { %v979_v57 = vsel %vm977_vm6, %v974_v27, %v976_v21 }
 0x222   : > { %v983_v3 = vmul.f32 %v979_v57, %v1994_v5 }
 0x223   : > { %v847_v31 = vpop.permute.xlu1 %846 }
 0x224   : > { %v1016_v33 = vpop.permute.xlu0 %1015  ;;  %v853_v36 = vsel %vm852_vm3, %v847_v31, %v849_v20 }
 0x225   : > { %v857_v39 = vmul.f32 %v853_v36, %v841_v4  ;;  %v1021_v0 = vsel %vm1019_vm7, %v1016_v33, %v1018_v23 }
 0x226   : > { %v1025_v20 = vmul.f32 %v1021_v0, %v1996_v6 }
 0x227   : > { %v889_v34 = vpop.permute.xlu1 %888  ;;  %v859_v30 = vadd.f32 %v857_v39, %v815_v43 }
 0x228   : > { %v895_v38 = vsel %vm894_vm4, %v889_v34, %v891_v22  ;;  %v1058_v40 = vpop.permute.xlu0 %1057 }
 0x229   : > { %v899_v10 = vmul.f32 %v895_v38, %v883_v11  ;;  %v1062_v11 = vsel %vm1061_vm8, %v1056_v18, %v1058_v40  ;;  %v1063_v15 = vsel %vm1061_vm8, %v1058_v40, %v1060_v26  ;;  %v1242_v26 = vsub.f32 %v1166_v59, %v2023_v17 }
 0x22a   : > { %v1067_v23 = vmul.f32 %v1063_v15, %v1998_v7 }
 0x22b   : > { %v931_v37 = vpop.permute.xlu1 %930  ;;  %v901_v53 = vadd.f32 %v899_v10, %v859_v30 }
 0x22c   : > { %v937_v9 = vsel %vm936_vm5, %v931_v37, %v933_v24  ;;  %v1142_v54 = vpop.permute.xlu0 %1141  ;;  %v1066_v24 = vmul.f32 %v1062_v11, %v1998_v7 }
 0x22d   : > { %v941_v48 = vmul.f32 %v937_v9, %v925_v13  ;;  %v985_v13 = vadd.f32 %v983_v3, %v944_v19 }
 0x22f   : > { %v972_v44 = vpop.permute.xlu1 %971  ;;  %v943_v62 = vadd.f32 %v941_v48, %v901_v53  ;;  %v1027_v28 = vadd.f32 %v1025_v20, %v985_v13  ;;  %v1161_v53 = vld [vmem:[%s266_s17] sm:$0xff] }
 0x230   : > { %v978_v46 = vsel %vm977_vm6, %v972_v44, %v974_v27  ;;  %v1140_v21 = vpop.permute.xlu0 %1139 }
 0x231   : > { %v982_v55 = vmul.f32 %v978_v46, %v1994_v5  ;;  %v1146_v5 = vsel %vm1145_vm9, %v1140_v21, %v1142_v54  ;;  %v1069_v32 = vadd.f32 %v1067_v23, %v1027_v28 }
 0x233   : > { %v1014_v56 = vpop.permute.xlu1 %1013  ;;  %v984_v4 = vadd.f32 %v982_v55, %v943_v62 }
 0x234   : > { %v1020_v58 = vsel %vm1019_vm7, %v1014_v56, %v1016_v33  ;;  %v1150_v33 = vmul.f32 %v1146_v5, %v2002_v14 }
 0x235   : > { %v1024_v63 = vmul.f32 %v1020_v58, %v1996_v6 }
 0x237   : > { %v1098_v8 = vpop.permute.xlu1 %1097  ;;  %v1026_v22 = vadd.f32 %v1024_v63, %v984_v4 }
 0x239   : > { %v1068_v29 = vadd.f32 %v1066_v24, %v1026_v22 }
 0x23b   : > { %v1100_v25 = vpop.permute.xlu1 %1099 }
 0x23c   : > { %v1104_v27 = vsel %vm1103_vm0, %v1098_v8, %v1100_v25  ;;  %v1105_v18 = vsel %vm1103_vm0, %v1100_v25, %v2004_v16  ;;  %v1243_v16 = vand.u32 4294901760, %v1242_v26 }
 0x23d   : > { %v1108_v6 = vmul.f32 %v1104_v27, %v2000_v12  ;;  %v1109_v31 = vmul.f32 %v1105_v18, %v2000_v12 }
 0x23e   : > { %v1244_v9 = vsub.f32 %v1242_v26, %v1243_v16 }
 0x23f   : > { %v1110_v34 = vadd.f32 %v1108_v6, %v1068_v29  ;;  %v1144_v35 = vpop.permute.xlu1 %1143  ;;  %v1111_v36 = vadd.f32 %v1109_v31, %v1069_v32 }
 0x240   : > { %v1147_v7 = vsel %vm1145_vm9, %v1142_v54, %v1144_v35  ;;  %v1245_v47 = vand.u32 4294901760, %v1244_v9  ;;  %v1163_v54 = vcombine.high %v1161_v53, %v1161_v53 }
 0x241   : > { %v1152_v37 = vadd.f32 %v1150_v33, %v1110_v34  ;;  %v1151_v38 = vmul.f32 %v1147_v7, %v2002_v14 }
 0x243   : > { %vm1154_vm10 = vcmp.ge.f32.partialorder %v1152_v37, 0.0  ;;  %v1156_v39 = vmul.f32 0.1, %v1152_v37  ;;  %v1153_v40 = vadd.f32 %v1151_v38, %v1111_v36 }
 0x245   : > { %vm1155_vm11 = vcmp.ge.f32.partialorder %v1153_v40, 0.0  ;;  %v1157_v41 = vmul.f32 0.1, %v1153_v40  ;;  %v1158_v42 = vsel %vm1154_vm10, %v1152_v37, %v1156_v39 }
 0x246   : > { %v1169_v12 = vsel %vm280_vm1, %v1158_v42, 0 }
 0x247   : > { %v1159_v43 = vsel %vm1155_vm11, %v1153_v40, %v1157_v41  ;;  %v1176_v10 = vand.u32 4294901760, %v1169_v12 }
 0x248   : > { %v1172_v44 = vsel %vm280_vm1, %v1159_v43, 0 }
 0x249   : > { %v1174_v45 = vand.u32 4294901760, %v1172_v44  ;;  %v1259_v46 = vsub.f32 %v1169_v12, %v1176_v10 }
 0x24b   : > { %1175 = vmatprep.subr.mxu1 %v1174_v45  ;;  %v1253_v30 = vsub.f32 %v1172_v44, %v1174_v45  ;;  %v1260_v14 = vand.u32 4294901760, %v1259_v46 }
 0x24c   : > { %1177 = vmatpush1.msra.mxu1 %v1176_v10 }
 0x24d   : > { %1246 = vmatmul.mubr.f32.vlgmr.msra.gmra.mrb[0].mxu1 %v1245_v47  ;;  %v1254_v48 = vand.u32 4294901760, %v1253_v30  ;;  %v1261_v49 = vsub.f32 %v1259_v46, %v1260_v14 }
 0x24e   : > { %1326 = vmatprep.mubr.f32.mxu1 %v1787_v2 }
 0x24f   : > { %v1255_v50 = vsub.f32 %v1253_v30, %v1254_v48  ;;  %v1262_v52 = vand.u32 4294901760, %v1261_v49 }
 0x251   : > { %v1256_v51 = vand.u32 4294901760, %v1255_v50 }
 0x253   : > { %1257 = vmatprep.subr.mxu1 %v1256_v51 }
 0x254   : > { %1263 = vmatpush1.msra.mxu1 %v1262_v52 }
 0x255   : > { %1328 = vmatmul.mubr.f32.vlgmr.msra.gmra.mrb[0].mxu1 %v2023_v17  ;;  %1336 = vmatprep.subr.mxu1 %v1253_v30 }
 0x256   : > { %1339 = vmatpush1.msra.mxu1 %v1259_v46  ;;  %1402 = vmatprep.mubr.f32.mxu1 %v1787_v2 }
 0x257   : > { %1412 = vmatprep.subr.mxu1 %v1174_v45 }
 0x25d   : > { %1405 = vmatmul.mubr.f32.vlgmr.msra.gmra.mrb[0].mxu1 %v1242_v26 }
 0x25e   : > { %1414 = vmatpush1.msra.mxu1 %v1176_v10  ;;  %1477 = vmatprep.mubr.f32.mxu1 %v1787_v2 }
 0x25f   : > { %1490 = vmatprep.subr.mxu1 %v1254_v48 }
 0x265   : > { %1481 = vmatmul.mubr.f32.vlgmr.msra.gmra.mrb[0].mxu1 %v1243_v16 }
 0x266   : > { %1494 = vmatpush1.msra.mxu1 %v1260_v14  ;;  %1557 = vmatprep.mubr.f32.mxu1 %v1787_v2 }
 0x267   : > { %1566 = vmatprep.subr.mxu1 %v1174_v45 }
 0x26d   : > { %1559 = vmatmul.mubr.f32.vlgmr.msra.gmra.mrb[0].mxu1 %v2023_v17 }
 0x26e   : > { %1568 = vmatpush1.msra.mxu1 %v1176_v10  ;;  %1631 = vmatprep.mubr.f32.mxu1 %v1787_v2 }
 0x275   : > { %1633 = vmatmul.mubr.f32.vlgmr.msra.gmra.mrb[0].mxu1 %v2023_v17 }
 0x348   : > { %v1634_v55 = vpop.f32.mrb[0].mxu1 }
 0x349   : > { %v1727_v56 = vadd.f32 %v1634_v55, %v1161_v53  ;;  %v1636_v57 = vpop.f32.mrb[1].mxu1 }
 0x34a   : > { %v1728_v58 = vadd.f32 %v1636_v57, %v1163_v54 }
 0x34c   : > { %v1641_v59 = vcombine.low %v1727_v56, %v1728_v58 }
 0x34e   : > { %1643 = vst [vmem:[%s271_s20] sm:$0xff] %v1641_v59 }
 0x34f PF: > { %s16_s21 = sadd.s32 1, %s1785_s21  }
 0x350   : > { %p13_p4 = scmp.ge.s32.totalorder %s16_s21, 4  }
 0x352   :  { %15 = sbr.rel (!%p13_p4) target bundleno = 1 (0x1), region = 77 }

</bundles_post_ra>
